<compile_context>
chip_gen: v7x
topology: tpu7x:2x2x1
jax: 0.10.0
libtpu: 0.0.40
codegen_flags: <defaults>
</compile_context>

<pallas_src>
import functools
import math

import jax
import jax.numpy as jnp
from jax.experimental import pallas as pl
from jax.experimental.pallas import tpu as pltpu

# ----------------------------- model config ---------------------------------
VOCAB_SIZE = 858 + 1
PAD_IDX = 858
DIM_MODEL = 128
DIM_WORD_VEC = 128
N_LAYERS = 2
N_HEAD = 4
DIM_K = 32
DIM_V = 32
DIM_HID = 256
TEXT_LEN = 104
NUM_CLASSES = 17
FEATURE_SIZE = 128
WINDOW_SIZES = (2, 4, 6, 8, 10)
BATCH = 2
LN_EPS = 1e-6   # jadore-style Encoder uses 1e-6 (PyTorch nn.LayerNorm default is 1e-5)


# ----------------------------- small helpers --------------------------------
def _bcast_spec(shape):
    """BlockSpec for a grid-invariant (weight) input: whole array, block (0,...)."""
    zeros = (0,) * len(shape)
    return pl.BlockSpec(shape, lambda b, _z=zeros: _z)


def _layernorm(x, g, b, eps):
    mean = jnp.mean(x, axis=-1, keepdims=True)
    var = jnp.mean(jnp.square(x - mean), axis=-1, keepdims=True)
    return (x - mean) * jax.lax.rsqrt(var + eps) * g + b


# ----------------------------- Pallas kernels -------------------------------
def _layernorm_kernel(x_ref, g_ref, b_ref, o_ref, *, eps):
    o_ref[...] = _layernorm(x_ref[...].astype(jnp.float32),
                            g_ref[...], b_ref[...], eps).astype(o_ref.dtype)


def pallas_layernorm(x, gamma, beta, eps=LN_EPS):
    """x: (M, D) row-wise LayerNorm; gamma/beta: (1, D). Whole problem in VMEM."""
    M, D = x.shape
    return pl.pallas_call(
        functools.partial(_layernorm_kernel, eps=eps),
        out_shape=jax.ShapeDtypeStruct((M, D), jnp.float32),
    )(x, gamma, beta)


def _encoder_layer_kernel(x_ref, bias_ref,
                          wqkv_ref, bqkv_ref, wo_ref, bo_ref,
                          ln1g_ref, ln1b_ref,
                          w1_ref, b1_ref, w2_ref, b2_ref,
                          ln2g_ref, ln2b_ref,
                          o_ref, *, n_head, dim_k, dim_v, eps):
    """One batch element: full encoder layer fused in a single kernel."""
    x = x_ref[0]                                 # (L, D) f32 activations
    bias = bias_ref[0]                           # (1, L) additive key-pad mask
    scale = 1.0 / math.sqrt(dim_k)

    # ---- fused Q|K|V projection (bf16 operands, f32 accumulation) ----------
    qkv = jnp.dot(x.astype(jnp.bfloat16), wqkv_ref[...],
                  preferred_element_type=jnp.float32) + bqkv_ref[...]
    qkv_b = qkv.astype(jnp.bfloat16)             # (L, 3*H*dk)

    # ---- multi-head attention: static unroll over heads, no HBM transposes -
    q_off, k_off, v_off = 0, n_head * dim_k, 2 * n_head * dim_k
    head_outs = []
    for h in range(n_head):
        qh = qkv_b[:, q_off + h * dim_k: q_off + (h + 1) * dim_k]
        kh = qkv_b[:, k_off + h * dim_k: k_off + (h + 1) * dim_k]
        vh = qkv_b[:, v_off + h * dim_v: v_off + (h + 1) * dim_v]
        s = jax.lax.dot_general(qh, kh, (((1,), (1,)), ((), ())),
                                preferred_element_type=jnp.float32)
        s = s * scale + bias                                    # (L, L)
        m = jnp.max(s, axis=-1, keepdims=True)
        e = jnp.exp(s - m)
        p = e * pl.reciprocal(jnp.sum(e, axis=-1, keepdims=True), approx=True)
        head_outs.append(jnp.dot(p.astype(jnp.bfloat16), vh,
                                 preferred_element_type=jnp.float32))
    attn = jnp.concatenate(head_outs, axis=-1)                  # (L, H*dv) lane-dense

    # ---- output projection + residual + LayerNorm ---------------------------
    o = jnp.dot(attn.astype(jnp.bfloat16), wo_ref[...],
                preferred_element_type=jnp.float32) + bo_ref[...]
    h1 = _layernorm(o + x, ln1g_ref[...], ln1b_ref[...], eps)

    # ---- position-wise FFN + residual + LayerNorm ----------------------------
    f = jnp.dot(h1.astype(jnp.bfloat16), w1_ref[...],
                preferred_element_type=jnp.float32) + b1_ref[...]
    f = jnp.maximum(f, 0.0)
    f = jnp.dot(f.astype(jnp.bfloat16), w2_ref[...],
                preferred_element_type=jnp.float32) + b2_ref[...]
    h2 = _layernorm(f + h1, ln2g_ref[...], ln2b_ref[...], eps)

    o_ref[0] = h2.astype(o_ref.dtype)


def pallas_encoder_layer(h, attn_bias, p):
    """h: (B, L, D) f32, attn_bias: (B, 1, L) f32 -> (B, L, D) f32."""
    B, L, D = h.shape
    weights = [p["wqkv"], p["bqkv"], p["wo"], p["bo"],
               p["ln1_g"], p["ln1_b"],
               p["w1"], p["b1"], p["w2"], p["b2"],
               p["ln2_g"], p["ln2_b"]]
    return pl.pallas_call(
        functools.partial(_encoder_layer_kernel,
                          n_head=N_HEAD, dim_k=DIM_K, dim_v=DIM_V, eps=LN_EPS),
        grid=(B,),
        in_specs=[pl.BlockSpec((1, L, D), lambda b: (b, 0, 0)),
                  pl.BlockSpec((1, 1, L), lambda b: (b, 0, 0))]
                 + [_bcast_spec(w.shape) for w in weights],
        out_specs=pl.BlockSpec((1, L, D), lambda b: (b, 0, 0)),
        out_shape=jax.ShapeDtypeStruct((B, L, D), jnp.float32),
        compiler_params=pltpu.CompilerParams(dimension_semantics=("parallel",)),
    )(h, attn_bias, *weights)


def _cnn_head_kernel(x_ref, convw_ref, convb_ref,
                     fc1w_ref, fc1b_ref, fc2w_ref, fc2b_ref,
                     o_ref, *, window_sizes, seq_len):
    """One batch element: 5 conv/ReLU/max-pool branches + concat + fc1 + fc2."""
    L = seq_len
    x = x_ref[0]                                           # (L, C) f32, stays in VMEM
    n_out = convw_ref.shape[-1]
    cb = convb_ref[...]                                    # (n_windows, n_out)
    row_ids = jax.lax.broadcasted_iota(jnp.int32, (L, n_out), 0)

    pooled = []
    off = 0
    for i, k in enumerate(window_sizes):
        l_out = L - k + 1
        acc = jnp.zeros((L, n_out), jnp.float32)
        for j in range(k):
            # Align tap j with an (8,128)-preserving XLU roll instead of an
            # unaligned sublane slice; wrapped rows land at t >= l_out and are
            # masked below before the max-reduce.
            xj = x if j == 0 else pltpu.roll(x, shift=L - j, axis=0)
            acc = acc + jnp.dot(xj.astype(jnp.bfloat16), convw_ref[off + j],
                                preferred_element_type=jnp.float32)
        off += k
        y = jnp.maximum(acc + cb[i:i + 1, :], 0.0)         # Conv1d bias + ReLU
        y = jnp.where(row_ids < l_out, y, -1e30)           # mask wrapped tail rows
        pooled.append(jnp.max(y, axis=0, keepdims=True))   # global MaxPool1d -> (1, O)

    feat = jnp.concatenate(pooled, axis=-1)                # (1, n_windows*O)
    # Dropout(0.2) is identity in eval/inference mode.
    z = jnp.dot(feat.astype(jnp.bfloat16), fc1w_ref[...],
                preferred_element_type=jnp.float32) + fc1b_ref[...]
    out = jnp.dot(z.astype(jnp.bfloat16), fc2w_ref[...],
                  preferred_element_type=jnp.float32) + fc2b_ref[...]
    o_ref[0] = out.astype(o_ref.dtype)


def pallas_cnn_head(h, params):
    """h: (B, L, C) f32 -> logits (B, NUM_CLASSES)."""
    B, L, C = h.shape
    weights = [params["conv_w"], params["conv_b"],
               params["fc1_w"], params["fc1_b"],
               params["fc2_w"], params["fc2_b"]]
    out = pl.pallas_call(
        functools.partial(_cnn_head_kernel,
                          window_sizes=WINDOW_SIZES, seq_len=L),
        grid=(B,),
        in_specs=[pl.BlockSpec((1, L, C), lambda b: (b, 0, 0))]
                 + [_bcast_spec(w.shape) for w in weights],
        out_specs=pl.BlockSpec((1, 1, NUM_CLASSES), lambda b: (b, 0, 0)),
        out_shape=jax.ShapeDtypeStruct((B, 1, NUM_CLASSES), jnp.float32),
        compiler_params=pltpu.CompilerParams(dimension_semantics=("parallel",)),
    )(h, *weights)
    return out[:, 0, :]


# ----------------------------- parameters -----------------------------------
def _sinusoid_table(n_pos, d):
    pos = jnp.arange(n_pos, dtype=jnp.float32)[:, None]
    i = jnp.arange(d)[None, :]
    angle = pos / jnp.power(10000.0, (2.0 * (i // 2)).astype(jnp.float32) / d)
    return jnp.where(i % 2 == 0, jnp.sin(angle), jnp.cos(angle)).astype(jnp.float32)


def init_params(key):
    keys = iter(jax.random.split(key, 64))

    def nrm(shape, scale=0.02):
        return jax.random.normal(next(keys), shape, jnp.float32) * scale

    emb = nrm((VOCAB_SIZE, DIM_WORD_VEC))
    emb = emb.at[PAD_IDX].set(0.0)                         # padding_idx row is zero

    layers = []
    for _ in range(N_LAYERS):
        layers.append(dict(
            # fused Q|K|V projection (D, 3*H*dk); matmul weights stored in bf16
            wqkv=nrm((DIM_MODEL, 3 * N_HEAD * DIM_K)).astype(jnp.bfloat16),
            bqkv=jnp.zeros((1, 3 * N_HEAD * DIM_K), jnp.float32),
            wo=nrm((N_HEAD * DIM_V, DIM_MODEL)).astype(jnp.bfloat16),
            bo=jnp.zeros((1, DIM_MODEL), jnp.float32),
            ln1_g=jnp.ones((1, DIM_MODEL), jnp.float32),
            ln1_b=jnp.zeros((1, DIM_MODEL), jnp.float32),
            w1=nrm((DIM_MODEL, DIM_HID)).astype(jnp.bfloat16),
            b1=jnp.zeros((1, DIM_HID), jnp.float32),
            w2=nrm((DIM_HID, DIM_MODEL)).astype(jnp.bfloat16),
            b2=jnp.zeros((1, DIM_MODEL), jnp.float32),
            ln2_g=jnp.ones((1, DIM_MODEL), jnp.float32),
            ln2_b=jnp.zeros((1, DIM_MODEL), jnp.float32),
        ))

    # conv weights concatenated along the tap axis: (sum(k), C_in, C_out)
    conv_w = jnp.concatenate(
        [nrm((k, DIM_MODEL, FEATURE_SIZE)) for k in WINDOW_SIZES], axis=0
    ).astype(jnp.bfloat16)
    conv_b = jnp.zeros((len(WINDOW_SIZES), FEATURE_SIZE), jnp.float32)

    return dict(
        emb=emb,
        pos_enc=_sinusoid_table(TEXT_LEN, DIM_MODEL),
        ln0_g=jnp.ones((1, DIM_MODEL), jnp.float32),
        ln0_b=jnp.zeros((1, DIM_MODEL), jnp.float32),
        layers=layers,
        conv_w=conv_w, conv_b=conv_b,
        fc1_w=nrm((len(WINDOW_SIZES) * FEATURE_SIZE, 128)).astype(jnp.bfloat16),
        fc1_b=jnp.zeros((1, 128), jnp.float32),
        fc2_w=nrm((128, NUM_CLASSES)).astype(jnp.bfloat16),
        fc2_b=jnp.zeros((1, NUM_CLASSES), jnp.float32),
    )


# ----------------------------- forward pass ----------------------------------
def encoder_forward(params, tokens):
    B, L = tokens.shape
    key_pad = (tokens != PAD_IDX)
    attn_bias = jnp.where(key_pad, 0.0, -1e9).astype(jnp.float32).reshape(B, 1, L)

    # TODO(synk): embedding-table gather stays as XLA glue (a Pallas DMA-gather
    # buys nothing at this size).
    h = jnp.take(params["emb"], tokens, axis=0) + params["pos_enc"][None, :L, :]
    h = pallas_layernorm(h.reshape(B * L, DIM_MODEL),
                         params["ln0_g"], params["ln0_b"]).reshape(B, L, DIM_MODEL)
    for layer in params["layers"]:
        h = pallas_encoder_layer(h, attn_bias, layer)
    return h


def attn_cnn_forward(params, tokens):
    h = encoder_forward(params, tokens)        # (B, L, D)  (== NCL input after permute)
    return pallas_cnn_head(h, params)          # (B, 17)


# ------------------------ pure-JAX reference (self-check) --------------------
def _ref_ln(x, g, b, eps=LN_EPS):
    mean = jnp.mean(x, axis=-1, keepdims=True)
    var = jnp.mean(jnp.square(x - mean), axis=-1, keepdims=True)
    return (x - mean) * jax.lax.rsqrt(var + eps) * g + b


def ref_forward(params, tokens):
    """Plain-XLA forward mirroring the same bf16 matmul casts (correctness check)."""
    B, L = tokens.shape
    bias = jnp.where(tokens != PAD_IDX, 0.0, -1e9).astype(jnp.float32)   # (B, L)
    h = jnp.take(params["emb"], tokens, axis=0) + params["pos_enc"][None, :L, :]
    h = _ref_ln(h, params["ln0_g"], params["ln0_b"])
    for p in params["layers"]:
        qkv = jnp.einsum("bld,df->blf", h.astype(jnp.bfloat16), p["wqkv"],
                         preferred_element_type=jnp.float32) + p["bqkv"]
        qkv_b = qkv.astype(jnp.bfloat16)
        outs = []
        for hd in range(N_HEAD):
            q = qkv_b[..., hd * DIM_K:(hd + 1) * DIM_K]
            k = qkv_b[..., N_HEAD * DIM_K + hd * DIM_K: N_HEAD * DIM_K + (hd + 1) * DIM_K]
            v = qkv_b[..., 2 * N_HEAD * DIM_K + hd * DIM_V: 2 * N_HEAD * DIM_K + (hd + 1) * DIM_V]
            s = jnp.einsum("bqd,bkd->bqk", q, k,
                           preferred_element_type=jnp.float32) / math.sqrt(DIM_K)
            s = s + bias[:, None, :]
            patt = jax.nn.softmax(s, axis=-1)
            outs.append(jnp.einsum("bqk,bkd->bqd", patt.astype(jnp.bfloat16), v,
                                   preferred_element_type=jnp.float32))
        attn = jnp.concatenate(outs, axis=-1)
        o = jnp.einsum("bld,df->blf", attn.astype(jnp.bfloat16), p["wo"],
                       preferred_element_type=jnp.float32) + p["bo"]
        h1 = _ref_ln(o + h, p["ln1_g"], p["ln1_b"])
        f = jnp.maximum(jnp.einsum("bld,df->blf", h1.astype(jnp.bfloat16), p["w1"],
                                   preferred_element_type=jnp.float32) + p["b1"], 0.0)
        f = jnp.einsum("bld,df->blf", f.astype(jnp.bfloat16), p["w2"],
                       preferred_element_type=jnp.float32) + p["b2"]
        h = _ref_ln(f + h1, p["ln2_g"], p["ln2_b"])

    feats = []
    off = 0
    for i, k in enumerate(WINDOW_SIZES):
        l_out = L - k + 1
        acc = jnp.zeros((B, l_out, FEATURE_SIZE), jnp.float32)
        for j in range(k):
            acc = acc + jnp.einsum("blc,co->blo",
                                   h[:, j:j + l_out, :].astype(jnp.bfloat16),
                                   params["conv_w"][off + j],
                                   preferred_element_type=jnp.float32)
        off += k
        y = jnp.maximum(acc + params["conv_b"][i][None, None, :], 0.0)
        feats.append(jnp.max(y, axis=1))                   # (B, O)
    feat = jnp.concatenate(feats, axis=-1)                 # (B, 5*O)
    z = jnp.dot(feat.astype(jnp.bfloat16), params["fc1_w"],
                preferred_element_type=jnp.float32) + params["fc1_b"]
    return jnp.dot(z.astype(jnp.bfloat16), params["fc2_w"],
                   preferred_element_type=jnp.float32) + params["fc2_b"]


# --------------------------------- main --------------------------------------
if __name__ == "__main__":
    key = jax.random.PRNGKey(0)
    pkey, xkey = jax.random.split(key)
    params = init_params(pkey)

    # token ids in [0, 858); last few positions set to PAD to exercise the mask
    tokens = jax.random.randint(xkey, (BATCH, TEXT_LEN), 0, PAD_IDX, dtype=jnp.int32)
    tokens = tokens.at[:, -6:].set(PAD_IDX)

    out = jax.jit(attn_cnn_forward)(params, tokens)
    out = jax.block_until_ready(out)
    assert out.shape == (BATCH, NUM_CLASSES)
    assert bool(jnp.all(jnp.isfinite(out)))

    # numerical self-check against a plain-XLA reference with matching bf16 casts
    ref = jax.block_until_ready(jax.jit(ref_forward)(params, tokens))
    err = float(jnp.max(jnp.abs(out - ref)))
    ref_scale = float(jnp.max(jnp.abs(ref)))
    assert err <= 5e-2 + 5e-2 * ref_scale, f"mismatch: max|diff|={err}, ref scale={ref_scale}"

    print("KERNEL_OK")
</pallas_src>

<mosaic_0001>
module attributes {stable_mosaic.version = 11 : i64} {
  func.func @_encoder_layer_kernel(%arg0: i32, %arg1: memref<1x104x128xf32, #tpu.memory_space<vmem>>, %arg2: memref<1x1x104xf32, #tpu.memory_space<vmem>>, %arg3: memref<128x384xbf16, #tpu.memory_space<vmem>>, %arg4: memref<1x384xf32, #tpu.memory_space<vmem>>, %arg5: memref<128x128xbf16, #tpu.memory_space<vmem>>, %arg6: memref<1x128xf32, #tpu.memory_space<vmem>>, %arg7: memref<1x128xf32, #tpu.memory_space<vmem>>, %arg8: memref<1x128xf32, #tpu.memory_space<vmem>>, %arg9: memref<128x256xbf16, #tpu.memory_space<vmem>>, %arg10: memref<1x256xf32, #tpu.memory_space<vmem>>, %arg11: memref<256x128xbf16, #tpu.memory_space<vmem>>, %arg12: memref<1x128xf32, #tpu.memory_space<vmem>>, %arg13: memref<1x128xf32, #tpu.memory_space<vmem>>, %arg14: memref<1x128xf32, #tpu.memory_space<vmem>>, %arg15: memref<1x104x128xf32, #tpu.memory_space<vmem>>) attributes {dimension_semantics = [#tpu.dimension_semantics<parallel>], iteration_bounds = array<i64: 2>, scalar_prefetch = 0 : i64, scratch_operands = 0 : i64, tpu.core_type = #tpu.core_type<tc>, window_params = [{transform_indices = @transform_0, window_bounds = array<i64: 1, 104, 128>}, {transform_indices = @transform_1, window_bounds = array<i64: 1, 1, 104>}, {pipeline_mode = #tpu.pipeline_mode<synchronous>, transform_indices = @transform_2, window_bounds = array<i64: 128, 384>}, {pipeline_mode = #tpu.pipeline_mode<synchronous>, transform_indices = @transform_3, window_bounds = array<i64: 1, 384>}, {pipeline_mode = #tpu.pipeline_mode<synchronous>, transform_indices = @transform_4, window_bounds = array<i64: 128, 128>}, {pipeline_mode = #tpu.pipeline_mode<synchronous>, transform_indices = @transform_5, window_bounds = array<i64: 1, 128>}, {pipeline_mode = #tpu.pipeline_mode<synchronous>, transform_indices = @transform_6, window_bounds = array<i64: 1, 128>}, {pipeline_mode = #tpu.pipeline_mode<synchronous>, transform_indices = @transform_7, window_bounds = array<i64: 1, 128>}, {pipeline_mode = #tpu.pipeline_mode<synchronous>, transform_indices = @transform_8, window_bounds = array<i64: 128, 256>}, {pipeline_mode = #tpu.pipeline_mode<synchronous>, transform_indices = @transform_9, window_bounds = array<i64: 1, 256>}, {pipeline_mode = #tpu.pipeline_mode<synchronous>, transform_indices = @transform_10, window_bounds = array<i64: 256, 128>}, {pipeline_mode = #tpu.pipeline_mode<synchronous>, transform_indices = @transform_11, window_bounds = array<i64: 1, 128>}, {pipeline_mode = #tpu.pipeline_mode<synchronous>, transform_indices = @transform_12, window_bounds = array<i64: 1, 128>}, {pipeline_mode = #tpu.pipeline_mode<synchronous>, transform_indices = @transform_13, window_bounds = array<i64: 1, 128>}, {transform_indices = @transform_14, window_bounds = array<i64: 1, 104, 128>}]} {
    %c0 = arith.constant 0 : index
    %c0_0 = arith.constant 0 : index
    %c0_1 = arith.constant 0 : index
    %0 = vector.load %arg1[%c0, %c0_0, %c0_1] : memref<1x104x128xf32, #tpu.memory_space<vmem>>, vector<1x104x128xf32>
    %1 = vector.shape_cast %0 : vector<1x104x128xf32> to vector<104x128xf32>
    %c0_2 = arith.constant 0 : index
    %c0_3 = arith.constant 0 : index
    %c0_4 = arith.constant 0 : index
    %2 = vector.load %arg2[%c0_2, %c0_3, %c0_4] : memref<1x1x104xf32, #tpu.memory_space<vmem>>, vector<1x1x104xf32>
    %3 = vector.shape_cast %2 : vector<1x1x104xf32> to vector<1x104xf32>
    %4 = arith.truncf %1 : vector<104x128xf32> to vector<104x128xbf16>
    %c0_5 = arith.constant 0 : index
    %c0_6 = arith.constant 0 : index
    %5 = vector.load %arg3[%c0_5, %c0_6] : memref<128x384xbf16, #tpu.memory_space<vmem>>, vector<128x384xbf16>
    %cst = arith.constant dense<0.000000e+00> : vector<104x384xf32>
    %6 = tpu.matmul %4, %5, %cst {dimension_numbers = #tpu.dot_dimension_numbers<[1], [0], [0], [1], [0, 0, 1, 1], [], []>} : vector<104x128xbf16>, vector<128x384xbf16>, vector<104x384xf32> -> vector<104x384xf32>
    %c0_7 = arith.constant 0 : index
    %c0_8 = arith.constant 0 : index
    %7 = vector.load %arg4[%c0_7, %c0_8] : memref<1x384xf32, #tpu.memory_space<vmem>>, vector<1x384xf32>
    %8 = vector.broadcast %7 : vector<1x384xf32> to vector<104x384xf32>
    %9 = arith.addf %6, %8 : vector<104x384xf32>
    %10 = arith.truncf %9 : vector<104x384xf32> to vector<104x384xbf16>
    %11 = vector.extract_strided_slice %10 {offsets = [0, 0], sizes = [104, 32], strides = [1, 1]} : vector<104x384xbf16> to vector<104x32xbf16>
    %12 = vector.extract_strided_slice %10 {offsets = [0, 128], sizes = [104, 32], strides = [1, 1]} : vector<104x384xbf16> to vector<104x32xbf16>
    %13 = vector.extract_strided_slice %10 {offsets = [0, 256], sizes = [104, 32], strides = [1, 1]} : vector<104x384xbf16> to vector<104x32xbf16>
    %cst_9 = arith.constant dense<0.000000e+00> : vector<104x104xf32>
    %14 = tpu.matmul %11, %12, %cst_9 {dimension_numbers = #tpu.dot_dimension_numbers<[1], [1], [0], [0], [0, 0, 1, 0], [], []>} : vector<104x32xbf16>, vector<104x32xbf16>, vector<104x104xf32> -> vector<104x104xf32>
    %cst_10 = arith.constant 0.176776692 : f32
    %15 = vector.broadcast %cst_10 : f32 to vector<104x104xf32>
    %16 = arith.mulf %14, %15 : vector<104x104xf32>
    %17 = vector.broadcast %3 : vector<1x104xf32> to vector<104x104xf32>
    %18 = arith.addf %16, %17 : vector<104x104xf32>
    %cst_11 = arith.constant dense<0xFF800000> : vector<104xf32>
    %19 = vector.multi_reduction <maximumf>, %18, %cst_11 [1] : vector<104x104xf32> to vector<104xf32>
    %20 = vector.shape_cast %19 : vector<104xf32> to vector<104x1xf32>
    %21 = vector.broadcast %20 : vector<104x1xf32> to vector<104x104xf32>
    %22 = arith.subf %18, %21 : vector<104x104xf32>
    %23 = math.exp %22 : vector<104x104xf32>
    %cst_12 = arith.constant dense<0.000000e+00> : vector<104xf32>
    %24 = vector.multi_reduction <add>, %23, %cst_12 [1] : vector<104x104xf32> to vector<104xf32>
    %25 = vector.shape_cast %24 : vector<104xf32> to vector<104x1xf32>
    %26 = tpu.reciprocal %25 {approx = true} : vector<104x1xf32> -> vector<104x1xf32>
    %27 = vector.broadcast %26 : vector<104x1xf32> to vector<104x104xf32>
    %28 = arith.mulf %23, %27 : vector<104x104xf32>
    %29 = arith.truncf %28 : vector<104x104xf32> to vector<104x104xbf16>
    %cst_13 = arith.constant dense<0.000000e+00> : vector<104x32xf32>
    %30 = tpu.matmul %29, %13, %cst_13 {dimension_numbers = #tpu.dot_dimension_numbers<[1], [0], [0], [1], [0, 0, 1, 1], [], []>} : vector<104x104xbf16>, vector<104x32xbf16>, vector<104x32xf32> -> vector<104x32xf32>
    %31 = vector.extract_strided_slice %10 {offsets = [0, 32], sizes = [104, 32], strides = [1, 1]} : vector<104x384xbf16> to vector<104x32xbf16>
    %32 = vector.extract_strided_slice %10 {offsets = [0, 160], sizes = [104, 32], strides = [1, 1]} : vector<104x384xbf16> to vector<104x32xbf16>
    %33 = vector.extract_strided_slice %10 {offsets = [0, 288], sizes = [104, 32], strides = [1, 1]} : vector<104x384xbf16> to vector<104x32xbf16>
    %cst_14 = arith.constant dense<0.000000e+00> : vector<104x104xf32>
    %34 = tpu.matmul %31, %32, %cst_14 {dimension_numbers = #tpu.dot_dimension_numbers<[1], [1], [0], [0], [0, 0, 1, 0], [], []>} : vector<104x32xbf16>, vector<104x32xbf16>, vector<104x104xf32> -> vector<104x104xf32>
    %cst_15 = arith.constant 0.176776692 : f32
    %35 = vector.broadcast %cst_15 : f32 to vector<104x104xf32>
    %36 = arith.mulf %34, %35 : vector<104x104xf32>
    %37 = vector.broadcast %3 : vector<1x104xf32> to vector<104x104xf32>
    %38 = arith.addf %36, %37 : vector<104x104xf32>
    %cst_16 = arith.constant dense<0xFF800000> : vector<104xf32>
    %39 = vector.multi_reduction <maximumf>, %38, %cst_16 [1] : vector<104x104xf32> to vector<104xf32>
    %40 = vector.shape_cast %39 : vector<104xf32> to vector<104x1xf32>
    %41 = vector.broadcast %40 : vector<104x1xf32> to vector<104x104xf32>
    %42 = arith.subf %38, %41 : vector<104x104xf32>
    %43 = math.exp %42 : vector<104x104xf32>
    %cst_17 = arith.constant dense<0.000000e+00> : vector<104xf32>
    %44 = vector.multi_reduction <add>, %43, %cst_17 [1] : vector<104x104xf32> to vector<104xf32>
    %45 = vector.shape_cast %44 : vector<104xf32> to vector<104x1xf32>
    %46 = tpu.reciprocal %45 {approx = true} : vector<104x1xf32> -> vector<104x1xf32>
    %47 = vector.broadcast %46 : vector<104x1xf32> to vector<104x104xf32>
    %48 = arith.mulf %43, %47 : vector<104x104xf32>
    %49 = arith.truncf %48 : vector<104x104xf32> to vector<104x104xbf16>
    %cst_18 = arith.constant dense<0.000000e+00> : vector<104x32xf32>
    %50 = tpu.matmul %49, %33, %cst_18 {dimension_numbers = #tpu.dot_dimension_numbers<[1], [0], [0], [1], [0, 0, 1, 1], [], []>} : vector<104x104xbf16>, vector<104x32xbf16>, vector<104x32xf32> -> vector<104x32xf32>
    %51 = vector.extract_strided_slice %10 {offsets = [0, 64], sizes = [104, 32], strides = [1, 1]} : vector<104x384xbf16> to vector<104x32xbf16>
    %52 = vector.extract_strided_slice %10 {offsets = [0, 192], sizes = [104, 32], strides = [1, 1]} : vector<104x384xbf16> to vector<104x32xbf16>
    %53 = vector.extract_strided_slice %10 {offsets = [0, 320], sizes = [104, 32], strides = [1, 1]} : vector<104x384xbf16> to vector<104x32xbf16>
    %cst_19 = arith.constant dense<0.000000e+00> : vector<104x104xf32>
    %54 = tpu.matmul %51, %52, %cst_19 {dimension_numbers = #tpu.dot_dimension_numbers<[1], [1], [0], [0], [0, 0, 1, 0], [], []>} : vector<104x32xbf16>, vector<104x32xbf16>, vector<104x104xf32> -> vector<104x104xf32>
    %cst_20 = arith.constant 0.176776692 : f32
    %55 = vector.broadcast %cst_20 : f32 to vector<104x104xf32>
    %56 = arith.mulf %54, %55 : vector<104x104xf32>
    %57 = vector.broadcast %3 : vector<1x104xf32> to vector<104x104xf32>
    %58 = arith.addf %56, %57 : vector<104x104xf32>
    %cst_21 = arith.constant dense<0xFF800000> : vector<104xf32>
    %59 = vector.multi_reduction <maximumf>, %58, %cst_21 [1] : vector<104x104xf32> to vector<104xf32>
    %60 = vector.shape_cast %59 : vector<104xf32> to vector<104x1xf32>
    %61 = vector.broadcast %60 : vector<104x1xf32> to vector<104x104xf32>
    %62 = arith.subf %58, %61 : vector<104x104xf32>
    %63 = math.exp %62 : vector<104x104xf32>
    %cst_22 = arith.constant dense<0.000000e+00> : vector<104xf32>
    %64 = vector.multi_reduction <add>, %63, %cst_22 [1] : vector<104x104xf32> to vector<104xf32>
    %65 = vector.shape_cast %64 : vector<104xf32> to vector<104x1xf32>
    %66 = tpu.reciprocal %65 {approx = true} : vector<104x1xf32> -> vector<104x1xf32>
    %67 = vector.broadcast %66 : vector<104x1xf32> to vector<104x104xf32>
    %68 = arith.mulf %63, %67 : vector<104x104xf32>
    %69 = arith.truncf %68 : vector<104x104xf32> to vector<104x104xbf16>
    %cst_23 = arith.constant dense<0.000000e+00> : vector<104x32xf32>
    %70 = tpu.matmul %69, %53, %cst_23 {dimension_numbers = #tpu.dot_dimension_numbers<[1], [0], [0], [1], [0, 0, 1, 1], [], []>} : vector<104x104xbf16>, vector<104x32xbf16>, vector<104x32xf32> -> vector<104x32xf32>
    %71 = vector.extract_strided_slice %10 {offsets = [0, 96], sizes = [104, 32], strides = [1, 1]} : vector<104x384xbf16> to vector<104x32xbf16>
    %72 = vector.extract_strided_slice %10 {offsets = [0, 224], sizes = [104, 32], strides = [1, 1]} : vector<104x384xbf16> to vector<104x32xbf16>
    %73 = vector.extract_strided_slice %10 {offsets = [0, 352], sizes = [104, 32], strides = [1, 1]} : vector<104x384xbf16> to vector<104x32xbf16>
    %cst_24 = arith.constant dense<0.000000e+00> : vector<104x104xf32>
    %74 = tpu.matmul %71, %72, %cst_24 {dimension_numbers = #tpu.dot_dimension_numbers<[1], [1], [0], [0], [0, 0, 1, 0], [], []>} : vector<104x32xbf16>, vector<104x32xbf16>, vector<104x104xf32> -> vector<104x104xf32>
    %cst_25 = arith.constant 0.176776692 : f32
    %75 = vector.broadcast %cst_25 : f32 to vector<104x104xf32>
    %76 = arith.mulf %74, %75 : vector<104x104xf32>
    %77 = vector.broadcast %3 : vector<1x104xf32> to vector<104x104xf32>
    %78 = arith.addf %76, %77 : vector<104x104xf32>
    %cst_26 = arith.constant dense<0xFF800000> : vector<104xf32>
    %79 = vector.multi_reduction <maximumf>, %78, %cst_26 [1] : vector<104x104xf32> to vector<104xf32>
    %80 = vector.shape_cast %79 : vector<104xf32> to vector<104x1xf32>
    %81 = vector.broadcast %80 : vector<104x1xf32> to vector<104x104xf32>
    %82 = arith.subf %78, %81 : vector<104x104xf32>
    %83 = math.exp %82 : vector<104x104xf32>
    %cst_27 = arith.constant dense<0.000000e+00> : vector<104xf32>
    %84 = vector.multi_reduction <add>, %83, %cst_27 [1] : vector<104x104xf32> to vector<104xf32>
    %85 = vector.shape_cast %84 : vector<104xf32> to vector<104x1xf32>
    %86 = tpu.reciprocal %85 {approx = true} : vector<104x1xf32> -> vector<104x1xf32>
    %87 = vector.broadcast %86 : vector<104x1xf32> to vector<104x104xf32>
    %88 = arith.mulf %83, %87 : vector<104x104xf32>
    %89 = arith.truncf %88 : vector<104x104xf32> to vector<104x104xbf16>
    %cst_28 = arith.constant dense<0.000000e+00> : vector<104x32xf32>
    %90 = tpu.matmul %89, %73, %cst_28 {dimension_numbers = #tpu.dot_dimension_numbers<[1], [0], [0], [1], [0, 0, 1, 1], [], []>} : vector<104x104xbf16>, vector<104x32xbf16>, vector<104x32xf32> -> vector<104x32xf32>
    %91 = tpu.concatenate %30, %50, %70, %90 in 1 : vector<104x32xf32>, vector<104x32xf32>, vector<104x32xf32>, vector<104x32xf32> -> vector<104x128xf32>
    %92 = arith.truncf %91 : vector<104x128xf32> to vector<104x128xbf16>
    %c0_29 = arith.constant 0 : index
    %c0_30 = arith.constant 0 : index
    %93 = vector.load %arg5[%c0_29, %c0_30] : memref<128x128xbf16, #tpu.memory_space<vmem>>, vector<128x128xbf16>
    %cst_31 = arith.constant dense<0.000000e+00> : vector<104x128xf32>
    %94 = tpu.matmul %92, %93, %cst_31 {dimension_numbers = #tpu.dot_dimension_numbers<[1], [0], [0], [1], [0, 0, 1, 1], [], []>} : vector<104x128xbf16>, vector<128x128xbf16>, vector<104x128xf32> -> vector<104x128xf32>
    %c0_32 = arith.constant 0 : index
    %c0_33 = arith.constant 0 : index
    %95 = vector.load %arg6[%c0_32, %c0_33] : memref<1x128xf32, #tpu.memory_space<vmem>>, vector<1x128xf32>
    %96 = vector.broadcast %95 : vector<1x128xf32> to vector<104x128xf32>
    %97 = arith.addf %94, %96 : vector<104x128xf32>
    %98 = arith.addf %97, %1 : vector<104x128xf32>
    %c0_34 = arith.constant 0 : index
    %c0_35 = arith.constant 0 : index
    %99 = vector.load %arg7[%c0_34, %c0_35] : memref<1x128xf32, #tpu.memory_space<vmem>>, vector<1x128xf32>
    %c0_36 = arith.constant 0 : index
    %c0_37 = arith.constant 0 : index
    %100 = vector.load %arg8[%c0_36, %c0_37] : memref<1x128xf32, #tpu.memory_space<vmem>>, vector<1x128xf32>
    %cst_38 = arith.constant dense<0.000000e+00> : vector<104xf32>
    %101 = vector.multi_reduction <add>, %98, %cst_38 [1] : vector<104x128xf32> to vector<104xf32>
    %102 = vector.shape_cast %101 : vector<104xf32> to vector<104x1xf32>
    %cst_39 = arith.constant 1.280000e+02 : f32
    %103 = vector.broadcast %cst_39 : f32 to vector<104x1xf32>
    %104 = arith.divf %102, %103 : vector<104x1xf32>
    %105 = vector.broadcast %104 : vector<104x1xf32> to vector<104x128xf32>
    %106 = arith.subf %98, %105 : vector<104x128xf32>
    %107 = arith.mulf %106, %106 : vector<104x128xf32>
    %cst_40 = arith.constant dense<0.000000e+00> : vector<104xf32>
    %108 = vector.multi_reduction <add>, %107, %cst_40 [1] : vector<104x128xf32> to vector<104xf32>
    %109 = vector.shape_cast %108 : vector<104xf32> to vector<104x1xf32>
    %cst_41 = arith.constant 1.280000e+02 : f32
    %110 = vector.broadcast %cst_41 : f32 to vector<104x1xf32>
    %111 = arith.divf %109, %110 : vector<104x1xf32>
    %112 = vector.broadcast %104 : vector<104x1xf32> to vector<104x128xf32>
    %113 = arith.subf %98, %112 : vector<104x128xf32>
    %cst_42 = arith.constant 9.99999997E-7 : f32
    %114 = vector.broadcast %cst_42 : f32 to vector<104x1xf32>
    %115 = arith.addf %111, %114 : vector<104x1xf32>
    %116 = math.rsqrt %115 : vector<104x1xf32>
    %117 = vector.broadcast %116 : vector<104x1xf32> to vector<104x128xf32>
    %118 = arith.mulf %113, %117 : vector<104x128xf32>
    %119 = vector.broadcast %99 : vector<1x128xf32> to vector<104x128xf32>
    %120 = arith.mulf %118, %119 : vector<104x128xf32>
    %121 = vector.broadcast %100 : vector<1x128xf32> to vector<104x128xf32>
    %122 = arith.addf %120, %121 : vector<104x128xf32>
    %123 = arith.truncf %122 : vector<104x128xf32> to vector<104x128xbf16>
    %c0_43 = arith.constant 0 : index
    %c0_44 = arith.constant 0 : index
    %124 = vector.load %arg9[%c0_43, %c0_44] : memref<128x256xbf16, #tpu.memory_space<vmem>>, vector<128x256xbf16>
    %cst_45 = arith.constant dense<0.000000e+00> : vector<104x256xf32>
    %125 = tpu.matmul %123, %124, %cst_45 {dimension_numbers = #tpu.dot_dimension_numbers<[1], [0], [0], [1], [0, 0, 1, 1], [], []>} : vector<104x128xbf16>, vector<128x256xbf16>, vector<104x256xf32> -> vector<104x256xf32>
    %c0_46 = arith.constant 0 : index
    %c0_47 = arith.constant 0 : index
    %126 = vector.load %arg10[%c0_46, %c0_47] : memref<1x256xf32, #tpu.memory_space<vmem>>, vector<1x256xf32>
    %127 = vector.broadcast %126 : vector<1x256xf32> to vector<104x256xf32>
    %128 = arith.addf %125, %127 : vector<104x256xf32>
    %cst_48 = arith.constant 0.000000e+00 : f32
    %129 = vector.broadcast %cst_48 : f32 to vector<104x256xf32>
    %130 = arith.maximumf %128, %129 : vector<104x256xf32>
    %131 = arith.truncf %130 : vector<104x256xf32> to vector<104x256xbf16>
    %c0_49 = arith.constant 0 : index
    %c0_50 = arith.constant 0 : index
    %132 = vector.load %arg11[%c0_49, %c0_50] : memref<256x128xbf16, #tpu.memory_space<vmem>>, vector<256x128xbf16>
    %cst_51 = arith.constant dense<0.000000e+00> : vector<104x128xf32>
    %133 = tpu.matmul %131, %132, %cst_51 {dimension_numbers = #tpu.dot_dimension_numbers<[1], [0], [0], [1], [0, 0, 1, 1], [], []>} : vector<104x256xbf16>, vector<256x128xbf16>, vector<104x128xf32> -> vector<104x128xf32>
    %c0_52 = arith.constant 0 : index
    %c0_53 = arith.constant 0 : index
    %134 = vector.load %arg12[%c0_52, %c0_53] : memref<1x128xf32, #tpu.memory_space<vmem>>, vector<1x128xf32>
    %135 = vector.broadcast %134 : vector<1x128xf32> to vector<104x128xf32>
    %136 = arith.addf %133, %135 : vector<104x128xf32>
    %137 = arith.addf %136, %122 : vector<104x128xf32>
    %c0_54 = arith.constant 0 : index
    %c0_55 = arith.constant 0 : index
    %138 = vector.load %arg13[%c0_54, %c0_55] : memref<1x128xf32, #tpu.memory_space<vmem>>, vector<1x128xf32>
    %c0_56 = arith.constant 0 : index
    %c0_57 = arith.constant 0 : index
    %139 = vector.load %arg14[%c0_56, %c0_57] : memref<1x128xf32, #tpu.memory_space<vmem>>, vector<1x128xf32>
    %cst_58 = arith.constant dense<0.000000e+00> : vector<104xf32>
    %140 = vector.multi_reduction <add>, %137, %cst_58 [1] : vector<104x128xf32> to vector<104xf32>
    %141 = vector.shape_cast %140 : vector<104xf32> to vector<104x1xf32>
    %cst_59 = arith.constant 1.280000e+02 : f32
    %142 = vector.broadcast %cst_59 : f32 to vector<104x1xf32>
    %143 = arith.divf %141, %142 : vector<104x1xf32>
    %144 = vector.broadcast %143 : vector<104x1xf32> to vector<104x128xf32>
    %145 = arith.subf %137, %144 : vector<104x128xf32>
    %146 = arith.mulf %145, %145 : vector<104x128xf32>
    %cst_60 = arith.constant dense<0.000000e+00> : vector<104xf32>
    %147 = vector.multi_reduction <add>, %146, %cst_60 [1] : vector<104x128xf32> to vector<104xf32>
    %148 = vector.shape_cast %147 : vector<104xf32> to vector<104x1xf32>
    %cst_61 = arith.constant 1.280000e+02 : f32
    %149 = vector.broadcast %cst_61 : f32 to vector<104x1xf32>
    %150 = arith.divf %148, %149 : vector<104x1xf32>
    %151 = vector.broadcast %143 : vector<104x1xf32> to vector<104x128xf32>
    %152 = arith.subf %137, %151 : vector<104x128xf32>
    %cst_62 = arith.constant 9.99999997E-7 : f32
    %153 = vector.broadcast %cst_62 : f32 to vector<104x1xf32>
    %154 = arith.addf %150, %153 : vector<104x1xf32>
    %155 = math.rsqrt %154 : vector<104x1xf32>
    %156 = vector.broadcast %155 : vector<104x1xf32> to vector<104x128xf32>
    %157 = arith.mulf %152, %156 : vector<104x128xf32>
    %158 = vector.broadcast %138 : vector<1x128xf32> to vector<104x128xf32>
    %159 = arith.mulf %157, %158 : vector<104x128xf32>
    %160 = vector.broadcast %139 : vector<1x128xf32> to vector<104x128xf32>
    %161 = arith.addf %159, %160 : vector<104x128xf32>
    %c0_63 = arith.constant 0 : index
    %c0_64 = arith.constant 0 : index
    %c0_65 = arith.constant 0 : index
    %162 = vector.load %arg15[%c0_63, %c0_64, %c0_65] : memref<1x104x128xf32, #tpu.memory_space<vmem>>, vector<1x104x128xf32>
    %163 = vector.shape_cast %162 : vector<1x104x128xf32> to vector<104x128xf32>
    %164 = vector.shape_cast %161 : vector<104x128xf32> to vector<1x104x128xf32>
    tpu.vector_store %arg15[%c0_63, %c0_64, %c0_65], %164 {strides = array<i32>} : memref<1x104x128xf32, #tpu.memory_space<vmem>>, vector<1x104x128xf32>,
    return
  }
  func.func @transform_0(%arg0: i32) -> (i32, i32, i32) {
    %c0_i32 = arith.constant 0 : i32
    %c0_i32_0 = arith.constant 0 : i32
    %c0_i32_1 = arith.constant 0 : i32
    return %arg0, %c0_i32, %c0_i32_0 : i32, i32, i32
  }
  func.func @transform_1(%arg0: i32) -> (i32, i32, i32) {
    %c0_i32 = arith.constant 0 : i32
    %c0_i32_0 = arith.constant 0 : i32
    %c0_i32_1 = arith.constant 0 : i32
    return %arg0, %c0_i32, %c0_i32_0 : i32, i32, i32
  }
  func.func @transform_2(%arg0: i32) -> (i32, i32) {
    %c0_i32 = arith.constant 0 : i32
    %c0_i32_0 = arith.constant 0 : i32
    %c0_i32_1 = arith.constant 0 : i32
    return %c0_i32, %c0_i32_0 : i32, i32
  }
  func.func @transform_3(%arg0: i32) -> (i32, i32) {
    %c0_i32 = arith.constant 0 : i32
    %c0_i32_0 = arith.constant 0 : i32
    %c0_i32_1 = arith.constant 0 : i32
    return %c0_i32, %c0_i32_0 : i32, i32
  }
  func.func @transform_4(%arg0: i32) -> (i32, i32) {
    %c0_i32 = arith.constant 0 : i32
    %c0_i32_0 = arith.constant 0 : i32
    %c0_i32_1 = arith.constant 0 : i32
    return %c0_i32, %c0_i32_0 : i32, i32
  }
  func.func @transform_5(%arg0: i32) -> (i32, i32) {
    %c0_i32 = arith.constant 0 : i32
    %c0_i32_0 = arith.constant 0 : i32
    %c0_i32_1 = arith.constant 0 : i32
    return %c0_i32, %c0_i32_0 : i32, i32
  }
  func.func @transform_6(%arg0: i32) -> (i32, i32) {
    %c0_i32 = arith.constant 0 : i32
    %c0_i32_0 = arith.constant 0 : i32
    %c0_i32_1 = arith.constant 0 : i32
    return %c0_i32, %c0_i32_0 : i32, i32
  }
  func.func @transform_7(%arg0: i32) -> (i32, i32) {
    %c0_i32 = arith.constant 0 : i32
    %c0_i32_0 = arith.constant 0 : i32
    %c0_i32_1 = arith.constant 0 : i32
    return %c0_i32, %c0_i32_0 : i32, i32
  }
  func.func @transform_8(%arg0: i32) -> (i32, i32) {
    %c0_i32 = arith.constant 0 : i32
    %c0_i32_0 = arith.constant 0 : i32
    %c0_i32_1 = arith.constant 0 : i32
    return %c0_i32, %c0_i32_0 : i32, i32
  }
  func.func @transform_9(%arg0: i32) -> (i32, i32) {
    %c0_i32 = arith.constant 0 : i32
    %c0_i32_0 = arith.constant 0 : i32
    %c0_i32_1 = arith.constant 0 : i32
    return %c0_i32, %c0_i32_0 : i32, i32
  }
  func.func @transform_10(%arg0: i32) -> (i32, i32) {
    %c0_i32 = arith.constant 0 : i32
    %c0_i32_0 = arith.constant 0 : i32
    %c0_i32_1 = arith.constant 0 : i32
    return %c0_i32, %c0_i32_0 : i32, i32
  }
  func.func @transform_11(%arg0: i32) -> (i32, i32) {
    %c0_i32 = arith.constant 0 : i32
    %c0_i32_0 = arith.constant 0 : i32
    %c0_i32_1 = arith.constant 0 : i32
    return %c0_i32, %c0_i32_0 : i32, i32
  }
  func.func @transform_12(%arg0: i32) -> (i32, i32) {
    %c0_i32 = arith.constant 0 : i32
    %c0_i32_0 = arith.constant 0 : i32
    %c0_i32_1 = arith.constant 0 : i32
    return %c0_i32, %c0_i32_0 : i32, i32
  }
  func.func @transform_13(%arg0: i32) -> (i32, i32) {
    %c0_i32 = arith.constant 0 : i32
    %c0_i32_0 = arith.constant 0 : i32
    %c0_i32_1 = arith.constant 0 : i32
    return %c0_i32, %c0_i32_0 : i32, i32
  }
  func.func @transform_14(%arg0: i32) -> (i32, i32, i32) {
    %c0_i32 = arith.constant 0 : i32
    %c0_i32_0 = arith.constant 0 : i32
    %c0_i32_1 = arith.constant 0 : i32
    return %arg0, %c0_i32, %c0_i32_0 : i32, i32, i32
  }
}

module attributes {stable_mosaic.version = 11 : i64} {
  func.func @_layernorm_kernel(%arg0: memref<208x128xf32, #tpu.memory_space<vmem>>, %arg1: memref<1x128xf32, #tpu.memory_space<vmem>>, %arg2: memref<1x128xf32, #tpu.memory_space<vmem>>, %arg3: memref<208x128xf32, #tpu.memory_space<vmem>>) attributes {dimension_semantics = [], scalar_prefetch = 0 : i64, scratch_operands = 0 : i64, tpu.core_type = #tpu.core_type<tc>} {
    %c0 = arith.constant 0 : index
    %c0_0 = arith.constant 0 : index
    %0 = vector.load %arg0[%c0, %c0_0] : memref<208x128xf32, #tpu.memory_space<vmem>>, vector<208x128xf32>
    %c0_1 = arith.constant 0 : index
    %c0_2 = arith.constant 0 : index
    %1 = vector.load %arg1[%c0_1, %c0_2] : memref<1x128xf32, #tpu.memory_space<vmem>>, vector<1x128xf32>
    %c0_3 = arith.constant 0 : index
    %c0_4 = arith.constant 0 : index
    %2 = vector.load %arg2[%c0_3, %c0_4] : memref<1x128xf32, #tpu.memory_space<vmem>>, vector<1x128xf32>
    %cst = arith.constant dense<0.000000e+00> : vector<208xf32>
    %3 = vector.multi_reduction <add>, %0, %cst [1] : vector<208x128xf32> to vector<208xf32>
    %4 = vector.shape_cast %3 : vector<208xf32> to vector<208x1xf32>
    %cst_5 = arith.constant 1.280000e+02 : f32
    %5 = vector.broadcast %cst_5 : f32 to vector<208x1xf32>
    %6 = arith.divf %4, %5 : vector<208x1xf32>
    %7 = vector.broadcast %6 : vector<208x1xf32> to vector<208x128xf32>
    %8 = arith.subf %0, %7 : vector<208x128xf32>
    %9 = arith.mulf %8, %8 : vector<208x128xf32>
    %cst_6 = arith.constant dense<0.000000e+00> : vector<208xf32>
    %10 = vector.multi_reduction <add>, %9, %cst_6 [1] : vector<208x128xf32> to vector<208xf32>
    %11 = vector.shape_cast %10 : vector<208xf32> to vector<208x1xf32>
    %cst_7 = arith.constant 1.280000e+02 : f32
    %12 = vector.broadcast %cst_7 : f32 to vector<208x1xf32>
    %13 = arith.divf %11, %12 : vector<208x1xf32>
    %14 = vector.broadcast %6 : vector<208x1xf32> to vector<208x128xf32>
    %15 = arith.subf %0, %14 : vector<208x128xf32>
    %cst_8 = arith.constant 9.99999997E-7 : f32
    %16 = vector.broadcast %cst_8 : f32 to vector<208x1xf32>
    %17 = arith.addf %13, %16 : vector<208x1xf32>
    %18 = math.rsqrt %17 : vector<208x1xf32>
    %19 = vector.broadcast %18 : vector<208x1xf32> to vector<208x128xf32>
    %20 = arith.mulf %15, %19 : vector<208x128xf32>
    %21 = vector.broadcast %1 : vector<1x128xf32> to vector<208x128xf32>
    %22 = arith.mulf %20, %21 : vector<208x128xf32>
    %23 = vector.broadcast %2 : vector<1x128xf32> to vector<208x128xf32>
    %24 = arith.addf %22, %23 : vector<208x128xf32>
    %c0_9 = arith.constant 0 : index
    %c0_10 = arith.constant 0 : index
    %25 = vector.load %arg3[%c0_9, %c0_10] : memref<208x128xf32, #tpu.memory_space<vmem>>, vector<208x128xf32>
    tpu.vector_store %arg3[%c0_9, %c0_10], %24 {strides = array<i32>} : memref<208x128xf32, #tpu.memory_space<vmem>>, vector<208x128xf32>,
    return
  }
}

module attributes {stable_mosaic.version = 11 : i64} {
  func.func @_cnn_head_kernel(%arg0: i32, %arg1: memref<1x104x128xf32, #tpu.memory_space<vmem>>, %arg2: memref<30x128x128xbf16, #tpu.memory_space<vmem>>, %arg3: memref<5x128xf32, #tpu.memory_space<vmem>>, %arg4: memref<640x128xbf16, #tpu.memory_space<vmem>>, %arg5: memref<1x128xf32, #tpu.memory_space<vmem>>, %arg6: memref<128x17xbf16, #tpu.memory_space<vmem>>, %arg7: memref<1x17xf32, #tpu.memory_space<vmem>>, %arg8: memref<1x1x17xf32, #tpu.memory_space<vmem>>) attributes {dimension_semantics = [#tpu.dimension_semantics<parallel>], iteration_bounds = array<i64: 2>, scalar_prefetch = 0 : i64, scratch_operands = 0 : i64, tpu.core_type = #tpu.core_type<tc>, window_params = [{transform_indices = @transform_0, window_bounds = array<i64: 1, 104, 128>}, {pipeline_mode = #tpu.pipeline_mode<synchronous>, transform_indices = @transform_1, window_bounds = array<i64: 30, 128, 128>}, {pipeline_mode = #tpu.pipeline_mode<synchronous>, transform_indices = @transform_2, window_bounds = array<i64: 5, 128>}, {pipeline_mode = #tpu.pipeline_mode<synchronous>, transform_indices = @transform_3, window_bounds = array<i64: 640, 128>}, {pipeline_mode = #tpu.pipeline_mode<synchronous>, transform_indices = @transform_4, window_bounds = array<i64: 1, 128>}, {pipeline_mode = #tpu.pipeline_mode<synchronous>, transform_indices = @transform_5, window_bounds = array<i64: 128, 17>}, {pipeline_mode = #tpu.pipeline_mode<synchronous>, transform_indices = @transform_6, window_bounds = array<i64: 1, 17>}, {transform_indices = @transform_7, window_bounds = array<i64: 1, 1, 17>}]} {
    %c0 = arith.constant 0 : index
    %c0_0 = arith.constant 0 : index
    %c0_1 = arith.constant 0 : index
    %0 = vector.load %arg1[%c0, %c0_0, %c0_1] : memref<1x104x128xf32, #tpu.memory_space<vmem>>, vector<1x104x128xf32>
    %1 = vector.shape_cast %0 : vector<1x104x128xf32> to vector<104x128xf32>
    %c0_2 = arith.constant 0 : index
    %c0_3 = arith.constant 0 : index
    %2 = vector.load %arg3[%c0_2, %c0_3] : memref<5x128xf32, #tpu.memory_space<vmem>>, vector<5x128xf32>
    %3 = tpu.iota {dimensions = array<i32: 0>} : vector<104x128xi32>
    %cst = arith.constant 0.000000e+00 : f32
    %4 = vector.broadcast %cst : f32 to vector<104x128xf32>
    %5 = arith.truncf %1 : vector<104x128xf32> to vector<104x128xbf16>
    %c0_4 = arith.constant 0 : index
    %c0_5 = arith.constant 0 : index
    %c0_6 = arith.constant 0 : index
    %6 = vector.load %arg2[%c0_4, %c0_5, %c0_6] : memref<30x128x128xbf16, #tpu.memory_space<vmem>>, vector<1x128x128xbf16>
    %7 = vector.shape_cast %6 : vector<1x128x128xbf16> to vector<128x128xbf16>
    %cst_7 = arith.constant dense<0.000000e+00> : vector<104x128xf32>
    %8 = tpu.matmul %5, %7, %cst_7 {dimension_numbers = #tpu.dot_dimension_numbers<[1], [0], [0], [1], [0, 0, 1, 1], [], []>} : vector<104x128xbf16>, vector<128x128xbf16>, vector<104x128xf32> -> vector<104x128xf32>
    %9 = arith.addf %4, %8 : vector<104x128xf32>
    %c103_i32 = arith.constant 103 : i32
    %10 = tpu.dynamic_rotate %1 by %c103_i32 dim 0 : vector<104x128xf32>, i32 -> vector<104x128xf32>
    %11 = arith.truncf %10 : vector<104x128xf32> to vector<104x128xbf16>
    %c1 = arith.constant 1 : index
    %c0_8 = arith.constant 0 : index
    %c0_9 = arith.constant 0 : index
    %12 = vector.load %arg2[%c1, %c0_8, %c0_9] : memref<30x128x128xbf16, #tpu.memory_space<vmem>>, vector<1x128x128xbf16>
    %13 = vector.shape_cast %12 : vector<1x128x128xbf16> to vector<128x128xbf16>
    %cst_10 = arith.constant dense<0.000000e+00> : vector<104x128xf32>
    %14 = tpu.matmul %11, %13, %cst_10 {dimension_numbers = #tpu.dot_dimension_numbers<[1], [0], [0], [1], [0, 0, 1, 1], [], []>} : vector<104x128xbf16>, vector<128x128xbf16>, vector<104x128xf32> -> vector<104x128xf32>
    %15 = arith.addf %9, %14 : vector<104x128xf32>
    %16 = vector.extract_strided_slice %2 {offsets = [0, 0], sizes = [1, 128], strides = [1, 1]} : vector<5x128xf32> to vector<1x128xf32>
    %17 = vector.broadcast %16 : vector<1x128xf32> to vector<104x128xf32>
    %18 = arith.addf %15, %17 : vector<104x128xf32>
    %cst_11 = arith.constant 0.000000e+00 : f32
    %19 = vector.broadcast %cst_11 : f32 to vector<104x128xf32>
    %20 = arith.maximumf %18, %19 : vector<104x128xf32>
    %c103_i32_12 = arith.constant 103 : i32
    %21 = vector.broadcast %c103_i32_12 : i32 to vector<104x128xi32>
    %22 = arith.cmpi slt, %3, %21 : vector<104x128xi32>
    %cst_13 = arith.constant -1.000000e+30 : f32
    %23 = vector.broadcast %cst_13 : f32 to vector<104x128xf32>
    %24 = arith.select %22, %20, %23 : vector<104x128xi1>, vector<104x128xf32>
    %cst_14 = arith.constant dense<0xFF800000> : vector<128xf32>
    %25 = vector.multi_reduction <maximumf>, %24, %cst_14 [0] : vector<104x128xf32> to vector<128xf32>
    %26 = vector.shape_cast %25 : vector<128xf32> to vector<1x128xf32>
    %cst_15 = arith.constant 0.000000e+00 : f32
    %27 = vector.broadcast %cst_15 : f32 to vector<104x128xf32>
    %28 = arith.truncf %1 : vector<104x128xf32> to vector<104x128xbf16>
    %c2 = arith.constant 2 : index
    %c0_16 = arith.constant 0 : index
    %c0_17 = arith.constant 0 : index
    %29 = vector.load %arg2[%c2, %c0_16, %c0_17] : memref<30x128x128xbf16, #tpu.memory_space<vmem>>, vector<1x128x128xbf16>
    %30 = vector.shape_cast %29 : vector<1x128x128xbf16> to vector<128x128xbf16>
    %cst_18 = arith.constant dense<0.000000e+00> : vector<104x128xf32>
    %31 = tpu.matmul %28, %30, %cst_18 {dimension_numbers = #tpu.dot_dimension_numbers<[1], [0], [0], [1], [0, 0, 1, 1], [], []>} : vector<104x128xbf16>, vector<128x128xbf16>, vector<104x128xf32> -> vector<104x128xf32>
    %32 = arith.addf %27, %31 : vector<104x128xf32>
    %c103_i32_19 = arith.constant 103 : i32
    %33 = tpu.dynamic_rotate %1 by %c103_i32_19 dim 0 : vector<104x128xf32>, i32 -> vector<104x128xf32>
    %34 = arith.truncf %33 : vector<104x128xf32> to vector<104x128xbf16>
    %c3 = arith.constant 3 : index
    %c0_20 = arith.constant 0 : index
    %c0_21 = arith.constant 0 : index
    %35 = vector.load %arg2[%c3, %c0_20, %c0_21] : memref<30x128x128xbf16, #tpu.memory_space<vmem>>, vector<1x128x128xbf16>
    %36 = vector.shape_cast %35 : vector<1x128x128xbf16> to vector<128x128xbf16>
    %cst_22 = arith.constant dense<0.000000e+00> : vector<104x128xf32>
    %37 = tpu.matmul %34, %36, %cst_22 {dimension_numbers = #tpu.dot_dimension_numbers<[1], [0], [0], [1], [0, 0, 1, 1], [], []>} : vector<104x128xbf16>, vector<128x128xbf16>, vector<104x128xf32> -> vector<104x128xf32>
    %38 = arith.addf %32, %37 : vector<104x128xf32>
    %c102_i32 = arith.constant 102 : i32
    %39 = tpu.dynamic_rotate %1 by %c102_i32 dim 0 : vector<104x128xf32>, i32 -> vector<104x128xf32>
    %40 = arith.truncf %39 : vector<104x128xf32> to vector<104x128xbf16>
    %c4 = arith.constant 4 : index
    %c0_23 = arith.constant 0 : index
    %c0_24 = arith.constant 0 : index
    %41 = vector.load %arg2[%c4, %c0_23, %c0_24] : memref<30x128x128xbf16, #tpu.memory_space<vmem>>, vector<1x128x128xbf16>
    %42 = vector.shape_cast %41 : vector<1x128x128xbf16> to vector<128x128xbf16>
    %cst_25 = arith.constant dense<0.000000e+00> : vector<104x128xf32>
    %43 = tpu.matmul %40, %42, %cst_25 {dimension_numbers = #tpu.dot_dimension_numbers<[1], [0], [0], [1], [0, 0, 1, 1], [], []>} : vector<104x128xbf16>, vector<128x128xbf16>, vector<104x128xf32> -> vector<104x128xf32>
    %44 = arith.addf %38, %43 : vector<104x128xf32>
    %c101_i32 = arith.constant 101 : i32
    %45 = tpu.dynamic_rotate %1 by %c101_i32 dim 0 : vector<104x128xf32>, i32 -> vector<104x128xf32>
    %46 = arith.truncf %45 : vector<104x128xf32> to vector<104x128xbf16>
    %c5 = arith.constant 5 : index
    %c0_26 = arith.constant 0 : index
    %c0_27 = arith.constant 0 : index
    %47 = vector.load %arg2[%c5, %c0_26, %c0_27] : memref<30x128x128xbf16, #tpu.memory_space<vmem>>, vector<1x128x128xbf16>
    %48 = vector.shape_cast %47 : vector<1x128x128xbf16> to vector<128x128xbf16>
    %cst_28 = arith.constant dense<0.000000e+00> : vector<104x128xf32>
    %49 = tpu.matmul %46, %48, %cst_28 {dimension_numbers = #tpu.dot_dimension_numbers<[1], [0], [0], [1], [0, 0, 1, 1], [], []>} : vector<104x128xbf16>, vector<128x128xbf16>, vector<104x128xf32> -> vector<104x128xf32>
    %50 = arith.addf %44, %49 : vector<104x128xf32>
    %51 = vector.extract_strided_slice %2 {offsets = [1, 0], sizes = [1, 128], strides = [1, 1]} : vector<5x128xf32> to vector<1x128xf32>
    %52 = vector.broadcast %51 : vector<1x128xf32> to vector<104x128xf32>
    %53 = arith.addf %50, %52 : vector<104x128xf32>
    %cst_29 = arith.constant 0.000000e+00 : f32
    %54 = vector.broadcast %cst_29 : f32 to vector<104x128xf32>
    %55 = arith.maximumf %53, %54 : vector<104x128xf32>
    %c101_i32_30 = arith.constant 101 : i32
    %56 = vector.broadcast %c101_i32_30 : i32 to vector<104x128xi32>
    %57 = arith.cmpi slt, %3, %56 : vector<104x128xi32>
    %cst_31 = arith.constant -1.000000e+30 : f32
    %58 = vector.broadcast %cst_31 : f32 to vector<104x128xf32>
    %59 = arith.select %57, %55, %58 : vector<104x128xi1>, vector<104x128xf32>
    %cst_32 = arith.constant dense<0xFF800000> : vector<128xf32>
    %60 = vector.multi_reduction <maximumf>, %59, %cst_32 [0] : vector<104x128xf32> to vector<128xf32>
    %61 = vector.shape_cast %60 : vector<128xf32> to vector<1x128xf32>
    %cst_33 = arith.constant 0.000000e+00 : f32
    %62 = vector.broadcast %cst_33 : f32 to vector<104x128xf32>
    %63 = arith.truncf %1 : vector<104x128xf32> to vector<104x128xbf16>
    %c6 = arith.constant 6 : index
    %c0_34 = arith.constant 0 : index
    %c0_35 = arith.constant 0 : index
    %64 = vector.load %arg2[%c6, %c0_34, %c0_35] : memref<30x128x128xbf16, #tpu.memory_space<vmem>>, vector<1x128x128xbf16>
    %65 = vector.shape_cast %64 : vector<1x128x128xbf16> to vector<128x128xbf16>
    %cst_36 = arith.constant dense<0.000000e+00> : vector<104x128xf32>
    %66 = tpu.matmul %63, %65, %cst_36 {dimension_numbers = #tpu.dot_dimension_numbers<[1], [0], [0], [1], [0, 0, 1, 1], [], []>} : vector<104x128xbf16>, vector<128x128xbf16>, vector<104x128xf32> -> vector<104x128xf32>
    %67 = arith.addf %62, %66 : vector<104x128xf32>
    %c103_i32_37 = arith.constant 103 : i32
    %68 = tpu.dynamic_rotate %1 by %c103_i32_37 dim 0 : vector<104x128xf32>, i32 -> vector<104x128xf32>
    %69 = arith.truncf %68 : vector<104x128xf32> to vector<104x128xbf16>
    %c7 = arith.constant 7 : index
    %c0_38 = arith.constant 0 : index
    %c0_39 = arith.constant 0 : index
    %70 = vector.load %arg2[%c7, %c0_38, %c0_39] : memref<30x128x128xbf16, #tpu.memory_space<vmem>>, vector<1x128x128xbf16>
    %71 = vector.shape_cast %70 : vector<1x128x128xbf16> to vector<128x128xbf16>
    %cst_40 = arith.constant dense<0.000000e+00> : vector<104x128xf32>
    %72 = tpu.matmul %69, %71, %cst_40 {dimension_numbers = #tpu.dot_dimension_numbers<[1], [0], [0], [1], [0, 0, 1, 1], [], []>} : vector<104x128xbf16>, vector<128x128xbf16>, vector<104x128xf32> -> vector<104x128xf32>
    %73 = arith.addf %67, %72 : vector<104x128xf32>
    %c102_i32_41 = arith.constant 102 : i32
    %74 = tpu.dynamic_rotate %1 by %c102_i32_41 dim 0 : vector<104x128xf32>, i32 -> vector<104x128xf32>
    %75 = arith.truncf %74 : vector<104x128xf32> to vector<104x128xbf16>
    %c8 = arith.constant 8 : index
    %c0_42 = arith.constant 0 : index
    %c0_43 = arith.constant 0 : index
    %76 = vector.load %arg2[%c8, %c0_42, %c0_43] : memref<30x128x128xbf16, #tpu.memory_space<vmem>>, vector<1x128x128xbf16>
    %77 = vector.shape_cast %76 : vector<1x128x128xbf16> to vector<128x128xbf16>
    %cst_44 = arith.constant dense<0.000000e+00> : vector<104x128xf32>
    %78 = tpu.matmul %75, %77, %cst_44 {dimension_numbers = #tpu.dot_dimension_numbers<[1], [0], [0], [1], [0, 0, 1, 1], [], []>} : vector<104x128xbf16>, vector<128x128xbf16>, vector<104x128xf32> -> vector<104x128xf32>
    %79 = arith.addf %73, %78 : vector<104x128xf32>
    %c101_i32_45 = arith.constant 101 : i32
    %80 = tpu.dynamic_rotate %1 by %c101_i32_45 dim 0 : vector<104x128xf32>, i32 -> vector<104x128xf32>
    %81 = arith.truncf %80 : vector<104x128xf32> to vector<104x128xbf16>
    %c9 = arith.constant 9 : index
    %c0_46 = arith.constant 0 : index
    %c0_47 = arith.constant 0 : index
    %82 = vector.load %arg2[%c9, %c0_46, %c0_47] : memref<30x128x128xbf16, #tpu.memory_space<vmem>>, vector<1x128x128xbf16>
    %83 = vector.shape_cast %82 : vector<1x128x128xbf16> to vector<128x128xbf16>
    %cst_48 = arith.constant dense<0.000000e+00> : vector<104x128xf32>
    %84 = tpu.matmul %81, %83, %cst_48 {dimension_numbers = #tpu.dot_dimension_numbers<[1], [0], [0], [1], [0, 0, 1, 1], [], []>} : vector<104x128xbf16>, vector<128x128xbf16>, vector<104x128xf32> -> vector<104x128xf32>
    %85 = arith.addf %79, %84 : vector<104x128xf32>
    %c100_i32 = arith.constant 100 : i32
    %86 = tpu.dynamic_rotate %1 by %c100_i32 dim 0 : vector<104x128xf32>, i32 -> vector<104x128xf32>
    %87 = arith.truncf %86 : vector<104x128xf32> to vector<104x128xbf16>
    %c10 = arith.constant 10 : index
    %c0_49 = arith.constant 0 : index
    %c0_50 = arith.constant 0 : index
    %88 = vector.load %arg2[%c10, %c0_49, %c0_50] : memref<30x128x128xbf16, #tpu.memory_space<vmem>>, vector<1x128x128xbf16>
    %89 = vector.shape_cast %88 : vector<1x128x128xbf16> to vector<128x128xbf16>
    %cst_51 = arith.constant dense<0.000000e+00> : vector<104x128xf32>
    %90 = tpu.matmul %87, %89, %cst_51 {dimension_numbers = #tpu.dot_dimension_numbers<[1], [0], [0], [1], [0, 0, 1, 1], [], []>} : vector<104x128xbf16>, vector<128x128xbf16>, vector<104x128xf32> -> vector<104x128xf32>
    %91 = arith.addf %85, %90 : vector<104x128xf32>
    %c99_i32 = arith.constant 99 : i32
    %92 = tpu.dynamic_rotate %1 by %c99_i32 dim 0 : vector<104x128xf32>, i32 -> vector<104x128xf32>
    %93 = arith.truncf %92 : vector<104x128xf32> to vector<104x128xbf16>
    %c11 = arith.constant 11 : index
    %c0_52 = arith.constant 0 : index
    %c0_53 = arith.constant 0 : index
    %94 = vector.load %arg2[%c11, %c0_52, %c0_53] : memref<30x128x128xbf16, #tpu.memory_space<vmem>>, vector<1x128x128xbf16>
    %95 = vector.shape_cast %94 : vector<1x128x128xbf16> to vector<128x128xbf16>
    %cst_54 = arith.constant dense<0.000000e+00> : vector<104x128xf32>
    %96 = tpu.matmul %93, %95, %cst_54 {dimension_numbers = #tpu.dot_dimension_numbers<[1], [0], [0], [1], [0, 0, 1, 1], [], []>} : vector<104x128xbf16>, vector<128x128xbf16>, vector<104x128xf32> -> vector<104x128xf32>
    %97 = arith.addf %91, %96 : vector<104x128xf32>
    %98 = vector.extract_strided_slice %2 {offsets = [2, 0], sizes = [1, 128], strides = [1, 1]} : vector<5x128xf32> to vector<1x128xf32>
    %99 = vector.broadcast %98 : vector<1x128xf32> to vector<104x128xf32>
    %100 = arith.addf %97, %99 : vector<104x128xf32>
    %cst_55 = arith.constant 0.000000e+00 : f32
    %101 = vector.broadcast %cst_55 : f32 to vector<104x128xf32>
    %102 = arith.maximumf %100, %101 : vector<104x128xf32>
    %c99_i32_56 = arith.constant 99 : i32
    %103 = vector.broadcast %c99_i32_56 : i32 to vector<104x128xi32>
    %104 = arith.cmpi slt, %3, %103 : vector<104x128xi32>
    %cst_57 = arith.constant -1.000000e+30 : f32
    %105 = vector.broadcast %cst_57 : f32 to vector<104x128xf32>
    %106 = arith.select %104, %102, %105 : vector<104x128xi1>, vector<104x128xf32>
    %cst_58 = arith.constant dense<0xFF800000> : vector<128xf32>
    %107 = vector.multi_reduction <maximumf>, %106, %cst_58 [0] : vector<104x128xf32> to vector<128xf32>
    %108 = vector.shape_cast %107 : vector<128xf32> to vector<1x128xf32>
    %cst_59 = arith.constant 0.000000e+00 : f32
    %109 = vector.broadcast %cst_59 : f32 to vector<104x128xf32>
    %110 = arith.truncf %1 : vector<104x128xf32> to vector<104x128xbf16>
    %c12 = arith.constant 12 : index
    %c0_60 = arith.constant 0 : index
    %c0_61 = arith.constant 0 : index
    %111 = vector.load %arg2[%c12, %c0_60, %c0_61] : memref<30x128x128xbf16, #tpu.memory_space<vmem>>, vector<1x128x128xbf16>
    %112 = vector.shape_cast %111 : vector<1x128x128xbf16> to vector<128x128xbf16>
    %cst_62 = arith.constant dense<0.000000e+00> : vector<104x128xf32>
    %113 = tpu.matmul %110, %112, %cst_62 {dimension_numbers = #tpu.dot_dimension_numbers<[1], [0], [0], [1], [0, 0, 1, 1], [], []>} : vector<104x128xbf16>, vector<128x128xbf16>, vector<104x128xf32> -> vector<104x128xf32>
    %114 = arith.addf %109, %113 : vector<104x128xf32>
    %c103_i32_63 = arith.constant 103 : i32
    %115 = tpu.dynamic_rotate %1 by %c103_i32_63 dim 0 : vector<104x128xf32>, i32 -> vector<104x128xf32>
    %116 = arith.truncf %115 : vector<104x128xf32> to vector<104x128xbf16>
    %c13 = arith.constant 13 : index
    %c0_64 = arith.constant 0 : index
    %c0_65 = arith.constant 0 : index
    %117 = vector.load %arg2[%c13, %c0_64, %c0_65] : memref<30x128x128xbf16, #tpu.memory_space<vmem>>, vector<1x128x128xbf16>
    %118 = vector.shape_cast %117 : vector<1x128x128xbf16> to vector<128x128xbf16>
    %cst_66 = arith.constant dense<0.000000e+00> : vector<104x128xf32>
    %119 = tpu.matmul %116, %118, %cst_66 {dimension_numbers = #tpu.dot_dimension_numbers<[1], [0], [0], [1], [0, 0, 1, 1], [], []>} : vector<104x128xbf16>, vector<128x128xbf16>, vector<104x128xf32> -> vector<104x128xf32>
    %120 = arith.addf %114, %119 : vector<104x128xf32>
    %c102_i32_67 = arith.constant 102 : i32
    %121 = tpu.dynamic_rotate %1 by %c102_i32_67 dim 0 : vector<104x128xf32>, i32 -> vector<104x128xf32>
    %122 = arith.truncf %121 : vector<104x128xf32> to vector<104x128xbf16>
    %c14 = arith.constant 14 : index
    %c0_68 = arith.constant 0 : index
    %c0_69 = arith.constant 0 : index
    %123 = vector.load %arg2[%c14, %c0_68, %c0_69] : memref<30x128x128xbf16, #tpu.memory_space<vmem>>, vector<1x128x128xbf16>
    %124 = vector.shape_cast %123 : vector<1x128x128xbf16> to vector<128x128xbf16>
    %cst_70 = arith.constant dense<0.000000e+00> : vector<104x128xf32>
    %125 = tpu.matmul %122, %124, %cst_70 {dimension_numbers = #tpu.dot_dimension_numbers<[1], [0], [0], [1], [0, 0, 1, 1], [], []>} : vector<104x128xbf16>, vector<128x128xbf16>, vector<104x128xf32> -> vector<104x128xf32>
    %126 = arith.addf %120, %125 : vector<104x128xf32>
    %c101_i32_71 = arith.constant 101 : i32
    %127 = tpu.dynamic_rotate %1 by %c101_i32_71 dim 0 : vector<104x128xf32>, i32 -> vector<104x128xf32>
    %128 = arith.truncf %127 : vector<104x128xf32> to vector<104x128xbf16>
    %c15 = arith.constant 15 : index
    %c0_72 = arith.constant 0 : index
    %c0_73 = arith.constant 0 : index
    %129 = vector.load %arg2[%c15, %c0_72, %c0_73] : memref<30x128x128xbf16, #tpu.memory_space<vmem>>, vector<1x128x128xbf16>
    %130 = vector.shape_cast %129 : vector<1x128x128xbf16> to vector<128x128xbf16>
    %cst_74 = arith.constant dense<0.000000e+00> : vector<104x128xf32>
    %131 = tpu.matmul %128, %130, %cst_74 {dimension_numbers = #tpu.dot_dimension_numbers<[1], [0], [0], [1], [0, 0, 1, 1], [], []>} : vector<104x128xbf16>, vector<128x128xbf16>, vector<104x128xf32> -> vector<104x128xf32>
    %132 = arith.addf %126, %131 : vector<104x128xf32>
    %c100_i32_75 = arith.constant 100 : i32
    %133 = tpu.dynamic_rotate %1 by %c100_i32_75 dim 0 : vector<104x128xf32>, i32 -> vector<104x128xf32>
    %134 = arith.truncf %133 : vector<104x128xf32> to vector<104x128xbf16>
    %c16 = arith.constant 16 : index
    %c0_76 = arith.constant 0 : index
    %c0_77 = arith.constant 0 : index
    %135 = vector.load %arg2[%c16, %c0_76, %c0_77] : memref<30x128x128xbf16, #tpu.memory_space<vmem>>, vector<1x128x128xbf16>
    %136 = vector.shape_cast %135 : vector<1x128x128xbf16> to vector<128x128xbf16>
    %cst_78 = arith.constant dense<0.000000e+00> : vector<104x128xf32>
    %137 = tpu.matmul %134, %136, %cst_78 {dimension_numbers = #tpu.dot_dimension_numbers<[1], [0], [0], [1], [0, 0, 1, 1], [], []>} : vector<104x128xbf16>, vector<128x128xbf16>, vector<104x128xf32> -> vector<104x128xf32>
    %138 = arith.addf %132, %137 : vector<104x128xf32>
    %c99_i32_79 = arith.constant 99 : i32
    %139 = tpu.dynamic_rotate %1 by %c99_i32_79 dim 0 : vector<104x128xf32>, i32 -> vector<104x128xf32>
    %140 = arith.truncf %139 : vector<104x128xf32> to vector<104x128xbf16>
    %c17 = arith.constant 17 : index
    %c0_80 = arith.constant 0 : index
    %c0_81 = arith.constant 0 : index
    %141 = vector.load %arg2[%c17, %c0_80, %c0_81] : memref<30x128x128xbf16, #tpu.memory_space<vmem>>, vector<1x128x128xbf16>
    %142 = vector.shape_cast %141 : vector<1x128x128xbf16> to vector<128x128xbf16>
    %cst_82 = arith.constant dense<0.000000e+00> : vector<104x128xf32>
    %143 = tpu.matmul %140, %142, %cst_82 {dimension_numbers = #tpu.dot_dimension_numbers<[1], [0], [0], [1], [0, 0, 1, 1], [], []>} : vector<104x128xbf16>, vector<128x128xbf16>, vector<104x128xf32> -> vector<104x128xf32>
    %144 = arith.addf %138, %143 : vector<104x128xf32>
    %c98_i32 = arith.constant 98 : i32
    %145 = tpu.dynamic_rotate %1 by %c98_i32 dim 0 : vector<104x128xf32>, i32 -> vector<104x128xf32>
    %146 = arith.truncf %145 : vector<104x128xf32> to vector<104x128xbf16>
    %c18 = arith.constant 18 : index
    %c0_83 = arith.constant 0 : index
    %c0_84 = arith.constant 0 : index
    %147 = vector.load %arg2[%c18, %c0_83, %c0_84] : memref<30x128x128xbf16, #tpu.memory_space<vmem>>, vector<1x128x128xbf16>
    %148 = vector.shape_cast %147 : vector<1x128x128xbf16> to vector<128x128xbf16>
    %cst_85 = arith.constant dense<0.000000e+00> : vector<104x128xf32>
    %149 = tpu.matmul %146, %148, %cst_85 {dimension_numbers = #tpu.dot_dimension_numbers<[1], [0], [0], [1], [0, 0, 1, 1], [], []>} : vector<104x128xbf16>, vector<128x128xbf16>, vector<104x128xf32> -> vector<104x128xf32>
    %150 = arith.addf %144, %149 : vector<104x128xf32>
    %c97_i32 = arith.constant 97 : i32
    %151 = tpu.dynamic_rotate %1 by %c97_i32 dim 0 : vector<104x128xf32>, i32 -> vector<104x128xf32>
    %152 = arith.truncf %151 : vector<104x128xf32> to vector<104x128xbf16>
    %c19 = arith.constant 19 : index
    %c0_86 = arith.constant 0 : index
    %c0_87 = arith.constant 0 : index
    %153 = vector.load %arg2[%c19, %c0_86, %c0_87] : memref<30x128x128xbf16, #tpu.memory_space<vmem>>, vector<1x128x128xbf16>
    %154 = vector.shape_cast %153 : vector<1x128x128xbf16> to vector<128x128xbf16>
    %cst_88 = arith.constant dense<0.000000e+00> : vector<104x128xf32>
    %155 = tpu.matmul %152, %154, %cst_88 {dimension_numbers = #tpu.dot_dimension_numbers<[1], [0], [0], [1], [0, 0, 1, 1], [], []>} : vector<104x128xbf16>, vector<128x128xbf16>, vector<104x128xf32> -> vector<104x128xf32>
    %156 = arith.addf %150, %155 : vector<104x128xf32>
    %157 = vector.extract_strided_slice %2 {offsets = [3, 0], sizes = [1, 128], strides = [1, 1]} : vector<5x128xf32> to vector<1x128xf32>
    %158 = vector.broadcast %157 : vector<1x128xf32> to vector<104x128xf32>
    %159 = arith.addf %156, %158 : vector<104x128xf32>
    %cst_89 = arith.constant 0.000000e+00 : f32
    %160 = vector.broadcast %cst_89 : f32 to vector<104x128xf32>
    %161 = arith.maximumf %159, %160 : vector<104x128xf32>
    %c97_i32_90 = arith.constant 97 : i32
    %162 = vector.broadcast %c97_i32_90 : i32 to vector<104x128xi32>
    %163 = arith.cmpi slt, %3, %162 : vector<104x128xi32>
    %cst_91 = arith.constant -1.000000e+30 : f32
    %164 = vector.broadcast %cst_91 : f32 to vector<104x128xf32>
    %165 = arith.select %163, %161, %164 : vector<104x128xi1>, vector<104x128xf32>
    %cst_92 = arith.constant dense<0xFF800000> : vector<128xf32>
    %166 = vector.multi_reduction <maximumf>, %165, %cst_92 [0] : vector<104x128xf32> to vector<128xf32>
    %167 = vector.shape_cast %166 : vector<128xf32> to vector<1x128xf32>
    %cst_93 = arith.constant 0.000000e+00 : f32
    %168 = vector.broadcast %cst_93 : f32 to vector<104x128xf32>
    %169 = arith.truncf %1 : vector<104x128xf32> to vector<104x128xbf16>
    %c20 = arith.constant 20 : index
    %c0_94 = arith.constant 0 : index
    %c0_95 = arith.constant 0 : index
    %170 = vector.load %arg2[%c20, %c0_94, %c0_95] : memref<30x128x128xbf16, #tpu.memory_space<vmem>>, vector<1x128x128xbf16>
    %171 = vector.shape_cast %170 : vector<1x128x128xbf16> to vector<128x128xbf16>
    %cst_96 = arith.constant dense<0.000000e+00> : vector<104x128xf32>
    %172 = tpu.matmul %169, %171, %cst_96 {dimension_numbers = #tpu.dot_dimension_numbers<[1], [0], [0], [1], [0, 0, 1, 1], [], []>} : vector<104x128xbf16>, vector<128x128xbf16>, vector<104x128xf32> -> vector<104x128xf32>
    %173 = arith.addf %168, %172 : vector<104x128xf32>
    %c103_i32_97 = arith.constant 103 : i32
    %174 = tpu.dynamic_rotate %1 by %c103_i32_97 dim 0 : vector<104x128xf32>, i32 -> vector<104x128xf32>
    %175 = arith.truncf %174 : vector<104x128xf32> to vector<104x128xbf16>
    %c21 = arith.constant 21 : index
    %c0_98 = arith.constant 0 : index
    %c0_99 = arith.constant 0 : index
    %176 = vector.load %arg2[%c21, %c0_98, %c0_99] : memref<30x128x128xbf16, #tpu.memory_space<vmem>>, vector<1x128x128xbf16>
    %177 = vector.shape_cast %176 : vector<1x128x128xbf16> to vector<128x128xbf16>
    %cst_100 = arith.constant dense<0.000000e+00> : vector<104x128xf32>
    %178 = tpu.matmul %175, %177, %cst_100 {dimension_numbers = #tpu.dot_dimension_numbers<[1], [0], [0], [1], [0, 0, 1, 1], [], []>} : vector<104x128xbf16>, vector<128x128xbf16>, vector<104x128xf32> -> vector<104x128xf32>
    %179 = arith.addf %173, %178 : vector<104x128xf32>
    %c102_i32_101 = arith.constant 102 : i32
    %180 = tpu.dynamic_rotate %1 by %c102_i32_101 dim 0 : vector<104x128xf32>, i32 -> vector<104x128xf32>
    %181 = arith.truncf %180 : vector<104x128xf32> to vector<104x128xbf16>
    %c22 = arith.constant 22 : index
    %c0_102 = arith.constant 0 : index
    %c0_103 = arith.constant 0 : index
    %182 = vector.load %arg2[%c22, %c0_102, %c0_103] : memref<30x128x128xbf16, #tpu.memory_space<vmem>>, vector<1x128x128xbf16>
    %183 = vector.shape_cast %182 : vector<1x128x128xbf16> to vector<128x128xbf16>
    %cst_104 = arith.constant dense<0.000000e+00> : vector<104x128xf32>
    %184 = tpu.matmul %181, %183, %cst_104 {dimension_numbers = #tpu.dot_dimension_numbers<[1], [0], [0], [1], [0, 0, 1, 1], [], []>} : vector<104x128xbf16>, vector<128x128xbf16>, vector<104x128xf32> -> vector<104x128xf32>
    %185 = arith.addf %179, %184 : vector<104x128xf32>
    %c101_i32_105 = arith.constant 101 : i32
    %186 = tpu.dynamic_rotate %1 by %c101_i32_105 dim 0 : vector<104x128xf32>, i32 -> vector<104x128xf32>
    %187 = arith.truncf %186 : vector<104x128xf32> to vector<104x128xbf16>
    %c23 = arith.constant 23 : index
    %c0_106 = arith.constant 0 : index
    %c0_107 = arith.constant 0 : index
    %188 = vector.load %arg2[%c23, %c0_106, %c0_107] : memref<30x128x128xbf16, #tpu.memory_space<vmem>>, vector<1x128x128xbf16>
    %189 = vector.shape_cast %188 : vector<1x128x128xbf16> to vector<128x128xbf16>
    %cst_108 = arith.constant dense<0.000000e+00> : vector<104x128xf32>
    %190 = tpu.matmul %187, %189, %cst_108 {dimension_numbers = #tpu.dot_dimension_numbers<[1], [0], [0], [1], [0, 0, 1, 1], [], []>} : vector<104x128xbf16>, vector<128x128xbf16>, vector<104x128xf32> -> vector<104x128xf32>
    %191 = arith.addf %185, %190 : vector<104x128xf32>
    %c100_i32_109 = arith.constant 100 : i32
    %192 = tpu.dynamic_rotate %1 by %c100_i32_109 dim 0 : vector<104x128xf32>, i32 -> vector<104x128xf32>
    %193 = arith.truncf %192 : vector<104x128xf32> to vector<104x128xbf16>
    %c24 = arith.constant 24 : index
    %c0_110 = arith.constant 0 : index
    %c0_111 = arith.constant 0 : index
    %194 = vector.load %arg2[%c24, %c0_110, %c0_111] : memref<30x128x128xbf16, #tpu.memory_space<vmem>>, vector<1x128x128xbf16>
    %195 = vector.shape_cast %194 : vector<1x128x128xbf16> to vector<128x128xbf16>
    %cst_112 = arith.constant dense<0.000000e+00> : vector<104x128xf32>
    %196 = tpu.matmul %193, %195, %cst_112 {dimension_numbers = #tpu.dot_dimension_numbers<[1], [0], [0], [1], [0, 0, 1, 1], [], []>} : vector<104x128xbf16>, vector<128x128xbf16>, vector<104x128xf32> -> vector<104x128xf32>
    %197 = arith.addf %191, %196 : vector<104x128xf32>
    %c99_i32_113 = arith.constant 99 : i32
    %198 = tpu.dynamic_rotate %1 by %c99_i32_113 dim 0 : vector<104x128xf32>, i32 -> vector<104x128xf32>
    %199 = arith.truncf %198 : vector<104x128xf32> to vector<104x128xbf16>
    %c25 = arith.constant 25 : index
    %c0_114 = arith.constant 0 : index
    %c0_115 = arith.constant 0 : index
    %200 = vector.load %arg2[%c25, %c0_114, %c0_115] : memref<30x128x128xbf16, #tpu.memory_space<vmem>>, vector<1x128x128xbf16>
    %201 = vector.shape_cast %200 : vector<1x128x128xbf16> to vector<128x128xbf16>
    %cst_116 = arith.constant dense<0.000000e+00> : vector<104x128xf32>
    %202 = tpu.matmul %199, %201, %cst_116 {dimension_numbers = #tpu.dot_dimension_numbers<[1], [0], [0], [1], [0, 0, 1, 1], [], []>} : vector<104x128xbf16>, vector<128x128xbf16>, vector<104x128xf32> -> vector<104x128xf32>
    %203 = arith.addf %197, %202 : vector<104x128xf32>
    %c98_i32_117 = arith.constant 98 : i32
    %204 = tpu.dynamic_rotate %1 by %c98_i32_117 dim 0 : vector<104x128xf32>, i32 -> vector<104x128xf32>
    %205 = arith.truncf %204 : vector<104x128xf32> to vector<104x128xbf16>
    %c26 = arith.constant 26 : index
    %c0_118 = arith.constant 0 : index
    %c0_119 = arith.constant 0 : index
    %206 = vector.load %arg2[%c26, %c0_118, %c0_119] : memref<30x128x128xbf16, #tpu.memory_space<vmem>>, vector<1x128x128xbf16>
    %207 = vector.shape_cast %206 : vector<1x128x128xbf16> to vector<128x128xbf16>
    %cst_120 = arith.constant dense<0.000000e+00> : vector<104x128xf32>
    %208 = tpu.matmul %205, %207, %cst_120 {dimension_numbers = #tpu.dot_dimension_numbers<[1], [0], [0], [1], [0, 0, 1, 1], [], []>} : vector<104x128xbf16>, vector<128x128xbf16>, vector<104x128xf32> -> vector<104x128xf32>
    %209 = arith.addf %203, %208 : vector<104x128xf32>
    %c97_i32_121 = arith.constant 97 : i32
    %210 = tpu.dynamic_rotate %1 by %c97_i32_121 dim 0 : vector<104x128xf32>, i32 -> vector<104x128xf32>
    %211 = arith.truncf %210 : vector<104x128xf32> to vector<104x128xbf16>
    %c27 = arith.constant 27 : index
    %c0_122 = arith.constant 0 : index
    %c0_123 = arith.constant 0 : index
    %212 = vector.load %arg2[%c27, %c0_122, %c0_123] : memref<30x128x128xbf16, #tpu.memory_space<vmem>>, vector<1x128x128xbf16>
    %213 = vector.shape_cast %212 : vector<1x128x128xbf16> to vector<128x128xbf16>
    %cst_124 = arith.constant dense<0.000000e+00> : vector<104x128xf32>
    %214 = tpu.matmul %211, %213, %cst_124 {dimension_numbers = #tpu.dot_dimension_numbers<[1], [0], [0], [1], [0, 0, 1, 1], [], []>} : vector<104x128xbf16>, vector<128x128xbf16>, vector<104x128xf32> -> vector<104x128xf32>
    %215 = arith.addf %209, %214 : vector<104x128xf32>
    %c96_i32 = arith.constant 96 : i32
    %216 = tpu.dynamic_rotate %1 by %c96_i32 dim 0 : vector<104x128xf32>, i32 -> vector<104x128xf32>
    %217 = arith.truncf %216 : vector<104x128xf32> to vector<104x128xbf16>
    %c28 = arith.constant 28 : index
    %c0_125 = arith.constant 0 : index
    %c0_126 = arith.constant 0 : index
    %218 = vector.load %arg2[%c28, %c0_125, %c0_126] : memref<30x128x128xbf16, #tpu.memory_space<vmem>>, vector<1x128x128xbf16>
    %219 = vector.shape_cast %218 : vector<1x128x128xbf16> to vector<128x128xbf16>
    %cst_127 = arith.constant dense<0.000000e+00> : vector<104x128xf32>
    %220 = tpu.matmul %217, %219, %cst_127 {dimension_numbers = #tpu.dot_dimension_numbers<[1], [0], [0], [1], [0, 0, 1, 1], [], []>} : vector<104x128xbf16>, vector<128x128xbf16>, vector<104x128xf32> -> vector<104x128xf32>
    %221 = arith.addf %215, %220 : vector<104x128xf32>
    %c95_i32 = arith.constant 95 : i32
    %222 = tpu.dynamic_rotate %1 by %c95_i32 dim 0 : vector<104x128xf32>, i32 -> vector<104x128xf32>
    %223 = arith.truncf %222 : vector<104x128xf32> to vector<104x128xbf16>
    %c29 = arith.constant 29 : index
    %c0_128 = arith.constant 0 : index
    %c0_129 = arith.constant 0 : index
    %224 = vector.load %arg2[%c29, %c0_128, %c0_129] : memref<30x128x128xbf16, #tpu.memory_space<vmem>>, vector<1x128x128xbf16>
    %225 = vector.shape_cast %224 : vector<1x128x128xbf16> to vector<128x128xbf16>
    %cst_130 = arith.constant dense<0.000000e+00> : vector<104x128xf32>
    %226 = tpu.matmul %223, %225, %cst_130 {dimension_numbers = #tpu.dot_dimension_numbers<[1], [0], [0], [1], [0, 0, 1, 1], [], []>} : vector<104x128xbf16>, vector<128x128xbf16>, vector<104x128xf32> -> vector<104x128xf32>
    %227 = arith.addf %221, %226 : vector<104x128xf32>
    %228 = vector.extract_strided_slice %2 {offsets = [4, 0], sizes = [1, 128], strides = [1, 1]} : vector<5x128xf32> to vector<1x128xf32>
    %229 = vector.broadcast %228 : vector<1x128xf32> to vector<104x128xf32>
    %230 = arith.addf %227, %229 : vector<104x128xf32>
    %cst_131 = arith.constant 0.000000e+00 : f32
    %231 = vector.broadcast %cst_131 : f32 to vector<104x128xf32>
    %232 = arith.maximumf %230, %231 : vector<104x128xf32>
    %c95_i32_132 = arith.constant 95 : i32
    %233 = vector.broadcast %c95_i32_132 : i32 to vector<104x128xi32>
    %234 = arith.cmpi slt, %3, %233 : vector<104x128xi32>
    %cst_133 = arith.constant -1.000000e+30 : f32
    %235 = vector.broadcast %cst_133 : f32 to vector<104x128xf32>
    %236 = arith.select %234, %232, %235 : vector<104x128xi1>, vector<104x128xf32>
    %cst_134 = arith.constant dense<0xFF800000> : vector<128xf32>
    %237 = vector.multi_reduction <maximumf>, %236, %cst_134 [0] : vector<104x128xf32> to vector<128xf32>
    %238 = vector.shape_cast %237 : vector<128xf32> to vector<1x128xf32>
    %239 = tpu.concatenate %26, %61, %108, %167, %238 in 1 : vector<1x128xf32>, vector<1x128xf32>, vector<1x128xf32>, vector<1x128xf32>, vector<1x128xf32> -> vector<1x640xf32>
    %240 = arith.truncf %239 : vector<1x640xf32> to vector<1x640xbf16>
    %c0_135 = arith.constant 0 : index
    %c0_136 = arith.constant 0 : index
    %241 = vector.load %arg4[%c0_135, %c0_136] : memref<640x128xbf16, #tpu.memory_space<vmem>>, vector<640x128xbf16>
    %cst_137 = arith.constant dense<0.000000e+00> : vector<1x128xf32>
    %242 = tpu.matmul %240, %241, %cst_137 {dimension_numbers = #tpu.dot_dimension_numbers<[1], [0], [0], [1], [0, 0, 1, 1], [], []>} : vector<1x640xbf16>, vector<640x128xbf16>, vector<1x128xf32> -> vector<1x128xf32>
    %c0_138 = arith.constant 0 : index
    %c0_139 = arith.constant 0 : index
    %243 = vector.load %arg5[%c0_138, %c0_139] : memref<1x128xf32, #tpu.memory_space<vmem>>, vector<1x128xf32>
    %244 = arith.addf %242, %243 : vector<1x128xf32>
    %245 = arith.truncf %244 : vector<1x128xf32> to vector<1x128xbf16>
    %c0_140 = arith.constant 0 : index
    %c0_141 = arith.constant 0 : index
    %246 = vector.load %arg6[%c0_140, %c0_141] : memref<128x17xbf16, #tpu.memory_space<vmem>>, vector<128x17xbf16>
    %cst_142 = arith.constant dense<0.000000e+00> : vector<1x17xf32>
    %247 = tpu.matmul %245, %246, %cst_142 {dimension_numbers = #tpu.dot_dimension_numbers<[1], [0], [0], [1], [0, 0, 1, 1], [], []>} : vector<1x128xbf16>, vector<128x17xbf16>, vector<1x17xf32> -> vector<1x17xf32>
    %c0_143 = arith.constant 0 : index
    %c0_144 = arith.constant 0 : index
    %248 = vector.load %arg7[%c0_143, %c0_144] : memref<1x17xf32, #tpu.memory_space<vmem>>, vector<1x17xf32>
    %249 = arith.addf %247, %248 : vector<1x17xf32>
    %c0_145 = arith.constant 0 : index
    %c0_146 = arith.constant 0 : index
    %c0_147 = arith.constant 0 : index
    %250 = vector.load %arg8[%c0_145, %c0_146, %c0_147] : memref<1x1x17xf32, #tpu.memory_space<vmem>>, vector<1x1x17xf32>
    %251 = vector.shape_cast %250 : vector<1x1x17xf32> to vector<1x17xf32>
    %252 = vector.shape_cast %249 : vector<1x17xf32> to vector<1x1x17xf32>
    tpu.vector_store %arg8[%c0_145, %c0_146, %c0_147], %252 {strides = array<i32>} : memref<1x1x17xf32, #tpu.memory_space<vmem>>, vector<1x1x17xf32>,
    return
  }
  func.func @transform_0(%arg0: i32) -> (i32, i32, i32) {
    %c0_i32 = arith.constant 0 : i32
    %c0_i32_0 = arith.constant 0 : i32
    %c0_i32_1 = arith.constant 0 : i32
    return %arg0, %c0_i32, %c0_i32_0 : i32, i32, i32
  }
  func.func @transform_1(%arg0: i32) -> (i32, i32, i32) {
    %c0_i32 = arith.constant 0 : i32
    %c0_i32_0 = arith.constant 0 : i32
    %c0_i32_1 = arith.constant 0 : i32
    %c0_i32_2 = arith.constant 0 : i32
    return %c0_i32, %c0_i32_0, %c0_i32_1 : i32, i32, i32
  }
  func.func @transform_2(%arg0: i32) -> (i32, i32) {
    %c0_i32 = arith.constant 0 : i32
    %c0_i32_0 = arith.constant 0 : i32
    %c0_i32_1 = arith.constant 0 : i32
    return %c0_i32, %c0_i32_0 : i32, i32
  }
  func.func @transform_3(%arg0: i32) -> (i32, i32) {
    %c0_i32 = arith.constant 0 : i32
    %c0_i32_0 = arith.constant 0 : i32
    %c0_i32_1 = arith.constant 0 : i32
    return %c0_i32, %c0_i32_0 : i32, i32
  }
  func.func @transform_4(%arg0: i32) -> (i32, i32) {
    %c0_i32 = arith.constant 0 : i32
    %c0_i32_0 = arith.constant 0 : i32
    %c0_i32_1 = arith.constant 0 : i32
    return %c0_i32, %c0_i32_0 : i32, i32
  }
  func.func @transform_5(%arg0: i32) -> (i32, i32) {
    %c0_i32 = arith.constant 0 : i32
    %c0_i32_0 = arith.constant 0 : i32
    %c0_i32_1 = arith.constant 0 : i32
    return %c0_i32, %c0_i32_0 : i32, i32
  }
  func.func @transform_6(%arg0: i32) -> (i32, i32) {
    %c0_i32 = arith.constant 0 : i32
    %c0_i32_0 = arith.constant 0 : i32
    %c0_i32_1 = arith.constant 0 : i32
    return %c0_i32, %c0_i32_0 : i32, i32
  }
  func.func @transform_7(%arg0: i32) -> (i32, i32, i32) {
    %c0_i32 = arith.constant 0 : i32
    %c0_i32_0 = arith.constant 0 : i32
    %c0_i32_1 = arith.constant 0 : i32
    return %arg0, %c0_i32, %c0_i32_0 : i32, i32, i32
  }
}

</mosaic_0001>

<bundles_post_ra>
// kernel: attn_cnn_forward.4
= control target key start
LH: loop header
LB: loop body
LE: loop exit
PB: predicated region body
PF: predicated region fallthrough
CT: control target
= control target key end

     0   :  { %s933_s0 = inlined_call_operand.vmem [shape: f32[208,128], index: 0, kind: input, shape index: {}]   ;;  %s934_s1 = inlined_call_operand.vmem [shape: f32[1,128], index: 1, kind: input, shape index: {}]   ;;  %s935_s2 = inlined_call_operand.vmem [shape: f32[1,128], index: 2, kind: input, shape index: {}]   ;;  %s936_s3 = inlined_call_operand.vmem [shape: f32[208,128], index: 3, kind: output, shape index: {}]  }
   0x1   :  { %v14_v0 = vld [vmem:[%s933_s0] sm:$0xff]  ;;  %v16_v1 = vld [vmem:[%s933_s0 + $0x10] sm:$0xff]  ;;  %v15_v2 = vld [vmem:[%s933_s0 + $0x8] sm:$0xff] }
   0x2   :  { %42 = vadd.xlane.f32.xlu0 %v14_v0  ;;  %46 = vadd.xlane.f32.xlu1 %v16_v1  ;;  %v17_v3 = vld [vmem:[%s933_s0 + $0x18] sm:$0xff]  ;;  %v512_v4 = vld [vmem:[%s933_s0 + $0x20] sm:$0xff]  ;;  %v517_v5 = vld [vmem:[%s933_s0 + $0x28] sm:$0xff] }
   0x3   :  { %v524_v6 = vld [vmem:[%s933_s0 + $0x30] sm:$0xff]  ;;  %v529_v7 = vld [vmem:[%s933_s0 + $0x38] sm:$0xff]  ;;  %v536_v8 = vld [vmem:[%s933_s0 + $0x40] sm:$0xff] }
   0x4   :  { %v541_v9 = vld [vmem:[%s933_s0 + $0x48] sm:$0xff]  ;;  %v548_v10 = vld [vmem:[%s933_s0 + $0x50] sm:$0xff]  ;;  %v553_v11 = vld [vmem:[%s933_s0 + $0x58] sm:$0xff] }
   0x5   :  { %v560_v12 = vld [vmem:[%s933_s0 + $0x60] sm:$0xff]  ;;  %v565_v13 = vld [vmem:[%s933_s0 + $0x68] sm:$0xff]  ;;  %v572_v14 = vld [vmem:[%s933_s0 + $0x70] sm:$0xff] }
   0x6   :  { %44 = vadd.xlane.f32.xlu0 %v15_v2  ;;  %48 = vadd.xlane.f32.xlu1 %v17_v3  ;;  %v577_v15 = vld [vmem:[%s933_s0 + $0x78] sm:$0xff]  ;;  %v584_v16 = vld [vmem:[%s933_s0 + $0x80] sm:$0xff]  ;;  %v589_v17 = vld [vmem:[%s933_s0 + $0x88] sm:$0xff] }
   0x7   :  { %v596_v18 = vld [vmem:[%s933_s0 + $0x90] sm:$0xff]  ;;  %v601_v19 = vld [vmem:[%s933_s0 + $0x98] sm:$0xff]  ;;  %v608_v20 = vld [vmem:[%s933_s0 + $0xa0] sm:$0xff] }
   0x8   :  { %v613_v21 = vld [vmem:[%s933_s0 + $0xa8] sm:$0xff]  ;;  %v620_v22 = vld [vmem:[%s933_s0 + $0xb0] sm:$0xff]  ;;  %v625_v23 = vld [vmem:[%s933_s0 + $0xb8] sm:$0xff] }
   0x9   :  { %v632_v24 = vld [vmem:[%s933_s0 + $0xc0] sm:$0xff]  ;;  %v637_v25 = vld [vmem:[%s933_s0 + $0xc8] sm:$0xff] }
   0xa   :  { %50 = vadd.xlane.f32.xlu0 %v512_v4  ;;  %52 = vadd.xlane.f32.xlu1 %v517_v5 }
   0xe   :  { %54 = vadd.xlane.f32.xlu0 %v524_v6  ;;  %56 = vadd.xlane.f32.xlu1 %v529_v7 }
  0x12   :  { %58 = vadd.xlane.f32.xlu0 %v536_v8  ;;  %60 = vadd.xlane.f32.xlu1 %v541_v9 }
  0x16   :  { %62 = vadd.xlane.f32.xlu0 %v548_v10  ;;  %64 = vadd.xlane.f32.xlu1 %v553_v11 }
  0x1a   :  { %66 = vadd.xlane.f32.xlu0 %v560_v12  ;;  %68 = vadd.xlane.f32.xlu1 %v565_v13 }
  0x1e   :  { %70 = vadd.xlane.f32.xlu0 %v572_v14  ;;  %72 = vadd.xlane.f32.xlu1 %v577_v15 }
  0x22   :  { %74 = vadd.xlane.f32.xlu0 %v584_v16  ;;  %76 = vadd.xlane.f32.xlu1 %v589_v17 }
  0x26   :  { %78 = vadd.xlane.f32.xlu0 %v596_v18  ;;  %80 = vadd.xlane.f32.xlu1 %v601_v19 }
  0x2a   :  { %82 = vadd.xlane.f32.xlu0 %v608_v20  ;;  %84 = vadd.xlane.f32.xlu1 %v613_v21 }
  0x2e   :  { %86 = vadd.xlane.f32.xlu0 %v620_v22  ;;  %88 = vadd.xlane.f32.xlu1 %v625_v23 }
  0x32   :  { %90 = vadd.xlane.f32.xlu0 %v632_v24  ;;  %92 = vadd.xlane.f32.xlu1 %v637_v25 }
  0x8f   :  { %v43_v26 = vpop.xlane.xlu0 %42  ;;  %v47_v27 = vpop.xlane.xlu1 %46 }
  0x90   :  { %v95_v28 = vmul.f32 0.0078125, %v43_v26  ;;  %v97_v29 = vmul.f32 0.0078125, %v47_v27 }
  0x92   :  { %v641_v30 = vsub.f32 %v14_v0, %v95_v28  ;;  %v643_v31 = vsub.f32 %v16_v1, %v97_v29 }
  0x93   :  { %v45_v32 = vpop.xlane.xlu0 %44  ;;  %v49_v33 = vpop.xlane.xlu1 %48 }
  0x94   :  { %v96_v34 = vmul.f32 0.0078125, %v45_v32  ;;  %v147_v35 = vmul.f32 %v641_v30, %v641_v30  ;;  %v98_v36 = vmul.f32 0.0078125, %v49_v33  ;;  %v149_v39 = vmul.f32 %v643_v31, %v643_v31 }
  0x96   :  { %v647_v37 = vsub.f32 %v15_v2, %v96_v34  ;;  %173 = vadd.xlane.f32.xlu0 %v147_v35  ;;  %v649_v38 = vsub.f32 %v17_v3, %v98_v36 }
  0x97   :  { %v51_v40 = vpop.xlane.xlu0 %50  ;;  %v53_v41 = vpop.xlane.xlu1 %52 }
  0x98   :  { %v99_v42 = vmul.f32 0.0078125, %v51_v40  ;;  %v148_v43 = vmul.f32 %v647_v37, %v647_v37  ;;  %v100_v44 = vmul.f32 0.0078125, %v53_v41  ;;  %v150_v47 = vmul.f32 %v649_v38, %v649_v38 }
  0x9a   :  { %v656_v45 = vsub.f32 %v512_v4, %v99_v42  ;;  %177 = vadd.xlane.f32.xlu0 %v149_v39  ;;  %175 = vadd.xlane.f32.xlu1 %v148_v43  ;;  %v659_v46 = vsub.f32 %v517_v5, %v100_v44 }
  0x9b   :  { %v55_v48 = vpop.xlane.xlu0 %54  ;;  %v57_v49 = vpop.xlane.xlu1 %56 }
  0x9c   :  { %v101_v50 = vmul.f32 0.0078125, %v55_v48  ;;  %v151_v51 = vmul.f32 %v656_v45, %v656_v45  ;;  %v102_v52 = vmul.f32 0.0078125, %v57_v49  ;;  %v152_v55 = vmul.f32 %v659_v46, %v659_v46 }
  0x9e   :  { %v666_v53 = vsub.f32 %v524_v6, %v101_v50  ;;  %179 = vadd.xlane.f32.xlu1 %v150_v47  ;;  %181 = vadd.xlane.f32.xlu0 %v151_v51  ;;  %v669_v54 = vsub.f32 %v529_v7, %v102_v52 }
  0x9f   :  { %v59_v56 = vpop.xlane.xlu0 %58  ;;  %v61_v57 = vpop.xlane.xlu1 %60 }
  0xa0   :  { %v103_v58 = vmul.f32 0.0078125, %v59_v56  ;;  %v153_v59 = vmul.f32 %v666_v53, %v666_v53  ;;  %v104_v60 = vmul.f32 0.0078125, %v61_v57  ;;  %v154_v63 = vmul.f32 %v669_v54, %v669_v54 }
  0xa2   :  { %v676_v61 = vsub.f32 %v536_v8, %v103_v58  ;;  %183 = vadd.xlane.f32.xlu1 %v152_v55  ;;  %185 = vadd.xlane.f32.xlu0 %v153_v59  ;;  %v679_v62 = vsub.f32 %v541_v9, %v104_v60 }
  0xa3   :  { %v63_v0 = vpop.xlane.xlu0 %62  ;;  %v65_v1 = vpop.xlane.xlu1 %64 }
  0xa4   :  { %v105_v2 = vmul.f32 0.0078125, %v63_v0  ;;  %v155_v3 = vmul.f32 %v676_v61, %v676_v61  ;;  %v106_v4 = vmul.f32 0.0078125, %v65_v1  ;;  %v156_v7 = vmul.f32 %v679_v62, %v679_v62 }
  0xa6   :  { %v686_v5 = vsub.f32 %v548_v10, %v105_v2  ;;  %187 = vadd.xlane.f32.xlu1 %v154_v63  ;;  %189 = vadd.xlane.f32.xlu0 %v155_v3  ;;  %v689_v6 = vsub.f32 %v553_v11, %v106_v4 }
  0xa7   :  { %v67_v8 = vpop.xlane.xlu0 %66  ;;  %v69_v9 = vpop.xlane.xlu1 %68 }
  0xa8   :  { %v107_v26 = vmul.f32 0.0078125, %v67_v8  ;;  %v157_v27 = vmul.f32 %v686_v5, %v686_v5  ;;  %v108_v28 = vmul.f32 0.0078125, %v69_v9  ;;  %v158_v11 = vmul.f32 %v689_v6, %v689_v6 }
  0xaa   :  { %v696_v29 = vsub.f32 %v560_v12, %v107_v26  ;;  %191 = vadd.xlane.f32.xlu1 %v156_v7  ;;  %193 = vadd.xlane.f32.xlu0 %v157_v27  ;;  %v699_v10 = vsub.f32 %v565_v13, %v108_v28 }
  0xab   :  { %v71_v32 = vpop.xlane.xlu0 %70  ;;  %v73_v33 = vpop.xlane.xlu1 %72 }
  0xac   :  { %v109_v34 = vmul.f32 0.0078125, %v71_v32  ;;  %v159_v35 = vmul.f32 %v696_v29, %v696_v29  ;;  %v110_v36 = vmul.f32 0.0078125, %v73_v33  ;;  %v160_v13 = vmul.f32 %v699_v10, %v699_v10 }
  0xae   :  { %v706_v39 = vsub.f32 %v572_v14, %v109_v34  ;;  %195 = vadd.xlane.f32.xlu1 %v158_v11  ;;  %197 = vadd.xlane.f32.xlu0 %v159_v35  ;;  %v709_v12 = vsub.f32 %v577_v15, %v110_v36 }
  0xaf   :  { %v75_v40 = vpop.xlane.xlu0 %74  ;;  %v77_v41 = vpop.xlane.xlu1 %76 }
  0xb0   :  { %v111_v42 = vmul.f32 0.0078125, %v75_v40  ;;  %v161_v43 = vmul.f32 %v706_v39, %v706_v39  ;;  %v112_v44 = vmul.f32 0.0078125, %v77_v41  ;;  %v162_v15 = vmul.f32 %v709_v12, %v709_v12 }
  0xb2   :  { %v716_v47 = vsub.f32 %v584_v16, %v111_v42  ;;  %199 = vadd.xlane.f32.xlu1 %v160_v13  ;;  %201 = vadd.xlane.f32.xlu0 %v161_v43  ;;  %v719_v14 = vsub.f32 %v589_v17, %v112_v44 }
  0xb3   :  { %v79_v48 = vpop.xlane.xlu0 %78  ;;  %v81_v49 = vpop.xlane.xlu1 %80 }
  0xb4   :  { %v113_v50 = vmul.f32 0.0078125, %v79_v48  ;;  %v163_v51 = vmul.f32 %v716_v47, %v716_v47  ;;  %v114_v52 = vmul.f32 0.0078125, %v81_v49  ;;  %v164_v17 = vmul.f32 %v719_v14, %v719_v14 }
  0xb6   :  { %v726_v55 = vsub.f32 %v596_v18, %v113_v50  ;;  %203 = vadd.xlane.f32.xlu1 %v162_v15  ;;  %205 = vadd.xlane.f32.xlu0 %v163_v51  ;;  %v729_v16 = vsub.f32 %v601_v19, %v114_v52 }
  0xb7   :  { %v83_v56 = vpop.xlane.xlu0 %82  ;;  %v85_v57 = vpop.xlane.xlu1 %84 }
  0xb8   :  { %v115_v58 = vmul.f32 0.0078125, %v83_v56  ;;  %v165_v59 = vmul.f32 %v726_v55, %v726_v55  ;;  %v116_v60 = vmul.f32 0.0078125, %v85_v57  ;;  %v166_v19 = vmul.f32 %v729_v16, %v729_v16 }
  0xba   :  { %v736_v63 = vsub.f32 %v608_v20, %v115_v58  ;;  %207 = vadd.xlane.f32.xlu1 %v164_v17  ;;  %209 = vadd.xlane.f32.xlu0 %v165_v59  ;;  %v739_v18 = vsub.f32 %v613_v21, %v116_v60  ;;  %v770_v58 = vld [vmem:[%s934_s1] ss:$0 sm:$0xff] }
  0xbb   :  { %v87_v0 = vpop.xlane.xlu0 %86  ;;  %v89_v1 = vpop.xlane.xlu1 %88 }
  0xbc   :  { %v117_v2 = vmul.f32 0.0078125, %v87_v0  ;;  %v167_v3 = vmul.f32 %v736_v63, %v736_v63  ;;  %v118_v4 = vmul.f32 0.0078125, %v89_v1  ;;  %v168_v21 = vmul.f32 %v739_v18, %v739_v18 }
  0xbe   :  { %v746_v7 = vsub.f32 %v620_v22, %v117_v2  ;;  %211 = vadd.xlane.f32.xlu1 %v166_v19  ;;  %213 = vadd.xlane.f32.xlu0 %v167_v3  ;;  %v749_v20 = vsub.f32 %v625_v23, %v118_v4  ;;  %v776_v2 = vld [vmem:[%s935_s2] ss:$0 sm:$0xff] }
  0xbf   :  { %v91_v8 = vpop.xlane.xlu0 %90  ;;  %v93_v9 = vpop.xlane.xlu1 %92 }
  0xc0   :  { %v119_v26 = vmul.f32 0.0078125, %v91_v8  ;;  %v169_v27 = vmul.f32 %v746_v7, %v746_v7  ;;  %v120_v28 = vmul.f32 0.0078125, %v93_v9  ;;  %v170_v23 = vmul.f32 %v749_v20, %v749_v20 }
  0xc2   :  { %v756_v11 = vsub.f32 %v632_v24, %v119_v26  ;;  %215 = vadd.xlane.f32.xlu1 %v168_v21  ;;  %217 = vadd.xlane.f32.xlu0 %v169_v27  ;;  %v759_v22 = vsub.f32 %v637_v25, %v120_v28 }
  0xc4   :  { %v171_v32 = vmul.f32 %v756_v11, %v756_v11  ;;  %v172_v33 = vmul.f32 %v759_v22, %v759_v22 }
  0xc6   :  { %219 = vadd.xlane.f32.xlu1 %v170_v23  ;;  %221 = vadd.xlane.f32.xlu0 %v171_v32 }
  0xca   :  { %223 = vadd.xlane.f32.xlu1 %v172_v33 }
 0x123   :  { %v174_v34 = vpop.xlane.xlu0 %173 }
 0x124   :  { %v225_v24 = vmul.f32 0.0078125, %v174_v34 }
 0x126   :  { %v251_v35 = vadd.f32 1e-06, %v225_v24 }
 0x127   :  { %v176_v36 = vpop.xlane.xlu1 %175  ;;  %v178_v13 = vpop.xlane.xlu0 %177 }
 0x128   :  { %425 = vrsqrt.f32 %v251_v35  ;;  %v226_v25 = vmul.f32 0.0078125, %v176_v36  ;;  %v227_v40 = vmul.f32 0.0078125, %v178_v13 }
 0x12a   :  { %v252_v41 = vadd.f32 1e-06, %v226_v25  ;;  %v253_v42 = vadd.f32 1e-06, %v227_v40 }
 0x12b   :  { %v180_v43 = vpop.xlane.xlu1 %179  ;;  %v182_v44 = vpop.xlane.xlu0 %181 }
 0x12c   :  { %427 = vrsqrt.f32 %v252_v41  ;;  %v228_v15 = vmul.f32 0.0078125, %v180_v43  ;;  %v229_v48 = vmul.f32 0.0078125, %v182_v44 }
 0x12d   :  { %429 = vrsqrt.f32 %v253_v42 }
 0x12e   :  { %v254_v49 = vadd.f32 1e-06, %v228_v15  ;;  %v255_v50 = vadd.f32 1e-06, %v229_v48 }
 0x12f   :  { %v184_v51 = vpop.xlane.xlu1 %183  ;;  %v186_v52 = vpop.xlane.xlu0 %185 }
 0x130   :  { %431 = vrsqrt.f32 %v254_v49  ;;  %v230_v17 = vmul.f32 0.0078125, %v184_v51  ;;  %v231_v56 = vmul.f32 0.0078125, %v186_v52 }
 0x131   :  { %433 = vrsqrt.f32 %v255_v50 }
 0x132   :  { %v426_v57 = vpop.eup %425  ;;  %v256_v59 = vadd.f32 1e-06, %v230_v17  ;;  %v257_v60 = vadd.f32 1e-06, %v231_v56 }
 0x133   :  { %v303_v19 = vmul.f32 %v426_v57, %v641_v30  ;;  %v188_v0 = vpop.xlane.xlu1 %187  ;;  %v190_v1 = vpop.xlane.xlu0 %189 }
 0x134   :  { %435 = vrsqrt.f32 %v256_v59  ;;  %v232_v3 = vmul.f32 0.0078125, %v188_v0  ;;  %v233_v4 = vmul.f32 0.0078125, %v190_v1 }
 0x135   :  { %v335_v21 = vmul.f32 %v770_v58, %v303_v19  ;;  %437 = vrsqrt.f32 %v257_v60 }
 0x136   :  { %v428_v8 = vpop.eup %427  ;;  %v258_v9 = vadd.f32 1e-06, %v232_v3  ;;  %v259_v26 = vadd.f32 1e-06, %v233_v4 }
 0x137   :  { %v430_v27 = vpop.eup %429  ;;  %v367_v28 = vadd.f32 %v776_v2, %v335_v21  ;;  %v304_v30 = vmul.f32 %v428_v8, %v647_v37  ;;  %v192_v23 = vpop.xlane.xlu1 %191 }
 0x138   :  { %v194_v32 = vpop.xlane.xlu0 %193  ;;  %v305_v33 = vmul.f32 %v430_v27, %v643_v31  ;;  %439 = vrsqrt.f32 %v258_v9  ;;  %v234_v34 = vmul.f32 0.0078125, %v192_v23 }
 0x139   :  { %v235_v24 = vmul.f32 0.0078125, %v194_v32  ;;  %393 = vst [vmem:[%s936_s3] sm:$0xff] %v367_v28  ;;  %v336_v35 = vmul.f32 %v770_v58, %v304_v30  ;;  %441 = vrsqrt.f32 %v259_v26 }
 0x13a   :  { %v432_v36 = vpop.eup %431  ;;  %v337_v13 = vmul.f32 %v770_v58, %v305_v33  ;;  %v260_v25 = vadd.f32 1e-06, %v234_v34 }
 0x13b   :  { %v261_v40 = vadd.f32 1e-06, %v235_v24  ;;  %v434_v37 = vpop.eup %433  ;;  %v368_v41 = vadd.f32 %v776_v2, %v336_v35  ;;  %v306_v31 = vmul.f32 %v432_v36, %v649_v38  ;;  %v196_v42 = vpop.xlane.xlu1 %195 }
 0x13c   :  { %v198_v43 = vpop.xlane.xlu0 %197  ;;  %v369_v44 = vadd.f32 %v776_v2, %v337_v13  ;;  %v307_v15 = vmul.f32 %v434_v37, %v656_v45  ;;  %443 = vrsqrt.f32 %v260_v25  ;;  %v236_v48 = vmul.f32 0.0078125, %v196_v42 }
 0x13d   :  { %394 = vst [vmem:[%s936_s3 + $0x8] sm:$0xff] %v368_v41  ;;  %v338_v49 = vmul.f32 %v770_v58, %v306_v31  ;;  %445 = vrsqrt.f32 %v261_v40  ;;  %v237_v50 = vmul.f32 0.0078125, %v198_v43 }
 0x13e   :  { %v436_v51 = vpop.eup %435  ;;  %395 = vst [vmem:[%s936_s3 + $0x10] sm:$0xff] %v369_v44  ;;  %v339_v38 = vmul.f32 %v770_v58, %v307_v15  ;;  %v262_v52 = vadd.f32 1e-06, %v236_v48 }
 0x13f   :  { %v438_v17 = vpop.eup %437  ;;  %v370_v45 = vadd.f32 %v776_v2, %v338_v49  ;;  %v308_v56 = vmul.f32 %v436_v51, %v659_v46  ;;  %v263_v57 = vadd.f32 1e-06, %v237_v50  ;;  %v200_v59 = vpop.xlane.xlu1 %199 }
 0x140   :  { %v202_v60 = vpop.xlane.xlu0 %201  ;;  %v371_v19 = vadd.f32 %v776_v2, %v339_v38  ;;  %v309_v0 = vmul.f32 %v438_v17, %v666_v53  ;;  %447 = vrsqrt.f32 %v262_v52  ;;  %v238_v1 = vmul.f32 0.0078125, %v200_v59 }
 0x141   :  { %396 = vst [vmem:[%s936_s3 + $0x18] sm:$0xff] %v370_v45  ;;  %v340_v3 = vmul.f32 %v770_v58, %v308_v56  ;;  %449 = vrsqrt.f32 %v263_v57  ;;  %v239_v4 = vmul.f32 0.0078125, %v202_v60 }
 0x142   :  { %v440_v21 = vpop.eup %439  ;;  %397 = vst [vmem:[%s936_s3 + $0x20] sm:$0xff] %v371_v19  ;;  %v341_v46 = vmul.f32 %v770_v58, %v309_v0  ;;  %v264_v8 = vadd.f32 1e-06, %v238_v1 }
 0x143   :  { %v442_v9 = vpop.eup %441  ;;  %v372_v53 = vadd.f32 %v776_v2, %v340_v3  ;;  %v310_v26 = vmul.f32 %v440_v21, %v669_v54  ;;  %v265_v27 = vadd.f32 1e-06, %v239_v4  ;;  %v204_v28 = vpop.xlane.xlu1 %203 }
 0x144   :  { %v206_v30 = vpop.xlane.xlu0 %205  ;;  %v373_v23 = vadd.f32 %v776_v2, %v341_v46  ;;  %v311_v32 = vmul.f32 %v442_v9, %v676_v61  ;;  %451 = vrsqrt.f32 %v264_v8  ;;  %v240_v33 = vmul.f32 0.0078125, %v204_v28 }
 0x145   :  { %398 = vst [vmem:[%s936_s3 + $0x28] sm:$0xff] %v372_v53  ;;  %v342_v34 = vmul.f32 %v770_v58, %v310_v26  ;;  %453 = vrsqrt.f32 %v265_v27  ;;  %v241_v24 = vmul.f32 0.0078125, %v206_v30 }
 0x146   :  { %v444_v35 = vpop.eup %443  ;;  %399 = vst [vmem:[%s936_s3 + $0x30] sm:$0xff] %v373_v23  ;;  %v343_v54 = vmul.f32 %v770_v58, %v311_v32  ;;  %v266_v36 = vadd.f32 1e-06, %v240_v33 }
 0x147   :  { %v446_v13 = vpop.eup %445  ;;  %v374_v61 = vadd.f32 %v776_v2, %v342_v34  ;;  %v312_v25 = vmul.f32 %v444_v35, %v679_v62  ;;  %v267_v40 = vadd.f32 1e-06, %v241_v24  ;;  %v208_v37 = vpop.xlane.xlu1 %207 }
 0x148   :  { %v210_v41 = vpop.xlane.xlu0 %209  ;;  %v375_v31 = vadd.f32 %v776_v2, %v343_v54  ;;  %v313_v42 = vmul.f32 %v446_v13, %v686_v5  ;;  %455 = vrsqrt.f32 %v266_v36  ;;  %v242_v43 = vmul.f32 0.0078125, %v208_v37 }
 0x149   :  { %400 = vst [vmem:[%s936_s3 + $0x38] sm:$0xff] %v374_v61  ;;  %v344_v44 = vmul.f32 %v770_v58, %v312_v25  ;;  %457 = vrsqrt.f32 %v267_v40  ;;  %v243_v15 = vmul.f32 0.0078125, %v210_v41 }
 0x14a   :  { %v448_v48 = vpop.eup %447  ;;  %401 = vst [vmem:[%s936_s3 + $0x40] sm:$0xff] %v375_v31  ;;  %v345_v62 = vmul.f32 %v770_v58, %v313_v42  ;;  %v268_v49 = vadd.f32 1e-06, %v242_v43 }
 0x14b   :  { %v450_v50 = vpop.eup %449  ;;  %v376_v5 = vadd.f32 %v776_v2, %v344_v44  ;;  %v314_v51 = vmul.f32 %v448_v48, %v689_v6  ;;  %v269_v38 = vadd.f32 1e-06, %v243_v15  ;;  %v212_v52 = vpop.xlane.xlu1 %211 }
 0x14c   :  { %v214_v17 = vpop.xlane.xlu0 %213  ;;  %v377_v45 = vadd.f32 %v776_v2, %v345_v62  ;;  %v315_v56 = vmul.f32 %v450_v50, %v696_v29  ;;  %459 = vrsqrt.f32 %v268_v49  ;;  %v244_v57 = vmul.f32 0.0078125, %v212_v52 }
 0x14d   :  { %402 = vst [vmem:[%s936_s3 + $0x48] sm:$0xff] %v376_v5  ;;  %v346_v59 = vmul.f32 %v770_v58, %v314_v51  ;;  %461 = vrsqrt.f32 %v269_v38  ;;  %v245_v60 = vmul.f32 0.0078125, %v214_v17 }
 0x14e   :  { %v452_v19 = vpop.eup %451  ;;  %403 = vst [vmem:[%s936_s3 + $0x50] sm:$0xff] %v377_v45  ;;  %v347_v6 = vmul.f32 %v770_v58, %v315_v56  ;;  %v270_v0 = vadd.f32 1e-06, %v244_v57 }
 0x14f   :  { %v454_v1 = vpop.eup %453  ;;  %v378_v29 = vadd.f32 %v776_v2, %v346_v59  ;;  %v316_v3 = vmul.f32 %v452_v19, %v699_v10  ;;  %v271_v4 = vadd.f32 1e-06, %v245_v60  ;;  %v216_v21 = vpop.xlane.xlu1 %215 }
 0x150   :  { %v218_v46 = vpop.xlane.xlu0 %217  ;;  %v379_v8 = vadd.f32 %v776_v2, %v347_v6  ;;  %v317_v9 = vmul.f32 %v454_v1, %v706_v39  ;;  %463 = vrsqrt.f32 %v270_v0  ;;  %v246_v53 = vmul.f32 0.0078125, %v216_v21 }
 0x151   :  { %404 = vst [vmem:[%s936_s3 + $0x58] sm:$0xff] %v378_v29  ;;  %v348_v26 = vmul.f32 %v770_v58, %v316_v3  ;;  %465 = vrsqrt.f32 %v271_v4  ;;  %v247_v27 = vmul.f32 0.0078125, %v218_v46 }
 0x152   :  { %v456_v28 = vpop.eup %455  ;;  %405 = vst [vmem:[%s936_s3 + $0x60] sm:$0xff] %v379_v8  ;;  %v349_v10 = vmul.f32 %v770_v58, %v317_v9  ;;  %v272_v30 = vadd.f32 1e-06, %v246_v53 }
 0x153   :  { %v458_v23 = vpop.eup %457  ;;  %v380_v39 = vadd.f32 %v776_v2, %v348_v26  ;;  %v318_v32 = vmul.f32 %v456_v28, %v709_v12  ;;  %v273_v33 = vadd.f32 1e-06, %v247_v27  ;;  %v220_v34 = vpop.xlane.xlu1 %219 }
 0x154   :  { %v222_v24 = vpop.xlane.xlu0 %221  ;;  %v381_v35 = vadd.f32 %v776_v2, %v349_v10  ;;  %v319_v54 = vmul.f32 %v458_v23, %v716_v47  ;;  %467 = vrsqrt.f32 %v272_v30  ;;  %v248_v36 = vmul.f32 0.0078125, %v220_v34 }
 0x155   :  { %406 = vst [vmem:[%s936_s3 + $0x68] sm:$0xff] %v380_v39  ;;  %v350_v13 = vmul.f32 %v770_v58, %v318_v32  ;;  %469 = vrsqrt.f32 %v273_v33  ;;  %v249_v61 = vmul.f32 0.0078125, %v222_v24 }
 0x156   :  { %v460_v25 = vpop.eup %459  ;;  %407 = vst [vmem:[%s936_s3 + $0x70] sm:$0xff] %v381_v35  ;;  %v351_v12 = vmul.f32 %v770_v58, %v319_v54  ;;  %v274_v40 = vadd.f32 1e-06, %v248_v36 }
 0x157   :  { %v462_v37 = vpop.eup %461  ;;  %v382_v47 = vadd.f32 %v776_v2, %v350_v13  ;;  %v320_v41 = vmul.f32 %v460_v25, %v719_v14  ;;  %v275_v31 = vadd.f32 1e-06, %v249_v61  ;;  %v224_v42 = vpop.xlane.xlu1 %223 }
 0x158   :  { %v383_v43 = vadd.f32 %v776_v2, %v351_v12  ;;  %v321_v44 = vmul.f32 %v462_v37, %v726_v55  ;;  %471 = vrsqrt.f32 %v274_v40  ;;  %v250_v15 = vmul.f32 0.0078125, %v224_v42 }
 0x159   :  { %408 = vst [vmem:[%s936_s3 + $0x78] sm:$0xff] %v382_v47  ;;  %v352_v48 = vmul.f32 %v770_v58, %v320_v41  ;;  %473 = vrsqrt.f32 %v275_v31 }
 0x15a   :  { %v464_v62 = vpop.eup %463  ;;  %409 = vst [vmem:[%s936_s3 + $0x80] sm:$0xff] %v383_v43  ;;  %v353_v14 = vmul.f32 %v770_v58, %v321_v44  ;;  %v276_v49 = vadd.f32 1e-06, %v250_v15 }
 0x15b   :  { %v466_v50 = vpop.eup %465  ;;  %v384_v55 = vadd.f32 %v776_v2, %v352_v48  ;;  %v322_v5 = vmul.f32 %v464_v62, %v729_v16 }
 0x15c   :  { %v385_v51 = vadd.f32 %v776_v2, %v353_v14  ;;  %v323_v38 = vmul.f32 %v466_v50, %v736_v63  ;;  %475 = vrsqrt.f32 %v276_v49 }
 0x15d   :  { %410 = vst [vmem:[%s936_s3 + $0x88] sm:$0xff] %v384_v55  ;;  %v354_v52 = vmul.f32 %v770_v58, %v322_v5 }
 0x15e   :  { %v468_v17 = vpop.eup %467  ;;  %411 = vst [vmem:[%s936_s3 + $0x90] sm:$0xff] %v385_v51  ;;  %v355_v45 = vmul.f32 %v770_v58, %v323_v38 }
 0x15f   :  { %v470_v56 = vpop.eup %469  ;;  %v386_v16 = vadd.f32 %v776_v2, %v354_v52  ;;  %v324_v57 = vmul.f32 %v468_v17, %v739_v18 }
 0x160   :  { %v387_v63 = vadd.f32 %v776_v2, %v355_v45  ;;  %v325_v59 = vmul.f32 %v470_v56, %v746_v7 }
 0x161   :  { %412 = vst [vmem:[%s936_s3 + $0x98] sm:$0xff] %v386_v16  ;;  %v356_v60 = vmul.f32 %v770_v58, %v324_v57 }
 0x162   :  { %v472_v19 = vpop.eup %471  ;;  %413 = vst [vmem:[%s936_s3 + $0xa0] sm:$0xff] %v387_v63  ;;  %v357_v6 = vmul.f32 %v770_v58, %v325_v59 }
 0x163   :  { %v474_v0 = vpop.eup %473  ;;  %v388_v18 = vadd.f32 %v776_v2, %v356_v60  ;;  %v326_v1 = vmul.f32 %v472_v19, %v749_v20 }
 0x164   :  { %v389_v7 = vadd.f32 %v776_v2, %v357_v6  ;;  %v327_v29 = vmul.f32 %v474_v0, %v756_v11 }
 0x165   :  { %414 = vst [vmem:[%s936_s3 + $0xa8] sm:$0xff] %v388_v18  ;;  %v358_v3 = vmul.f32 %v770_v58, %v326_v1 }
 0x166   :  { %v476_v4 = vpop.eup %475  ;;  %415 = vst [vmem:[%s936_s3 + $0xb0] sm:$0xff] %v389_v7  ;;  %v359_v21 = vmul.f32 %v770_v58, %v327_v29 }
 0x167   :  { %v390_v46 = vadd.f32 %v776_v2, %v358_v3  ;;  %v328_v20 = vmul.f32 %v476_v4, %v759_v22 }
 0x168   :  { %v391_v8 = vadd.f32 %v776_v2, %v359_v21 }
 0x169   :  { %416 = vst [vmem:[%s936_s3 + $0xb8] sm:$0xff] %v390_v46  ;;  %v360_v11 = vmul.f32 %v770_v58, %v328_v20 }
 0x16a   :  { %417 = vst [vmem:[%s936_s3 + $0xc0] sm:$0xff] %v391_v8 }
 0x16b   :  { %v392_v9 = vadd.f32 %v776_v2, %v360_v11 }
 0x16d   :  { %418 = vst [vmem:[%s936_s3 + $0xc8] sm:$0xff] %v392_v9 }

// kernel: attn_cnn_forward.5
= control target key start
LH: loop header
LB: loop body
LE: loop exit
PB: predicated region body
PF: predicated region fallthrough
CT: control target
= control target key end

     0   :  { %s5371_s29 = smov 0   ;;  %s7502_s0 = inlined_call_operand.vmem [shape: f32[2,104,128], index: 0, kind: input, shape index: {}]   ;;  %s7503_s1 = inlined_call_operand.vmem [shape: f32[2,1,104], index: 1, kind: input, shape index: {}]   ;;  %s7504_s2 = inlined_call_operand.vmem [shape: bf16[128,384], index: 2, kind: input, shape index: {}]   ;;  %s7505_s3 = inlined_call_operand.vmem [shape: f32[1,384], index: 3, kind: input, shape index: {}]   ;;  %s7506_s4 = inlined_call_operand.vmem [shape: bf16[128,128], index: 4, kind: input, shape index: {}]   ;;  %s7507_s5 = inlined_call_operand.vmem [shape: f32[1,128], index: 5, kind: input, shape index: {}]   ;;  %s7508_s6 = inlined_call_operand.vmem [shape: f32[1,128], index: 6, kind: input, shape index: {}]   ;;  %s7509_s7 = inlined_call_operand.vmem [shape: f32[1,128], index: 7, kind: input, shape index: {}]   ;;  %s7510_s8 = inlined_call_operand.vmem [shape: bf16[128,256], index: 8, kind: input, shape index: {}]   ;;  %s7511_s9 = inlined_call_operand.vmem [shape: f32[1,256], index: 9, kind: input, shape index: {}]   ;;  %s7512_s10 = inlined_call_operand.vmem [shape: bf16[256,128], index: 10, kind: input, shape index: {}]   ;;  %s7513_s11 = inlined_call_operand.vmem [shape: f32[1,128], index: 11, kind: input, shape index: {}]   ;;  %s7514_s12 = inlined_call_operand.vmem [shape: f32[1,128], index: 12, kind: input, shape index: {}]   ;;  %s7515_s13 = inlined_call_operand.vmem [shape: f32[1,128], index: 13, kind: input, shape index: {}]   ;;  %s7516_s14 = inlined_call_operand.vmem [shape: f32[2,104,128], index: 14, kind: output, shape index: {}]  }
   0x1 LB: > { %s4049_s30 = sadd.s32 4294967295, %s5288_s29   ;;  %p4053_p0 = scmp.ge.s32.totalorder %s5288_s29, 1  ;;  %s5288_s29 = sphi %s5371_s29, %s24_s29  }
   0x2   : > { %p420_p1 = scmp.lt.s32.totalorder %s5288_s29, 3 }
   0x4   : > { %p421_p2 = pnand %p4053_p0, %p420_p1 }
   0x6   : > { %424 = sbr.rel (%p421_p2) target bundleno = 3439 (0xd6f), region = 76 }
   0xd   : > { %v4928_v0 = vld [vmem:[%s7504_s2 + $0x4] ss:$12 sps:$4 sm:$0xff]   ;;  %v4930_v1 = vld [vmem:[%s7504_s2] ss:$12 sps:$4 sm:$0xff]   ;;  %v7519_v2 = vmov 0   ;;  %v7521_v4 = vmov 0.0   ;;  %v538_v46 = vlaneseq }
   0xe   : > { %713 = vmatprep.mubr.bf16.mxu0 %v7519_v2  ;;  %681 = vmatprep.subr.bf16.mxu0 %v4928_v0  ;;  %v4931_v3 = vld [vmem:[%s7504_s2 + $0x1c] ss:$12 sps:$4 sm:$0xff]   ;;  %v4933_v5 = vld [vmem:[%s7504_s2 + $0x18] ss:$12 sps:$4 sm:$0xff]   ;;  %vm5292_vm0 = vmmov 0   ;;  %p469_p3 = scmp.lt.s32.totalorder %s4049_s30, 1 }
   0xf   : > { %4385 = vmatprep.subr.bf16.mxu1 %v7521_v4  ;;  %682 = vmatpush1.bf16.msra.mxu0 %v4930_v1  ;;  %v4934_v6 = vld [vmem:[%s7504_s2 + $0x34] ss:$12 sps:$4 sm:$0xff]   ;;  %v4936_v7 = vld [vmem:[%s7504_s2 + $0x30] ss:$12 sps:$4 sm:$0xff]   ;;  %v4937_v8 = vld [vmem:[%s7504_s2 + $0x4c] ss:$12 sps:$4 sm:$0xff]  }
  0x10   : > { %4401 = vmatprep.mubr.msk.bf16.mxu1 %vm5292_vm0, %v7521_v4  ;;  %683 = vmatprep.subr.bf16.mxu0 %v4931_v3  ;;  %v4939_v9 = vld [vmem:[%s7504_s2 + $0x48] ss:$12 sps:$4 sm:$0xff]   ;;  %v4940_v10 = vld [vmem:[%s7504_s2 + $0x64] ss:$12 sps:$4 sm:$0xff]   ;;  %s7618_s30 = smov (!%p469_p3, %s4049_s30), 1  ;;  %v5509_v47 = vshrl.u32 %v538_v46, 7 }
  0x11   : > { %v4952_v11 = vld [vmem:[%s7504_s2 + $0x8] ss:$12 sps:$4 sm:$0xff]   ;;  %v4942_v12 = vld [vmem:[%s7504_s2 + $0x60] ss:$12 sps:$4 sm:$0xff]   ;;  %v4945_v15 = vld [vmem:[%s7504_s2 + $0x78] ss:$12 sps:$4 sm:$0xff]   ;;  %s5867_s21 = scalar_lea.vmem %s7503_s1, %s7618_s30 }
  0x12   : > { %v4943_v13 = vld [vmem:[%s7504_s2 + $0x7c] ss:$12 sps:$4 sm:$0xff]   ;;  %4386 = vmatpush3.bf16.msra.mxu1 %v4952_v11  ;;  %v4953_v14 = vld [vmem:[%s7504_s2 + $0x20] ss:$12 sps:$4 sm:$0xff]   ;;  %s4823_s15 = smul.u32 104, %s7618_s30  ;;  %7544 = vst [vmem:[#allocation2_spill] sm:$0xff] %v5509_v47 }
  0x13   : > { %684 = vmatpush1.bf16.msra.mxu0 %v4933_v5  ;;  %4387 = vmatprep.subr.bf16.mxu1 %v7521_v4  ;;  %v4946_v16 = vld [vmem:[%s7504_s2 + $0x94] ss:$12 sps:$4 sm:$0xff]   ;;  %v4954_v17 = vld [vmem:[%s7504_s2 + $0x38] ss:$12 sps:$4 sm:$0xff]   ;;  %v4948_v18 = vld [vmem:[%s7504_s2 + $0x90] ss:$12 sps:$4 sm:$0xff]  }
  0x14   : > { %685 = vmatprep.subr.bf16.mxu0 %v4934_v6  ;;  %s5444_s24 = scalar_lea.vmem %s7502_s0, %s4823_s15  ;;  %v4949_v19 = vld [vmem:[%s7504_s2 + $0xac] ss:$12 sps:$4 sm:$0xff]   ;;  %v4955_v20 = vld [vmem:[%s7504_s2 + $0x50] ss:$12 sps:$4 sm:$0xff]   ;;  %v4951_v21 = vld [vmem:[%s7504_s2 + $0xa8] ss:$12 sps:$4 sm:$0xff]  }
  0x15   : > { %v483_v22 = vld [vmem:[%s5444_s24] sm:$0xff]  ;;  %v484_v23 = vld [vmem:[%s5444_s24 + $0x8] sm:$0xff]  ;;  %v485_v27 = vld [vmem:[%s5444_s24 + $0x10] sm:$0xff]  ;;  %v7518_v48 = vsub.s32 0, %v5509_v47  ;;  %v7517_v50 = vsub.s32 1, %v5509_v47  ;;  %vm891_vm1 = vcmask 261120  }
  0x16   : > { %4388 = vmatpush3.bf16.msra.mxu1 %v4953_v14  ;;  %v4956_v24 = vld [vmem:[%s7504_s2 + $0x68] ss:$12 sps:$4 sm:$0xff]   ;;  %v497_v25 = vpack.c.bf16 %v484_v23, %v483_v22  ;;  %v4957_v26 = vld [vmem:[%s7504_s2 + $0x80] ss:$12 sps:$4 sm:$0xff]   ;;  %v486_v28 = vld [vmem:[%s5444_s24 + $0x18] sm:$0xff]  ;;  %s5293_s16 = smov 96  }
  0x17   : > { %686 = vmatpush1.bf16.msra.mxu0 %v4936_v7  ;;  %4389 = vmatprep.subr.bf16.mxu1 %v7521_v4  ;;  %v4958_v29 = vld [vmem:[%s7504_s2 + $0x98] ss:$12 sps:$4 sm:$0xff]   ;;  %v498_v30 = vpack.c.bf16 %v486_v28, %v485_v27  ;;  %v4959_v31 = vld [vmem:[%s7504_s2 + $0xb0] ss:$12 sps:$4 sm:$0xff]   ;;  %v488_v33 = vld [vmem:[%s5444_s24 + $0x28] sm:$0xff]  ;;  %v548_v1 = vsub.s32 2, %v5509_v47 }
  0x18   : > { %687 = vmatprep.subr.bf16.mxu0 %v4937_v8  ;;  %v487_v32 = vld [vmem:[%s5444_s24 + $0x20] sm:$0xff]  ;;  %v489_v35 = vld [vmem:[%s5444_s24 + $0x30] sm:$0xff]  ;;  %v490_v36 = vld [vmem:[%s5444_s24 + $0x38] sm:$0xff]  ;;  %s5294_s17 = smov 64   ;;  %vm1226_vm2 = vcmask 1043456   ;;  %s5295_s18 = smov 32  }
  0x19   : > { %v499_v34 = vpack.c.bf16 %v488_v33, %v487_v32  ;;  %v500_v37 = vpack.c.bf16 %v490_v36, %v489_v35  ;;  %v491_v38 = vld [vmem:[%s5444_s24 + $0x40] sm:$0xff]  ;;  %v492_v39 = vld [vmem:[%s5444_s24 + $0x48] sm:$0xff]  ;;  %v493_v41 = vld [vmem:[%s5444_s24 + $0x50] sm:$0xff]  ;;  %vm1054_vm3 = vcmask 850944   ;;  %vm2906_vm4 = vcmask 523264  }
  0x1a   : > { %4390 = vmatpush3.bf16.msra.mxu1 %v4954_v17  ;;  %v501_v40 = vpack.c.bf16 %v492_v39, %v491_v38  ;;  %v494_v42 = vld [vmem:[%s5444_s24 + $0x58] sm:$0xff]  ;;  %v495_v44 = vld [vmem:[%s5444_s24 + $0x60] sm:$0xff]  ;;  %vm2920_vm5 = vcmask 785408  }
  0x1b   : > { %688 = vmatpush1.bf16.msra.mxu0 %v4939_v9  ;;  %4391 = vmatprep.subr.bf16.mxu1 %v7521_v4  ;;  %v502_v43 = vpack.c.bf16 %v494_v42, %v493_v41  ;;  %v503_v45 = vpack.c.bf16 %v495_v44, %v495_v44  ;;  %v536_v49 = vld [vmem:[%s7505_s3] sm:$0x7] }
  0x1c   : > { %689 = vmatprep.subr.bf16.mxu0 %v4940_v10  ;;  %v5518_v51 = vrot.slane %v536_v49, %v7518_v48  ;;  %v5522_v53 = vrot.slane %v536_v49, %v7517_v50  ;;  %v5542_v11 = vrot.slane %v536_v49, %v548_v1 }
  0x1e   : > { %4392 = vmatpush3.bf16.msra.mxu1 %v4955_v20 }
  0x1f   : > { %690 = vmatpush1.bf16.msra.mxu0 %v4942_v12  ;;  %4393 = vmatprep.subr.bf16.mxu1 %v7521_v4 }
  0x20   : > { %691 = vmatprep.subr.bf16.mxu0 %v4943_v13 }
  0x22   : > { %4394 = vmatpush3.bf16.msra.mxu1 %v4956_v24 }
  0x23   : > { %692 = vmatpush1.bf16.msra.mxu0 %v4945_v15  ;;  %4395 = vmatprep.subr.bf16.mxu1 %v7521_v4 }
  0x24   : > { %693 = vmatprep.subr.bf16.mxu0 %v4946_v16 }
  0x26   : > { %4396 = vmatpush3.bf16.msra.mxu1 %v4957_v26 }
  0x27   : > { %694 = vmatpush1.bf16.msra.mxu0 %v4948_v18  ;;  %4397 = vmatprep.subr.bf16.mxu1 %v7521_v4 }
  0x28   : > { %695 = vmatprep.subr.bf16.mxu0 %v4949_v19 }
  0x2a   : > { %4398 = vmatpush3.bf16.msra.mxu1 %v4958_v29 }
  0x2b   : > { %696 = vmatpush1.bf16.msra.mxu0 %v4951_v21  ;;  %4399 = vmatprep.subr.bf16.mxu1 %v7521_v4 }
  0x2c   : > { %4429 = vmatprep.subr.bf16.mxu0 %v7521_v4 }
  0x2e   : > { %714 = vmatmul.mubr.bf16.vlgmr.msra.gmra.mrb[0].mxu0 %v497_v25  ;;  %4400 = vmatpush3.bf16.msra.mxu1 %v4959_v31 }
  0x2f   : > { %723 = vmatprep.mubr.bf16.mxu0 %v7519_v2  ;;  %4471 = vmatprep.subr.bf16.mxu1 %v7521_v4 }
  0x31   : > { %4402 = vmatmul.mubr.bf16.vlgmr.msra.gmra.mrb[0].mxu1 %v497_v25 }
  0x32   : > { %4405 = vmatprep.mubr.msk.bf16.mxu1 %vm5292_vm0, %v7521_v4 }
  0x36   : > { %724 = vmatmul.mubr.bf16.gmra.mrb[4].mxu0 %v498_v30 }
  0x37   : > { %733 = vmatprep.mubr.bf16.mxu0 %v7519_v2 }
  0x39   : > { %4406 = vmatmul.mubr.bf16.gmra.mrb[4].mxu1 %v498_v30 }
  0x3a   : > { %4409 = vmatprep.mubr.msk.bf16.mxu1 %vm5292_vm0, %v7521_v4 }
  0x3e   : > { %734 = vmatmul.mubr.bf16.gmra.mrb[8].mxu0 %v499_v34 }
  0x3f   : > { %743 = vmatprep.mubr.bf16.mxu0 %v7519_v2 }
  0x41   : > { %4410 = vmatmul.mubr.bf16.gmra.mrb[8].mxu1 %v499_v34 }
  0x42   : > { %4413 = vmatprep.mubr.msk.bf16.mxu1 %vm5292_vm0, %v7521_v4 }
  0x46   : > { %744 = vmatmul.mubr.bf16.gmra.mrb[12].mxu0 %v500_v37 }
  0x47   : > { %753 = vmatprep.mubr.bf16.mxu0 %v7519_v2 }
  0x49   : > { %4414 = vmatmul.mubr.bf16.gmra.mrb[12].mxu1 %v500_v37 }
  0x4a   : > { %4417 = vmatprep.mubr.msk.bf16.mxu1 %vm5292_vm0, %v7521_v4 }
  0x4e   : > { %754 = vmatmul.mubr.bf16.gmra.mrb[16].mxu0 %v501_v40 }
  0x4f   : > { %763 = vmatprep.mubr.bf16.mxu0 %v7519_v2 }
  0x51   : > { %4418 = vmatmul.mubr.bf16.gmra.mrb[16].mxu1 %v501_v40 }
  0x52   : > { %4421 = vmatprep.mubr.msk.bf16.mxu1 %vm5292_vm0, %v7521_v4 }
  0x56   : > { %764 = vmatmul.mubr.bf16.gmra.mrb[20].mxu0 %v502_v43 }
  0x57   : > { %773 = vmatprep.mubr.bf16.mxu0 %v7519_v2 }
  0x59   : > { %4422 = vmatmul.mubr.bf16.gmra.mrb[20].mxu1 %v502_v43 }
  0x5a   : > { %4425 = vmatprep.mubr.msk.bf16.mxu1 %vm5292_vm0, %v7521_v4 }
  0x5e   : > { %774 = vmatmul.mubr.bf16.gmra.mrb[24].mxu0 %v503_v45 }
  0x5f   : > { %4443 = vmatprep.mubr.msk.bf16.mxu0 %vm5292_vm0, %v7521_v4 }
  0x61   : > { %4426 = vmatmul.mubr.bf16.gmra.mrb[24].mxu1 %v503_v45 }
  0x62   : > { %4485 = vmatprep.mubr.msk.bf16.mxu1 %vm5292_vm0, %v7521_v4 }
 0x101   : > { %v715_v52 = vpop.f32.mrb[0].mxu0 }
 0x102   : > { %v717_v54 = vpop.f32.mrb[1].mxu0  ;;  %v716_v56 = vadd.f32 %v715_v52, %v5518_v51 }
 0x103   : > { %v719_v55 = vpop.f32.mrb[2].mxu0  ;;  %v718_v59 = vadd.f32 %v717_v54, %v5522_v53 }
 0x104   : > { %v720_v57 = vadd.f32 %v719_v55, %v5518_v51  ;;  %v721_v58 = vpop.f32.mrb[3].mxu0  ;;  %v816_v13 = vpop.f32.mrb[0].mxu1 }
 0x105   : > { %v722_v60 = vadd.f32 %v721_v58, %v5522_v53  ;;  %v817_v15 = vadd.f32 %v816_v13, %v5542_v11  ;;  %v4403_v16 = vpop.f32.mrb[1].mxu1 }
 0x106   : > { %v5528_v61 = vpack.c.bf16 %v720_v57, %v716_v56  ;;  %v819_v17 = vpop.f32.mrb[2].mxu1 }
 0x107   : > { %v5530_v62 = vpack.c.bf16 %v722_v60, %v718_v59  ;;  %v820_v20 = vadd.f32 %v819_v17, %v5542_v11  ;;  %v4404_v21 = vpop.f32.mrb[3].mxu1 }
 0x108   : > { %7545 = vst [vmem:[#allocation3_spill] sm:$0xff] %v5528_v61 }
 0x109   : > { %v725_v63 = vpop.f32.mrb[4].mxu0  ;;  %1346 = vrot.lane.b32.xlu0 %v5530_v62, %s5293_s16  ;;  %v914_v0 = vsel %vm891_vm1, %v5530_v62, 0  ;;  %v5555_v24 = vpack.c.bf16 %v820_v20, %v817_v15 }
 0x10a   : > { %v727_v3 = vpop.f32.mrb[5].mxu0  ;;  %4430 = vmatpush3.bf16.xpose.msra.mxu0 %v914_v0  ;;  %v726_v6 = vadd.f32 %v725_v63, %v5518_v51 }
 0x10b   : > { %v729_v5 = vpop.f32.mrb[6].mxu0  ;;  %4431 = vmatprep.subr.bf16.mxu0 %v7521_v4  ;;  %v728_v9 = vadd.f32 %v727_v3, %v5522_v53  ;;  %7547 = vst [vmem:[#allocation5_spill] sm:$0xff] %v5555_v24  ;;  %4472 = vmatpush3.bf16.msra.mxu1 %v5555_v24 }
 0x10c   : > { %v730_v7 = vadd.f32 %v729_v5, %v5518_v51  ;;  %v731_v8 = vpop.f32.mrb[7].mxu0  ;;  %v824_v31 = vpop.f32.mrb[4].mxu1  ;;  %4473 = vmatprep.subr.bf16.mxu1 %v7521_v4 }
 0x10d   : > { %v732_v10 = vadd.f32 %v731_v8, %v5522_v53  ;;  %v825_v33 = vadd.f32 %v824_v31, %v5542_v11  ;;  %v4407_v34 = vpop.f32.mrb[5].mxu1 }
 0x10e   : > { %v5544_v12 = vpack.c.bf16 %v730_v7, %v726_v6  ;;  %v827_v35 = vpop.f32.mrb[6].mxu1 }
 0x10f   : > { %v5546_v14 = vpack.c.bf16 %v732_v10, %v728_v9  ;;  %v828_v38 = vadd.f32 %v827_v35, %v5542_v11  ;;  %v4408_v39 = vpop.f32.mrb[7].mxu1 }
 0x110   : > { %7546 = vst [vmem:[#allocation4_spill] sm:$0xff] %v5544_v12 }
 0x111   : > { %v735_v18 = vpop.f32.mrb[8].mxu0  ;;  %1348 = vrot.lane.b32.xlu0 %v5546_v14, %s5293_s16  ;;  %v917_v19 = vsel %vm891_vm1, %v5546_v14, 0  ;;  %v5574_v42 = vpack.c.bf16 %v828_v38, %v825_v33 }
 0x112   : > { %v737_v22 = vpop.f32.mrb[9].mxu0  ;;  %4432 = vmatpush3.bf16.xpose.msra.mxu0 %v917_v19  ;;  %v736_v25 = vadd.f32 %v735_v18, %v5518_v51 }
 0x113   : > { %v739_v23 = vpop.f32.mrb[10].mxu0  ;;  %4433 = vmatprep.subr.bf16.mxu0 %v7521_v4  ;;  %v738_v28 = vadd.f32 %v737_v22, %v5522_v53  ;;  %7549 = vst [vmem:[#allocation7_spill] sm:$0xff] %v5574_v42  ;;  %4474 = vmatpush3.bf16.msra.mxu1 %v5574_v42 }
 0x114   : > { %v740_v26 = vadd.f32 %v739_v23, %v5518_v51  ;;  %v741_v27 = vpop.f32.mrb[11].mxu0  ;;  %v832_v54 = vpop.f32.mrb[8].mxu1  ;;  %4475 = vmatprep.subr.bf16.mxu1 %v7521_v4 }
 0x115   : > { %v742_v29 = vadd.f32 %v741_v27, %v5522_v53  ;;  %v833_v56 = vadd.f32 %v832_v54, %v5542_v11  ;;  %v4411_v57 = vpop.f32.mrb[9].mxu1 }
 0x116   : > { %v5562_v30 = vpack.c.bf16 %v740_v26, %v736_v25  ;;  %v835_v58 = vpop.f32.mrb[10].mxu1 }
 0x117   : > { %v5565_v32 = vpack.c.bf16 %v742_v29, %v738_v28  ;;  %v836_v63 = vadd.f32 %v835_v58, %v5542_v11  ;;  %v4412_v0 = vpop.f32.mrb[11].mxu1 }
 0x118   : > { %7548 = vst [vmem:[#allocation6_spill] sm:$0xff] %v5562_v30 }
 0x119   : > { %v745_v36 = vpop.f32.mrb[12].mxu0  ;;  %1350 = vrot.lane.b32.xlu1 %v5565_v32, %s5293_s16  ;;  %v920_v37 = vsel %vm891_vm1, %v5565_v32, 0  ;;  %v5593_v5 = vpack.c.bf16 %v836_v63, %v833_v56 }
 0x11a   : > { %v747_v40 = vpop.f32.mrb[13].mxu0  ;;  %4434 = vmatpush3.bf16.xpose.msra.mxu0 %v920_v37  ;;  %v746_v43 = vadd.f32 %v745_v36, %v5518_v51 }
 0x11b   : > { %v749_v41 = vpop.f32.mrb[14].mxu0  ;;  %4435 = vmatprep.subr.bf16.mxu0 %v7521_v4  ;;  %v748_v46 = vadd.f32 %v747_v40, %v5522_v53  ;;  %7551 = vst [vmem:[#allocation9_spill] sm:$0xff] %v5593_v5  ;;  %4476 = vmatpush3.bf16.msra.mxu1 %v5593_v5 }
 0x11c   : > { %v750_v44 = vadd.f32 %v749_v41, %v5518_v51  ;;  %v751_v45 = vpop.f32.mrb[15].mxu0  ;;  %v840_v15 = vpop.f32.mrb[12].mxu1  ;;  %4477 = vmatprep.subr.bf16.mxu1 %v7521_v4 }
 0x11d   : > { %v752_v49 = vadd.f32 %v751_v45, %v5522_v53  ;;  %v841_v17 = vadd.f32 %v840_v15, %v5542_v11  ;;  %v4415_v18 = vpop.f32.mrb[13].mxu1 }
 0x11e   : > { %v5581_v52 = vpack.c.bf16 %v750_v44, %v746_v43  ;;  %v843_v19 = vpop.f32.mrb[14].mxu1 }
 0x11f   : > { %v5584_v55 = vpack.c.bf16 %v752_v49, %v748_v46  ;;  %v844_v22 = vadd.f32 %v843_v19, %v5542_v11  ;;  %v4416_v23 = vpop.f32.mrb[15].mxu1 }
 0x120   : > { %7550 = vst [vmem:[#allocation8_spill] sm:$0xff] %v5581_v52 }
 0x121   : > { %v755_v59 = vpop.f32.mrb[16].mxu0  ;;  %1352 = vrot.lane.b32.xlu1 %v5584_v55, %s5293_s16  ;;  %v923_v60 = vsel %vm891_vm1, %v5584_v55, 0  ;;  %v5612_v27 = vpack.c.bf16 %v844_v22, %v841_v17 }
 0x122   : > { %v757_v1 = vpop.f32.mrb[17].mxu0  ;;  %4436 = vmatpush3.bf16.xpose.msra.mxu0 %v923_v60  ;;  %v756_v6 = vadd.f32 %v755_v59, %v5518_v51 }
 0x123   : > { %v759_v3 = vpop.f32.mrb[18].mxu0  ;;  %4437 = vmatprep.subr.bf16.mxu0 %v7521_v4  ;;  %v758_v9 = vadd.f32 %v757_v1, %v5522_v53  ;;  %7553 = vst [vmem:[#allocation11_spill] sm:$0xff] %v5612_v27  ;;  %4478 = vmatpush3.bf16.msra.mxu1 %v5612_v27 }
 0x124   : > { %v760_v7 = vadd.f32 %v759_v3, %v5518_v51  ;;  %v761_v8 = vpop.f32.mrb[19].mxu0  ;;  %v848_v36 = vpop.f32.mrb[16].mxu1  ;;  %4479 = vmatprep.subr.bf16.mxu1 %v7521_v4 }
 0x125   : > { %v762_v10 = vadd.f32 %v761_v8, %v5522_v53  ;;  %v849_v38 = vadd.f32 %v848_v36, %v5542_v11  ;;  %v4419_v39 = vpop.f32.mrb[17].mxu1 }
 0x126   : > { %v5600_v13 = vpack.c.bf16 %v760_v7, %v756_v6  ;;  %v851_v40 = vpop.f32.mrb[18].mxu1 }
 0x127   : > { %v5603_v16 = vpack.c.bf16 %v762_v10, %v758_v9  ;;  %v852_v44 = vadd.f32 %v851_v40, %v5542_v11  ;;  %v4420_v45 = vpop.f32.mrb[19].mxu1 }
 0x128   : > { %7552 = vst [vmem:[#allocation10_spill] sm:$0xff] %v5600_v13 }
 0x129   : > { %v765_v20 = vpop.f32.mrb[20].mxu0  ;;  %1354 = vrot.lane.b32.xlu0 %v5603_v16, %s5293_s16  ;;  %v926_v21 = vsel %vm891_vm1, %v5603_v16, 0  ;;  %v5632_v56 = vpack.c.bf16 %v852_v44, %v849_v38 }
 0x12a   : > { %v767_v25 = vpop.f32.mrb[21].mxu0  ;;  %4438 = vmatpush3.bf16.xpose.msra.mxu0 %v926_v21  ;;  %v766_v28 = vadd.f32 %v765_v20, %v5518_v51 }
 0x12b   : > { %v769_v26 = vpop.f32.mrb[22].mxu0  ;;  %4439 = vmatprep.subr.bf16.mxu0 %v7521_v4  ;;  %v768_v33 = vadd.f32 %v767_v25, %v5522_v53  ;;  %7555 = vst [vmem:[#allocation13_spill] sm:$0xff] %v5632_v56  ;;  %4480 = vmatpush3.bf16.msra.mxu1 %v5632_v56 }
 0x12c   : > { %v770_v29 = vadd.f32 %v769_v26, %v5518_v51  ;;  %v771_v31 = vpop.f32.mrb[23].mxu0  ;;  %v856_v59 = vpop.f32.mrb[20].mxu1  ;;  %4481 = vmatprep.subr.bf16.mxu1 %v7521_v4 }
 0x12d   : > { %v772_v34 = vadd.f32 %v771_v31, %v5522_v53  ;;  %v857_v60 = vadd.f32 %v856_v59, %v5542_v11  ;;  %v4423_v63 = vpop.f32.mrb[21].mxu1 }
 0x12e   : > { %v5619_v35 = vpack.c.bf16 %v770_v29, %v766_v28  ;;  %v859_v0 = vpop.f32.mrb[22].mxu1 }
 0x12f   : > { %v5622_v37 = vpack.c.bf16 %v772_v34, %v768_v33  ;;  %v860_v1 = vadd.f32 %v859_v0, %v5542_v11  ;;  %v4424_v3 = vpop.f32.mrb[23].mxu1 }
 0x130   : > { %7554 = vst [vmem:[#allocation12_spill] sm:$0xff] %v5619_v35 }
 0x131   : > { %v775_v41 = vpop.f32.mrb[24].mxu0  ;;  %1356 = vrot.lane.b32.xlu1 %v5622_v37, %s5293_s16  ;;  %v929_v43 = vsel %vm891_vm1, %v5622_v37, 0  ;;  %v5650_v6 = vpack.c.bf16 %v860_v1, %v857_v60 }
 0x132   : > { %v777_v46 = vpop.f32.mrb[25].mxu0  ;;  %4440 = vmatpush3.bf16.xpose.msra.mxu0 %v929_v43 }
 0x133   : > { %v778_v49 = vadd.f32 %v777_v46, %v5522_v53  ;;  %v779_v54 = vpop.f32.mrb[26].mxu0  ;;  %4441 = vmatprep.subr.bf16.mxu0 %v7521_v4  ;;  %7556 = vst [vmem:[#allocation14_spill] sm:$0xff] %v5650_v6  ;;  %4482 = vmatpush3.bf16.msra.mxu1 %v5650_v6 }
 0x134   : > { %v780_v57 = vpop.f32.mrb[27].mxu0  ;;  %v864_v7 = vpop.f32.mrb[24].mxu1  ;;  %4483 = vmatprep.subr.bf16.mxu1 %v7521_v4 }
 0x135   : > { %v5634_v58 = vpack.c.bf16 %v778_v49, %v778_v49  ;;  %1325 = vrot.lane.b32.xlu1 %v5528_v61, %s5293_s16  ;;  %v865_v8 = vadd.f32 %v864_v7, %v5542_v11  ;;  %v4427_v9 = vpop.f32.mrb[25].mxu1  ;;  %v776_v11 = vadd.f32 %v775_v41, %v5518_v51 }
 0x136   : > { %v867_v10 = vpop.f32.mrb[26].mxu1 }
 0x137   : > { %1358 = vrot.lane.b32.xlu0 %v5634_v58, %s5293_s16  ;;  %v932_v53 = vsel %vm891_vm1, %v5634_v58, 0  ;;  %v4428_v15 = vpop.f32.mrb[27].mxu1  ;;  %v5679_v17 = vpack.c.bf16 %v776_v11, %v776_v11  ;;  %v5723_v51 = vpack.c.bf16 %v865_v8, %v865_v8 }
 0x139   : > { %1327 = vrot.lane.b32.xlu1 %v5544_v12, %s5293_s16  ;;  %7557 = vst [vmem:[#allocation15_spill] sm:$0xff] %v5679_v17  ;;  %7558 = vst [vmem:[#allocation16_spill] sm:$0xff] %v5723_v51  ;;  %v1228_v18 = vsel %vm1226_vm2, %v5723_v51, 0 }
 0x13a   : > { %4442 = vmatpush3.bf16.xpose.msra.mxu0 %v932_v53  ;;  %4484 = vmatpush3.bf16.msra.mxu1 %v1228_v18 }
 0x13b   : > { %1819 = vrot.lane.b32.xlu0 %v5530_v62, %s5294_s17  ;;  %4513 = vmatprep.subr.bf16.mxu0 %v7521_v4 }
 0x13c   : > { %4555 = vmatprep.subr.bf16.mxu1 %v7521_v4 }
 0x13d   : > { %1329 = vrot.lane.b32.xlu1 %v5562_v30, %s5293_s16 }
 0x13f   : > { %1821 = vrot.lane.b32.xlu0 %v5546_v14, %s5294_s17 }
 0x141   : > { %1331 = vrot.lane.b32.xlu1 %v5581_v52, %s5293_s16  ;;  %4444 = vmatmul.mubr.msk.bf16.vlgmr.msra.gmra.mrb[28].mxu0 %vm891_vm1, %v5528_v61 }
 0x142   : > { %4447 = vmatprep.mubr.msk.bf16.mxu0 %vm5292_vm0, %v7521_v4 }
 0x143   : > { %1823 = vrot.lane.b32.xlu0 %v5565_v32, %s5294_s17 }
 0x145   : > { %1333 = vrot.lane.b32.xlu1 %v5600_v13, %s5293_s16 }
 0x147   : > { %1825 = vrot.lane.b32.xlu0 %v5584_v55, %s5294_s17 }
 0x149   : > { %1335 = vrot.lane.b32.xlu1 %v5619_v35, %s5293_s16  ;;  %4448 = vmatmul.mubr.msk.bf16.gmra.mrb[32].mxu0 %vm891_vm1, %v5544_v12 }
 0x14a   : > { %4451 = vmatprep.mubr.msk.bf16.mxu0 %vm5292_vm0, %v7521_v4 }
 0x14b   : > { %1827 = vrot.lane.b32.xlu0 %v5603_v16, %s5294_s17 }
 0x14d   : > { %1337 = vrot.lane.b32.xlu1 %v5679_v17, %s5293_s16 }
 0x14f   : > { %1829 = vrot.lane.b32.xlu0 %v5622_v37, %s5294_s17 }
 0x151   : > { %1805 = vrot.lane.b32.xlu1 %v5528_v61, %s5294_s17  ;;  %4452 = vmatmul.mubr.msk.bf16.gmra.mrb[36].mxu0 %vm891_vm1, %v5562_v30 }
 0x152   : > { %4455 = vmatprep.mubr.msk.bf16.mxu0 %vm5292_vm0, %v7521_v4 }
 0x153   : > { %1831 = vrot.lane.b32.xlu0 %v5634_v58, %s5294_s17 }
 0x155   : > { %1809 = vrot.lane.b32.xlu1 %v5562_v30, %s5294_s17 }
 0x157   : > { %1807 = vrot.lane.b32.xlu0 %v5544_v12, %s5294_s17 }
 0x159   : > { %1813 = vrot.lane.b32.xlu1 %v5600_v13, %s5294_s17  ;;  %4456 = vmatmul.mubr.msk.bf16.gmra.mrb[40].mxu0 %vm891_vm1, %v5581_v52 }
 0x15a   : > { %4459 = vmatprep.mubr.msk.bf16.mxu0 %vm5292_vm0, %v7521_v4 }
 0x15b   : > { %1811 = vrot.lane.b32.xlu0 %v5581_v52, %s5294_s17 }
 0x15d   : > { %1817 = vrot.lane.b32.xlu1 %v5679_v17, %s5294_s17 }
 0x15f   : > { %1815 = vrot.lane.b32.xlu0 %v5619_v35, %s5294_s17 }
 0x161   : > { %1675 = vrot.lane.b32.xlu1 %v5574_v42, %s5293_s16  ;;  %4460 = vmatmul.mubr.msk.bf16.gmra.mrb[44].mxu0 %vm891_vm1, %v5600_v13 }
 0x162   : > { %4463 = vmatprep.mubr.msk.bf16.mxu0 %vm5292_vm0, %v7521_v4 }
 0x163   : > { %1673 = vrot.lane.b32.xlu0 %v5555_v24, %s5293_s16 }
 0x165   : > { %1679 = vrot.lane.b32.xlu1 %v5612_v27, %s5293_s16 }
 0x167   : > { %1677 = vrot.lane.b32.xlu0 %v5593_v5, %s5293_s16 }
 0x169   : > { %1681 = vrot.lane.b32.xlu1 %v5632_v56, %s5293_s16  ;;  %4464 = vmatmul.mubr.msk.bf16.gmra.mrb[48].mxu0 %vm891_vm1, %v5619_v35 }
 0x16a   : > { %4467 = vmatprep.mubr.msk.bf16.mxu0 %vm5292_vm0, %v7521_v4 }
 0x16b   : > { %1683 = vrot.lane.b32.xlu0 %v5650_v6, %s5293_s16 }
 0x16d   : > { %1685 = vrot.lane.b32.xlu1 %v5723_v51, %s5293_s16 }
 0x16f   : > { %2139 = vrot.lane.b32.xlu0 %v5555_v24, %s5294_s17 }
 0x171   : > { %2141 = vrot.lane.b32.xlu1 %v5574_v42, %s5294_s17  ;;  %4468 = vmatmul.mubr.msk.bf16.gmra.mrb[52].mxu0 %vm891_vm1, %v5679_v17 }
 0x172   : > { %4527 = vmatprep.mubr.msk.bf16.mxu0 %vm5292_vm0, %v7521_v4 }
 0x173   : > { %2285 = vrot.lane.b32.xlu0 %v5530_v62, %s5295_s18 }
 0x175   : > { %2143 = vrot.lane.b32.xlu1 %v5593_v5, %s5294_s17 }
 0x177   : > { %2287 = vrot.lane.b32.xlu0 %v5546_v14, %s5295_s18 }
 0x179   : > { %2145 = vrot.lane.b32.xlu1 %v5612_v27, %s5294_s17 }
 0x17b   : > { %v1347_v19 = vpop.permute.xlu0 %1346  ;;  %2147 = vrot.lane.b32.xlu0 %v5632_v56, %s5294_s17 }
 0x17c   : > { %v1382_v62 = vsel %vm891_vm1, %v1347_v19, 0 }
 0x17d   : > { %2289 = vrot.lane.b32.xlu1 %v5565_v32, %s5295_s18  ;;  %4514 = vmatpush3.bf16.xpose.msra.mxu0 %v1382_v62 }
 0x17e   : > { %4515 = vmatprep.subr.bf16.mxu0 %v7521_v4 }
 0x181   : > { %2149 = vrot.lane.b32.xlu1 %v5650_v6, %s5294_s17 }
 0x183   : > { %v1349_v14 = vpop.permute.xlu0 %1348 }
 0x184   : > { %v1385_v20 = vsel %vm891_vm1, %v1349_v14, 0 }
 0x185   : > { %4516 = vmatpush3.bf16.xpose.msra.mxu0 %v1385_v20 }
 0x186   : > { %4517 = vmatprep.subr.bf16.mxu0 %v7521_v4 }
 0x18b   : > { %v1351_v21 = vpop.permute.xlu1 %1350 }
 0x18c   : > { %v1388_v22 = vsel %vm891_vm1, %v1351_v21, 0 }
 0x18d   : > { %4518 = vmatpush3.bf16.xpose.msra.mxu0 %v1388_v22 }
 0x18e   : > { %4519 = vmatprep.subr.bf16.mxu0 %v7521_v4 }
 0x193   : > { %v1353_v23 = vpop.permute.xlu1 %1352 }
 0x194   : > { %v1391_v32 = vsel %vm891_vm1, %v1353_v23, 0 }
 0x195   : > { %4520 = vmatpush3.bf16.xpose.msra.mxu0 %v1391_v32 }
 0x196   : > { %4521 = vmatprep.subr.bf16.mxu0 %v7521_v4 }
 0x19b   : > { %v1355_v25 = vpop.permute.xlu0 %1354 }
 0x19c   : > { %v1394_v26 = vsel %vm891_vm1, %v1355_v25, 0 }
 0x19d   : > { %4522 = vmatpush3.bf16.xpose.msra.mxu0 %v1394_v26 }
 0x19e   : > { %4523 = vmatprep.subr.bf16.mxu0 %v7521_v4 }
 0x1a3   : > { %v1357_v28 = vpop.permute.xlu1 %1356 }
 0x1a4   : > { %v1397_v29 = vsel %vm891_vm1, %v1357_v28, 0 }
 0x1a5   : > { %4524 = vmatpush3.bf16.xpose.msra.mxu0 %v1397_v29 }
 0x1a6   : > { %4525 = vmatprep.subr.bf16.mxu0 %v7521_v4 }
 0x1a7   : > { %v1326_v31 = vpop.permute.xlu1 %1325 }
 0x1a9   : > { %v1359_v33 = vpop.permute.xlu0 %1358 }
 0x1aa   : > { %v1400_v34 = vsel %vm891_vm1, %v1359_v33, 0 }
 0x1ab   : > { %v1328_v36 = vpop.permute.xlu1 %1327 }
 0x1ad   : > { %v1820_v38 = vpop.permute.xlu0 %1819  ;;  %4526 = vmatpush3.bf16.xpose.msra.mxu0 %v1400_v34 }
 0x1ae   : > { %4597 = vmatprep.subr.bf16.mxu0 %v7521_v4  ;;  %v1855_v43 = vsel %vm891_vm1, %v1820_v38, 0 }
 0x1af   : > { %v1330_v39 = vpop.permute.xlu1 %1329 }
 0x1b1   : > { %v1822_v40 = vpop.permute.xlu0 %1821 }
 0x1b2   : > { %v1858_v54 = vsel %vm891_vm1, %v1822_v40, 0  ;;  %v5870_v40 = vld [vmem:[%s5867_s21] ss:$0 sm:$0xff] }
 0x1b3   : > { %v1332_v41 = vpop.permute.xlu1 %1331 }
 0x1b4   : > { %4528 = vmatmul.mubr.msk.bf16.vlgmr.msra.gmra.mrb[56].mxu0 %vm891_vm1, %v1326_v31 }
 0x1b5   : > { %v1824_v44 = vpop.permute.xlu0 %1823  ;;  %4598 = vmatpush3.bf16.xpose.msra.mxu0 %v1855_v43  ;;  %4531 = vmatprep.mubr.msk.bf16.mxu0 %vm5292_vm0, %v7521_v4 }
 0x1b6   : > { %4599 = vmatprep.subr.bf16.mxu0 %v7521_v4  ;;  %v1861_v63 = vsel %vm891_vm1, %v1824_v44, 0 }
 0x1b7   : > { %v1334_v45 = vpop.permute.xlu1 %1333 }
 0x1b9   : > { %v1826_v46 = vpop.permute.xlu0 %1825 }
 0x1ba   : > { %v1864_v8 = vsel %vm891_vm1, %v1826_v46, 0 }
 0x1bb   : > { %v1336_v49 = vpop.permute.xlu1 %1335 }
 0x1bc   : > { %4532 = vmatmul.mubr.msk.bf16.gmra.mrb[60].mxu0 %vm891_vm1, %v1328_v36 }
 0x1bd   : > { %v1828_v57 = vpop.permute.xlu0 %1827  ;;  %4600 = vmatpush3.bf16.xpose.msra.mxu0 %v1858_v54  ;;  %4535 = vmatprep.mubr.msk.bf16.mxu0 %vm5292_vm0, %v7521_v4 }
 0x1be   : > { %4601 = vmatprep.subr.bf16.mxu0 %v7521_v4  ;;  %v1867_v18 = vsel %vm891_vm1, %v1828_v57, 0 }
 0x1bf   : > { %v1338_v59 = vpop.permute.xlu1 %1337 }
 0x1c1   : > { %v1830_v53 = vpop.permute.xlu0 %1829 }
 0x1c2   : > { %v1870_v21 = vsel %vm891_vm1, %v1830_v53, 0 }
 0x1c3   : > { %v1806_v60 = vpop.permute.xlu1 %1805 }
 0x1c4   : > { %4536 = vmatmul.mubr.msk.bf16.gmra.mrb[64].mxu0 %vm891_vm1, %v1330_v39 }
 0x1c5   : > { %v1832_v0 = vpop.permute.xlu0 %1831  ;;  %4602 = vmatpush3.bf16.xpose.msra.mxu0 %v1861_v63  ;;  %4539 = vmatprep.mubr.msk.bf16.mxu0 %vm5292_vm0, %v7521_v4 }
 0x1c6   : > { %4603 = vmatprep.subr.bf16.mxu0 %v7521_v4  ;;  %v1873_v25 = vsel %vm891_vm1, %v1832_v0, 0 }
 0x1c7   : > { %v1810_v1 = vpop.permute.xlu1 %1809 }
 0x1c9   : > { %v1808_v3 = vpop.permute.xlu0 %1807 }
 0x1cb   : > { %v1814_v7 = vpop.permute.xlu1 %1813 }
 0x1cc   : > { %4540 = vmatmul.mubr.msk.bf16.gmra.mrb[68].mxu0 %vm891_vm1, %v1332_v41 }
 0x1cd   : > { %v1812_v9 = vpop.permute.xlu0 %1811  ;;  %4604 = vmatpush3.bf16.xpose.msra.mxu0 %v1864_v8  ;;  %4543 = vmatprep.mubr.msk.bf16.mxu0 %vm5292_vm0, %v7521_v4 }
 0x1ce   : > { %4605 = vmatprep.subr.bf16.mxu0 %v7521_v4 }
 0x1cf   : > { %v5794_v10 = vpop.permute.xlu1 %1817 }
 0x1d1   : > { %v1816_v15 = vpop.permute.xlu0 %1815 }
 0x1d3   : > { %v5796_v11 = vpop.permute.xlu1 %1675 }
 0x1d4   : > { %4544 = vmatmul.mubr.msk.bf16.gmra.mrb[72].mxu0 %vm891_vm1, %v1334_v45 }
 0x1d5   : > { %v5800_v19 = vpop.permute.xlu0 %1673  ;;  %4606 = vmatpush3.bf16.xpose.msra.mxu0 %v1867_v18  ;;  %4547 = vmatprep.mubr.msk.bf16.mxu0 %vm5292_vm0, %v7521_v4 }
 0x1d6   : > { %4607 = vmatprep.subr.bf16.mxu0 %v7521_v4 }
 0x1d7   : > { %v5805_v62 = vpop.permute.xlu1 %1679 }
 0x1d9   : > { %v5807_v14 = vpop.permute.xlu0 %1677 }
 0x1db   : > { %v5809_v20 = vpop.permute.xlu1 %1681 }
 0x1dc   : > { %4548 = vmatmul.mubr.msk.bf16.gmra.mrb[76].mxu0 %vm891_vm1, %v1336_v49 }
 0x1dd   : > { %v5813_v22 = vpop.permute.xlu0 %1683  ;;  %4608 = vmatpush3.bf16.xpose.msra.mxu0 %v1870_v21  ;;  %4551 = vmatprep.mubr.msk.bf16.mxu0 %vm5292_vm0, %v7521_v4 }
 0x1de   : > { %4609 = vmatprep.subr.bf16.mxu0 %v7521_v4 }
 0x1df   : > { %v5818_v23 = vpop.permute.xlu1 %1685 }
 0x1e1   : > { %v5820_v32 = vpop.permute.xlu0 %2139 }
 0x1e2   : > { %7559 = vst [vmem:[#allocation17_spill] sm:$0xff] %v5820_v32 }
 0x1e3   : > { %v5827_v26 = vpop.permute.xlu1 %2141 }
 0x1e4   : > { %4552 = vmatmul.mubr.msk.bf16.gmra.mrb[80].mxu0 %vm891_vm1, %v1338_v59  ;;  %7560 = vst [vmem:[#allocation18_spill] sm:$0xff] %v5827_v26 }
 0x1e5   : > { %4610 = vmatpush3.bf16.xpose.msra.mxu0 %v1873_v25  ;;  %4611 = vmatprep.mubr.msk.bf16.mxu0 %vm5292_vm0, %v7521_v4  ;;  %v2286_v28 = vpop.permute.xlu0 %2285 }
 0x1e6   : > { %4681 = vmatprep.subr.bf16.mxu0 %v7521_v4  ;;  %v5830_v29 = vsel %vm891_vm1, %v2286_v28, 0 }
 0x1e7   : > { %7561 = vst [vmem:[#allocation19_spill] sm:$0xff] %v5830_v29  ;;  %v5833_v31 = vpop.permute.xlu1 %2143 }
 0x1e8   : > { %7562 = vst [vmem:[#allocation20_spill] sm:$0xff] %v5833_v31 }
 0x1e9   : > { %v2288_v33 = vpop.permute.xlu0 %2287 }
 0x1ea   : > { %v5842_v36 = vsel %vm891_vm1, %v2288_v33, 0 }
 0x1eb   : > { %v5839_v34 = vpop.permute.xlu1 %2145  ;;  %7564 = vst [vmem:[#allocation22_spill] sm:$0xff] %v5842_v36 }
 0x1ec   : > { %4612 = vmatmul.mubr.msk.bf16.vlgmr.msra.gmra.mrb[84].mxu0 %vm891_vm1, %v1806_v60  ;;  %7563 = vst [vmem:[#allocation21_spill] sm:$0xff] %v5839_v34 }
 0x1ed   : > { %4682 = vmatpush3.bf16.xpose.msra.mxu0 %v5830_v29  ;;  %4615 = vmatprep.mubr.msk.bf16.mxu0 %vm5292_vm0, %v7521_v4  ;;  %v5983_v48 = vpop.permute.xlu0 %2147 }
 0x1ee   : > { %4683 = vmatprep.subr.bf16.mxu0 %v7521_v4  ;;  %7566 = vst [vmem:[#allocation24_spill] sm:$0xff] %v5983_v48 }
 0x1ef   : > { %v2290_v38 = vpop.permute.xlu1 %2289 }
 0x1f0   : > { %v5850_v39 = vsel %vm891_vm1, %v2290_v38, 0 }
 0x1f1   : > { %7565 = vst [vmem:[#allocation23_spill] sm:$0xff] %v5850_v39 }
 0x1f3   : > { %v5990_v2 = vpop.permute.xlu1 %2149 }
 0x1f4   : > { %4616 = vmatmul.mubr.msk.bf16.gmra.mrb[88].mxu0 %vm891_vm1, %v1808_v3  ;;  %7567 = vst [vmem:[#allocation25_spill] sm:$0xff] %v5990_v2 }
 0x1f5   : > { %4684 = vmatpush3.bf16.xpose.msra.mxu0 %v5842_v36  ;;  %4619 = vmatprep.mubr.msk.bf16.mxu0 %vm5292_vm0, %v7521_v4 }
 0x1f6   : > { %4685 = vmatprep.subr.bf16.mxu0 %v7521_v4 }
 0x1fc   : > { %4620 = vmatmul.mubr.msk.bf16.gmra.mrb[92].mxu0 %vm891_vm1, %v1810_v1 }
 0x1fd   : > { %4686 = vmatpush3.bf16.xpose.msra.mxu0 %v5850_v39  ;;  %4623 = vmatprep.mubr.msk.bf16.mxu0 %vm5292_vm0, %v7521_v4 }
 0x1fe   : > { %4687 = vmatprep.subr.bf16.mxu0 %v7521_v4 }
 0x204   : > { %4624 = vmatmul.mubr.msk.bf16.gmra.mrb[96].mxu0 %vm891_vm1, %v1812_v9 }
 0x205   : > { %4627 = vmatprep.mubr.msk.bf16.mxu0 %vm5292_vm0, %v7521_v4 }
 0x20c   : > { %4628 = vmatmul.mubr.msk.bf16.gmra.mrb[100].mxu0 %vm891_vm1, %v1814_v7 }
 0x20d   : > { %4631 = vmatprep.mubr.msk.bf16.mxu0 %vm5292_vm0, %v7521_v4 }
 0x214   : > { %v968_v41 = vpop.f32.mrb[28].mxu0  ;;  %4632 = vmatmul.mubr.msk.bf16.gmra.mrb[104].mxu0 %vm891_vm1, %v1816_v15 }
 0x215   : > { %v1022_v43 = vmul.f32 0.17677669, %v968_v41  ;;  %v4445_v44 = vpop.f32.mrb[29].mxu0  ;;  %4635 = vmatprep.mubr.msk.bf16.mxu0 %vm5292_vm0, %v7521_v4 }
 0x216   : > { %v971_v45 = vpop.f32.mrb[30].mxu0 }
 0x217   : > { %v1023_v46 = vmul.f32 0.17677669, %v971_v45  ;;  %v4446_v49 = vpop.f32.mrb[31].mxu0  ;;  %v5876_v54 = vadd.f32 %v5870_v40, %v1022_v43 }
 0x219   : > { %v1055_v57 = vsel %vm1054_vm3, %v5876_v54, -inf  ;;  %v5881_v59 = vadd.f32 %v5870_v40, %v1023_v46 }
 0x21a   : > { %1056 = vmax.xlane.f32.xlu0 %v1055_v57 }
 0x21b   : > { %v1058_v53 = vsel %vm1054_vm3, %v5881_v59, -inf }
 0x21c   : > { %4636 = vmatmul.mubr.msk.bf16.gmra.mrb[108].mxu0 %vm891_vm1, %v5794_v10  ;;  %1059 = vmax.xlane.f32.xlu1 %v1058_v53  ;;  %v976_v60 = vpop.f32.mrb[32].mxu0 }
 0x21d   : > { %v1024_v63 = vmul.f32 0.17677669, %v976_v60  ;;  %v4449_v0 = vpop.f32.mrb[33].mxu0  ;;  %4695 = vmatprep.mubr.msk.bf16.mxu0 %vm5292_vm0, %v7521_v4 }
 0x21e   : > { %v979_v1 = vpop.f32.mrb[34].mxu0 }
 0x21f   : > { %v1025_v3 = vmul.f32 0.17677669, %v979_v1  ;;  %v4450_v7 = vpop.f32.mrb[35].mxu0  ;;  %v5890_v8 = vadd.f32 %v5870_v40, %v1024_v63 }
 0x221   : > { %v1061_v9 = vsel %vm1054_vm3, %v5890_v8, -inf  ;;  %v5895_v15 = vadd.f32 %v5870_v40, %v1025_v3 }
 0x222   : > { %1062 = vmax.xlane.f32.xlu0 %v1061_v9 }
 0x223   : > { %v1064_v25 = vsel %vm1054_vm3, %v5895_v15, -inf }
 0x224   : > { %v984_v10 = vpop.f32.mrb[36].mxu0 }
 0x225   : > { %v1026_v18 = vmul.f32 0.17677669, %v984_v10  ;;  %v4453_v21 = vpop.f32.mrb[37].mxu0 }
 0x226   : > { %1065 = vmax.xlane.f32.xlu0 %v1064_v25  ;;  %v987_v28 = vpop.f32.mrb[38].mxu0 }
 0x227   : > { %v1027_v33 = vmul.f32 0.17677669, %v987_v28  ;;  %v4454_v38 = vpop.f32.mrb[39].mxu0  ;;  %v5900_v41 = vadd.f32 %v5870_v40, %v1026_v18 }
 0x229   : > { %v1067_v43 = vsel %vm1054_vm3, %v5900_v41, -inf  ;;  %v5905_v44 = vadd.f32 %v5870_v40, %v1027_v33 }
 0x22a   : > { %1068 = vmax.xlane.f32.xlu1 %v1067_v43 }
 0x22b   : > { %v1070_v45 = vsel %vm1054_vm3, %v5905_v44, -inf }
 0x22c   : > { %1071 = vmax.xlane.f32.xlu0 %v1070_v45  ;;  %v992_v46 = vpop.f32.mrb[40].mxu0 }
 0x22d   : > { %v1028_v49 = vmul.f32 0.17677669, %v992_v46  ;;  %v4457_v57 = vpop.f32.mrb[41].mxu0 }
 0x22e   : > { %v995_v53 = vpop.f32.mrb[42].mxu0 }
 0x22f   : > { %v1029_v60 = vmul.f32 0.17677669, %v995_v53  ;;  %v4458_v63 = vpop.f32.mrb[43].mxu0  ;;  %v5910_v0 = vadd.f32 %v5870_v40, %v1028_v49 }
 0x231   : > { %v1073_v1 = vsel %vm1054_vm3, %v5910_v0, -inf  ;;  %v5915_v3 = vadd.f32 %v5870_v40, %v1029_v60 }
 0x232   : > { %1074 = vmax.xlane.f32.xlu1 %v1073_v1 }
 0x233   : > { %v1076_v7 = vsel %vm1054_vm3, %v5915_v3, -inf }
 0x234   : > { %1077 = vmax.xlane.f32.xlu0 %v1076_v7  ;;  %v1000_v9 = vpop.f32.mrb[44].mxu0 }
 0x235   : > { %v1030_v10 = vmul.f32 0.17677669, %v1000_v9  ;;  %v4461_v18 = vpop.f32.mrb[45].mxu0 }
 0x236   : > { %v1003_v21 = vpop.f32.mrb[46].mxu0 }
 0x237   : > { %v1031_v25 = vmul.f32 0.17677669, %v1003_v21  ;;  %v4462_v28 = vpop.f32.mrb[47].mxu0  ;;  %v5920_v33 = vadd.f32 %v5870_v40, %v1030_v10 }
 0x239   : > { %v1079_v38 = vsel %vm1054_vm3, %v5920_v33, -inf  ;;  %v5925_v43 = vadd.f32 %v5870_v40, %v1031_v25 }
 0x23a   : > { %1080 = vmax.xlane.f32.xlu1 %v1079_v38 }
 0x23b   : > { %v1082_v45 = vsel %vm1054_vm3, %v5925_v43, -inf }
 0x23c   : > { %1083 = vmax.xlane.f32.xlu0 %v1082_v45  ;;  %v1008_v46 = vpop.f32.mrb[48].mxu0 }
 0x23d   : > { %v4465_v49 = vpop.f32.mrb[49].mxu0  ;;  %v1032_v10 = vmul.f32 0.17677669, %v1008_v46 }
 0x23e   : > { %v1011_v57 = vpop.f32.mrb[50].mxu0 }
 0x23f   : > { %v4466_v53 = vpop.f32.mrb[51].mxu0  ;;  %v1033_v9 = vmul.f32 0.17677669, %v1011_v57  ;;  %v5939_v25 = vadd.f32 %v5870_v40, %v1032_v10 }
 0x241   : > { %v5936_v18 = vadd.f32 %v5870_v40, %v1033_v9 }
 0x243   : > { %v1088_v28 = vsel %vm1054_vm3, %v5936_v18, -inf }
 0x244   : > { %v1016_v60 = vpop.f32.mrb[52].mxu0 }
 0x245   : > { %v4469_v63 = vpop.f32.mrb[53].mxu0  ;;  %v1034_v21 = vmul.f32 0.17677669, %v1016_v60 }
 0x246   : > { %v1019_v1 = vpop.f32.mrb[54].mxu0 }
 0x247   : > { %v4470_v7 = vpop.f32.mrb[55].mxu0 }
 0x24b   : > { %2291 = vrot.lane.b32.xlu1 %v5584_v55, %s5295_s18  ;;  %v1085_v55 = vsel %vm1054_vm3, %v5939_v25, -inf }
 0x24f   : > { %2293 = vrot.lane.b32.xlu1 %v5603_v16, %s5295_s18  ;;  %v5946_v16 = vadd.f32 %v5870_v40, %v1034_v21 }
 0x251   : > { %v1091_v38 = vsel %vm1054_vm3, %v5946_v16, -inf }
 0x252   : > { %2151 = vrot.lane.b32.xlu0 %v5723_v51, %s5294_s17 }
 0x271   : > { %1089 = vmax.xlane.f32.xlu0 %v1088_v28 }
 0x273   : > { %1086 = vmax.xlane.f32.xlu1 %v1085_v55 }
 0x277   : > { %1092 = vmax.xlane.f32.xlu1 %v1091_v38 }
 0x287   : > { %v1436_v45 = vpop.f32.mrb[56].mxu0 }
 0x288   : > { %v1490_v46 = vmul.f32 0.17677669, %v1436_v45  ;;  %v4529_v49 = vpop.f32.mrb[57].mxu0 }
 0x289   : > { %v1439_v57 = vpop.f32.mrb[58].mxu0 }
 0x28a   : > { %v1491_v53 = vmul.f32 0.17677669, %v1439_v57  ;;  %v4530_v60 = vpop.f32.mrb[59].mxu0  ;;  %v5951_v63 = vadd.f32 %v5870_v40, %v1490_v46 }
 0x28c   : > { %v1516_v1 = vsel %vm1054_vm3, %v5951_v63, -inf  ;;  %v5956_v7 = vadd.f32 %v5870_v40, %v1491_v53 }
 0x28d   : > { %1517 = vmax.xlane.f32.xlu0 %v1516_v1 }
 0x28e   : > { %v1519_v9 = vsel %vm1054_vm3, %v5956_v7, -inf }
 0x28f   : > { %1520 = vmax.xlane.f32.xlu1 %v1519_v9  ;;  %v1444_v10 = vpop.f32.mrb[60].mxu0 }
 0x290   : > { %v1492_v21 = vmul.f32 0.17677669, %v1444_v10  ;;  %v4533_v28 = vpop.f32.mrb[61].mxu0 }
 0x291   : > { %v1447_v55 = vpop.f32.mrb[62].mxu0 }
 0x292   : > { %v1493_v38 = vmul.f32 0.17677669, %v1447_v55  ;;  %v4534_v45 = vpop.f32.mrb[63].mxu0  ;;  %v5961_v46 = vadd.f32 %v5870_v40, %v1492_v21 }
 0x294   : > { %v1522_v49 = vsel %vm1054_vm3, %v5961_v46, -inf  ;;  %v5966_v57 = vadd.f32 %v5870_v40, %v1493_v38 }
 0x295   : > { %1523 = vmax.xlane.f32.xlu0 %v1522_v49 }
 0x296   : > { %v1525_v53 = vsel %vm1054_vm3, %v5966_v57, -inf }
 0x297   : > { %1526 = vmax.xlane.f32.xlu1 %v1525_v53  ;;  %v1452_v60 = vpop.f32.mrb[64].mxu0 }
 0x298   : > { %v1494_v1 = vmul.f32 0.17677669, %v1452_v60  ;;  %v4537_v9 = vpop.f32.mrb[65].mxu0 }
 0x299   : > { %v1455_v10 = vpop.f32.mrb[66].mxu0 }
 0x29a   : > { %v1495_v28 = vmul.f32 0.17677669, %v1455_v10  ;;  %v4538_v55 = vpop.f32.mrb[67].mxu0  ;;  %v5971_v21 = vadd.f32 %v5870_v40, %v1494_v1 }
 0x29c   : > { %v1528_v45 = vsel %vm1054_vm3, %v5971_v21, -inf  ;;  %v5976_v38 = vadd.f32 %v5870_v40, %v1495_v28 }
 0x29d   : > { %1529 = vmax.xlane.f32.xlu0 %v1528_v45 }
 0x29e   : > { %v1531_v49 = vsel %vm1054_vm3, %v5976_v38, -inf }
 0x29f   : > { %1532 = vmax.xlane.f32.xlu1 %v1531_v49  ;;  %v1460_v53 = vpop.f32.mrb[68].mxu0 }
 0x2a0   : > { %v1496_v60 = vmul.f32 0.17677669, %v1460_v53  ;;  %v4541_v9 = vpop.f32.mrb[69].mxu0 }
 0x2a1   : > { %v1463_v50 = vpop.f32.mrb[70].mxu0 }
 0x2a2   : > { %v1497_v10 = vmul.f32 0.17677669, %v1463_v50  ;;  %v4542_v55 = vpop.f32.mrb[71].mxu0  ;;  %v5981_v1 = vadd.f32 %v5870_v40, %v1496_v60 }
 0x2a4   : > { %v1534_v28 = vsel %vm1054_vm3, %v5981_v1, -inf  ;;  %v5988_v45 = vadd.f32 %v5870_v40, %v1497_v10 }
 0x2a5   : > { %1535 = vmax.xlane.f32.xlu0 %v1534_v28 }
 0x2a6   : > { %v1537_v49 = vsel %vm1054_vm3, %v5988_v45, -inf }
 0x2a7   : > { %v1057_v53 = vpop.xlane.xlu0 %1056  ;;  %1538 = vmax.xlane.f32.xlu1 %v1537_v49  ;;  %v1468_v50 = vpop.f32.mrb[72].mxu0 }
 0x2a8   : > { %v1094_v60 = vsub.f32 %v5876_v54, %v1057_v53  ;;  %v1498_v9 = vmul.f32 0.17677669, %v1468_v50  ;;  %v4545_v55 = vpop.f32.mrb[73].mxu0 }
 0x2a9   : > { %v1060_v4 = vpop.xlane.xlu1 %1059  ;;  %v1471_v47 = vpop.f32.mrb[74].mxu0 }
 0x2aa   : > { %v1107_v51 = vmul.f32 1.442695, %v1094_v60  ;;  %v1095_v6 = vsub.f32 %v5881_v59, %v1060_v4  ;;  %v1499_v10 = vmul.f32 0.17677669, %v1471_v47  ;;  %v4546_v56 = vpop.f32.mrb[75].mxu0  ;;  %v5997_v27 = vadd.f32 %v5870_v40, %v1498_v9 }
 0x2ac   : > { %5008 = vpow2.f32 %v1107_v51  ;;  %v1109_v28 = vmul.f32 1.442695, %v1095_v6  ;;  %v1540_v49 = vsel %vm1054_vm3, %v5997_v27, -inf  ;;  %v6002_v5 = vadd.f32 %v5870_v40, %v1499_v10 }
 0x2ad   : > { %1541 = vmax.xlane.f32.xlu0 %v1540_v49 }
 0x2ae   : > { %5010 = vpow2.f32 %v1109_v28  ;;  %v1543_v54 = vsel %vm1054_vm3, %v6002_v5, -inf }
 0x2af   : > { %v1063_v53 = vpop.xlane.xlu0 %1062  ;;  %1544 = vmax.xlane.f32.xlu1 %v1543_v54  ;;  %v1476_v4 = vpop.f32.mrb[76].mxu0 }
 0x2b0   : > { %v1096_v47 = vsub.f32 %v5890_v8, %v1063_v53  ;;  %v1500_v56 = vmul.f32 0.17677669, %v1476_v4  ;;  %v4549_v59 = vpop.f32.mrb[77].mxu0 }
 0x2b1   : > { %v1479_v51 = vpop.f32.mrb[78].mxu0 }
 0x2b2   : > { %v1111_v6 = vmul.f32 1.442695, %v1096_v47  ;;  %v1501_v50 = vmul.f32 0.17677669, %v1479_v51  ;;  %v4550_v60 = vpop.f32.mrb[79].mxu0  ;;  %v6008_v9 = vadd.f32 %v5870_v40, %v1500_v56 }
 0x2b3   : > { %v1066_v55 = vpop.xlane.xlu0 %1065 }
 0x2b4   : > { %5012 = vpow2.f32 %v1111_v6  ;;  %v1097_v10 = vsub.f32 %v5895_v15, %v1066_v55  ;;  %v1546_v28 = vsel %vm1054_vm3, %v6008_v9, -inf  ;;  %v6014_v49 = vadd.f32 %v5870_v40, %v1501_v50 }
 0x2b5   : > { %1547 = vmax.xlane.f32.xlu0 %v1546_v28 }
 0x2b6   : > { %v6016_v8 = vpop.eup %5008  ;;  %v1113_v54 = vmul.f32 1.442695, %v1097_v10  ;;  %v1549_v53 = vsel %vm1054_vm3, %v6014_v49, -inf }
 0x2b7   : > { %v1069_v4 = vpop.xlane.xlu1 %1068  ;;  %1550 = vmax.xlane.f32.xlu1 %v1549_v53  ;;  %v1484_v47 = vpop.f32.mrb[80].mxu0  ;;  %v1133_v56 = vsel %vm1054_vm3, %v6016_v8, 0.0 }
 0x2b8   : > { %v6022_v15 = vpop.eup %5010  ;;  %5014 = vpow2.f32 %v1113_v54  ;;  %v1098_v59 = vsub.f32 %v5900_v41, %v1069_v4  ;;  %v1502_v51 = vmul.f32 0.17677669, %v1484_v47  ;;  %v4553_v6 = vpop.f32.mrb[81].mxu0 }
 0x2b9   : > { %v1072_v50 = vpop.xlane.xlu0 %1071  ;;  %1134 = vadd.xlane.f32.xlu0 %v1133_v56  ;;  %v1487_v60 = vpop.f32.mrb[82].mxu0  ;;  %v1136_v55 = vsel %vm1054_vm3, %v6022_v15, 0.0 }
 0x2ba   : > { %v1115_v10 = vmul.f32 1.442695, %v1098_v59  ;;  %v1099_v28 = vsub.f32 %v5905_v44, %v1072_v50  ;;  %v4554_v53 = vpop.f32.mrb[83].mxu0  ;;  %v6029_v24 = vadd.f32 %v5870_v40, %v1502_v51 }
 0x2bb   : > { %1137 = vadd.xlane.f32.xlu1 %v1136_v55 }
 0x2bc   : > { %v1117_v42 = vmul.f32 1.442695, %v1099_v28  ;;  %v1552_v41 = vsel %vm1054_vm3, %v6029_v24, -inf  ;;  %5016 = vpow2.f32 %v1115_v10 }
 0x2bd   : > { %1553 = vmax.xlane.f32.xlu0 %v1552_v41 }
 0x2be   : > { %v6033_v54 = vpop.eup %5012  ;;  %5018 = vpow2.f32 %v1117_v42 }
 0x2bf   : > { %v1075_v4 = vpop.xlane.xlu1 %1074  ;;  %v1909_v47 = vpop.f32.mrb[84].mxu0  ;;  %v1139_v56 = vsel %vm1054_vm3, %v6033_v54, 0.0 }
 0x2c0   : > { %v1100_v44 = vsub.f32 %v5910_v0, %v1075_v4  ;;  %v1963_v59 = vmul.f32 0.17677669, %v1909_v47  ;;  %v4613_v51 = vpop.f32.mrb[85].mxu0 }
 0x2c1   : > { %v1078_v6 = vpop.xlane.xlu0 %1077  ;;  %1140 = vadd.xlane.f32.xlu0 %v1139_v56  ;;  %v1912_v50 = vpop.f32.mrb[86].mxu0 }
 0x2c2   : > { %v6038_v60 = vpop.eup %5014  ;;  %v1119_v55 = vmul.f32 1.442695, %v1100_v44  ;;  %v1101_v10 = vsub.f32 %v5915_v3, %v1078_v6  ;;  %v1964_v28 = vmul.f32 0.17677669, %v1912_v50  ;;  %v4614_v53 = vpop.f32.mrb[87].mxu0  ;;  %v6044_v41 = vadd.f32 %v5870_v40, %v1963_v59 }
 0x2c3   : > { %v1142_v42 = vsel %vm1054_vm3, %v6038_v60, 0.0 }
 0x2c4   : > { %v1121_v39 = vmul.f32 1.442695, %v1101_v10  ;;  %1143 = vadd.xlane.f32.xlu1 %v1142_v42  ;;  %v6047_v0 = vadd.f32 %v5870_v40, %v1964_v28  ;;  %5020 = vpow2.f32 %v1119_v55  ;;  %v1989_v44 = vsel %vm1054_vm3, %v6044_v41, -inf }
 0x2c6   : > { %5022 = vpow2.f32 %v1121_v39  ;;  %v1992_v4 = vsel %vm1054_vm3, %v6047_v0, -inf  ;;  %v6051_v47 = vpop.eup %5016 }
 0x2c7   : > { %v1081_v3 = vpop.xlane.xlu1 %1080  ;;  %1993 = vmax.xlane.f32.xlu0 %v1992_v4  ;;  %v1917_v56 = vpop.f32.mrb[88].mxu0  ;;  %v1145_v4 = vsel %vm1054_vm3, %v6051_v47, 0.0 }
 0x2c8   : > { %v6055_v59 = vpop.eup %5018  ;;  %v1102_v51 = vsub.f32 %v5920_v33, %v1081_v3  ;;  %v1965_v6 = vmul.f32 0.17677669, %v1917_v56  ;;  %1990 = vmax.xlane.f32.xlu1 %v1989_v44  ;;  %v4617_v50 = vpop.f32.mrb[89].mxu0 }
 0x2c9   : > { %v1084_v55 = vpop.xlane.xlu0 %1083  ;;  %v1920_v39 = vpop.f32.mrb[90].mxu0  ;;  %v1148_v29 = vsel %vm1054_vm3, %v6055_v59, 0.0 }
 0x2ca   : > { %v1123_v10 = vmul.f32 1.442695, %v1102_v51  ;;  %v1103_v28 = vsub.f32 %v5925_v43, %v1084_v55  ;;  %v1966_v53 = vmul.f32 0.17677669, %v1920_v39  ;;  %v4618_v42 = vpop.f32.mrb[91].mxu0  ;;  %v6064_v33 = vadd.f32 %v5870_v40, %v1965_v6 }
 0x2cb   : > { %v2292_v36 = vpop.permute.xlu1 %2291  ;;  %1146 = vadd.xlane.f32.xlu0 %v1145_v4  ;;  %v7569_v51 = vmov 0.0  }
 0x2cc   : > { %v1125_v3 = vmul.f32 1.442695, %v1103_v28  ;;  %v6067_v56 = vsel %vm891_vm1, %v2292_v36, 0  ;;  %1149 = vadd.xlane.f32.xlu1 %v1148_v29  ;;  %v6070_v43 = vadd.f32 %v5870_v40, %v1966_v53  ;;  %5024 = vpow2.f32 %v1123_v10 }
 0x2cd   : > { %7568 = vst [vmem:[#allocation26_spill] sm:$0xff] %v6067_v56  ;;  %4688 = vmatpush3.bf16.xpose.msra.mxu0 %v6067_v56  ;;  %v1995_v36 = vsel %vm1054_vm3, %v6064_v33, -inf  ;;  %v6119_v12 = vpop.permute.xlu0 %2151 }
 0x2ce   : > { %5026 = vpow2.f32 %v1125_v3  ;;  %v1998_v44 = vsel %vm1054_vm3, %v6070_v43, -inf  ;;  %4689 = vmatprep.subr.bf16.mxu0 %v7569_v51  ;;  %v6076_v50 = vpop.eup %5020 }
 0x2cf   : > { %1999 = vmax.xlane.f32.xlu0 %v1998_v44  ;;  %v1925_v6 = vpop.f32.mrb[92].mxu0  ;;  %v2294_v10 = vpop.permute.xlu1 %2293  ;;  %v1151_v3 = vsel %vm1054_vm3, %v6076_v50, 0.0 }
 0x2d0   : > { %v6080_v29 = vpop.eup %5022  ;;  %v1967_v55 = vmul.f32 0.17677669, %v1925_v6  ;;  %1996 = vmax.xlane.f32.xlu1 %v1995_v36  ;;  %v4621_v39 = vpop.f32.mrb[93].mxu0  ;;  %v6090_v56 = vsel %vm891_vm1, %v2294_v10, 0 }
 0x2d1   : > { %v1928_v28 = vpop.f32.mrb[94].mxu0  ;;  %v1154_v53 = vsel %vm1054_vm3, %v6080_v29, 0.0  ;;  %7570 = vst [vmem:[#allocation27_spill] sm:$0xff] %v6090_v56 }
 0x2d2   : > { %v1968_v42 = vmul.f32 0.17677669, %v1928_v28  ;;  %v4622_v4 = vpop.f32.mrb[95].mxu0  ;;  %v6087_v44 = vadd.f32 %v5870_v40, %v1967_v55 }
 0x2d3   : > { %1155 = vadd.xlane.f32.xlu0 %v1154_v53 }
 0x2d4   : > { %1152 = vadd.xlane.f32.xlu1 %v1151_v3  ;;  %v6093_v6 = vadd.f32 %v5870_v40, %v1968_v42  ;;  %v2001_v55 = vsel %vm1054_vm3, %v6087_v44, -inf }
 0x2d5   : > { %4690 = vmatpush3.bf16.xpose.msra.mxu0 %v6090_v56 }
 0x2d6   : > { %v2004_v36 = vsel %vm1054_vm3, %v6093_v6, -inf  ;;  %4691 = vmatprep.subr.bf16.mxu0 %v7569_v51  ;;  %v6099_v39 = vpop.eup %5024 }
 0x2d7   : > { %2005 = vmax.xlane.f32.xlu0 %v2004_v36  ;;  %v1933_v28 = vpop.f32.mrb[96].mxu0  ;;  %v1157_v36 = vsel %vm1054_vm3, %v6099_v39, 0.0 }
 0x2d8   : > { %v6103_v10 = vpop.eup %5026  ;;  %v1969_v53 = vmul.f32 0.17677669, %v1933_v28  ;;  %2002 = vmax.xlane.f32.xlu1 %v2001_v55  ;;  %v4625_v42 = vpop.f32.mrb[97].mxu0 }
 0x2d9   : > { %v1936_v4 = vpop.f32.mrb[98].mxu0  ;;  %v1160_v3 = vsel %vm1054_vm3, %v6103_v10, 0.0 }
 0x2da   : > { %v1970_v56 = vmul.f32 0.17677669, %v1936_v4  ;;  %v4626_v17 = vpop.f32.mrb[99].mxu0  ;;  %v6108_v35 = vadd.f32 %v5870_v40, %v1969_v53 }
 0x2db   : > { %1161 = vadd.xlane.f32.xlu0 %v1160_v3 }
 0x2dc   : > { %1158 = vadd.xlane.f32.xlu1 %v1157_v36  ;;  %v6113_v13 = vadd.f32 %v5870_v40, %v1970_v56  ;;  %v2007_v28 = vsel %vm1054_vm3, %v6108_v35, -inf }
 0x2de   : > { %v2010_v55 = vsel %vm1054_vm3, %v6113_v13, -inf }
 0x2df   : > { %2008 = vmax.xlane.f32.xlu0 %v2007_v28  ;;  %v1941_v42 = vpop.f32.mrb[100].mxu0 }
 0x2e0   : > { %2011 = vmax.xlane.f32.xlu1 %v2010_v55  ;;  %v4629_v17 = vpop.f32.mrb[101].mxu0  ;;  %v1971_v61 = vmul.f32 0.17677669, %v1941_v42 }
 0x2e1   : > { %v1944_v53 = vpop.f32.mrb[102].mxu0 }
 0x2e2   : > { %v4630_v4 = vpop.f32.mrb[103].mxu0 }
 0x2e7   : > { %v1949_v3 = vpop.f32.mrb[104].mxu0 }
 0x2e8   : > { %v4633_v52 = vpop.f32.mrb[105].mxu0 }
 0x2e9   : > { %v1952_v30 = vpop.f32.mrb[106].mxu0 }
 0x2ea   : > { %v4634_v2 = vpop.f32.mrb[107].mxu0 }
 0x2ef   : > { %v1957_v36 = vpop.f32.mrb[108].mxu0 }
 0x2f0   : > { %v4637_v48 = vpop.f32.mrb[109].mxu0 }
 0x2f1   : > { %v1960_v56 = vpop.f32.mrb[110].mxu0  ;;  %v1972_v48 = vmul.f32 0.17677669, %v1944_v53 }
 0x2f2   : > { %v4638_v34 = vpop.f32.mrb[111].mxu0  ;;  %v1973_v56 = vmul.f32 0.17677669, %v1949_v3 }
 0x2f4   : > { %v6141_v53 = vadd.f32 %v5870_v40, %v1973_v56 }
 0x2fe   : > { %v1090_v31 = vpop.xlane.xlu0 %1089 }
 0x2ff   : > { %v1105_v26 = vsub.f32 %v5936_v18, %v1090_v31 }
 0x300   : > { %v1087_v32 = vpop.xlane.xlu1 %1086 }
 0x301   : > { %v1129_v28 = vmul.f32 1.442695, %v1105_v26  ;;  %v1104_v55 = vsub.f32 %v5939_v25, %v1087_v32  ;;  %v6129_v26 = vadd.f32 %v5870_v40, %v1971_v61  ;;  %v6136_v25 = vadd.f32 %v5870_v40, %v1972_v48 }
 0x302   : > { %v1974_v61 = vmul.f32 0.17677669, %v1952_v30 }
 0x303   : > { %5028 = vpow2.f32 %v1129_v28  ;;  %v1127_v17 = vmul.f32 1.442695, %v1104_v55  ;;  %v2013_v42 = vsel %vm1054_vm3, %v6129_v26, -inf  ;;  %v2016_v3 = vsel %vm1054_vm3, %v6136_v25, -inf }
 0x304   : > { %v1093_v4 = vpop.xlane.xlu1 %1092  ;;  %v2019_v55 = vsel %vm1054_vm3, %v6141_v53, -inf }
 0x305   : > { %5030 = vpow2.f32 %v1127_v17  ;;  %v1106_v52 = vsub.f32 %v5946_v16, %v1093_v4  ;;  %v1975_v16 = vmul.f32 0.17677669, %v1957_v36  ;;  %v6153_v36 = vadd.f32 %v5870_v40, %v1974_v61 }
 0x307   : > { %v1131_v2 = vmul.f32 1.442695, %v1106_v52  ;;  %v6150_v17 = vadd.f32 %v5870_v40, %v1975_v16  ;;  %v2022_v56 = vsel %vm1054_vm3, %v6153_v36, -inf }
 0x309   : > { %5032 = vpow2.f32 %v1131_v2  ;;  %v2025_v52 = vsel %vm1054_vm3, %v6150_v17, -inf }
 0x30d   : > { %v6124_v34 = vpop.eup %5028 }
 0x30e   : > { %v1166_v31 = vsel %vm1054_vm3, %v6124_v34, 0.0 }
 0x30f   : > { %v6131_v32 = vpop.eup %5030  ;;  %1167 = vadd.xlane.f32.xlu0 %v1166_v31 }
 0x310   : > { %v1163_v18 = vsel %vm1054_vm3, %v6131_v32, 0.0 }
 0x311   : > { %1164 = vadd.xlane.f32.xlu1 %v1163_v18 }
 0x313   : > { %2014 = vmax.xlane.f32.xlu0 %v2013_v42  ;;  %v6145_v28 = vpop.eup %5032 }
 0x314   : > { %v1169_v4 = vsel %vm1054_vm3, %v6145_v28, 0.0 }
 0x315   : > { %2017 = vmax.xlane.f32.xlu1 %v2016_v3 }
 0x317   : > { %2020 = vmax.xlane.f32.xlu0 %v2019_v55 }
 0x319   : > { %1170 = vadd.xlane.f32.xlu1 %v1169_v4 }
 0x31a   : > { %v1518_v30 = vpop.xlane.xlu0 %1517 }
 0x31b   : > { %v1555_v2 = vsub.f32 %v5951_v63, %v1518_v30  ;;  %2026 = vmax.xlane.f32.xlu0 %v2025_v52 }
 0x31c   : > { %v1521_v48 = vpop.xlane.xlu1 %1520 }
 0x31d   : > { %v1568_v31 = vmul.f32 1.442695, %v1555_v2  ;;  %v1556_v18 = vsub.f32 %v5956_v7, %v1521_v48  ;;  %2023 = vmax.xlane.f32.xlu1 %v2022_v56 }
 0x31f   : > { %5034 = vpow2.f32 %v1568_v31  ;;  %v1570_v40 = vmul.f32 1.442695, %v1556_v18 }
 0x321   : > { %5036 = vpow2.f32 %v1570_v40 }
 0x322   : > { %v1524_v16 = vpop.xlane.xlu0 %1523 }
 0x323   : > { %v1557_v42 = vsub.f32 %v5961_v46, %v1524_v16 }
 0x324   : > { %v1527_v61 = vpop.xlane.xlu1 %1526 }
 0x325   : > { %v1572_v3 = vmul.f32 1.442695, %v1557_v42  ;;  %v1558_v55 = vsub.f32 %v5966_v57, %v1527_v61 }
 0x327   : > { %5038 = vpow2.f32 %v1572_v3  ;;  %v1574_v63 = vmul.f32 1.442695, %v1558_v55 }
 0x329   : > { %v6165_v4 = vpop.eup %5034  ;;  %5040 = vpow2.f32 %v1574_v63 }
 0x32a   : > { %v1530_v30 = vpop.xlane.xlu0 %1529  ;;  %v1594_v7 = vsel %vm1054_vm3, %v6165_v4, 0.0 }
 0x32b   : > { %v6169_v52 = vpop.eup %5036  ;;  %v1559_v2 = vsub.f32 %v5971_v21, %v1530_v30  ;;  %1595 = vadd.xlane.f32.xlu0 %v1594_v7 }
 0x32c   : > { %v1533_v48 = vpop.xlane.xlu1 %1532  ;;  %v1597_v46 = vsel %vm1054_vm3, %v6169_v52, 0.0 }
 0x32d   : > { %v1576_v56 = vmul.f32 1.442695, %v1559_v2  ;;  %v1560_v57 = vsub.f32 %v5976_v38, %v1533_v48  ;;  %1598 = vadd.xlane.f32.xlu1 %v1597_v46 }
 0x32f   : > { %5042 = vpow2.f32 %v1576_v56  ;;  %v1578_v31 = vmul.f32 1.442695, %v1560_v57 }
 0x331   : > { %v6175_v18 = vpop.eup %5038  ;;  %5044 = vpow2.f32 %v1578_v31 }
 0x332   : > { %v1536_v40 = vpop.xlane.xlu0 %1535  ;;  %v1600_v16 = vsel %vm1054_vm3, %v6175_v18, 0.0 }
 0x333   : > { %v6179_v42 = vpop.eup %5040  ;;  %v1561_v21 = vsub.f32 %v5981_v1, %v1536_v40  ;;  %1601 = vadd.xlane.f32.xlu1 %v1600_v16 }
 0x334   : > { %v1539_v61 = vpop.xlane.xlu1 %1538  ;;  %v1603_v3 = vsel %vm1054_vm3, %v6179_v42, 0.0 }
 0x335   : > { %v1580_v38 = vmul.f32 1.442695, %v1561_v21  ;;  %v1562_v55 = vsub.f32 %v5988_v45, %v1539_v61  ;;  %1604 = vadd.xlane.f32.xlu0 %v1603_v3 }
 0x337   : > { %5046 = vpow2.f32 %v1580_v38  ;;  %v1582_v63 = vmul.f32 1.442695, %v1562_v55 }
 0x339   : > { %v6185_v30 = vpop.eup %5042  ;;  %5048 = vpow2.f32 %v1582_v63 }
 0x33a   : > { %v1542_v7 = vpop.xlane.xlu0 %1541  ;;  %v1606_v2 = vsel %vm1054_vm3, %v6185_v30, 0.0 }
 0x33b   : > { %v6189_v48 = vpop.eup %5044  ;;  %v1563_v1 = vsub.f32 %v5997_v27, %v1542_v7  ;;  %1607 = vadd.xlane.f32.xlu1 %v1606_v2 }
 0x33c   : > { %v1545_v46 = vpop.xlane.xlu1 %1544  ;;  %v1609_v56 = vsel %vm1054_vm3, %v6189_v48, 0.0 }
 0x33d   : > { %v1584_v45 = vmul.f32 1.442695, %v1563_v1  ;;  %v1564_v57 = vsub.f32 %v6002_v5, %v1545_v46  ;;  %1610 = vadd.xlane.f32.xlu0 %v1609_v56 }
 0x33f   : > { %5050 = vpow2.f32 %v1584_v45  ;;  %v1586_v31 = vmul.f32 1.442695, %v1564_v57 }
 0x341   : > { %v6195_v40 = vpop.eup %5046  ;;  %5052 = vpow2.f32 %v1586_v31 }
 0x342   : > { %v1548_v16 = vpop.xlane.xlu0 %1547  ;;  %v1612_v21 = vsel %vm1054_vm3, %v6195_v40, 0.0 }
 0x343   : > { %v6199_v61 = vpop.eup %5048  ;;  %v1565_v27 = vsub.f32 %v6008_v9, %v1548_v16  ;;  %1613 = vadd.xlane.f32.xlu1 %v1612_v21 }
 0x344   : > { %v1551_v3 = vpop.xlane.xlu1 %1550  ;;  %v1615_v38 = vsel %vm1054_vm3, %v6199_v61, 0.0 }
 0x345   : > { %v1588_v5 = vmul.f32 1.442695, %v1565_v27  ;;  %v1566_v55 = vsub.f32 %v6014_v49, %v1551_v3  ;;  %1616 = vadd.xlane.f32.xlu0 %v1615_v38 }
 0x346   : > { %v1135_v63 = vpop.xlane.xlu0 %1134 }
 0x347   : > { %5054 = vpow2.f32 %v1588_v5  ;;  %v1590_v7 = vmul.f32 1.442695, %v1566_v55 }
 0x348   : > { %5056 = vrcp.f32 %v1135_v63  ;;  %v1138_v2 = vpop.xlane.xlu1 %1137 }
 0x349   : > { %v6205_v1 = vpop.eup %5050  ;;  %5058 = vpow2.f32 %v1590_v7 }
 0x34a   : > { %5060 = vrcp.f32 %v1138_v2  ;;  %v1554_v46 = vpop.xlane.xlu0 %1553  ;;  %v1618_v9 = vsel %vm1054_vm3, %v6205_v1, 0.0 }
 0x34b   : > { %v6209_v56 = vpop.eup %5052  ;;  %v1567_v45 = vsub.f32 %v6029_v24, %v1554_v46  ;;  %1619 = vadd.xlane.f32.xlu0 %v1618_v9 }
 0x34c   : > { %v1621_v31 = vsel %vm1054_vm3, %v6209_v56, 0.0 }
 0x34d   : > { %v1592_v49 = vmul.f32 1.442695, %v1567_v45 }
 0x34e   : > { %v1141_v57 = vpop.xlane.xlu0 %1140 }
 0x34f   : > { %5062 = vpow2.f32 %v1592_v49  ;;  %1622 = vadd.xlane.f32.xlu0 %v1621_v31 }
 0x350   : > { %5064 = vrcp.f32 %v1141_v57 }
 0x351   : > { %v6214_v16 = vpop.eup %5054  ;;  %v1144_v21 = vpop.xlane.xlu1 %1143 }
 0x352   : > { %v5057_v27 = vpop.eup %5056  ;;  %5066 = vrcp.f32 %v1144_v21  ;;  %v1624_v3 = vsel %vm1054_vm3, %v6214_v16, 0.0 }
 0x353   : > { %v6218_v38 = vpop.eup %5058  ;;  %1625 = vadd.xlane.f32.xlu0 %v1624_v3  ;;  %v1185_v55 = vmul.f32 %v5057_v27, %v6016_v8 }
 0x354   : > { %v5061_v24 = vpop.eup %5060  ;;  %v6220_v5 = vpop.xlane.xlu0 %1993  ;;  %v1627_v46 = vsel %vm1054_vm3, %v6218_v38, 0.0 }
 0x355   : > { %v1186_v63 = vmul.f32 %v5061_v24, %v6022_v15  ;;  %v1991_v7 = vpop.xlane.xlu1 %1990 }
 0x356   : > { %v2028_v2 = vsub.f32 %v6044_v41, %v1991_v7 }
 0x357   : > { %v1198_v9 = vpack.c.bf16 %v1186_v63, %v1185_v55  ;;  %1628 = vadd.xlane.f32.xlu0 %v1627_v46 }
 0x358   : > { %v2041_v45 = vmul.f32 1.442695, %v2028_v2  ;;  %v1147_v49 = vpop.xlane.xlu0 %1146 }
 0x359   : > { %v6227_v57 = vpop.eup %5062  ;;  %4486 = vmatmul.mubr.msk.bf16.vlgmr.msra.gmra.mrb[28].mxu1 %vm1054_vm3, %v1198_v9  ;;  %v1150_v31 = vpop.xlane.xlu1 %1149 }
 0x35a   : > { %v5065_v21 = vpop.eup %5064  ;;  %5068 = vpow2.f32 %v2041_v45  ;;  %4556 = vmatpush3.bf16.msra.mxu1 %v5800_v19  ;;  %v1630_v8 = vsel %vm1054_vm3, %v6227_v57, 0.0  ;;  %4489 = vmatprep.mubr.msk.bf16.mxu1 %vm5292_vm0, %v7569_v51 }
 0x35b   : > { %5070 = vrcp.f32 %v1147_v49  ;;  %4557 = vmatprep.subr.bf16.mxu1 %v7569_v51  ;;  %1631 = vadd.xlane.f32.xlu1 %v1630_v8  ;;  %v1187_v3 = vmul.f32 %v5065_v21, %v6033_v54  ;;  %v1715_v21 = vsel %vm1226_vm2, %v5818_v23, 0 }
 0x35c   : > { %v5067_v15 = vpop.eup %5066  ;;  %5072 = vrcp.f32 %v1150_v31  ;;  %v6236_v41 = vpop.xlane.xlu0 %1999 }
 0x35d   : > { %v1997_v27 = vpop.xlane.xlu1 %1996  ;;  %v1188_v24 = vmul.f32 %v5067_v15, %v6038_v60 }
 0x35e   : > { %4558 = vmatpush3.bf16.msra.mxu1 %v5796_v11 }
 0x35f   : > { %4559 = vmatprep.subr.bf16.mxu1 %v7569_v51  ;;  %v1199_v19 = vpack.c.bf16 %v1188_v24, %v1187_v3  ;;  %v2030_v24 = vsub.f32 %v6064_v33, %v1997_v27 }
 0x360   : > { %v1156_v55 = vpop.xlane.xlu0 %1155 }
 0x361   : > { %4490 = vmatmul.mubr.msk.bf16.gmra.mrb[32].mxu1 %vm1054_vm3, %v1199_v19  ;;  %v1153_v63 = vpop.xlane.xlu1 %1152  ;;  %5074 = vrcp.f32 %v1156_v55  ;;  %v2045_v19 = vmul.f32 1.442695, %v2030_v24  ;;  %v2031_v55 = vsub.f32 %v6070_v43, %v6236_v41 }
 0x362   : > { %4560 = vmatpush3.bf16.msra.mxu1 %v5807_v14  ;;  %4493 = vmatprep.mubr.msk.bf16.mxu1 %vm5292_vm0, %v7569_v51  ;;  %5076 = vrcp.f32 %v1153_v63 }
 0x363   : > { %4561 = vmatprep.subr.bf16.mxu1 %v7569_v51  ;;  %v2047_v63 = vmul.f32 1.442695, %v2031_v55 }
 0x364   : > { %v6247_v54 = vpop.eup %5068  ;;  %v2006_v60 = vpop.xlane.xlu0 %2005 }
 0x365   : > { %v5071_v11 = vpop.eup %5070  ;;  %v2003_v7 = vpop.xlane.xlu1 %2002  ;;  %v2067_v2 = vsel %vm1054_vm3, %v6247_v54, 0.0 }
 0x366   : > { %v5073_v46 = vpop.eup %5072  ;;  %4562 = vmatpush3.bf16.msra.mxu1 %v5805_v62  ;;  %2068 = vadd.xlane.f32.xlu0 %v2067_v2  ;;  %v1189_v14 = vmul.f32 %v5071_v11, %v6051_v47 }
 0x367   : > { %4563 = vmatprep.subr.bf16.mxu1 %v7569_v51  ;;  %v1190_v9 = vmul.f32 %v5073_v46, %v6055_v59 }
 0x368   : > { %v1162_v45 = vpop.xlane.xlu0 %1161 }
 0x369   : > { %v1200_v49 = vpack.c.bf16 %v1190_v9, %v1189_v14  ;;  %v1159_v31 = vpop.xlane.xlu1 %1158  ;;  %5078 = vrcp.f32 %v1162_v45 }
 0x36a   : > { %4564 = vmatpush3.bf16.msra.mxu1 %v5809_v20  ;;  %5080 = vrcp.f32 %v1159_v31 }
 0x36b   : > { %4494 = vmatmul.mubr.msk.bf16.gmra.mrb[36].mxu1 %vm1054_vm3, %v1200_v49  ;;  %4565 = vmatprep.subr.bf16.mxu1 %v7569_v51  ;;  %v5075_v62 = vpop.eup %5074 }
 0x36c   : > { %2297 = vrot.lane.b32.xlu1 %v5634_v58, %s5295_s18  ;;  %4497 = vmatprep.mubr.msk.bf16.mxu1 %vm5292_vm0, %v7569_v51  ;;  %v5077_v47 = vpop.eup %5076  ;;  %v1192_v59 = vmul.f32 %v5075_v62, %v6080_v29 }
 0x36d   : > { %v1191_v20 = vmul.f32 %v5077_v47, %v6076_v50  ;;  %v2029_v50 = vsub.f32 %v6047_v0, %v6220_v5  ;;  %v2012_v2 = vpop.xlane.xlu1 %2011 }
 0x36e   : > { %4566 = vmatpush3.bf16.msra.mxu1 %v5813_v22 }
 0x36f   : > { %4567 = vmatprep.subr.bf16.mxu1 %v7569_v51  ;;  %v1201_v8 = vpack.c.bf16 %v1192_v59, %v1191_v20  ;;  %v2043_v23 = vmul.f32 1.442695, %v2029_v50 }
 0x371   : > { %5082 = vpow2.f32 %v2043_v23 }
 0x372   : > { %4568 = vmatpush3.bf16.msra.mxu1 %v1715_v21  ;;  %5084 = vpow2.f32 %v2045_v19 }
 0x373   : > { %4498 = vmatmul.mubr.msk.bf16.gmra.mrb[40].mxu1 %vm1054_vm3, %v1201_v8  ;;  %4639 = vmatprep.subr.bf16.mxu1 %v7569_v51  ;;  %v5079_v58 = vpop.eup %5078 }
 0x374   : > { %4501 = vmatprep.mubr.msk.bf16.mxu1 %vm5292_vm0, %v7569_v51  ;;  %v5081_v22 = vpop.eup %5080  ;;  %v1194_v29 = vmul.f32 %v5079_v58, %v6103_v10  ;;  %v2032_v10 = vsub.f32 %v6087_v44, %v2003_v7  ;;  %v2035_v44 = vsub.f32 %v6113_v13, %v2012_v2 }
 0x375   : > { %v1193_v15 = vmul.f32 %v5081_v22, %v6099_v39  ;;  %v2009_v39 = vpop.xlane.xlu0 %2008 }
 0x376   : > { %v2049_v0 = vmul.f32 1.442695, %v2032_v10  ;;  %v2034_v5 = vsub.f32 %v6108_v35, %v2009_v39  ;;  %v2055_v35 = vmul.f32 1.442695, %v2035_v44 }
 0x377   : > { %v1202_v3 = vpack.c.bf16 %v1194_v29, %v1193_v15 }
 0x378   : > { %5086 = vpow2.f32 %v2049_v0  ;;  %v2053_v11 = vmul.f32 1.442695, %v2034_v5 }
 0x379   : > { %5088 = vpow2.f32 %v2047_v63  ;;  %v7571_v63 = vld [vmem:[#allocation3_spill] sm:$0xff] }
 0x37a   : > { %5090 = vpow2.f32 %v2053_v11 }
 0x37b   : > { %4502 = vmatmul.mubr.msk.bf16.gmra.mrb[44].mxu1 %vm1054_vm3, %v1202_v3  ;;  %v6287_v46 = vpop.eup %5082 }
 0x37c   : > { %2295 = vrot.lane.b32.xlu0 %v5622_v37, %s5295_s18  ;;  %4505 = vmatprep.mubr.msk.bf16.mxu1 %vm5292_vm0, %v7569_v51  ;;  %v2033_v37 = vsub.f32 %v6093_v6, %v2006_v60  ;;  %v2070_v43 = vsel %vm1054_vm3, %v6287_v46, 0.0  ;;  %v6292_v41 = vpop.eup %5084 }
 0x37d   : > { %v2073_v6 = vsel %vm1054_vm3, %v6292_v41, 0.0 }
 0x37e   : > { %v2051_v33 = vmul.f32 1.442695, %v2033_v37 }
 0x380   : > { %5092 = vpow2.f32 %v2051_v33 }
 0x381   : > { %5094 = vpow2.f32 %v2055_v35 }
 0x382   : > { %v6296_v27 = vpop.eup %5086 }
 0x383   : > { %v6298_v60 = vpop.eup %5088  ;;  %v2079_v13 = vsel %vm1054_vm3, %v6296_v27, 0.0 }
 0x384   : > { %v6302_v7 = vpop.eup %5090  ;;  %v2076_v14 = vsel %vm1054_vm3, %v6298_v60, 0.0 }
 0x385   : > { %v2085_v45 = vsel %vm1054_vm3, %v6302_v7, 0.0 }
 0x38a   : > { %v6306_v9 = vpop.eup %5092 }
 0x38b   : > { %v2082_v62 = vsel %vm1054_vm3, %v6306_v9, 0.0  ;;  %v6312_v47 = vpop.eup %5094 }
 0x38c   : > { %v2088_v8 = vsel %vm1054_vm3, %v6312_v47, 0.0 }
 0x390   : > { %2071 = vadd.xlane.f32.xlu1 %v2070_v43 }
 0x394   : > { %2074 = vadd.xlane.f32.xlu1 %v2073_v6 }
 0x398   : > { %2080 = vadd.xlane.f32.xlu1 %v2079_v13 }
 0x39b   : > { %2077 = vadd.xlane.f32.xlu0 %v2076_v14 }
 0x39c   : > { %v1168_v49 = vpop.xlane.xlu0 %1167  ;;  %2086 = vadd.xlane.f32.xlu1 %v2085_v45 }
 0x39d   : > { %5096 = vrcp.f32 %v1168_v49 }
 0x39e   : > { %v1165_v31 = vpop.xlane.xlu1 %1164 }
 0x39f   : > { %5098 = vrcp.f32 %v1165_v31  ;;  %2083 = vadd.xlane.f32.xlu0 %v2082_v62 }
 0x3a0   : > { %v2015_v59 = vpop.xlane.xlu0 %2014 }
 0x3a1   : > { %v2036_v20 = vsub.f32 %v6129_v26, %v2015_v59 }
 0x3a2   : > { %v2018_v21 = vpop.xlane.xlu1 %2017 }
 0x3a3   : > { %v2057_v58 = vmul.f32 1.442695, %v2036_v20  ;;  %v2037_v22 = vsub.f32 %v6136_v25, %v2018_v21  ;;  %2089 = vadd.xlane.f32.xlu0 %v2088_v8 }
 0x3a4   : > { %v2021_v29 = vpop.xlane.xlu0 %2020 }
 0x3a5   : > { %5100 = vpow2.f32 %v2057_v58  ;;  %v2059_v15 = vmul.f32 1.442695, %v2037_v22  ;;  %v2038_v43 = vsub.f32 %v6141_v53, %v2021_v29  ;;  %v7572_v22 = vld [vmem:[#allocation17_spill] sm:$0xff] }
 0x3a6   : > { %v1171_v3 = vpop.xlane.xlu1 %1170 }
 0x3a7   : > { %v5097_v50 = vpop.eup %5096  ;;  %5102 = vpow2.f32 %v2059_v15  ;;  %v2061_v13 = vmul.f32 1.442695, %v2038_v43  ;;  %v2181_v43 = vsel %vm1226_vm2, %v6119_v12, 0 }
 0x3a8   : > { %5104 = vrcp.f32 %v1171_v3  ;;  %v2027_v23 = vpop.xlane.xlu0 %2026  ;;  %v1196_v39 = vmul.f32 %v5097_v50, %v6124_v34  ;;  %v7573_v3 = vld [vmem:[#allocation18_spill] sm:$0xff] }
 0x3a9   : > { %v5099_v24 = vpop.eup %5098  ;;  %v2040_v19 = vsub.f32 %v6150_v17, %v2027_v23 }
 0x3aa   : > { %v2024_v26 = vpop.xlane.xlu1 %2023  ;;  %v1195_v10 = vmul.f32 %v5099_v24, %v6131_v32 }
 0x3ab   : > { %v2039_v55 = vsub.f32 %v6153_v36, %v2024_v26  ;;  %v2065_v0 = vmul.f32 1.442695, %v2040_v19 }
 0x3ac   : > { %v1203_v25 = vpack.c.bf16 %v1196_v39, %v1195_v10  ;;  %v7574_v10 = vld [vmem:[#allocation20_spill] sm:$0xff] }
 0x3ad   : > { %v2063_v5 = vmul.f32 1.442695, %v2039_v55  ;;  %2271 = vrot.lane.b32.xlu1 %v7571_v63, %s5295_s18 }
 0x3ae   : > { %4506 = vmatmul.mubr.msk.bf16.gmra.mrb[48].mxu1 %vm1054_vm3, %v1203_v25  ;;  %v7576_v25 = vld [vmem:[#allocation21_spill] sm:$0xff] }
 0x3af   : > { %v6325_v37 = vpop.eup %5100  ;;  %5106 = vpow2.f32 %v2063_v5  ;;  %4509 = vmatprep.mubr.msk.bf16.mxu1 %vm5292_vm0, %v7569_v51 }
 0x3b0   : > { %v2091_v32 = vsel %vm1054_vm3, %v6325_v37, 0.0  ;;  %5108 = vpow2.f32 %v2065_v0 }
 0x3b1   : > { %v6331_v34 = vpop.eup %5102  ;;  %2092 = vadd.xlane.f32.xlu0 %v2091_v32  ;;  %v7577_v32 = vld [vmem:[#allocation24_spill] sm:$0xff] }
 0x3b2   : > { %v5105_v17 = vpop.eup %5104  ;;  %v2094_v11 = vsel %vm1054_vm3, %v6331_v34, 0.0 }
 0x3b3   : > { %v1197_v36 = vmul.f32 %v5105_v17, %v6145_v28 }
 0x3b5   : > { %2095 = vadd.xlane.f32.xlu0 %v2094_v11  ;;  %v1204_v2 = vpack.c.bf16 %v1197_v36, %v1197_v36  ;;  %v7578_v11 = vld [vmem:[#allocation25_spill] sm:$0xff] }
 0x3b7   : > { %4510 = vmatmul.mubr.msk.bf16.gmra.mrb[52].mxu1 %vm1054_vm3, %v1204_v2 }
 0x3b8   : > { %v1596_v33 = vpop.xlane.xlu0 %1595  ;;  %4569 = vmatprep.mubr.msk.bf16.mxu1 %vm5292_vm0, %v7569_v51 }
 0x3b9   : > { %v6339_v44 = vpop.eup %5106  ;;  %5110 = vrcp.f32 %v1596_v33 }
 0x3ba   : > { %v1599_v35 = vpop.xlane.xlu1 %1598  ;;  %v2100_v28 = vsel %vm1054_vm3, %v6339_v44, 0.0  ;;  %v6344_v6 = vpop.eup %5108 }
 0x3bb   : > { %5112 = vrcp.f32 %v1599_v35  ;;  %2101 = vadd.xlane.f32.xlu0 %v2100_v28  ;;  %v2103_v14 = vsel %vm1054_vm3, %v6344_v6, 0.0  ;;  %v7579_v35 = vld [vmem:[#allocation6_spill] sm:$0xff]  ;;  %v7580_v28 = vld [vmem:[#allocation8_spill] sm:$0xff] }
 0x3bf   : > { %2104 = vadd.xlane.f32.xlu0 %v2103_v14 }
 0x3c0   : > { %v1602_v45 = vpop.xlane.xlu1 %1601 }
 0x3c1   : > { %5114 = vrcp.f32 %v1602_v45 }
 0x3c2   : > { %5116 = vpow2.f32 %v2061_v13  ;;  %v1605_v49 = vpop.xlane.xlu0 %1604 }
 0x3c3   : > { %v5111_v31 = vpop.eup %5110  ;;  %5118 = vrcp.f32 %v1605_v49  ;;  %v7581_v49 = vld [vmem:[#allocation10_spill] sm:$0xff] }
 0x3c4   : > { %v1646_v62 = vmul.f32 %v5111_v31, %v6165_v4 }
 0x3c5   : > { %v5113_v53 = vpop.eup %5112 }
 0x3c6   : > { %v1647_v59 = vmul.f32 %v5113_v53, %v6169_v52 }
 0x3c8   : > { %v1659_v20 = vpack.c.bf16 %v1647_v59, %v1646_v62  ;;  %v1608_v21 = vpop.xlane.xlu1 %1607  ;;  %v7582_v62 = vld [vmem:[#allocation12_spill] sm:$0xff] }
 0x3c9   : > { %5120 = vrcp.f32 %v1608_v21 }
 0x3ca   : > { %4570 = vmatmul.mubr.msk.bf16.vlgmr.msra.gmra.mrb[56].mxu1 %vm1054_vm3, %v1659_v20  ;;  %v1611_v8 = vpop.xlane.xlu0 %1610 }
 0x3cb   : > { %v5115_v58 = vpop.eup %5114  ;;  %4640 = vmatpush3.bf16.msra.mxu1 %v7572_v22  ;;  %5122 = vrcp.f32 %v1611_v8  ;;  %4573 = vmatprep.mubr.msk.bf16.mxu1 %vm5292_vm0, %v7569_v51 }
 0x3cc   : > { %v6354_v29 = vpop.eup %5116  ;;  %4641 = vmatprep.subr.bf16.mxu1 %v7569_v51  ;;  %v1648_v52 = vmul.f32 %v5115_v58, %v6175_v18 }
 0x3cd   : > { %v5119_v4 = vpop.eup %5118  ;;  %v2097_v23 = vsel %vm1054_vm3, %v6354_v29, 0.0 }
 0x3ce   : > { %v1649_v15 = vmul.f32 %v5119_v4, %v6179_v42  ;;  %v7575_v42 = vld [vmem:[#allocation4_spill] sm:$0xff] }
 0x3cf   : > { %4642 = vmatpush3.bf16.msra.mxu1 %v7573_v3 }
 0x3d0   : > { %v1614_v50 = vpop.xlane.xlu1 %1613  ;;  %4643 = vmatprep.subr.bf16.mxu1 %v7569_v51  ;;  %v1660_v24 = vpack.c.bf16 %v1649_v15, %v1648_v52 }
 0x3d1   : > { %5124 = vrcp.f32 %v1614_v50  ;;  %2098 = vadd.xlane.f32.xlu1 %v2097_v23 }
 0x3d2   : > { %4574 = vmatmul.mubr.msk.bf16.gmra.mrb[60].mxu1 %vm1054_vm3, %v1660_v24  ;;  %v1617_v19 = vpop.xlane.xlu0 %1616 }
 0x3d3   : > { %v5121_v26 = vpop.eup %5120  ;;  %4644 = vmatpush3.bf16.msra.mxu1 %v7574_v10  ;;  %5126 = vrcp.f32 %v1617_v19  ;;  %4577 = vmatprep.mubr.msk.bf16.mxu1 %vm5292_vm0, %v7569_v51 }
 0x3d4   : > { %4645 = vmatprep.subr.bf16.mxu1 %v7569_v51  ;;  %v1650_v39 = vmul.f32 %v5121_v26, %v6185_v30 }
 0x3d5   : > { %v5123_v18 = vpop.eup %5122  ;;  %2273 = vrot.lane.b32.xlu0 %v7575_v42, %s5295_s18 }
 0x3d6   : > { %v1651_v55 = vmul.f32 %v5123_v18, %v6189_v48 }
 0x3d7   : > { %4646 = vmatpush3.bf16.msra.mxu1 %v7576_v25 }
 0x3d8   : > { %v1620_v0 = vpop.xlane.xlu0 %1619  ;;  %4647 = vmatprep.subr.bf16.mxu1 %v7569_v51  ;;  %v1661_v5 = vpack.c.bf16 %v1651_v55, %v1650_v39 }
 0x3d9   : > { %5128 = vrcp.f32 %v1620_v0 }
 0x3da   : > { %4578 = vmatmul.mubr.msk.bf16.gmra.mrb[64].mxu1 %vm1054_vm3, %v1661_v5 }
 0x3db   : > { %v5125_v63 = vpop.eup %5124  ;;  %4648 = vmatpush3.bf16.msra.mxu1 %v7577_v32  ;;  %4581 = vmatprep.mubr.msk.bf16.mxu1 %vm5292_vm0, %v7569_v51 }
 0x3dc   : > { %v1623_v17 = vpop.xlane.xlu0 %1622  ;;  %4649 = vmatprep.subr.bf16.mxu1 %v7569_v51  ;;  %v1652_v48 = vmul.f32 %v5125_v63, %v6195_v40  ;;  %v7584_v63 = vld [vmem:[#allocation19_spill] sm:$0xff] }
 0x3dd   : > { %v5127_v30 = vpop.eup %5126  ;;  %5130 = vrcp.f32 %v1623_v17 }
 0x3de   : > { %v1653_v36 = vmul.f32 %v5127_v30, %v6199_v61 }
 0x3df   : > { %4650 = vmatpush3.bf16.msra.mxu1 %v7578_v11 }
 0x3e0   : > { %v1626_v2 = vpop.xlane.xlu0 %1625  ;;  %4651 = vmatprep.subr.bf16.mxu1 %v7569_v51  ;;  %v1662_v33 = vpack.c.bf16 %v1653_v36, %v1652_v48 }
 0x3e1   : > { %5132 = vrcp.f32 %v1626_v2  ;;  %v7585_v2 = vld [vmem:[#allocation22_spill] sm:$0xff] }
 0x3e2   : > { %2275 = vrot.lane.b32.xlu1 %v7579_v35, %s5295_s18  ;;  %4582 = vmatmul.mubr.msk.bf16.gmra.mrb[68].mxu1 %vm1054_vm3, %v1662_v33 }
 0x3e3   : > { %4652 = vmatpush3.bf16.msra.mxu1 %v2181_v43  ;;  %4585 = vmatprep.mubr.msk.bf16.mxu1 %vm5292_vm0, %v7569_v51  ;;  %v5129_v61 = vpop.eup %5128 }
 0x3e4   : > { %v1629_v40 = vpop.xlane.xlu0 %1628  ;;  %4809 = vmatprep.subr.bf16.mxu1 %v7569_v51  ;;  %v1654_v14 = vmul.f32 %v5129_v61, %v6205_v1 }
 0x3e5   : > { %5134 = vrcp.f32 %v1629_v40 }
 0x3e6   : > { %2277 = vrot.lane.b32.xlu1 %v7580_v28, %s5295_s18 }
 0x3e7   : > { %v5131_v13 = vpop.eup %5130 }
 0x3e8   : > { %v1632_v12 = vpop.xlane.xlu1 %1631  ;;  %v1655_v45 = vmul.f32 %v5131_v13, %v6209_v56  ;;  %v7583_v56 = vld [vmem:[#allocation15_spill] sm:$0xff] }
 0x3e9   : > { %5136 = vrcp.f32 %v1632_v12  ;;  %v7586_v13 = vld [vmem:[#allocation23_spill] sm:$0xff] }
 0x3ea   : > { %2279 = vrot.lane.b32.xlu1 %v7581_v49, %s5295_s18  ;;  %v1663_v31 = vpack.c.bf16 %v1655_v45, %v1654_v14 }
 0x3eb   : > { %v5133_v53 = vpop.eup %5132 }
 0x3ec   : > { %4586 = vmatmul.mubr.msk.bf16.gmra.mrb[72].mxu1 %vm1054_vm3, %v1663_v31  ;;  %v1656_v20 = vmul.f32 %v5133_v53, %v6214_v16 }
 0x3ed   : > { %4589 = vmatprep.mubr.msk.bf16.mxu1 %vm5292_vm0, %v7569_v51 }
 0x3ee   : > { %2281 = vrot.lane.b32.xlu1 %v7582_v62, %s5295_s18 }
 0x3ef   : > { %v5135_v59 = vpop.eup %5134 }
 0x3f0   : > { %v1657_v1 = vmul.f32 %v5135_v59, %v6218_v38  ;;  %v2298_v38 = vpop.permute.xlu1 %2297 }
 0x3f1   : > { %v6419_v15 = vsel %vm891_vm1, %v2298_v38, 0  ;;  %v7588_v38 = vld [vmem:[#allocation27_spill] sm:$0xff] }
 0x3f2   : > { %2283 = vrot.lane.b32.xlu1 %v7583_v56, %s5295_s18  ;;  %v1664_v21 = vpack.c.bf16 %v1657_v1, %v1656_v20  ;;  %v7587_v1 = vld [vmem:[#allocation26_spill] sm:$0xff] }
 0x3f3   : > { %v5137_v8 = vpop.eup %5136  ;;  %v2069_v58 = vpop.xlane.xlu0 %2068 }
 0x3f4   : > { %4590 = vmatmul.mubr.msk.bf16.gmra.mrb[76].mxu1 %vm1054_vm3, %v1664_v21  ;;  %v1658_v22 = vmul.f32 %v5137_v8, %v6227_v57  ;;  %5138 = vrcp.f32 %v2069_v58 }
 0x3f5   : > { %4593 = vmatprep.mubr.msk.bf16.mxu1 %vm5292_vm0, %v7569_v51 }
 0x3f6   : > { %v1665_v16 = vpack.c.bf16 %v1658_v22, %v1658_v22 }
 0x3f7   : > { %v2296_v4 = vpop.permute.xlu0 %2295 }
 0x3f8   : > { %v6411_v52 = vsel %vm891_vm1, %v2296_v4, 0 }
 0x3f9   : > { %4692 = vmatpush3.bf16.xpose.msra.mxu0 %v6411_v52 }
 0x3fa   : > { %4693 = vmatprep.subr.bf16.mxu0 %v7569_v51 }
 0x3fc   : > { %4594 = vmatmul.mubr.msk.bf16.gmra.mrb[80].mxu1 %vm1054_vm3, %v1665_v16 }
 0x3fd   : > { %4653 = vmatprep.mubr.msk.bf16.mxu1 %vm5292_vm0, %v7569_v51 }
 0x3fe   : > { %v5139_v23 = vpop.eup %5138 }
 0x3ff   : > { %v2119_v26 = vmul.f32 %v5139_v23, %v6247_v54 }
 0x401   : > { %4694 = vmatpush3.bf16.xpose.msra.mxu0 %v6419_v15 }
 0x402   : > { %4765 = vmatprep.subr.bf16.mxu0 %v7569_v51 }
 0x41d   : > { %v2072_v57 = vpop.xlane.xlu1 %2071 }
 0x41e   : > { %5140 = vrcp.f32 %v2072_v57 }
 0x421   : > { %v2075_v3 = vpop.xlane.xlu1 %2074 }
 0x422   : > { %5142 = vrcp.f32 %v2075_v3 }
 0x425   : > { %v2081_v50 = vpop.xlane.xlu1 %2080 }
 0x428   : > { %v5141_v24 = vpop.eup %5140  ;;  %v2078_v19 = vpop.xlane.xlu0 %2077 }
 0x429   : > { %v2120_v10 = vmul.f32 %v5141_v24, %v6287_v46  ;;  %5144 = vrcp.f32 %v2078_v19  ;;  %v2087_v18 = vpop.xlane.xlu1 %2086 }
 0x42b   : > { %v2132_v42 = vpack.c.bf16 %v2120_v10, %v2119_v26 }
 0x42c   : > { %v6425_v39 = vpop.f32.mrb[28].mxu1  ;;  %v2084_v55 = vpop.xlane.xlu0 %2083 }
 0x42d   : > { %v4487_v25 = vpop.f32.mrb[29].mxu1  ;;  %5146 = vrcp.f32 %v2084_v55  ;;  %v2272_v0 = vpop.permute.xlu1 %2271  ;;  %4654 = vmatmul.mubr.msk.bf16.vlgmr.msra.gmra.mrb[84].mxu1 %vm1054_vm3, %v2132_v42 }
 0x42e   : > { %v6428_v5 = vpop.f32.mrb[30].mxu1  ;;  %4816 = vmatpush3.bf16.xpose.msra.mxu1 %v7584_v63  ;;  %4696 = vmatmul.mubr.msk.bf16.vlgmr.msra.gmra.mrb[112].mxu0 %vm891_vm1, %v2272_v0  ;;  %5148 = vrcp.f32 %v2081_v50  ;;  %v5143_v46 = vpop.eup %5142 }
 0x42f   : > { %v4488_v54 = vpop.f32.mrb[31].mxu1  ;;  %4810 = vmatprep.subr.bf16.mxu1 %v7569_v51  ;;  %4657 = vmatprep.mubr.msk.bf16.mxu1 %vm5292_vm0, %v7569_v51  ;;  %v2121_v48 = vmul.f32 %v5143_v46, %v6292_v41 }
 0x430   : > { %4699 = vmatprep.mubr.msk.bf16.mxu0 %vm5292_vm0, %v7569_v51  ;;  %v2090_v32 = vpop.xlane.xlu0 %2089 }
 0x431   : > { %5150 = vrcp.f32 %v2090_v32 }
 0x432   : > { %5152 = vrcp.f32 %v2087_v18 }
 0x433   : > { %v5145_v17 = vpop.eup %5144 }
 0x434   : > { %v6437_v30 = vpop.f32.mrb[32].mxu1  ;;  %v2122_v36 = vmul.f32 %v5145_v17, %v6298_v60 }
 0x435   : > { %v4491_v11 = vpop.f32.mrb[33].mxu1 }
 0x436   : > { %4817 = vmatpush3.bf16.xpose.msra.mxu1 %v7585_v2  ;;  %v6442_v33 = vpop.f32.mrb[34].mxu1  ;;  %v2133_v43 = vpack.c.bf16 %v2122_v36, %v2121_v48 }
 0x437   : > { %v5147_v35 = vpop.eup %5146  ;;  %v4492_v40 = vpop.f32.mrb[35].mxu1  ;;  %4811 = vmatprep.subr.bf16.mxu1 %v7569_v51 }
 0x438   : > { %4658 = vmatmul.mubr.msk.bf16.gmra.mrb[88].mxu1 %vm1054_vm3, %v2133_v43  ;;  %v5149_v61 = vpop.eup %5148  ;;  %v2124_v41 = vmul.f32 %v5147_v35, %v6306_v9 }
 0x439   : > { %4661 = vmatprep.mubr.msk.bf16.mxu1 %vm5292_vm0, %v7569_v51  ;;  %v2123_v60 = vmul.f32 %v5149_v61, %v6296_v27  ;;  %v7592_v61 = vld [vmem:[#allocation5_spill] sm:$0xff] }
 0x43b   : > { %v2134_v14 = vpack.c.bf16 %v2124_v41, %v2123_v60  ;;  %v5151_v45 = vpop.eup %5150 }
 0x43c   : > { %v5153_v53 = vpop.eup %5152  ;;  %v2126_v9 = vmul.f32 %v5151_v45, %v6312_v47 }
 0x43d   : > { %v2125_v59 = vmul.f32 %v5153_v53, %v6302_v7 }
 0x43e   : > { %v6450_v28 = vpop.f32.mrb[36].mxu1  ;;  %4818 = vmatpush3.bf16.xpose.msra.mxu1 %v7586_v13  ;;  %v2093_v12 = vpop.xlane.xlu0 %2092 }
 0x43f   : > { %v4495_v49 = vpop.f32.mrb[37].mxu1  ;;  %4812 = vmatprep.subr.bf16.mxu1 %v7569_v51  ;;  %5154 = vrcp.f32 %v2093_v12  ;;  %v2135_v56 = vpack.c.bf16 %v2126_v9, %v2125_v59 }
 0x440   : > { %v6454_v31 = vpop.f32.mrb[38].mxu1  ;;  %4662 = vmatmul.mubr.msk.bf16.gmra.mrb[92].mxu1 %vm1054_vm3, %v2134_v14  ;;  %v7591_v14 = vld [vmem:[#allocation7_spill] sm:$0xff] }
 0x441   : > { %v4496_v62 = vpop.f32.mrb[39].mxu1  ;;  %4665 = vmatprep.mubr.msk.bf16.mxu1 %vm5292_vm0, %v7569_v51 }
 0x442   : > { %v2096_v27 = vpop.xlane.xlu0 %2095 }
 0x443   : > { %5156 = vrcp.f32 %v2096_v27 }
 0x446   : > { %v6461_v20 = vpop.f32.mrb[40].mxu1  ;;  %4819 = vmatpush3.bf16.xpose.msra.mxu1 %v7587_v1 }
 0x447   : > { %v4499_v21 = vpop.f32.mrb[41].mxu1  ;;  %4813 = vmatprep.subr.bf16.mxu1 %v7569_v51 }
 0x448   : > { %v6465_v8 = vpop.f32.mrb[42].mxu1  ;;  %4666 = vmatmul.mubr.msk.bf16.gmra.mrb[96].mxu1 %vm1054_vm3, %v2135_v56  ;;  %v2102_v58 = vpop.xlane.xlu0 %2101 }
 0x449   : > { %v4500_v22 = vpop.f32.mrb[43].mxu1  ;;  %4669 = vmatprep.mubr.msk.bf16.mxu1 %vm5292_vm0, %v7569_v51  ;;  %v5155_v47 = vpop.eup %5154  ;;  %5158 = vrcp.f32 %v2102_v58 }
 0x44a   : > { %v2127_v57 = vmul.f32 %v5155_v47, %v6325_v37 }
 0x44c   : > { %v2105_v4 = vpop.xlane.xlu0 %2104 }
 0x44d   : > { %v5157_v7 = vpop.eup %5156 }
 0x44e   : > { %v6470_v16 = vpop.f32.mrb[44].mxu1  ;;  %4820 = vmatpush3.bf16.xpose.msra.mxu1 %v7588_v38  ;;  %v2128_v3 = vmul.f32 %v5157_v7, %v6331_v34 }
 0x44f   : > { %v4503_v50 = vpop.f32.mrb[45].mxu1  ;;  %4814 = vmatprep.subr.bf16.mxu1 %v7569_v51 }
 0x450   : > { %v6476_v23 = vpop.f32.mrb[46].mxu1  ;;  %v2274_v24 = vpop.permute.xlu0 %2273  ;;  %v2136_v19 = vpack.c.bf16 %v2128_v3, %v2127_v57 }
 0x451   : > { %v4504_v26 = vpop.f32.mrb[47].mxu1  ;;  %4700 = vmatmul.mubr.msk.bf16.gmra.mrb[116].mxu0 %vm891_vm1, %v2274_v24 }
 0x452   : > { %4670 = vmatmul.mubr.msk.bf16.gmra.mrb[100].mxu1 %vm1054_vm3, %v2136_v19  ;;  %4703 = vmatprep.mubr.msk.bf16.mxu0 %vm5292_vm0, %v7569_v51 }
 0x453   : > { %4673 = vmatprep.mubr.msk.bf16.mxu1 %vm5292_vm0, %v7569_v51  ;;  %v5159_v10 = vpop.eup %5158 }
 0x454   : > { %v2130_v55 = vmul.f32 %v5159_v10, %v6339_v44 }
 0x456   : > { %4821 = vmatpush3.bf16.xpose.msra.mxu1 %v6411_v52 }
 0x457   : > { %4815 = vmatprep.subr.bf16.mxu1 %v7569_v51 }
 0x45e   : > { %4822 = vmatpush3.bf16.xpose.msra.mxu1 %v6419_v15  ;;  %v2099_v37 = vpop.xlane.xlu1 %2098 }
 0x45f   : > { %5160 = vrcp.f32 %v2099_v37  ;;  %4723 = vmatprep.subr.bf16.mxu1 %v7569_v51 }
 0x460   : > { %5162 = vrcp.f32 %v2105_v4 }
 0x462   : > { %v2276_v34 = vpop.permute.xlu1 %2275 }
 0x463   : > { %4704 = vmatmul.mubr.msk.bf16.gmra.mrb[120].mxu0 %vm891_vm1, %v2276_v34 }
 0x464   : > { %4707 = vmatprep.mubr.msk.bf16.mxu0 %vm5292_vm0, %v7569_v51 }
 0x466   : > { %v2278_v42 = vpop.permute.xlu1 %2277 }
 0x469   : > { %v5161_v18 = vpop.eup %5160 }
 0x46a   : > { %v2129_v52 = vmul.f32 %v5161_v18, %v6354_v29  ;;  %v5163_v25 = vpop.eup %5162  ;;  %v2280_v44 = vpop.permute.xlu1 %2279 }
 0x46b   : > { %4708 = vmatmul.mubr.msk.bf16.gmra.mrb[124].mxu0 %vm891_vm1, %v2278_v42  ;;  %v2131_v0 = vmul.f32 %v5163_v25, %v6344_v6 }
 0x46c   : > { %v2137_v15 = vpack.c.bf16 %v2130_v55, %v2129_v52  ;;  %4781 = vmatprep.mubr.msk.bf16.mxu0 %vm5292_vm0, %v7569_v51 }
 0x46d   : > { %v2138_v63 = vpack.c.bf16 %v2131_v0, %v2131_v0 }
 0x46e   : > { %4674 = vmatmul.mubr.msk.bf16.gmra.mrb[104].mxu1 %vm1054_vm3, %v2137_v15  ;;  %v2282_v17 = vpop.permute.xlu1 %2281 }
 0x46f   : > { %4677 = vmatprep.mubr.msk.bf16.mxu1 %vm5292_vm0, %v7569_v51 }
 0x472   : > { %v2284_v11 = vpop.permute.xlu1 %2283 }
 0x476   : > { %4678 = vmatmul.mubr.msk.bf16.gmra.mrb[108].mxu1 %vm1054_vm3, %v2138_v63 }
 0x477   : > { %4711 = vmatprep.mubr.msk.bf16.mxu1 %vm5292_vm0, %v7569_v51 }
 0x47e   : > { %4712 = vmatmul.mubr.msk.bf16.vlgmr.msra.gmra.mrb[112].mxu1 %vm891_vm1, %v2280_v44 }
 0x47f   : > { %4715 = vmatprep.mubr.msk.bf16.mxu1 %vm5292_vm0, %v7569_v51 }
 0x481   : > { %v6506_v29 = vpop.f32.mrb[48].mxu1 }
 0x482   : > { %7589 = vst [vmem:[#allocation3_spill] sm:$0xff] %v6506_v29  ;;  %v4507_v54 = vpop.f32.mrb[49].mxu1 }
 0x483   : > { %v6508_v46 = vpop.f32.mrb[50].mxu1  ;;  %v6563_v54 = vld [vmem:[%s5867_s21] ss:$0 sm:$0xff] }
 0x484   : > { %v4508_v32 = vpop.f32.mrb[51].mxu1 }
 0x486   : > { %4716 = vmatmul.mubr.msk.bf16.gmra.mrb[116].mxu1 %vm891_vm1, %v2282_v17 }
 0x487   : > { %4719 = vmatprep.mubr.msk.bf16.mxu1 %vm5292_vm0, %v7569_v51 }
 0x48a   : > { %v6513_v6 = vpop.f32.mrb[52].mxu1 }
 0x48b   : > { %7590 = vst [vmem:[#allocation17_spill] sm:$0xff] %v6513_v6  ;;  %v4511_v48 = vpop.f32.mrb[53].mxu1 }
 0x48c   : > { %v1315_v36 = vpop.f32.mrb[54].mxu1 }
 0x48d   : > { %v4512_v2 = vpop.f32.mrb[55].mxu1 }
 0x48e   : > { %4720 = vmatmul.mubr.msk.bf16.gmra.mrb[120].mxu1 %vm891_vm1, %v2284_v11 }
 0x48f   : > { %4737 = vmatprep.mubr.msk.bf16.mxu1 %vm5292_vm0, %v7569_v51 }
 0x49d   : > { %v6518_v43 = vpop.f32.mrb[56].mxu1 }
 0x49e   : > { %v4571_v35 = vpop.f32.mrb[57].mxu1 }
 0x49f   : > { %v6520_v40 = vpop.f32.mrb[58].mxu1 }
 0x4a0   : > { %v4572_v41 = vpop.f32.mrb[59].mxu1 }
 0x4a5   : > { %v6524_v60 = vpop.f32.mrb[60].mxu1 }
 0x4a6   : > { %v4575_v13 = vpop.f32.mrb[61].mxu1 }
 0x4a7   : > { %v6526_v12 = vpop.f32.mrb[62].mxu1 }
 0x4a8   : > { %v4576_v45 = vpop.f32.mrb[63].mxu1 }
 0x4ad   : > { %v6530_v49 = vpop.f32.mrb[64].mxu1 }
 0x4ae   : > { %v4579_v53 = vpop.f32.mrb[65].mxu1 }
 0x4af   : > { %v6532_v62 = vpop.f32.mrb[66].mxu1 }
 0x4b0   : > { %v4580_v9 = vpop.f32.mrb[67].mxu1 }
 0x4b5   : > { %v6536_v59 = vpop.f32.mrb[68].mxu1 }
 0x4b6   : > { %v4583_v1 = vpop.f32.mrb[69].mxu1 }
 0x4b7   : > { %v6538_v56 = vpop.f32.mrb[70].mxu1 }
 0x4b8   : > { %v4584_v58 = vpop.f32.mrb[71].mxu1 }
 0x4bf   : > { %v6542_v22 = vpop.f32.mrb[72].mxu1 }
 0x4c0   : > { %v4587_v47 = vpop.f32.mrb[73].mxu1 }
 0x4c1   : > { %v6544_v4 = vpop.f32.mrb[74].mxu1 }
 0x4c2   : > { %v4588_v38 = vpop.f32.mrb[75].mxu1 }
 0x4c7   : > { %v6548_v57 = vpop.f32.mrb[76].mxu1 }
 0x4c8   : > { %v4591_v3 = vpop.f32.mrb[77].mxu1 }
 0x4c9   : > { %v6550_v50 = vpop.f32.mrb[78].mxu1 }
 0x4ca   : > { %v4592_v19 = vpop.f32.mrb[79].mxu1 }
 0x4cf   : > { %v6554_v26 = vpop.f32.mrb[80].mxu1 }
 0x4d0   : > { %v4595_v37 = vpop.f32.mrb[81].mxu1 }
 0x4d1   : > { %v1802_v34 = vpop.f32.mrb[82].mxu1 }
 0x4d2   : > { %v4596_v10 = vpop.f32.mrb[83].mxu1 }
 0x500   : > { %v6556_v18 = vpop.f32.mrb[84].mxu1 }
 0x501   : > { %v4655_v42 = vpop.f32.mrb[85].mxu1  ;;  %v2375_v52 = vpop.f32.mrb[112].mxu0 }
 0x502   : > { %v2429_v55 = vmul.f32 0.17677669, %v2375_v52  ;;  %v6558_v15 = vpop.f32.mrb[86].mxu1  ;;  %v4697_v25 = vpop.f32.mrb[113].mxu0 }
 0x503   : > { %v4656_v63 = vpop.f32.mrb[87].mxu1  ;;  %v2378_v44 = vpop.f32.mrb[114].mxu0 }
 0x504   : > { %v6566_v32 = vadd.f32 %v6563_v54, %v2429_v55  ;;  %v2430_v17 = vmul.f32 0.17677669, %v2378_v44  ;;  %v4698_v48 = vpop.f32.mrb[115].mxu0 }
 0x506   : > { %v6569_v36 = vadd.f32 %v6563_v54, %v2430_v17  ;;  %v2455_v11 = vsel %vm1054_vm3, %v6566_v32, -inf }
 0x507   : > { %2456 = vmax.xlane.f32.xlu0 %v2455_v11 }
 0x508   : > { %v2458_v2 = vsel %vm1054_vm3, %v6569_v36, -inf }
 0x509   : > { %2459 = vmax.xlane.f32.xlu1 %v2458_v2 }
 0x50b   : > { %v6575_v35 = vpop.f32.mrb[88].mxu1 }
 0x50c   : > { %v4659_v41 = vpop.f32.mrb[89].mxu1 }
 0x50d   : > { %v6577_v13 = vpop.f32.mrb[90].mxu1 }
 0x50e   : > { %v4660_v53 = vpop.f32.mrb[91].mxu1 }
 0x513   : > { %v6581_v9 = vpop.f32.mrb[92].mxu1 }
 0x514   : > { %v4663_v1 = vpop.f32.mrb[93].mxu1 }
 0x515   : > { %v6583_v58 = vpop.f32.mrb[94].mxu1 }
 0x516   : > { %v4664_v38 = vpop.f32.mrb[95].mxu1 }
 0x51b   : > { %v6587_v3 = vpop.f32.mrb[96].mxu1 }
 0x51c   : > { %v4667_v19 = vpop.f32.mrb[97].mxu1 }
 0x51d   : > { %v6589_v37 = vpop.f32.mrb[98].mxu1 }
 0x51e   : > { %v4668_v10 = vpop.f32.mrb[99].mxu1 }
 0x524   : > { %v2383_v42 = vpop.f32.mrb[116].mxu0 }
 0x525   : > { %v2431_v52 = vmul.f32 0.17677669, %v2383_v42  ;;  %v6593_v55 = vpop.f32.mrb[100].mxu1  ;;  %v4701_v25 = vpop.f32.mrb[117].mxu0 }
 0x526   : > { %v4671_v63 = vpop.f32.mrb[101].mxu1  ;;  %v2386_v44 = vpop.f32.mrb[118].mxu0 }
 0x527   : > { %v6596_v17 = vadd.f32 %v6563_v54, %v2431_v52  ;;  %v2432_v48 = vmul.f32 0.17677669, %v2386_v44  ;;  %v6598_v11 = vpop.f32.mrb[102].mxu1  ;;  %v4702_v2 = vpop.f32.mrb[119].mxu0 }
 0x528   : > { %v4672_v53 = vpop.f32.mrb[103].mxu1 }
 0x529   : > { %v6603_v1 = vadd.f32 %v6563_v54, %v2432_v48  ;;  %v2461_v38 = vsel %vm1054_vm3, %v6596_v17, -inf }
 0x52a   : > { %2462 = vmax.xlane.f32.xlu0 %v2461_v38 }
 0x52b   : > { %v2464_v19 = vsel %vm1054_vm3, %v6603_v1, -inf }
 0x52e   : > { %2465 = vmax.xlane.f32.xlu0 %v2464_v19 }
 0x536   : > { %v2391_v10 = vpop.f32.mrb[120].mxu0 }
 0x537   : > { %v2433_v42 = vmul.f32 0.17677669, %v2391_v10  ;;  %v4705_v52 = vpop.f32.mrb[121].mxu0 }
 0x538   : > { %v2394_v25 = vpop.f32.mrb[122].mxu0 }
 0x539   : > { %v6610_v63 = vadd.f32 %v6563_v54, %v2433_v42  ;;  %v2434_v44 = vmul.f32 0.17677669, %v2394_v25  ;;  %v4706_v2 = vpop.f32.mrb[123].mxu0 }
 0x53b   : > { %v6613_v48 = vadd.f32 %v6563_v54, %v2434_v44  ;;  %v2467_v53 = vsel %vm1054_vm3, %v6610_v63, -inf }
 0x53c   : > { %2468 = vmax.xlane.f32.xlu1 %v2467_v53 }
 0x53d   : > { %v2470_v38 = vsel %vm1054_vm3, %v6613_v48, -inf }
 0x53e   : > { %2471 = vmax.xlane.f32.xlu0 %v2470_v38  ;;  %v2399_v19 = vpop.f32.mrb[124].mxu0 }
 0x53f   : > { %v2435_v10 = vmul.f32 0.17677669, %v2399_v19  ;;  %v4709_v52 = vpop.f32.mrb[125].mxu0 }
 0x540   : > { %v2402_v24 = vpop.f32.mrb[126].mxu0 }
 0x541   : > { %v6620_v42 = vadd.f32 %v6563_v54, %v2435_v10  ;;  %v2436_v25 = vmul.f32 0.17677669, %v2402_v24  ;;  %v6622_v2 = vpop.f32.mrb[104].mxu1  ;;  %v4710_v44 = vpop.f32.mrb[127].mxu0 }
 0x542   : > { %v4675_v41 = vpop.f32.mrb[105].mxu1 }
 0x543   : > { %v6625_v7 = vadd.f32 %v6563_v54, %v2436_v25  ;;  %v6627_v53 = vpop.f32.mrb[106].mxu1  ;;  %v2473_v38 = vsel %vm1054_vm3, %v6620_v42, -inf }
 0x544   : > { %v4676_v52 = vpop.f32.mrb[107].mxu1  ;;  %2474 = vmax.xlane.f32.xlu1 %v2473_v38 }
 0x545   : > { %v2476_v24 = vsel %vm1054_vm3, %v6625_v7, -inf }
 0x546   : > { %2477 = vmax.xlane.f32.xlu0 %v2476_v24  ;;  %v7593_v24 = vld [vmem:[#allocation9_spill] sm:$0xff] }
 0x549   : > { %v6635_v10 = vpop.f32.mrb[108].mxu1 }
 0x54a   : > { %v4679_v41 = vpop.f32.mrb[109].mxu1 }
 0x54b   : > { %v2268_v44 = vpop.f32.mrb[110].mxu1 }
 0x54c   : > { %v4680_v25 = vpop.f32.mrb[111].mxu1 }
 0x551   : > { %v2407_v34 = vpop.f32.mrb[112].mxu1 }
 0x552   : > { %v4713_v21 = vpop.f32.mrb[113].mxu1 }
 0x553   : > { %v2410_v47 = vpop.f32.mrb[114].mxu1 }
 0x554   : > { %v4714_v45 = vpop.f32.mrb[115].mxu1 }
 0x555   : > { %2607 = vrot.lane.b32.xlu1 %v7591_v14, %s5295_s18 }
 0x559   : > { %v2415_v27 = vpop.f32.mrb[116].mxu1 }
 0x55a   : > { %v4717_v19 = vpop.f32.mrb[117].mxu1 }
 0x55b   : > { %v2418_v52 = vpop.f32.mrb[118].mxu1 }
 0x55c   : > { %v4718_v38 = vpop.f32.mrb[119].mxu1  ;;  %2605 = vrot.lane.b32.xlu0 %v7592_v61, %s5295_s18 }
 0x560   : > { %2609 = vrot.lane.b32.xlu0 %v7593_v24, %s5295_s18 }
 0x561   : > { %v2423_v41 = vpop.f32.mrb[120].mxu1 }
 0x562   : > { %v4721_v44 = vpop.f32.mrb[121].mxu1 }
 0x563   : > { %v2426_v25 = vpop.f32.mrb[122].mxu1 }
 0x564   : > { %v4722_v0 = vpop.f32.mrb[123].mxu1 }
 0x594   : > { %v2457_v21 = vpop.xlane.xlu0 %2456 }
 0x595   : > { %v2494_v45 = vsub.f32 %v6566_v32, %v2457_v21  ;;  %v2437_v21 = vmul.f32 0.17677669, %v2407_v34 }
 0x596   : > { %v2460_v6 = vpop.xlane.xlu1 %2459 }
 0x597   : > { %v2507_v29 = vmul.f32 1.442695, %v2494_v45  ;;  %v2495_v14 = vsub.f32 %v6569_v36, %v2460_v6 }
 0x599   : > { %5164 = vpow2.f32 %v2507_v29  ;;  %v2509_v19 = vmul.f32 1.442695, %v2495_v14  ;;  %v6658_v14 = vadd.f32 %v6563_v54, %v2437_v21 }
 0x59b   : > { %5166 = vpow2.f32 %v2509_v19  ;;  %v2438_v19 = vmul.f32 0.17677669, %v2410_v47 }
 0x5a3   : > { %v6645_v38 = vpop.eup %5164 }
 0x5a4   : > { %v2533_v61 = vsel %vm1054_vm3, %v6645_v38, 0.0 }
 0x5a5   : > { %v6649_v24 = vpop.eup %5166  ;;  %2534 = vadd.xlane.f32.xlu0 %v2533_v61  ;;  %v2439_v61 = vmul.f32 0.17677669, %v2415_v27 }
 0x5a6   : > { %v2536_v0 = vsel %vm1054_vm3, %v6649_v24, 0.0 }
 0x5a7   : > { %2537 = vadd.xlane.f32.xlu1 %v2536_v0  ;;  %v6670_v34 = vadd.f32 %v6563_v54, %v2439_v61 }
 0x5b7   : > { %v2463_v32 = vpop.xlane.xlu0 %2462 }
 0x5b8   : > { %v2496_v44 = vsub.f32 %v6596_v17, %v2463_v32  ;;  %v6665_v32 = vadd.f32 %v6563_v54, %v2438_v19  ;;  %v2485_v19 = vsel %vm1054_vm3, %v6670_v34, -inf }
 0x5ba   : > { %v2511_v25 = vmul.f32 1.442695, %v2496_v44  ;;  %v2440_v44 = vmul.f32 0.17677669, %v2418_v52  ;;  %v2482_v52 = vsel %vm1054_vm3, %v6665_v32, -inf }
 0x5bb   : > { %v2466_v6 = vpop.xlane.xlu0 %2465 }
 0x5bc   : > { %5168 = vpow2.f32 %v2511_v25  ;;  %v2497_v29 = vsub.f32 %v6603_v1, %v2466_v6  ;;  %v2479_v1 = vsel %vm1054_vm3, %v6658_v14, -inf  ;;  %v2441_v25 = vmul.f32 0.17677669, %v2423_v41 }
 0x5be   : > { %v2513_v36 = vmul.f32 1.442695, %v2497_v29  ;;  %v6679_v21 = vadd.f32 %v6563_v54, %v2441_v25 }
 0x5c0   : > { %5170 = vpow2.f32 %v2513_v36  ;;  %v6676_v36 = vadd.f32 %v6563_v54, %v2440_v44  ;;  %v2491_v61 = vsel %vm1054_vm3, %v6679_v21, -inf }
 0x5c6   : > { %v6655_v45 = vpop.eup %5168 }
 0x5c7   : > { %v2539_v0 = vsel %vm1054_vm3, %v6655_v45, 0.0 }
 0x5c8   : > { %2540 = vadd.xlane.f32.xlu1 %v2539_v0  ;;  %v2488_v0 = vsel %vm1054_vm3, %v6676_v36, -inf }
 0x5c9   : > { %v2469_v41 = vpop.xlane.xlu1 %2468 }
 0x5ca   : > { %v6662_v17 = vpop.eup %5170 }
 0x5cb   : > { %v2472_v6 = vpop.xlane.xlu0 %2471  ;;  %v2542_v27 = vsel %vm1054_vm3, %v6662_v17, 0.0 }
 0x5cc   : > { %v2499_v47 = vsub.f32 %v6613_v48, %v2472_v6  ;;  %2480 = vmax.xlane.f32.xlu1 %v2479_v1  ;;  %2543 = vadd.xlane.f32.xlu0 %v2542_v27 }
 0x5ce   : > { %v2517_v29 = vmul.f32 1.442695, %v2499_v47  ;;  %v7594_v47 = vld [vmem:[#allocation11_spill] sm:$0xff] }
 0x5d0   : > { %5172 = vpow2.f32 %v2517_v29  ;;  %2486 = vmax.xlane.f32.xlu1 %v2485_v19  ;;  %2483 = vmax.xlane.f32.xlu0 %v2482_v52  ;;  %v7595_v29 = vld [vmem:[#allocation13_spill] sm:$0xff]  ;;  %v2498_v19 = vsub.f32 %v6610_v63, %v2469_v41  ;;  %v7596_v63 = vld [vmem:[#allocation14_spill] sm:$0xff]  ;;  %v7597_v41 = vld [vmem:[#allocation16_spill] sm:$0xff] }
 0x5d1   : > { %v2475_v54 = vpop.xlane.xlu1 %2474 }
 0x5d2   : > { %v2515_v52 = vmul.f32 1.442695, %v2498_v19 }
 0x5d3   : > { %v2478_v48 = vpop.xlane.xlu0 %2477 }
 0x5d4   : > { %2492 = vmax.xlane.f32.xlu1 %v2491_v61  ;;  %2489 = vmax.xlane.f32.xlu0 %v2488_v0  ;;  %5174 = vpow2.f32 %v2515_v52  ;;  %v2501_v61 = vsub.f32 %v6625_v7, %v2478_v48  ;;  %v2500_v7 = vsub.f32 %v6620_v42, %v2475_v54  ;;  %v7598_v48 = vpack.i.bf16 %v6558_v15, %v6556_v18 }
 0x5d5   : > { %v2608_v25 = vpop.permute.xlu1 %2607 }
 0x5d6   : > { %v2521_v0 = vmul.f32 1.442695, %v2501_v61 }
 0x5d7   : > { %v2606_v1 = vpop.permute.xlu0 %2605 }
 0x5d8   : > { %4724 = vmatpush3.bf16.msra.mxu1 %v2606_v1  ;;  %5176 = vpow2.f32 %v2521_v0 }
 0x5d9   : > { %4725 = vmatprep.subr.bf16.mxu1 %v7569_v51 }
 0x5da   : > { %v6690_v44 = vpop.eup %5172 }
 0x5db   : > { %v2548_v6 = vsel %vm1054_vm3, %v6690_v44, 0.0  ;;  %v2610_v27 = vpop.permute.xlu0 %2609 }
 0x5dc   : > { %2549 = vadd.xlane.f32.xlu0 %v2548_v6  ;;  %4726 = vmatpush3.bf16.msra.mxu1 %v2608_v25 }
 0x5dd   : > { %4727 = vmatprep.subr.bf16.mxu1 %v7569_v51 }
 0x5de   : > { %v6702_v1 = vpop.eup %5174 }
 0x5df   : > { %v2545_v25 = vsel %vm1054_vm3, %v6702_v1, 0.0 }
 0x5e0   : > { %4728 = vmatpush3.bf16.msra.mxu1 %v2610_v27 }
 0x5e1   : > { %4729 = vmatprep.subr.bf16.mxu1 %v7569_v51 }
 0x5e2   : > { %v6706_v6 = vpop.eup %5176 }
 0x5e3   : > { %v2554_v27 = vsel %vm1054_vm3, %v6706_v6, 0.0 }
 0x5e5   : > { %2611 = vrot.lane.b32.xlu1 %v7594_v47, %s5295_s18  ;;  %v2519_v47 = vmul.f32 1.442695, %v2500_v7 }
 0x5e7   : > { %5178 = vpow2.f32 %v2519_v47 }
 0x5f1   : > { %v6719_v52 = vpop.eup %5178 }
 0x5f2   : > { %2613 = vrot.lane.b32.xlu0 %v7595_v29, %s5295_s18  ;;  %v2551_v0 = vsel %vm1054_vm3, %v6719_v52, 0.0 }
 0x609   : > { %2546 = vadd.xlane.f32.xlu1 %v2545_v25 }
 0x611   : > { %2555 = vadd.xlane.f32.xlu0 %v2554_v27 }
 0x61a   : > { %2615 = vrot.lane.b32.xlu1 %v7596_v63, %s5295_s18 }
 0x627   : > { %2617 = vrot.lane.b32.xlu0 %v7597_v41, %s5295_s18 }
 0x62b   : > { %4844 = vrot.lane.b32.xlu0 %v7598_v48, %s5294_s17 }
 0x632   : > { %v2535_v29 = vpop.xlane.xlu0 %2534 }
 0x633   : > { %5180 = vrcp.f32 %v2535_v29 }
 0x634   : > { %v2538_v19 = vpop.xlane.xlu1 %2537 }
 0x635   : > { %5182 = vrcp.f32 %v2538_v19 }
 0x63d   : > { %v5181_v61 = vpop.eup %5180 }
 0x63e   : > { %2552 = vadd.xlane.f32.xlu1 %v2551_v0  ;;  %v6724_v42 = vmul.f32 %v5181_v61, %v6645_v38 }
 0x63f   : > { %v5183_v25 = vpop.eup %5182 }
 0x640   : > { %v6727_v18 = vmul.f32 %v5183_v25, %v6649_v24 }
 0x655   : > { %v2541_v54 = vpop.xlane.xlu1 %2540 }
 0x656   : > { %5184 = vrcp.f32 %v2541_v54 }
 0x659   : > { %v2481_v27 = vpop.xlane.xlu1 %2480  ;;  %v2544_v63 = vpop.xlane.xlu0 %2543 }
 0x65a   : > { %v2502_v41 = vsub.f32 %v6658_v14, %v2481_v27  ;;  %5186 = vrcp.f32 %v2544_v63 }
 0x65c   : > { %v2523_v7 = vmul.f32 1.442695, %v2502_v41 }
 0x65d   : > { %v2487_v48 = vpop.xlane.xlu1 %2486  ;;  %v2484_v47 = vpop.xlane.xlu0 %2483 }
 0x65e   : > { %5188 = vpow2.f32 %v2523_v7  ;;  %v2504_v38 = vsub.f32 %v6670_v34, %v2487_v48  ;;  %v2503_v29 = vsub.f32 %v6665_v32, %v2484_v47 }
 0x660   : > { %v2525_v24 = vmul.f32 1.442695, %v2503_v29  ;;  %v5185_v19 = vpop.eup %5184  ;;  %v2527_v61 = vmul.f32 1.442695, %v2504_v38 }
 0x661   : > { %v2493_v0 = vpop.xlane.xlu1 %2492  ;;  %v2490_v25 = vpop.xlane.xlu0 %2489  ;;  %v2587_v14 = vmul.f32 %v5185_v19, %v6655_v45 }
 0x662   : > { %v2505_v54 = vsub.f32 %v6676_v36, %v2490_v25  ;;  %5190 = vpow2.f32 %v2525_v24  ;;  %v2506_v27 = vsub.f32 %v6679_v21, %v2493_v0  ;;  %v7599_v0 = vpack.i.bf16 %v6520_v40, %v6518_v43 }
 0x663   : > { %5192 = vpow2.f32 %v2527_v61  ;;  %v7600_v25 = vpack.i.bf16 %v6532_v62, %v6530_v49  ;;  %v7601_v43 = vpack.c.bf16 %v6727_v18, %v6724_v42 }
 0x664   : > { %v5187_v15 = vpop.eup %5186  ;;  %v2529_v63 = vmul.f32 1.442695, %v2505_v54  ;;  %v2531_v48 = vmul.f32 1.442695, %v2506_v27 }
 0x665   : > { %v2612_v41 = vpop.permute.xlu1 %2611  ;;  %v2588_v34 = vmul.f32 %v5187_v15, %v6662_v17 }
 0x666   : > { %4730 = vmatpush3.bf16.msra.mxu1 %v2612_v41  ;;  %5194 = vpow2.f32 %v2529_v63 }
 0x667   : > { %4731 = vmatprep.subr.bf16.mxu1 %v7569_v51  ;;  %v2599_v32 = vpack.c.bf16 %v2588_v34, %v2587_v14  ;;  %5196 = vpow2.f32 %v2531_v48 }
 0x668   : > { %v6739_v7 = vpop.eup %5188 }
 0x669   : > { %v2550_v36 = vpop.xlane.xlu0 %2549  ;;  %v2557_v47 = vsel %vm1054_vm3, %v6739_v7, 0.0 }
 0x66a   : > { %2558 = vadd.xlane.f32.xlu1 %v2557_v47 }
 0x66c   : > { %v5191_v45 = vpop.eup %5190 }
 0x66d   : > { %v2614_v21 = vpop.permute.xlu0 %2613  ;;  %v2560_v38 = vsel %vm1054_vm3, %v5191_v45, 0.0  ;;  %v6744_v17 = vpop.eup %5192 }
 0x66e   : > { %4732 = vmatpush3.bf16.msra.mxu1 %v2614_v21  ;;  %2561 = vadd.xlane.f32.xlu1 %v2560_v38  ;;  %v2563_v15 = vsel %vm1054_vm3, %v6744_v17, 0.0 }
 0x66f   : > { %4733 = vmatprep.subr.bf16.mxu1 %v7569_v51 }
 0x670   : > { %v5195_v29 = vpop.eup %5194 }
 0x671   : > { %v2566_v24 = vsel %vm1054_vm3, %v5195_v29, 0.0  ;;  %v5197_v19 = vpop.eup %5196 }
 0x672   : > { %2564 = vadd.xlane.f32.xlu1 %v2563_v15  ;;  %v2569_v61 = vsel %vm1054_vm3, %v5197_v19, 0.0 }
 0x676   : > { %2567 = vadd.xlane.f32.xlu1 %v2566_v24 }
 0x67a   : > { %2570 = vadd.xlane.f32.xlu1 %v2569_v61 }
 0x68b   : > { %4839 = vrot.lane.b32.xlu1 %v7599_v0, %s5295_s18 }
 0x68f   : > { %4869 = vrot.lane.b32.xlu1 %v7600_v25, %s5295_s18 }
 0x696   : > { %v2547_v54 = vpop.xlane.xlu1 %2546 }
 0x697   : > { %5198 = vrcp.f32 %v2547_v54 }
 0x698   : > { %5200 = vrcp.f32 %v2550_v36 }
 0x69a   : > { %v2616_v14 = vpop.permute.xlu1 %2615 }
 0x69b   : > { %4734 = vmatpush3.bf16.msra.mxu1 %v2616_v14 }
 0x69c   : > { %4735 = vmatprep.subr.bf16.mxu1 %v7569_v51 }
 0x69e   : > { %v2556_v27 = vpop.xlane.xlu0 %2555 }
 0x69f   : > { %5202 = vrcp.f32 %v2556_v27 }
 0x6a1   : > { %v5199_v40 = vpop.eup %5198 }
 0x6a2   : > { %v2618_v63 = vpop.permute.xlu0 %2617  ;;  %v5201_v49 = vpop.eup %5200  ;;  %v2589_v62 = vmul.f32 %v5199_v40, %v6702_v1  ;;  %v7602_v40 = vmov 0  }
 0x6a3   : > { %v2647_v41 = vsel %vm1226_vm2, %v2618_v63, 0  ;;  %v2590_v34 = vmul.f32 %v5201_v49, %v6690_v44  ;;  %v4960_v49 = vld [vmem:[%s7506_s4] sm:$0xff]  }
 0x6a4   : > { %4736 = vmatpush3.bf16.msra.mxu1 %v2647_v41  ;;  %4766 = vmatpush3.bf16.msra.mxu0 %v4960_v49 }
 0x6a5   : > { %v2600_v48 = vpack.c.bf16 %v2590_v34, %v2589_v62  ;;  %4767 = vmatprep.subr.bf16.mxu0 %v7569_v51  ;;  %v4964_v62 = vld [vmem:[%s7506_s4 + $0x20] sm:$0xff]   ;;  %v4965_v34 = vld [vmem:[%s7506_s4 + $0x28] sm:$0xff]  }
 0x6a7   : > { %4738 = vmatmul.mubr.msk.bf16.vlgmr.msra.gmra.mrb[124].mxu1 %vm1054_vm3, %v7601_v43 }
 0x6a8   : > { %4741 = vmatprep.mubr.msk.bf16.mxu1 %vm5292_vm0, %v7569_v51 }
 0x6a9   : > { %v5203_v18 = vpop.eup %5202 }
 0x6aa   : > { %v2592_v47 = vmul.f32 %v5203_v18, %v6706_v6 }
 0x6af   : > { %4742 = vmatmul.mubr.msk.bf16.gmra.mrb[128].mxu1 %vm1054_vm3, %v2599_v32 }
 0x6b0   : > { %4745 = vmatprep.mubr.msk.bf16.mxu1 %vm5292_vm0, %v7569_v51 }
 0x6b7   : > { %4746 = vmatmul.mubr.msk.bf16.gmra.mrb[132].mxu1 %vm1054_vm3, %v2600_v48  ;;  %v4966_v48 = vld [vmem:[%s7506_s4 + $0x30] sm:$0xff]  }
 0x6b8   : > { %4749 = vmatprep.mubr.msk.bf16.mxu1 %vm5292_vm0, %v7569_v51 }
 0x6cb   : > { %v2553_v42 = vpop.xlane.xlu1 %2552 }
 0x6cc   : > { %5204 = vrcp.f32 %v2553_v42  ;;  %v4967_v42 = vld [vmem:[%s7506_s4 + $0x38] sm:$0xff]  }
 0x6d6   : > { %v5205_v36 = vpop.eup %5204 }
 0x6d7   : > { %v2591_v32 = vmul.f32 %v5205_v36, %v6719_v52 }
 0x6d9   : > { %v2601_v21 = vpack.c.bf16 %v2592_v47, %v2591_v32 }
 0x6db   : > { %4750 = vmatmul.mubr.msk.bf16.gmra.mrb[136].mxu1 %vm1054_vm3, %v2601_v21 }
 0x6dc   : > { %4753 = vmatprep.mubr.msk.bf16.mxu1 %vm5292_vm0, %v7569_v51 }
 0x6f7   : > { %v2559_v44 = vpop.xlane.xlu1 %2558 }
 0x6f8   : > { %5206 = vrcp.f32 %v2559_v44 }
 0x6fb   : > { %v2562_v1 = vpop.xlane.xlu1 %2561 }
 0x6fc   : > { %5208 = vrcp.f32 %v2562_v1  ;;  %v7603_v1 = vpack.i.bf16 %v6526_v12, %v6524_v60  ;;  %v7605_v60 = vpack.i.bf16 %v6583_v58, %v6581_v9  ;;  %v7606_v12 = vpack.i.bf16 %v6538_v56, %v6536_v59 }
 0x6fd   : > { %v7609_v59 = vpack.i.bf16 %v6598_v11, %v6593_v55  ;;  %v7610_v56 = vpack.i.bf16 %v6550_v50, %v6548_v57 }
 0x6ff   : > { %v2565_v38 = vpop.xlane.xlu1 %2564 }
 0x700   : > { %5210 = vrcp.f32 %v2565_v38 }
 0x702   : > { %v5207_v24 = vpop.eup %5206 }
 0x703   : > { %v2568_v15 = vpop.xlane.xlu1 %2567  ;;  %v2593_v52 = vmul.f32 %v5207_v24, %v6739_v7 }
 0x704   : > { %5212 = vrcp.f32 %v2568_v15 }
 0x706   : > { %v5209_v61 = vpop.eup %5208 }
 0x707   : > { %v2571_v0 = vpop.xlane.xlu1 %2570  ;;  %v2594_v6 = vmul.f32 %v5209_v61, %v5191_v45 }
 0x708   : > { %5214 = vrcp.f32 %v2571_v0  ;;  %v7604_v0 = vpack.i.bf16 %v6577_v13, %v6575_v35  ;;  %v7607_v35 = vpack.i.bf16 %v6589_v37, %v6587_v3  ;;  %v7608_v13 = vpack.i.bf16 %v6544_v4, %v6542_v22 }
 0x709   : > { %v2602_v25 = vpack.c.bf16 %v2594_v6, %v2593_v52 }
 0x70a   : > { %v5211_v54 = vpop.eup %5210 }
 0x70b   : > { %4754 = vmatmul.mubr.msk.bf16.gmra.mrb[140].mxu1 %vm1054_vm3, %v2602_v25  ;;  %v2595_v27 = vmul.f32 %v5211_v54, %v6744_v17  ;;  %v4961_v17 = vld [vmem:[%s7506_s4 + $0x8] sm:$0xff]   ;;  %v4840_v11 = vpop.permute.xlu1 %4839 }
 0x70c   : > { %4757 = vmatprep.mubr.msk.bf16.mxu1 %vm5292_vm0, %v7569_v51  ;;  %4768 = vmatpush3.bf16.msra.mxu0 %v4961_v17  ;;  %v4842_v57 = vunpack.i.h.bf16 %v4840_v11  ;;  %v4841_v50 = vunpack.i.l.bf16 %v4840_v11 }
 0x70d   : > { %4769 = vmatprep.subr.bf16.mxu0 %v7569_v51 }
 0x70e   : > { %v5213_v14 = vpop.eup %5212 }
 0x70f   : > { %v2596_v63 = vmul.f32 %v5213_v14, %v5195_v29  ;;  %v4962_v29 = vld [vmem:[%s7506_s4 + $0x10] sm:$0xff]  }
 0x710   : > { %4770 = vmatpush3.bf16.msra.mxu0 %v4962_v29 }
 0x711   : > { %v2603_v41 = vpack.c.bf16 %v2596_v63, %v2595_v27  ;;  %4771 = vmatprep.subr.bf16.mxu0 %v7569_v51 }
 0x712   : > { %v5215_v43 = vpop.eup %5214 }
 0x713   : > { %4758 = vmatmul.mubr.msk.bf16.gmra.mrb[144].mxu1 %vm1054_vm3, %v2603_v41  ;;  %v2597_v7 = vmul.f32 %v5215_v43, %v5197_v19  ;;  %v4963_v19 = vld [vmem:[%s7506_s4 + $0x18] sm:$0xff]  }
 0x714   : > { %4761 = vmatprep.mubr.msk.bf16.mxu1 %vm5292_vm0, %v7569_v51  ;;  %4772 = vmatpush3.bf16.msra.mxu0 %v4963_v19  ;;  %v4845_v19 = vpop.permute.xlu0 %4844 }
 0x715   : > { %v2604_v45 = vpack.c.bf16 %v2597_v7, %v2597_v7  ;;  %4773 = vmatprep.subr.bf16.mxu0 %v7569_v51 }
 0x718   : > { %4774 = vmatpush3.bf16.msra.mxu0 %v4964_v62 }
 0x719   : > { %4775 = vmatprep.subr.bf16.mxu0 %v7569_v51 }
 0x71b   : > { %4762 = vmatmul.mubr.msk.bf16.gmra.mrb[148].mxu1 %vm1054_vm3, %v2604_v45  ;;  %v7611_v45 = vpack.i.bf16 %v6627_v53, %v6622_v2  ;;  %v2893_v2 = vsel %vm891_vm1, %v6425_v39, %v4841_v50 }
 0x71c   : > { %3444 = vmatprep.mubr.bf16.mxu1 %v7602_v40  ;;  %4776 = vmatpush3.bf16.msra.mxu0 %v4965_v34  ;;  %v2894_v34 = vsel %vm891_vm1, %v6428_v5, %v4842_v57 }
 0x71d   : > { %4777 = vmatprep.subr.bf16.mxu0 %v7569_v51 }
 0x720   : > { %4778 = vmatpush3.bf16.msra.mxu0 %v4966_v48  ;;  %v4847_v48 = vunpack.i.h.bf16 %v4845_v19 }
 0x721   : > { %4779 = vmatprep.subr.bf16.mxu0 %v7569_v51 }
 0x724   : > { %4780 = vmatpush3.bf16.msra.mxu0 %v4967_v42  ;;  %v4846_v42 = vunpack.i.l.bf16 %v4845_v19 }
 0x726   : > { %v2907_v5 = vsel %vm2906_vm4, %v2893_v2, %v4846_v42 }
 0x77a   : > { %v2683_v18 = vpop.f32.mrb[124].mxu1 }
 0x77b   : > { %v4739_v36 = vpop.f32.mrb[125].mxu1 }
 0x77c   : > { %v2686_v32 = vpop.f32.mrb[126].mxu1 }
 0x77d   : > { %v4848_v47 = vpack.i.bf16 %v2686_v32, %v2683_v18  ;;  %v4740_v21 = vpop.f32.mrb[127].mxu1 }
 0x77e   : > { %v2908_v21 = vsel %vm2906_vm4, %v2894_v34, %v4847_v48 }
 0x77f   : > { %4849 = vrot.lane.b32.xlu0 %v4848_v47, %s5293_s16 }
 0x782   : > { %v2691_v44 = vpop.f32.mrb[128].mxu1 }
 0x783   : > { %4854 = vrot.lane.b32.xlu0 %v7603_v1, %s5295_s18  ;;  %v4743_v38 = vpop.f32.mrb[129].mxu1 }
 0x784   : > { %v2694_v15 = vpop.f32.mrb[130].mxu1 }
 0x785   : > { %v4863_v24 = vpack.i.bf16 %v2694_v15, %v2691_v44  ;;  %v4744_v61 = vpop.f32.mrb[131].mxu1 }
 0x787   : > { %4859 = vrot.lane.b32.xlu0 %v7604_v0, %s5294_s17 }
 0x78a   : > { %v2699_v52 = vpop.f32.mrb[132].mxu1 }
 0x78b   : > { %4864 = vrot.lane.b32.xlu0 %v4863_v24, %s5293_s16  ;;  %v4747_v6 = vpop.f32.mrb[133].mxu1 }
 0x78c   : > { %v2702_v25 = vpop.f32.mrb[134].mxu1 }
 0x78d   : > { %v4878_v54 = vpack.i.bf16 %v2702_v25, %v2699_v52  ;;  %v4748_v14 = vpop.f32.mrb[135].mxu1  ;;  %v4870_v52 = vpop.permute.xlu1 %4869 }
 0x78f   : > { %4874 = vrot.lane.b32.xlu0 %v7605_v60, %s5294_s17  ;;  %4879 = vrot.lane.b32.xlu1 %v4878_v54, %s5293_s16 }
 0x793   : > { %4884 = vrot.lane.b32.xlu0 %v7606_v12, %s5295_s18  ;;  %4889 = vrot.lane.b32.xlu1 %v7607_v35, %s5294_s17  ;;  %v4872_v12 = vunpack.i.h.bf16 %v4870_v52  ;;  %v4871_v35 = vunpack.i.l.bf16 %v4870_v52 }
 0x797   : > { %4899 = vrot.lane.b32.xlu1 %v7608_v13, %s5295_s18 }
 0x7ae   : > { %v2707_v27 = vpop.f32.mrb[136].mxu1 }
 0x7af   : > { %v4751_v9 = vpop.f32.mrb[137].mxu1 }
 0x7b0   : > { %v2710_v58 = vpop.f32.mrb[138].mxu1 }
 0x7b1   : > { %v4893_v63 = vpack.i.bf16 %v2710_v58, %v2707_v27  ;;  %v4752_v41 = vpop.f32.mrb[139].mxu1 }
 0x7b3   : > { %4894 = vrot.lane.b32.xlu0 %v4893_v63, %s5293_s16 }
 0x7b7   : > { %4904 = vrot.lane.b32.xlu0 %v7609_v59, %s5294_s17 }
 0x7bb   : > { %4914 = vrot.lane.b32.xlu0 %v7610_v56, %s5295_s18 }
 0x7de   : > { %v2715_v3 = vpop.f32.mrb[140].mxu1 }
 0x7df   : > { %v4755_v22 = vpop.f32.mrb[141].mxu1 }
 0x7e0   : > { %v2718_v4 = vpop.f32.mrb[142].mxu1 }
 0x7e1   : > { %v4908_v37 = vpack.i.bf16 %v2718_v4, %v2715_v3  ;;  %v4756_v43 = vpop.f32.mrb[143].mxu1  ;;  %v2897_v4 = vsel %vm891_vm1, %v6450_v28, %v4871_v35 }
 0x7e3   : > { %4909 = vrot.lane.b32.xlu1 %v4908_v37, %s5293_s16 }
 0x7e6   : > { %v2723_v7 = vpop.f32.mrb[144].mxu1 }
 0x7e7   : > { %4919 = vrot.lane.b32.xlu1 %v7611_v45, %s5294_s17  ;;  %v4759_v55 = vpop.f32.mrb[145].mxu1 }
 0x7e8   : > { %v2726_v49 = vpop.f32.mrb[146].mxu1 }
 0x7e9   : > { %v4923_v17 = vpack.i.bf16 %v2726_v49, %v2723_v7  ;;  %v4760_v29 = vpop.f32.mrb[147].mxu1 }
 0x7eb   : > { %2774 = vrot.lane.b32.xlu1 %v6554_v26, %s5295_s18  ;;  %4924 = vrot.lane.b32.xlu0 %v4923_v17, %s5293_s16  ;;  %s7448_s18 = scalar_lea.vmem %s7516_s14, %s4823_s15 }
 0x7ee   : > { %v2731_v62 = vpop.f32.mrb[148].mxu1 }
 0x7ef   : > { %2826 = vrot.lane.b32.xlu0 %v6635_v10, %s5294_s17  ;;  %2878 = vrot.lane.b32.xlu1 %v2731_v62, %s5293_s16  ;;  %v4763_v53 = vpop.f32.mrb[149].mxu1 }
 0x7f0   : > { %v2734_v26 = vpop.f32.mrb[150].mxu1 }
 0x7f1   : > { %v4850_v18 = vpop.permute.xlu0 %4849  ;;  %v4764_v36 = vpop.f32.mrb[151].mxu1 }
 0x7f2   : > { %v4852_v32 = vunpack.i.h.bf16 %v4850_v18  ;;  %v4851_v47 = vunpack.i.l.bf16 %v4850_v18 }
 0x7f4   : > { %v2921_v39 = vsel %vm2920_vm5, %v2907_v5, %v4851_v47  ;;  %v2922_v10 = vsel %vm2920_vm5, %v2908_v21, %v4852_v32 }
 0x7f5   : > { %v2934_v44 = vpack.c.bf16 %v2922_v10, %v2921_v39  ;;  %v4855_v1 = vpop.permute.xlu0 %4854 }
 0x7f6   : > { %v4857_v15 = vunpack.i.h.bf16 %v4855_v1  ;;  %v4856_v24 = vunpack.i.l.bf16 %v4855_v1 }
 0x7f7   : > { %4782 = vmatmul.mubr.bf16.vlgmr.msra.gmra.mrb[128].mxu0 %v2934_v44 }
 0x7f8   : > { %4785 = vmatprep.mubr.msk.bf16.mxu0 %vm5292_vm0, %v7569_v51  ;;  %v2896_v25 = vsel %vm891_vm1, %v6442_v33, %v4857_v15  ;;  %v2895_v54 = vsel %vm891_vm1, %v6437_v30, %v4856_v24  ;;  %v2898_v30 = vsel %vm891_vm1, %v6454_v31, %v4872_v12  ;;  %v7612_v12 = vld [vmem:[#allocation3_spill] sm:$0xff] }
 0x7f9   : > { %v4860_v38 = vpop.permute.xlu0 %4859 }
 0x7fa   : > { %v4862_v61 = vunpack.i.h.bf16 %v4860_v38  ;;  %v4861_v0 = vunpack.i.l.bf16 %v4860_v38 }
 0x7fc   : > { %v2909_v13 = vsel %vm2906_vm4, %v2895_v54, %v4861_v0  ;;  %v2910_v27 = vsel %vm2906_vm4, %v2896_v25, %v4862_v61 }
 0x7fd   : > { %v4865_v6 = vpop.permute.xlu0 %4864 }
 0x7fe   : > { %v4867_v14 = vunpack.i.h.bf16 %v4865_v6  ;;  %v4866_v60 = vunpack.i.l.bf16 %v4865_v6 }
 0x800   : > { %v2923_v9 = vsel %vm2920_vm5, %v2909_v13, %v4866_v60  ;;  %v2924_v58 = vsel %vm2920_vm5, %v2910_v27, %v4867_v14 }
 0x801   : > { %v4880_v63 = vpop.permute.xlu1 %4879  ;;  %v4875_v41 = vpop.permute.xlu0 %4874  ;;  %v2935_v59 = vpack.c.bf16 %v2924_v58, %v2923_v9 }
 0x802   : > { %v4882_v56 = vunpack.i.h.bf16 %v4880_v63  ;;  %v4881_v33 = vunpack.i.l.bf16 %v4880_v63  ;;  %v4877_v3 = vunpack.i.h.bf16 %v4875_v41  ;;  %v4876_v22 = vunpack.i.l.bf16 %v4875_v41 }
 0x803   : > { %4786 = vmatmul.mubr.bf16.gmra.mrb[132].mxu0 %v2935_v59 }
 0x804   : > { %v2912_v37 = vsel %vm2906_vm4, %v2898_v30, %v4877_v3  ;;  %v2911_v43 = vsel %vm2906_vm4, %v2897_v4, %v4876_v22  ;;  %4789 = vmatprep.mubr.msk.bf16.mxu0 %vm5292_vm0, %v7569_v51 }
 0x805   : > { %v2925_v7 = vsel %vm2920_vm5, %v2911_v43, %v4881_v33  ;;  %v2926_v45 = vsel %vm2920_vm5, %v2912_v37, %v4882_v56  ;;  %v4885_v31 = vpop.permute.xlu0 %4884  ;;  %v4890_v11 = vpop.permute.xlu1 %4889  ;;  %v7613_v33 = vld [vmem:[#allocation17_spill] sm:$0xff]  ;;  %v6935_v37 = vld [vmem:[%s7507_s5] ss:$0 sm:$0xff] }
 0x806   : > { %v2936_v55 = vpack.c.bf16 %v2926_v45, %v2925_v7  ;;  %v4887_v28 = vunpack.i.h.bf16 %v4885_v31  ;;  %v4886_v49 = vunpack.i.l.bf16 %v4885_v31  ;;  %v4892_v17 = vunpack.i.h.bf16 %v4890_v11  ;;  %v5269_v31 = vld [vmem:[%s5444_s24] sm:$0xff] }
 0x807   : > { %v4891_v29 = vunpack.i.l.bf16 %v4890_v11 }
 0x808   : > { %v2900_v57 = vsel %vm891_vm1, %v6465_v8, %v4887_v28  ;;  %v2899_v50 = vsel %vm891_vm1, %v6461_v20, %v4886_v49  ;;  %v5270_v49 = vld [vmem:[%s5444_s24 + $0x8] sm:$0xff] }
 0x809   : > { %v2913_v2 = vsel %vm2906_vm4, %v2899_v50, %v4891_v29  ;;  %v2914_v53 = vsel %vm2906_vm4, %v2900_v57, %v4892_v17  ;;  %v4900_v8 = vpop.permute.xlu1 %4899 }
 0x80a   : > { %v4902_v36 = vunpack.i.h.bf16 %v4900_v8  ;;  %v4901_v20 = vunpack.i.l.bf16 %v4900_v8 }
 0x80b   : > { %4790 = vmatmul.mubr.bf16.gmra.mrb[136].mxu0 %v2936_v55 }
 0x80c   : > { %4793 = vmatprep.mubr.msk.bf16.mxu0 %vm5292_vm0, %v7569_v51  ;;  %v2902_v21 = vsel %vm891_vm1, %v6476_v23, %v4902_v36  ;;  %v2901_v39 = vsel %vm891_vm1, %v6470_v16, %v4901_v20  ;;  %v5273_v20 = vld [vmem:[%s5444_s24 + $0x20] sm:$0xff] }
 0x825   : > { %v4895_v19 = vpop.permute.xlu0 %4894 }
 0x826   : > { %v4897_v62 = vunpack.i.h.bf16 %v4895_v19  ;;  %v4896_v34 = vunpack.i.l.bf16 %v4895_v19 }
 0x828   : > { %v2927_v48 = vsel %vm2920_vm5, %v2913_v2, %v4896_v34  ;;  %v2928_v42 = vsel %vm2920_vm5, %v2914_v53, %v4897_v62  ;;  %v5271_v62 = vld [vmem:[%s5444_s24 + $0x10] sm:$0xff] }
 0x829   : > { %v2937_v26 = vpack.c.bf16 %v2928_v42, %v2927_v48  ;;  %v4905_v18 = vpop.permute.xlu0 %4904  ;;  %v5272_v48 = vld [vmem:[%s5444_s24 + $0x18] sm:$0xff] }
 0x82a   : > { %v4907_v32 = vunpack.i.h.bf16 %v4905_v18  ;;  %v4906_v47 = vunpack.i.l.bf16 %v4905_v18 }
 0x82b   : > { %4794 = vmatmul.mubr.bf16.gmra.mrb[140].mxu0 %v2937_v26 }
 0x82c   : > { %4797 = vmatprep.mubr.msk.bf16.mxu0 %vm5292_vm0, %v7569_v51  ;;  %v2916_v1 = vsel %vm2906_vm4, %v2902_v21, %v4907_v32  ;;  %v2915_v38 = vsel %vm2906_vm4, %v2901_v39, %v4906_v47  ;;  %v5274_v21 = vld [vmem:[%s5444_s24 + $0x28] sm:$0xff] }
 0x82d   : > { %v4915_v15 = vpop.permute.xlu0 %4914 }
 0x82e   : > { %v4917_v6 = vunpack.i.h.bf16 %v4915_v15  ;;  %v4916_v25 = vunpack.i.l.bf16 %v4915_v15  ;;  %v5275_v15 = vld [vmem:[%s5444_s24 + $0x30] sm:$0xff] }
 0x830   : > { %v2904_v60 = vsel %vm891_vm1, %v6508_v46, %v4917_v6  ;;  %v2903_v35 = vsel %vm891_vm1, %v7612_v12, %v4916_v25 }
 0x855   : > { %v4910_v5 = vpop.permute.xlu1 %4909 }
 0x856   : > { %v4912_v10 = vunpack.i.h.bf16 %v4910_v5  ;;  %v4911_v44 = vunpack.i.l.bf16 %v4910_v5 }
 0x858   : > { %v2929_v24 = vsel %vm2920_vm5, %v2915_v38, %v4911_v44  ;;  %v2930_v61 = vsel %vm2920_vm5, %v2916_v1, %v4912_v10 }
 0x859   : > { %v4920_v0 = vpop.permute.xlu1 %4919  ;;  %v2938_v52 = vpack.c.bf16 %v2930_v61, %v2929_v24 }
 0x85a   : > { %v4922_v54 = vunpack.i.h.bf16 %v4920_v0  ;;  %v4921_v23 = vunpack.i.l.bf16 %v4920_v0 }
 0x85b   : > { %4798 = vmatmul.mubr.bf16.gmra.mrb[144].mxu0 %v2938_v52  ;;  %v5276_v52 = vld [vmem:[%s5444_s24 + $0x38] sm:$0xff] }
 0x85c   : > { %4801 = vmatprep.mubr.msk.bf16.mxu0 %vm5292_vm0, %v7569_v51  ;;  %v2917_v9 = vsel %vm2906_vm4, %v2903_v35, %v4921_v23  ;;  %v2918_v58 = vsel %vm2906_vm4, %v2904_v60, %v4922_v54 }
 0x85d   : > { %v2775_v16 = vpop.permute.xlu1 %2774  ;;  %v4925_v14 = vpop.permute.xlu0 %4924 }
 0x85e   : > { %v4927_v13 = vunpack.i.h.bf16 %v4925_v14  ;;  %v4926_v27 = vunpack.i.l.bf16 %v4925_v14  ;;  %v2905_v3 = vsel %vm891_vm1, %v7613_v33, %v2775_v16  ;;  %v5277_v14 = vld [vmem:[%s5444_s24 + $0x40] sm:$0xff] }
 0x860   : > { %v2931_v63 = vsel %vm2920_vm5, %v2917_v9, %v4926_v27  ;;  %v2932_v41 = vsel %vm2920_vm5, %v2918_v58, %v4927_v13  ;;  %v5278_v13 = vld [vmem:[%s5444_s24 + $0x48] sm:$0xff] }
 0x861   : > { %v2827_v59 = vpop.permute.xlu0 %2826  ;;  %v2939_v56 = vpack.c.bf16 %v2932_v41, %v2931_v63  ;;  %v2879_v46 = vpop.permute.xlu1 %2878 }
 0x862   : > { %v2919_v22 = vsel %vm2906_vm4, %v2905_v3, %v2827_v59  ;;  %v5279_v59 = vld [vmem:[%s5444_s24 + $0x50] sm:$0xff] }
 0x863   : > { %4802 = vmatmul.mubr.bf16.gmra.mrb[148].mxu0 %v2939_v56  ;;  %v2933_v30 = vsel %vm2920_vm5, %v2919_v22, %v2879_v46  ;;  %v5280_v46 = vld [vmem:[%s5444_s24 + $0x58] sm:$0xff] }
 0x864   : > { %4805 = vmatprep.mubr.msk.bf16.mxu0 %vm5292_vm0, %v7569_v51  ;;  %v2940_v4 = vpack.c.bf16 %v2933_v30, %v2933_v30 }
 0x86b   : > { %4806 = vmatmul.mubr.bf16.gmra.mrb[152].mxu0 %v2940_v4 }
 0x8ca   : > { %v3046_v43 = vpop.f32.mrb[128].mxu0 }
 0x8cb   : > { %v3047_v7 = vadd.f32 %v6935_v37, %v3046_v43  ;;  %v4783_v45 = vpop.f32.mrb[129].mxu0 }
 0x8cc   : > { %v3049_v55 = vpop.f32.mrb[130].mxu0  ;;  %v5281_v45 = vld [vmem:[%s5444_s24 + $0x60] sm:$0xff] }
 0x8cd   : > { %v6939_v11 = vadd.f32 %v5269_v31, %v3047_v7  ;;  %v3050_v51 = vadd.f32 %v6935_v37, %v3049_v55  ;;  %v4784_v28 = vpop.f32.mrb[131].mxu0 }
 0x8ce   : > { %v4970_v28 = vld [vmem:[%s7510_s8 + $0x4] ss:$8 sps:$4 sm:$0xff]  }
 0x8cf   : > { %v6943_v17 = vadd.f32 %v5270_v49, %v3050_v51  ;;  %3115 = vadd.xlane.f32.xlu0 %v6939_v11  ;;  %v4968_v51 = vld [vmem:[%s7510_s8] ss:$8 sps:$4 sm:$0xff]   ;;  %3412 = vmatprep.subr.bf16.mxu1 %v4970_v28  ;;  %v4971_v49 = vld [vmem:[%s7510_s8 + $0x10] ss:$8 sps:$4 sm:$0xff]  }
 0x8d0   : > { %3413 = vmatpush1.bf16.msra.mxu1 %v4968_v51 }
 0x8d1   : > { %3117 = vadd.xlane.f32.xlu1 %v6943_v17 }
 0x8d6   : > { %v3054_v29 = vpop.f32.mrb[132].mxu0 }
 0x8d7   : > { %v3055_v57 = vadd.f32 %v6935_v37, %v3054_v29  ;;  %v4787_v50 = vpop.f32.mrb[133].mxu0 }
 0x8d8   : > { %v3057_v19 = vpop.f32.mrb[134].mxu0 }
 0x8d9   : > { %v6949_v34 = vadd.f32 %v5271_v62, %v3055_v57  ;;  %v3058_v2 = vadd.f32 %v6935_v37, %v3057_v19  ;;  %v4788_v53 = vpop.f32.mrb[135].mxu0 }
 0x8db   : > { %3119 = vadd.xlane.f32.xlu0 %v6949_v34  ;;  %v6954_v42 = vadd.f32 %v5272_v48, %v3058_v2 }
 0x8de   : > { %v3062_v26 = vpop.f32.mrb[136].mxu0 }
 0x8df   : > { %v3063_v8 = vadd.f32 %v6935_v37, %v3062_v26  ;;  %3121 = vadd.xlane.f32.xlu0 %v6954_v42  ;;  %v4791_v18 = vpop.f32.mrb[137].mxu0 }
 0x8e0   : > { %v3065_v36 = vpop.f32.mrb[138].mxu0 }
 0x8e1   : > { %v6959_v32 = vadd.f32 %v5273_v20, %v3063_v8  ;;  %v3066_v47 = vadd.f32 %v6935_v37, %v3065_v36  ;;  %v4792_v5 = vpop.f32.mrb[139].mxu0 }
 0x8e3   : > { %v6963_v39 = vadd.f32 %v5274_v21, %v3066_v47  ;;  %3123 = vadd.xlane.f32.xlu1 %v6959_v32 }
 0x8e5   : > { %3125 = vadd.xlane.f32.xlu0 %v6963_v39 }
 0x8fe   : > { %v3070_v10 = vpop.f32.mrb[140].mxu0 }
 0x8ff   : > { %v3071_v44 = vadd.f32 %v6935_v37, %v3070_v10  ;;  %v4795_v1 = vpop.f32.mrb[141].mxu0 }
 0x900   : > { %v3073_v38 = vpop.f32.mrb[142].mxu0 }
 0x901   : > { %v6969_v24 = vadd.f32 %v5275_v15, %v3071_v44  ;;  %v3074_v61 = vadd.f32 %v6935_v37, %v3073_v38  ;;  %v4796_v0 = vpop.f32.mrb[143].mxu0 }
 0x902   : > { %v4977_v0 = vld [vmem:[%s7510_s8 + $0x30] ss:$8 sps:$4 sm:$0xff]  }
 0x903   : > { %v6973_v6 = vadd.f32 %v5276_v52, %v3074_v61  ;;  %3127 = vadd.xlane.f32.xlu1 %v6969_v24  ;;  %v4979_v61 = vld [vmem:[%s7510_s8 + $0x34] ss:$8 sps:$4 sm:$0xff]   ;;  %v4980_v52 = vld [vmem:[%s7510_s8 + $0x40] ss:$8 sps:$4 sm:$0xff]  }
 0x905   : > { %3129 = vadd.xlane.f32.xlu0 %v6973_v6 }
 0x92e   : > { %v3078_v25 = vpop.f32.mrb[144].mxu0 }
 0x92f   : > { %v3079_v54 = vadd.f32 %v6935_v37, %v3078_v25  ;;  %v4799_v23 = vpop.f32.mrb[145].mxu0  ;;  %v4985_v25 = vld [vmem:[%s7510_s8 + $0x54] ss:$8 sps:$4 sm:$0xff]  }
 0x930   : > { %v3081_v16 = vpop.f32.mrb[146].mxu0  ;;  %v4988_v23 = vld [vmem:[%s7510_s8 + $0x64] ss:$8 sps:$4 sm:$0xff]  }
 0x931   : > { %v6979_v60 = vadd.f32 %v5277_v14, %v3079_v54  ;;  %v3082_v12 = vadd.f32 %v6935_v37, %v3081_v16  ;;  %v4800_v35 = vpop.f32.mrb[147].mxu0  ;;  %v4983_v54 = vld [vmem:[%s7510_s8 + $0x50] ss:$8 sps:$4 sm:$0xff]   ;;  %v4986_v16 = vld [vmem:[%s7510_s8 + $0x60] ss:$8 sps:$4 sm:$0xff]  }
 0x932   : > { %v4991_v14 = vld [vmem:[%s7510_s8 + $0x74] ss:$8 sps:$4 sm:$0xff]  }
 0x933   : > { %v6983_v27 = vadd.f32 %v5278_v13, %v3082_v12  ;;  %3131 = vadd.xlane.f32.xlu1 %v6979_v60  ;;  %v4989_v12 = vld [vmem:[%s7510_s8 + $0x70] ss:$8 sps:$4 sm:$0xff]  }
 0x935   : > { %3133 = vadd.xlane.f32.xlu0 %v6983_v27 }
 0x936   : > { %v3086_v9 = vpop.f32.mrb[148].mxu0 }
 0x937   : > { %v3087_v58 = vadd.f32 %v6935_v37, %v3086_v9  ;;  %v4803_v63 = vpop.f32.mrb[149].mxu0 }
 0x938   : > { %v3089_v41 = vpop.f32.mrb[150].mxu0 }
 0x939   : > { %v6989_v56 = vadd.f32 %v5279_v59, %v3087_v58  ;;  %v3090_v33 = vadd.f32 %v6935_v37, %v3089_v41  ;;  %v4804_v3 = vpop.f32.mrb[151].mxu0 }
 0x93b   : > { %v6993_v22 = vadd.f32 %v5280_v46, %v3090_v33  ;;  %3135 = vadd.xlane.f32.xlu1 %v6989_v56 }
 0x93d   : > { %3137 = vadd.xlane.f32.xlu0 %v6993_v22 }
 0x93e   : > { %v3094_v30 = vpop.f32.mrb[152].mxu0 }
 0x93f   : > { %v3095_v4 = vadd.f32 %v6935_v37, %v3094_v30  ;;  %v4807_v43 = vpop.f32.mrb[153].mxu0  ;;  %v4973_v37 = vld [vmem:[%s7510_s8 + $0x14] ss:$8 sps:$4 sm:$0xff]  }
 0x940   : > { %v3097_v7 = vpop.f32.mrb[154].mxu0  ;;  %3414 = vmatprep.subr.bf16.mxu1 %v4973_v37 }
 0x941   : > { %v6999_v55 = vadd.f32 %v5281_v45, %v3095_v4  ;;  %v4808_v31 = vpop.f32.mrb[155].mxu0  ;;  %3415 = vmatpush1.bf16.msra.mxu1 %v4971_v49 }
 0x943   : > { %3139 = vadd.xlane.f32.xlu1 %v6999_v55 }
 0x95c   : > { %v3116_v29 = vpop.xlane.xlu0 %3115 }
 0x95d   : > { %v3142_v57 = vmul.f32 0.0078125, %v3116_v29 }
 0x95e   : > { %v3118_v50 = vpop.xlane.xlu1 %3117 }
 0x95f   : > { %v7015_v19 = vsub.f32 %v6939_v11, %v3142_v57  ;;  %v3143_v62 = vmul.f32 0.0078125, %v3118_v50 }
 0x961   : > { %v7018_v2 = vsub.f32 %v6943_v17, %v3143_v62  ;;  %v3168_v53 = vmul.f32 %v7015_v19, %v7015_v19 }
 0x963   : > { %3181 = vadd.xlane.f32.xlu0 %v3168_v53  ;;  %v3169_v48 = vmul.f32 %v7018_v2, %v7018_v2 }
 0x965   : > { %3183 = vadd.xlane.f32.xlu1 %v3169_v48 }
 0x968   : > { %v3120_v26 = vpop.xlane.xlu0 %3119 }
 0x969   : > { %v3144_v8 = vmul.f32 0.0078125, %v3120_v26 }
 0x96b   : > { %v7025_v18 = vsub.f32 %v6949_v34, %v3144_v8  ;;  %v4976_v34 = vld [vmem:[%s7510_s8 + $0x24] ss:$8 sps:$4 sm:$0xff]  }
 0x96c   : > { %v3122_v11 = vpop.xlane.xlu0 %3121  ;;  %3416 = vmatprep.subr.bf16.mxu1 %v4976_v34 }
 0x96d   : > { %v3145_v36 = vmul.f32 0.0078125, %v3122_v11  ;;  %v3170_v20 = vmul.f32 %v7025_v18, %v7025_v18 }
 0x96f   : > { %v7030_v17 = vsub.f32 %v6954_v42, %v3145_v36  ;;  %3185 = vadd.xlane.f32.xlu0 %v3170_v20  ;;  %v4974_v42 = vld [vmem:[%s7510_s8 + $0x20] ss:$8 sps:$4 sm:$0xff]  }
 0x970   : > { %v3124_v47 = vpop.xlane.xlu1 %3123  ;;  %3417 = vmatpush1.bf16.msra.mxu1 %v4974_v42  ;;  %v7118_v20 = vld [vmem:[%s7508_s6] ss:$0 sm:$0xff] }
 0x971   : > { %v3146_v5 = vmul.f32 0.0078125, %v3124_v47  ;;  %v3171_v21 = vmul.f32 %v7030_v17, %v7030_v17  ;;  %3418 = vmatprep.subr.bf16.mxu1 %v4979_v61 }
 0x972   : > { %v3126_v10 = vpop.xlane.xlu0 %3125 }
 0x973   : > { %v7038_v44 = vsub.f32 %v6959_v32, %v3146_v5  ;;  %v3147_v1 = vmul.f32 0.0078125, %v3126_v10  ;;  %3187 = vadd.xlane.f32.xlu1 %v3171_v21  ;;  %v4992_v5 = vld [vmem:[%s7512_s10 + $0x40] sm:$0xff]   ;;  %v4994_v10 = vld [vmem:[%s7512_s10 + $0x48] sm:$0xff]  }
 0x974   : > { %3419 = vmatpush1.bf16.msra.mxu1 %v4977_v0  ;;  %v4993_v21 = vld [vmem:[%s7512_s10] sm:$0xff]   ;;  %4327 = vmatprep.subr.bf16.mxu0 %v4992_v5  ;;  %v4995_v0 = vld [vmem:[%s7512_s10 + $0x8] sm:$0xff]  }
 0x975   : > { %v7044_v38 = vsub.f32 %v6963_v39, %v3147_v1  ;;  %v3172_v15 = vmul.f32 %v7038_v44, %v7038_v44  ;;  %v4982_v39 = vld [vmem:[%s7510_s8 + $0x44] ss:$8 sps:$4 sm:$0xff]   ;;  %4328 = vmatpush3.bf16.msra.mxu0 %v4993_v21 }
 0x976   : > { %3420 = vmatprep.subr.bf16.mxu1 %v4982_v39  ;;  %4329 = vmatprep.subr.bf16.mxu0 %v4994_v10 }
 0x977   : > { %3189 = vadd.xlane.f32.xlu0 %v3172_v15  ;;  %v3173_v32 = vmul.f32 %v7044_v38, %v7044_v38 }
 0x978   : > { %3421 = vmatpush1.bf16.msra.mxu1 %v4980_v52  ;;  %v7138_v52 = vld [vmem:[%s7509_s7] ss:$0 sm:$0xff] }
 0x979   : > { %3191 = vadd.xlane.f32.xlu1 %v3173_v32  ;;  %3422 = vmatprep.subr.bf16.mxu1 %v4985_v25 }
 0x97a   : > { %4330 = vmatpush3.bf16.msra.mxu0 %v4995_v0 }
 0x97c   : > { %3423 = vmatpush1.bf16.msra.mxu1 %v4983_v54 }
 0x97d   : > { %3424 = vmatprep.subr.bf16.mxu1 %v4988_v23 }
 0x980   : > { %3425 = vmatpush1.bf16.msra.mxu1 %v4986_v16 }
 0x981   : > { %3426 = vmatprep.subr.bf16.mxu1 %v4991_v14 }
 0x984   : > { %3427 = vmatpush1.bf16.msra.mxu1 %v4989_v12  ;;  %v4997_v12 = vld [vmem:[%s7512_s10 + $0x10] sm:$0xff]  }
 0x990   : > { %v3128_v35 = vpop.xlane.xlu1 %3127 }
 0x991   : > { %v3148_v13 = vmul.f32 0.0078125, %v3128_v35 }
 0x992   : > { %v3130_v9 = vpop.xlane.xlu0 %3129 }
 0x993   : > { %v7081_v58 = vsub.f32 %v6969_v24, %v3148_v13  ;;  %v3149_v63 = vmul.f32 0.0078125, %v3130_v9  ;;  %v4998_v9 = vld [vmem:[%s7512_s10 + $0x58] sm:$0xff]  }
 0x995   : > { %v7084_v41 = vsub.f32 %v6973_v6, %v3149_v63  ;;  %v3174_v59 = vmul.f32 %v7081_v58, %v7081_v58 }
 0x997   : > { %3193 = vadd.xlane.f32.xlu0 %v3174_v59  ;;  %v3175_v33 = vmul.f32 %v7084_v41, %v7084_v41 }
 0x999   : > { %3195 = vadd.xlane.f32.xlu1 %v3175_v33  ;;  %v4999_v33 = vld [vmem:[%s7512_s10 + $0x18] sm:$0xff]  }
 0x9c0   : > { %v3132_v3 = vpop.xlane.xlu1 %3131 }
 0x9c1   : > { %v3150_v46 = vmul.f32 0.0078125, %v3132_v3 }
 0x9c2   : > { %v3134_v30 = vpop.xlane.xlu0 %3133 }
 0x9c3   : > { %v7091_v4 = vsub.f32 %v6979_v60, %v3150_v46  ;;  %v3151_v24 = vmul.f32 0.0078125, %v3134_v30  ;;  %v5000_v46 = vld [vmem:[%s7512_s10 + $0x60] sm:$0xff]  }
 0x9c5   : > { %v7094_v43 = vsub.f32 %v6983_v27, %v3151_v24  ;;  %v3176_v6 = vmul.f32 %v7091_v4, %v7091_v4  ;;  %v5001_v24 = vld [vmem:[%s7512_s10 + $0x20] sm:$0xff]  }
 0x9c7   : > { %3197 = vadd.xlane.f32.xlu0 %v3176_v6  ;;  %v3177_v7 = vmul.f32 %v7094_v43, %v7094_v43 }
 0x9c8   : > { %v3136_v45 = vpop.xlane.xlu1 %3135 }
 0x9c9   : > { %v3152_v31 = vmul.f32 0.0078125, %v3136_v45  ;;  %3199 = vadd.xlane.f32.xlu1 %v3177_v7  ;;  %v5002_v7 = vld [vmem:[%s7512_s10 + $0x68] sm:$0xff]  }
 0x9ca   : > { %v3138_v51 = vpop.xlane.xlu0 %3137 }
 0x9cb   : > { %v7101_v28 = vsub.f32 %v6989_v56, %v3152_v31  ;;  %v3153_v60 = vmul.f32 0.0078125, %v3138_v51 }
 0x9cd   : > { %v7104_v37 = vsub.f32 %v6993_v22, %v3153_v60  ;;  %v3178_v27 = vmul.f32 %v7101_v28, %v7101_v28 }
 0x9cf   : > { %3201 = vadd.xlane.f32.xlu0 %v3178_v27  ;;  %v3179_v49 = vmul.f32 %v7104_v37, %v7104_v37 }
 0x9d0   : > { %v3140_v29 = vpop.xlane.xlu1 %3139 }
 0x9d1   : > { %v3154_v57 = vmul.f32 0.0078125, %v3140_v29  ;;  %3203 = vadd.xlane.f32.xlu1 %v3179_v49 }
 0x9d3   : > { %v7111_v50 = vsub.f32 %v6999_v55, %v3154_v57 }
 0x9d5   : > { %v3180_v56 = vmul.f32 %v7111_v50, %v7111_v50 }
 0x9d7   : > { %3205 = vadd.xlane.f32.xlu0 %v3180_v56 }
 0x9f0   : > { %v3182_v62 = vpop.xlane.xlu0 %3181 }
 0x9f1   : > { %v3207_v22 = vmul.f32 0.0078125, %v3182_v62 }
 0x9f2   : > { %v3184_v53 = vpop.xlane.xlu1 %3183 }
 0x9f3   : > { %v3220_v48 = vadd.f32 1e-06, %v3207_v22  ;;  %v3208_v26 = vmul.f32 0.0078125, %v3184_v53 }
 0x9f5   : > { %5216 = vrsqrt.f32 %v3220_v48  ;;  %v3221_v8 = vadd.f32 1e-06, %v3208_v26 }
 0x9f7   : > { %5218 = vrsqrt.f32 %v3221_v8 }
 0x9fc   : > { %v3186_v11 = vpop.xlane.xlu0 %3185 }
 0x9fd   : > { %v3209_v36 = vmul.f32 0.0078125, %v3186_v11 }
 0x9ff   : > { %v5217_v55 = vpop.eup %5216  ;;  %v3222_v47 = vadd.f32 1e-06, %v3209_v36 }
 0xa00   : > { %v3246_v34 = vmul.f32 %v5217_v55, %v7015_v19  ;;  %v3188_v1 = vpop.xlane.xlu1 %3187  ;;  %v4996_v19 = vld [vmem:[%s7512_s10 + $0x50] sm:$0xff]  }
 0xa01   : > { %v5219_v42 = vpop.eup %5218  ;;  %5220 = vrsqrt.f32 %v3222_v47  ;;  %v3210_v15 = vmul.f32 0.0078125, %v3188_v1  ;;  %4331 = vmatprep.subr.bf16.mxu0 %v4996_v19 }
 0xa02   : > { %v3265_v61 = vmul.f32 %v7118_v20, %v3246_v34  ;;  %v3247_v32 = vmul.f32 %v5219_v42, %v7018_v2  ;;  %4332 = vmatpush3.bf16.msra.mxu0 %v4997_v12 }
 0xa03   : > { %v3223_v39 = vadd.f32 1e-06, %v3210_v15  ;;  %4333 = vmatprep.subr.bf16.mxu0 %v4998_v9 }
 0xa04   : > { %v3266_v25 = vmul.f32 %v7118_v20, %v3247_v32  ;;  %v3190_v54 = vpop.xlane.xlu0 %3189  ;;  %v7145_v16 = vadd.f32 %v7138_v52, %v3265_v61 }
 0xa05   : > { %5222 = vrsqrt.f32 %v3223_v39  ;;  %v3211_v2 = vmul.f32 0.0078125, %v3190_v54 }
 0xa06   : > { %v3192_v23 = vpop.xlane.xlu1 %3191  ;;  %v7148_v14 = vadd.f32 %v7138_v52, %v3266_v25  ;;  %4334 = vmatpush3.bf16.msra.mxu0 %v4999_v33  ;;  %v5003_v25 = vld [vmem:[%s7512_s10 + $0x28] sm:$0xff]  }
 0xa07   : > { %v3224_v35 = vadd.f32 1e-06, %v3211_v2  ;;  %v3212_v13 = vmul.f32 0.0078125, %v3192_v23  ;;  %4335 = vmatprep.subr.bf16.mxu0 %v5000_v46  ;;  %v5007_v46 = vld [vmem:[%s7512_s10 + $0x38] sm:$0xff]  }
 0xa08   : > { %v3297_v63 = vpack.c.bf16 %v7148_v14, %v7145_v16 }
 0xa09   : > { %5224 = vrsqrt.f32 %v3224_v35  ;;  %v3225_v59 = vadd.f32 1e-06, %v3212_v13  ;;  %v5004_v35 = vld [vmem:[%s7512_s10 + $0x70] sm:$0xff]  }
 0xa0a   : > { %3445 = vmatmul.mubr.bf16.vlgmr.msra.gmra.mrb[152].mxu1 %v3297_v63  ;;  %4336 = vmatpush3.bf16.msra.mxu0 %v5001_v24  ;;  %v5005_v13 = vld [vmem:[%s7512_s10 + $0x30] sm:$0xff]  }
 0xa0b   : > { %v5221_v3 = vpop.eup %5220  ;;  %5226 = vrsqrt.f32 %v3225_v59  ;;  %3454 = vmatprep.mubr.bf16.mxu1 %v7602_v40  ;;  %4337 = vmatprep.subr.bf16.mxu0 %v5002_v7  ;;  %v5006_v59 = vld [vmem:[%s7512_s10 + $0x78] sm:$0xff]  }
 0xa0c   : > { %v3248_v30 = vmul.f32 %v5221_v3, %v7025_v18 }
 0xa0e   : > { %v3267_v31 = vmul.f32 %v7118_v20, %v3248_v30  ;;  %4338 = vmatpush3.bf16.msra.mxu0 %v5003_v25 }
 0xa0f   : > { %v5223_v6 = vpop.eup %5222  ;;  %4339 = vmatprep.subr.bf16.mxu0 %v5004_v35 }
 0xa10   : > { %v3249_v45 = vmul.f32 %v5223_v6, %v7030_v17  ;;  %v7176_v18 = vadd.f32 %v7138_v52, %v3267_v31 }
 0xa12   : > { %v3268_v51 = vmul.f32 %v7118_v20, %v3249_v45  ;;  %4340 = vmatpush3.bf16.msra.mxu0 %v5005_v13 }
 0xa13   : > { %v5225_v60 = vpop.eup %5224  ;;  %4341 = vmatprep.subr.bf16.mxu0 %v5006_v59 }
 0xa14   : > { %v7179_v27 = vadd.f32 %v7138_v52, %v3268_v51  ;;  %v3250_v49 = vmul.f32 %v5225_v60, %v7038_v44 }
 0xa15   : > { %v5227_v29 = vpop.eup %5226 }
 0xa16   : > { %v3298_v57 = vpack.c.bf16 %v7179_v27, %v7176_v18  ;;  %v3251_v17 = vmul.f32 %v5227_v29, %v7044_v38  ;;  %v3269_v56 = vmul.f32 %v7118_v20, %v3250_v49  ;;  %4342 = vmatpush3.bf16.msra.mxu0 %v5007_v46 }
 0xa18   : > { %3455 = vmatmul.mubr.bf16.gmra.mrb[156].mxu1 %v3298_v57  ;;  %v3270_v62 = vmul.f32 %v7118_v20, %v3251_v17  ;;  %v7192_v53 = vadd.f32 %v7138_v52, %v3269_v56 }
 0xa19   : > { %3464 = vmatprep.mubr.bf16.mxu1 %v7602_v40 }
 0xa1a   : > { %v7189_v22 = vadd.f32 %v7138_v52, %v3270_v62 }
 0xa1c   : > { %v3299_v44 = vpack.c.bf16 %v7189_v22, %v7192_v53 }
 0xa20   : > { %3465 = vmatmul.mubr.bf16.gmra.mrb[160].mxu1 %v3299_v44 }
 0xa21   : > { %3474 = vmatprep.mubr.bf16.mxu1 %v7602_v40 }
 0xa24   : > { %v3194_v38 = vpop.xlane.xlu0 %3193 }
 0xa25   : > { %v3213_v48 = vmul.f32 0.0078125, %v3194_v38 }
 0xa26   : > { %v3196_v26 = vpop.xlane.xlu1 %3195 }
 0xa27   : > { %v3226_v8 = vadd.f32 1e-06, %v3213_v48  ;;  %v3214_v11 = vmul.f32 0.0078125, %v3196_v26 }
 0xa29   : > { %5228 = vrsqrt.f32 %v3226_v8  ;;  %v3227_v36 = vadd.f32 1e-06, %v3214_v11  ;;  %v3320_v11 = vld [vmem:[%s7511_s9] sm:$0x3] }
 0xa2b   : > { %5230 = vrsqrt.f32 %v3227_v36  ;;  %v7614_v36 = vld [vmem:[#allocation2_spill] sm:$0xff] }
 0xa33   : > { %v5229_v55 = vpop.eup %5228 }
 0xa34   : > { %v3252_v47 = vmul.f32 %v5229_v55, %v7081_v58  ;;  %v7615_v55 = vsub.s32 0, %v7614_v36 }
 0xa35   : > { %v5231_v5 = vpop.eup %5230 }
 0xa36   : > { %v3253_v21 = vmul.f32 %v5231_v5, %v7084_v41  ;;  %v3271_v10 = vmul.f32 %v7118_v20, %v3252_v47  ;;  %v7263_v47 = vrot.slane %v3320_v11, %v7615_v55 }
 0xa38   : > { %v3272_v34 = vmul.f32 %v7118_v20, %v3253_v21  ;;  %v7202_v1 = vadd.f32 %v7138_v52, %v3271_v10 }
 0xa3a   : > { %v7205_v42 = vadd.f32 %v7138_v52, %v3272_v34 }
 0xa3c   : > { %v3300_v15 = vpack.c.bf16 %v7205_v42, %v7202_v1 }
 0xa3e   : > { %3475 = vmatmul.mubr.bf16.gmra.mrb[164].mxu1 %v3300_v15 }
 0xa3f   : > { %3484 = vmatprep.mubr.bf16.mxu1 %v7602_v40 }
 0xa54   : > { %v3198_v58 = vpop.xlane.xlu0 %3197 }
 0xa55   : > { %v3215_v61 = vmul.f32 0.0078125, %v3198_v58 }
 0xa56   : > { %v3200_v32 = vpop.xlane.xlu1 %3199 }
 0xa57   : > { %v3228_v41 = vadd.f32 1e-06, %v3215_v61  ;;  %v3216_v0 = vmul.f32 0.0078125, %v3200_v32 }
 0xa59   : > { %5232 = vrsqrt.f32 %v3228_v41  ;;  %v3229_v39 = vadd.f32 1e-06, %v3216_v0 }
 0xa5b   : > { %5234 = vrsqrt.f32 %v3229_v39 }
 0xa5c   : > { %v3202_v19 = vpop.xlane.xlu0 %3201 }
 0xa5d   : > { %v3217_v54 = vmul.f32 0.0078125, %v3202_v19 }
 0xa5e   : > { %v3204_v2 = vpop.xlane.xlu1 %3203 }
 0xa5f   : > { %v3230_v23 = vadd.f32 1e-06, %v3217_v54  ;;  %v3218_v12 = vmul.f32 0.0078125, %v3204_v2 }
 0xa61   : > { %5236 = vrsqrt.f32 %v3230_v23  ;;  %v3231_v9 = vadd.f32 1e-06, %v3218_v12 }
 0xa63   : > { %v5233_v63 = vpop.eup %5232  ;;  %5238 = vrsqrt.f32 %v3231_v9 }
 0xa64   : > { %v3206_v33 = vpop.xlane.xlu0 %3205  ;;  %v3254_v3 = vmul.f32 %v5233_v63, %v7091_v4 }
 0xa65   : > { %v5235_v30 = vpop.eup %5234  ;;  %v3219_v24 = vmul.f32 0.0078125, %v3206_v33 }
 0xa66   : > { %v3255_v6 = vmul.f32 %v5235_v30, %v7094_v43  ;;  %v3273_v7 = vmul.f32 %v7118_v20, %v3254_v3 }
 0xa67   : > { %v3232_v45 = vadd.f32 1e-06, %v3219_v24 }
 0xa68   : > { %v3274_v31 = vmul.f32 %v7118_v20, %v3255_v6  ;;  %v7230_v51 = vadd.f32 %v7138_v52, %v3273_v7 }
 0xa69   : > { %5240 = vrsqrt.f32 %v3232_v45 }
 0xa6a   : > { %v7233_v4 = vadd.f32 %v7138_v52, %v3274_v31 }
 0xa6b   : > { %v5237_v60 = vpop.eup %5236 }
 0xa6c   : > { %v3301_v49 = vpack.c.bf16 %v7233_v4, %v7230_v51  ;;  %v3256_v29 = vmul.f32 %v5237_v60, %v7101_v28 }
 0xa6d   : > { %v5239_v43 = vpop.eup %5238 }
 0xa6e   : > { %3485 = vmatmul.mubr.bf16.gmra.mrb[168].mxu1 %v3301_v49  ;;  %v3257_v57 = vmul.f32 %v5239_v43, %v7104_v37  ;;  %v3275_v17 = vmul.f32 %v7118_v20, %v3256_v29 }
 0xa6f   : > { %3494 = vmatprep.mubr.bf16.mxu1 %v7602_v40 }
 0xa70   : > { %v3276_v56 = vmul.f32 %v7118_v20, %v3257_v57  ;;  %v7243_v62 = vadd.f32 %v7138_v52, %v3275_v17 }
 0xa72   : > { %v7246_v44 = vadd.f32 %v7138_v52, %v3276_v56 }
 0xa73   : > { %v5241_v38 = vpop.eup %5240 }
 0xa74   : > { %v3302_v28 = vpack.c.bf16 %v7246_v44, %v7243_v62  ;;  %v3258_v48 = vmul.f32 %v5241_v38, %v7111_v50  ;;  %v7616_v50 = vsub.s32 1, %v7614_v36 }
 0xa76   : > { %3495 = vmatmul.mubr.bf16.gmra.mrb[172].mxu1 %v3302_v28  ;;  %v3277_v37 = vmul.f32 %v7118_v20, %v3258_v48  ;;  %v7267_v20 = vrot.slane %v3320_v11, %v7616_v50 }
 0xa77   : > { %3504 = vmatprep.mubr.bf16.mxu1 %v7602_v40 }
 0xa78   : > { %v7254_v26 = vadd.f32 %v7138_v52, %v3277_v37 }
 0xa7a   : > { %v3303_v8 = vpack.c.bf16 %v7254_v26, %v7254_v26 }
 0xa7e   : > { %3505 = vmatmul.mubr.bf16.gmra.mrb[176].mxu1 %v3303_v8 }
 0xadd   : > { %v3446_v40 = vpop.f32.mrb[152].mxu1 }
 0xade   : > { %v3447_v52 = vadd.f32 %v3446_v40, %v7263_v47  ;;  %v3448_v5 = vpop.f32.mrb[153].mxu1 }
 0xadf   : > { %v3449_v21 = vadd.f32 %v3448_v5, %v7267_v20  ;;  %v3450_v10 = vpop.f32.mrb[154].mxu1 }
 0xae0   : > { %v3451_v34 = vadd.f32 %v3450_v10, %v7263_v47  ;;  %v3452_v15 = vpop.f32.mrb[155].mxu1  ;;  %v3513_v61 = vmax.f32 %v3447_v52, 0.0 }
 0xae1   : > { %v3453_v58 = vadd.f32 %v3452_v15, %v7267_v20  ;;  %v3514_v41 = vmax.f32 %v3449_v21, 0.0 }
 0xae2   : > { %v3515_v32 = vmax.f32 %v3451_v34, 0.0 }
 0xae3   : > { %v3516_v0 = vmax.f32 %v3453_v58, 0.0 }
 0xae4   : > { %v3539_v39 = vpack.c.bf16 %v3515_v32, %v3513_v61 }
 0xae5   : > { %v3540_v19 = vpack.c.bf16 %v3516_v0, %v3514_v41 }
 0xae7   : > { %3720 = vmatprep.mubr.bf16.mxu0 %v3540_v19 }
 0xae8   : > { %3721 = vmatmul.mubr.bf16.vlgmr.msra.gmra.mrb[156].mxu0 %v3539_v39 }
 0xaeb   : > { %v3456_v25 = vpop.f32.mrb[156].mxu1 }
 0xaec   : > { %v3457_v54 = vadd.f32 %v3456_v25, %v7263_v47  ;;  %v3458_v2 = vpop.f32.mrb[157].mxu1 }
 0xaed   : > { %v3459_v23 = vadd.f32 %v3458_v2, %v7267_v20  ;;  %v3460_v12 = vpop.f32.mrb[158].mxu1 }
 0xaee   : > { %v3461_v35 = vadd.f32 %v3460_v12, %v7263_v47  ;;  %v3462_v13 = vpop.f32.mrb[159].mxu1  ;;  %v3517_v63 = vmax.f32 %v3457_v54, 0.0 }
 0xaef   : > { %v3463_v9 = vadd.f32 %v3462_v13, %v7267_v20  ;;  %v3518_v33 = vmax.f32 %v3459_v23, 0.0 }
 0xaf0   : > { %v3519_v59 = vmax.f32 %v3461_v35, 0.0 }
 0xaf1   : > { %v3520_v3 = vmax.f32 %v3463_v9, 0.0 }
 0xaf2   : > { %v3541_v46 = vpack.c.bf16 %v3519_v59, %v3517_v63 }
 0xaf3   : > { %v3542_v30 = vpack.c.bf16 %v3520_v3, %v3518_v33  ;;  %v3466_v24 = vpop.f32.mrb[160].mxu1 }
 0xaf4   : > { %v3467_v6 = vadd.f32 %v3466_v24, %v7263_v47  ;;  %v3468_v7 = vpop.f32.mrb[161].mxu1 }
 0xaf5   : > { %v3469_v45 = vadd.f32 %v3468_v7, %v7267_v20  ;;  %v3470_v31 = vpop.f32.mrb[162].mxu1  ;;  %3728 = vmatprep.mubr.bf16.mxu0 %v3542_v30 }
 0xaf6   : > { %v3471_v60 = vadd.f32 %v3470_v31, %v7263_v47  ;;  %v3472_v49 = vpop.f32.mrb[163].mxu1  ;;  %3729 = vmatmul.mubr.bf16.gmra.mrb[160].mxu0 %v3541_v46  ;;  %v3521_v43 = vmax.f32 %v3467_v6, 0.0 }
 0xaf7   : > { %v3473_v29 = vadd.f32 %v3472_v49, %v7267_v20  ;;  %v3522_v17 = vmax.f32 %v3469_v45, 0.0 }
 0xaf8   : > { %v3523_v57 = vmax.f32 %v3471_v60, 0.0 }
 0xaf9   : > { %v3524_v56 = vmax.f32 %v3473_v29, 0.0 }
 0xafa   : > { %v3543_v38 = vpack.c.bf16 %v3523_v57, %v3521_v43 }
 0xafb   : > { %v3544_v28 = vpack.c.bf16 %v3524_v56, %v3522_v17 }
 0xafd   : > { %3736 = vmatprep.mubr.bf16.mxu0 %v3544_v28 }
 0xafe   : > { %3737 = vmatmul.mubr.bf16.gmra.mrb[164].mxu0 %v3543_v38 }
 0xb11   : > { %v3476_v48 = vpop.f32.mrb[164].mxu1 }
 0xb12   : > { %v3477_v37 = vadd.f32 %v3476_v48, %v7263_v47  ;;  %v3478_v8 = vpop.f32.mrb[165].mxu1 }
 0xb13   : > { %v3479_v11 = vadd.f32 %v3478_v8, %v7267_v20  ;;  %v3480_v36 = vpop.f32.mrb[166].mxu1 }
 0xb14   : > { %v3481_v55 = vadd.f32 %v3480_v36, %v7263_v47  ;;  %v3482_v50 = vpop.f32.mrb[167].mxu1  ;;  %v3525_v52 = vmax.f32 %v3477_v37, 0.0  ;;  %v7298_v36 = vld [vmem:[%s7513_s11] ss:$0 sm:$0xff] }
 0xb15   : > { %v3483_v40 = vadd.f32 %v3482_v50, %v7267_v20  ;;  %v3526_v21 = vmax.f32 %v3479_v11, 0.0 }
 0xb16   : > { %v3527_v5 = vmax.f32 %v3481_v55, 0.0 }
 0xb17   : > { %v3528_v10 = vmax.f32 %v3483_v40, 0.0 }
 0xb18   : > { %v3545_v34 = vpack.c.bf16 %v3527_v5, %v3525_v52 }
 0xb19   : > { %v3546_v15 = vpack.c.bf16 %v3528_v10, %v3526_v21 }
 0xb1b   : > { %3744 = vmatprep.mubr.bf16.mxu0 %v3546_v15 }
 0xb1c   : > { %3745 = vmatmul.mubr.bf16.gmra.mrb[168].mxu0 %v3545_v34 }
 0xb41   : > { %v3486_v58 = vpop.f32.mrb[168].mxu1 }
 0xb42   : > { %v3487_v61 = vadd.f32 %v3486_v58, %v7263_v47  ;;  %v3488_v32 = vpop.f32.mrb[169].mxu1 }
 0xb43   : > { %v3489_v41 = vadd.f32 %v3488_v32, %v7267_v20  ;;  %v3490_v0 = vpop.f32.mrb[170].mxu1 }
 0xb44   : > { %v3491_v39 = vadd.f32 %v3490_v0, %v7263_v47  ;;  %v3492_v19 = vpop.f32.mrb[171].mxu1  ;;  %v3529_v54 = vmax.f32 %v3487_v61, 0.0 }
 0xb45   : > { %v3493_v25 = vadd.f32 %v3492_v19, %v7267_v20  ;;  %v3530_v23 = vmax.f32 %v3489_v41, 0.0 }
 0xb46   : > { %v3531_v2 = vmax.f32 %v3491_v39, 0.0 }
 0xb47   : > { %v3532_v12 = vmax.f32 %v3493_v25, 0.0 }
 0xb48   : > { %v3547_v35 = vpack.c.bf16 %v3531_v2, %v3529_v54 }
 0xb49   : > { %v3548_v13 = vpack.c.bf16 %v3532_v12, %v3530_v23  ;;  %v3496_v9 = vpop.f32.mrb[172].mxu1 }
 0xb4a   : > { %v3497_v63 = vadd.f32 %v3496_v9, %v7263_v47  ;;  %v3498_v59 = vpop.f32.mrb[173].mxu1 }
 0xb4b   : > { %v3499_v33 = vadd.f32 %v3498_v59, %v7267_v20  ;;  %v3500_v3 = vpop.f32.mrb[174].mxu1  ;;  %3752 = vmatprep.mubr.bf16.mxu0 %v3548_v13 }
 0xb4c   : > { %v3501_v46 = vadd.f32 %v3500_v3, %v7263_v47  ;;  %v3502_v30 = vpop.f32.mrb[175].mxu1  ;;  %3753 = vmatmul.mubr.bf16.gmra.mrb[172].mxu0 %v3547_v35  ;;  %v3533_v6 = vmax.f32 %v3497_v63, 0.0 }
 0xb4d   : > { %v3503_v24 = vadd.f32 %v3502_v30, %v7267_v20  ;;  %v3534_v45 = vmax.f32 %v3499_v33, 0.0 }
 0xb4e   : > { %v3535_v7 = vmax.f32 %v3501_v46, 0.0 }
 0xb4f   : > { %v3536_v31 = vmax.f32 %v3503_v24, 0.0 }
 0xb50   : > { %v3549_v60 = vpack.c.bf16 %v3535_v7, %v3533_v6 }
 0xb51   : > { %v3550_v49 = vpack.c.bf16 %v3536_v31, %v3534_v45  ;;  %v3506_v29 = vpop.f32.mrb[176].mxu1 }
 0xb52   : > { %v3507_v43 = vadd.f32 %v3506_v29, %v7263_v47  ;;  %v3508_v57 = vpop.f32.mrb[177].mxu1 }
 0xb53   : > { %v3509_v17 = vadd.f32 %v3508_v57, %v7267_v20  ;;  %v3510_v56 = vpop.f32.mrb[178].mxu1  ;;  %3760 = vmatprep.mubr.bf16.mxu0 %v3550_v49 }
 0xb54   : > { %v3511_v38 = vpop.f32.mrb[179].mxu1  ;;  %3761 = vmatmul.mubr.bf16.gmra.mrb[176].mxu0 %v3549_v60  ;;  %v3537_v48 = vmax.f32 %v3507_v43, 0.0 }
 0xb55   : > { %v3538_v28 = vmax.f32 %v3509_v17, 0.0 }
 0xb56   : > { %v3551_v8 = vpack.c.bf16 %v3537_v48, %v3537_v48 }
 0xb57   : > { %v3552_v37 = vpack.c.bf16 %v3538_v28, %v3538_v28 }
 0xb59   : > { %3768 = vmatprep.mubr.bf16.mxu0 %v3552_v37 }
 0xb5c   : > { %3769 = vmatmul.mubr.bf16.gmra.mrb[180].mxu0 %v3551_v8 }
 0xbbb   : > { %v4343_v11 = vpop.f32.mrb[156].mxu0 }
 0xbbc   : > { %v4344_v47 = vpop.f32.mrb[157].mxu0 }
 0xbbd   : > { %v4345_v55 = vadd.f32 %v4344_v47, %v4343_v11  ;;  %v4346_v50 = vpop.f32.mrb[158].mxu0 }
 0xbbe   : > { %v4347_v20 = vpop.f32.mrb[159].mxu0 }
 0xbbf   : > { %v3723_v40 = vadd.f32 %v4345_v55, %v7298_v36  ;;  %v4348_v52 = vadd.f32 %v4347_v20, %v4346_v50 }
 0xbc1   : > { %v3726_v5 = vadd.f32 %v4348_v52, %v7298_v36  ;;  %v7303_v21 = vadd.f32 %v3723_v40, %v7145_v16 }
 0xbc3   : > { %3791 = vadd.xlane.f32.xlu1 %v7303_v21  ;;  %v7307_v10 = vadd.f32 %v3726_v5, %v7148_v14 }
 0xbc5   : > { %3793 = vadd.xlane.f32.xlu0 %v7307_v10 }
 0xbc9   : > { %v4349_v34 = vpop.f32.mrb[160].mxu0 }
 0xbca   : > { %v4350_v15 = vpop.f32.mrb[161].mxu0 }
 0xbcb   : > { %v4351_v58 = vadd.f32 %v4350_v15, %v4349_v34  ;;  %v4352_v61 = vpop.f32.mrb[162].mxu0 }
 0xbcc   : > { %v4353_v32 = vpop.f32.mrb[163].mxu0 }
 0xbcd   : > { %v3731_v41 = vadd.f32 %v4351_v58, %v7298_v36  ;;  %v4354_v0 = vadd.f32 %v4353_v32, %v4352_v61 }
 0xbcf   : > { %v3734_v39 = vadd.f32 %v4354_v0, %v7298_v36  ;;  %v7313_v16 = vadd.f32 %v3731_v41, %v7176_v18 }
 0xbd1   : > { %v4355_v19 = vpop.f32.mrb[164].mxu0  ;;  %3795 = vadd.xlane.f32.xlu1 %v7313_v16  ;;  %v7317_v14 = vadd.f32 %v3734_v39, %v7179_v27 }
 0xbd2   : > { %v4356_v25 = vpop.f32.mrb[165].mxu0 }
 0xbd3   : > { %v4357_v54 = vadd.f32 %v4356_v25, %v4355_v19  ;;  %v4358_v2 = vpop.f32.mrb[166].mxu0  ;;  %3797 = vadd.xlane.f32.xlu0 %v7317_v14 }
 0xbd4   : > { %v4359_v23 = vpop.f32.mrb[167].mxu0 }
 0xbd5   : > { %v3739_v12 = vadd.f32 %v4357_v54, %v7298_v36  ;;  %v4360_v35 = vadd.f32 %v4359_v23, %v4358_v2 }
 0xbd7   : > { %v3742_v13 = vadd.f32 %v4360_v35, %v7298_v36  ;;  %v7323_v18 = vadd.f32 %v3739_v12, %v7192_v53 }
 0xbd9   : > { %3799 = vadd.xlane.f32.xlu1 %v7323_v18  ;;  %v7327_v9 = vadd.f32 %v3742_v13, %v7189_v22 }
 0xbdb   : > { %3801 = vadd.xlane.f32.xlu0 %v7327_v9 }
 0xbef   : > { %v4361_v27 = vpop.f32.mrb[168].mxu0 }
 0xbf0   : > { %v4362_v63 = vpop.f32.mrb[169].mxu0 }
 0xbf1   : > { %v4363_v59 = vadd.f32 %v4362_v63, %v4361_v27  ;;  %v4364_v33 = vpop.f32.mrb[170].mxu0 }
 0xbf2   : > { %v4365_v3 = vpop.f32.mrb[171].mxu0 }
 0xbf3   : > { %v3747_v46 = vadd.f32 %v4363_v59, %v7298_v36  ;;  %v4366_v30 = vadd.f32 %v4365_v3, %v4364_v33 }
 0xbf5   : > { %v3750_v24 = vadd.f32 %v4366_v30, %v7298_v36  ;;  %v7333_v53 = vadd.f32 %v3747_v46, %v7202_v1 }
 0xbf7   : > { %3803 = vadd.xlane.f32.xlu1 %v7333_v53  ;;  %v7337_v22 = vadd.f32 %v3750_v24, %v7205_v42 }
 0xbf9   : > { %3805 = vadd.xlane.f32.xlu0 %v7337_v22 }
 0xc1f   : > { %v4367_v6 = vpop.f32.mrb[172].mxu0 }
 0xc20   : > { %v4368_v7 = vpop.f32.mrb[173].mxu0 }
 0xc21   : > { %v4369_v45 = vadd.f32 %v4368_v7, %v4367_v6  ;;  %v4370_v31 = vpop.f32.mrb[174].mxu0 }
 0xc22   : > { %v4371_v60 = vpop.f32.mrb[175].mxu0 }
 0xc23   : > { %v3755_v49 = vadd.f32 %v4369_v45, %v7298_v36  ;;  %v4372_v29 = vadd.f32 %v4371_v60, %v4370_v31 }
 0xc25   : > { %v3758_v43 = vadd.f32 %v4372_v29, %v7298_v36  ;;  %v7343_v1 = vadd.f32 %v3755_v49, %v7230_v51 }
 0xc27   : > { %v4373_v57 = vpop.f32.mrb[176].mxu0  ;;  %3807 = vadd.xlane.f32.xlu1 %v7343_v1  ;;  %v7347_v42 = vadd.f32 %v3758_v43, %v7233_v4 }
 0xc28   : > { %v4374_v17 = vpop.f32.mrb[177].mxu0 }
 0xc29   : > { %v4375_v56 = vadd.f32 %v4374_v17, %v4373_v57  ;;  %v4376_v38 = vpop.f32.mrb[178].mxu0  ;;  %3809 = vadd.xlane.f32.xlu0 %v7347_v42 }
 0xc2a   : > { %v4377_v28 = vpop.f32.mrb[179].mxu0 }
 0xc2b   : > { %v3763_v48 = vadd.f32 %v4375_v56, %v7298_v36  ;;  %v4378_v37 = vadd.f32 %v4377_v28, %v4376_v38 }
 0xc2d   : > { %v3766_v8 = vadd.f32 %v4378_v37, %v7298_v36  ;;  %v7353_v51 = vadd.f32 %v3763_v48, %v7243_v62 }
 0xc2f   : > { %v4379_v11 = vpop.f32.mrb[180].mxu0  ;;  %3811 = vadd.xlane.f32.xlu1 %v7353_v51  ;;  %v7357_v4 = vadd.f32 %v3766_v8, %v7246_v44 }
 0xc30   : > { %v4380_v47 = vpop.f32.mrb[181].mxu0 }
 0xc31   : > { %v4381_v55 = vadd.f32 %v4380_v47, %v4379_v11  ;;  %v4382_v50 = vpop.f32.mrb[182].mxu0  ;;  %3813 = vadd.xlane.f32.xlu0 %v7357_v4 }
 0xc32   : > { %v4383_v20 = vpop.f32.mrb[183].mxu0  ;;  %v7433_v50 = vld [vmem:[%s7514_s12] ss:$0 sm:$0xff] }
 0xc33   : > { %v3771_v40 = vadd.f32 %v4381_v55, %v7298_v36 }
 0xc35   : > { %v7362_v52 = vadd.f32 %v3771_v40, %v7254_v26 }
 0xc37   : > { %3815 = vadd.xlane.f32.xlu1 %v7362_v52 }
 0xc50   : > { %v3792_v62 = vpop.xlane.xlu1 %3791 }
 0xc51   : > { %v3817_v5 = vmul.f32 0.0078125, %v3792_v62 }
 0xc52   : > { %v3794_v34 = vpop.xlane.xlu0 %3793 }
 0xc53   : > { %v7366_v15 = vsub.f32 %v7303_v21, %v3817_v5  ;;  %v3818_v44 = vmul.f32 0.0078125, %v3794_v34  ;;  %v7439_v5 = vld [vmem:[%s7515_s13] ss:$0 sm:$0xff] }
 0xc55   : > { %v7369_v58 = vsub.f32 %v7307_v10, %v3818_v44  ;;  %v3843_v61 = vmul.f32 %v7366_v15, %v7366_v15 }
 0xc57   : > { %3856 = vadd.xlane.f32.xlu0 %v3843_v61  ;;  %v3844_v26 = vmul.f32 %v7369_v58, %v7369_v58 }
 0xc59   : > { %3858 = vadd.xlane.f32.xlu1 %v3844_v26 }
 0xc5e   : > { %v3796_v36 = vpop.xlane.xlu1 %3795 }
 0xc5f   : > { %v3819_v32 = vmul.f32 0.0078125, %v3796_v36 }
 0xc60   : > { %v3798_v41 = vpop.xlane.xlu0 %3797 }
 0xc61   : > { %v7376_v0 = vsub.f32 %v7313_v16, %v3819_v32  ;;  %v3820_v21 = vmul.f32 0.0078125, %v3798_v41 }
 0xc63   : > { %v7379_v39 = vsub.f32 %v7317_v14, %v3820_v21  ;;  %v3845_v10 = vmul.f32 %v7376_v0, %v7376_v0 }
 0xc65   : > { %3860 = vadd.xlane.f32.xlu0 %v3845_v10  ;;  %v3846_v19 = vmul.f32 %v7379_v39, %v7379_v39 }
 0xc66   : > { %v3800_v25 = vpop.xlane.xlu1 %3799 }
 0xc67   : > { %v3821_v54 = vmul.f32 0.0078125, %v3800_v25  ;;  %3862 = vadd.xlane.f32.xlu1 %v3846_v19 }
 0xc68   : > { %v3802_v2 = vpop.xlane.xlu0 %3801 }
 0xc69   : > { %v7386_v23 = vsub.f32 %v7323_v18, %v3821_v54  ;;  %v3822_v16 = vmul.f32 0.0078125, %v3802_v2 }
 0xc6b   : > { %v7389_v12 = vsub.f32 %v7327_v9, %v3822_v16  ;;  %v3847_v14 = vmul.f32 %v7386_v23, %v7386_v23 }
 0xc6d   : > { %3864 = vadd.xlane.f32.xlu0 %v3847_v14  ;;  %v3848_v35 = vmul.f32 %v7389_v12, %v7389_v12 }
 0xc6f   : > { %3866 = vadd.xlane.f32.xlu1 %v3848_v35 }
 0xc84   : > { %v3804_v13 = vpop.xlane.xlu1 %3803 }
 0xc85   : > { %v3823_v27 = vmul.f32 0.0078125, %v3804_v13 }
 0xc86   : > { %v3806_v63 = vpop.xlane.xlu0 %3805 }
 0xc87   : > { %v7396_v59 = vsub.f32 %v7333_v53, %v3823_v27  ;;  %v3824_v18 = vmul.f32 0.0078125, %v3806_v63 }
 0xc89   : > { %v7399_v33 = vsub.f32 %v7337_v22, %v3824_v18  ;;  %v3849_v9 = vmul.f32 %v7396_v59, %v7396_v59 }
 0xc8b   : > { %3868 = vadd.xlane.f32.xlu0 %v3849_v9  ;;  %v3850_v3 = vmul.f32 %v7399_v33, %v7399_v33 }
 0xc8d   : > { %3870 = vadd.xlane.f32.xlu1 %v3850_v3 }
 0xcb4   : > { %v3808_v46 = vpop.xlane.xlu1 %3807 }
 0xcb5   : > { %v3825_v30 = vmul.f32 0.0078125, %v3808_v46 }
 0xcb6   : > { %v3810_v24 = vpop.xlane.xlu0 %3809 }
 0xcb7   : > { %v7406_v6 = vsub.f32 %v7343_v1, %v3825_v30  ;;  %v3826_v53 = vmul.f32 0.0078125, %v3810_v24 }
 0xcb9   : > { %v7409_v7 = vsub.f32 %v7347_v42, %v3826_v53  ;;  %v3851_v22 = vmul.f32 %v7406_v6, %v7406_v6 }
 0xcbb   : > { %3872 = vadd.xlane.f32.xlu0 %v3851_v22  ;;  %v3852_v45 = vmul.f32 %v7409_v7, %v7409_v7 }
 0xcbc   : > { %v3812_v31 = vpop.xlane.xlu1 %3811 }
 0xcbd   : > { %v3827_v60 = vmul.f32 0.0078125, %v3812_v31  ;;  %3874 = vadd.xlane.f32.xlu1 %v3852_v45 }
 0xcbe   : > { %v3814_v49 = vpop.xlane.xlu0 %3813 }
 0xcbf   : > { %v7416_v29 = vsub.f32 %v7353_v51, %v3827_v60  ;;  %v3828_v43 = vmul.f32 0.0078125, %v3814_v49 }
 0xcc1   : > { %v7419_v1 = vsub.f32 %v7357_v4, %v3828_v43  ;;  %v3853_v57 = vmul.f32 %v7416_v29, %v7416_v29 }
 0xcc3   : > { %3876 = vadd.xlane.f32.xlu0 %v3853_v57  ;;  %v3854_v42 = vmul.f32 %v7419_v1, %v7419_v1 }
 0xcc4   : > { %v3816_v17 = vpop.xlane.xlu1 %3815 }
 0xcc5   : > { %v3829_v56 = vmul.f32 0.0078125, %v3816_v17  ;;  %3878 = vadd.xlane.f32.xlu1 %v3854_v42 }
 0xcc7   : > { %v7426_v38 = vsub.f32 %v7362_v52, %v3829_v56 }
 0xcc9   : > { %v3855_v28 = vmul.f32 %v7426_v38, %v7426_v38 }
 0xccb   : > { %3880 = vadd.xlane.f32.xlu0 %v3855_v28 }
 0xce4   : > { %v3857_v48 = vpop.xlane.xlu0 %3856 }
 0xce5   : > { %v3882_v37 = vmul.f32 0.0078125, %v3857_v48 }
 0xce6   : > { %v3859_v8 = vpop.xlane.xlu1 %3858 }
 0xce7   : > { %v3895_v51 = vadd.f32 1e-06, %v3882_v37  ;;  %v3883_v11 = vmul.f32 0.0078125, %v3859_v8 }
 0xce9   : > { %5242 = vrsqrt.f32 %v3895_v51  ;;  %v3896_v4 = vadd.f32 1e-06, %v3883_v11 }
 0xceb   : > { %5244 = vrsqrt.f32 %v3896_v4 }
 0xcf2   : > { %v3861_v47 = vpop.xlane.xlu0 %3860 }
 0xcf3   : > { %v5243_v55 = vpop.eup %5242  ;;  %v3884_v20 = vmul.f32 0.0078125, %v3861_v47 }
 0xcf4   : > { %v3921_v40 = vmul.f32 %v5243_v55, %v7366_v15  ;;  %v3863_v52 = vpop.xlane.xlu1 %3862 }
 0xcf5   : > { %v5245_v62 = vpop.eup %5244  ;;  %v3897_v34 = vadd.f32 1e-06, %v3884_v20  ;;  %v3885_v44 = vmul.f32 0.0078125, %v3863_v52 }
 0xcf6   : > { %v3940_v61 = vmul.f32 %v7433_v50, %v3921_v40  ;;  %v3922_v26 = vmul.f32 %v5245_v62, %v7369_v58 }
 0xcf7   : > { %5246 = vrsqrt.f32 %v3897_v34  ;;  %v3898_v15 = vadd.f32 1e-06, %v3885_v44 }
 0xcf8   : > { %v3959_v36 = vadd.f32 %v7439_v5, %v3940_v61  ;;  %v3941_v32 = vmul.f32 %v7433_v50, %v3922_v26 }
 0xcf9   : > { %5248 = vrsqrt.f32 %v3898_v15 }
 0xcfa   : > { %3972 = vst [vmem:[%s7448_s18] sm:$0xff] %v3959_v36  ;;  %v3960_v41 = vadd.f32 %v7439_v5, %v3941_v32  ;;  %v3865_v21 = vpop.xlane.xlu0 %3864 }
 0xcfb   : > { %v3886_v58 = vmul.f32 0.0078125, %v3865_v21 }
 0xcfc   : > { %3973 = vst [vmem:[%s7448_s18 + $0x8] sm:$0xff] %v3960_v41  ;;  %v3867_v10 = vpop.xlane.xlu1 %3866 }
 0xcfd   : > { %v3899_v19 = vadd.f32 1e-06, %v3886_v58  ;;  %v3887_v25 = vmul.f32 0.0078125, %v3867_v10 }
 0xcff   : > { %5250 = vrsqrt.f32 %v3899_v19  ;;  %v3900_v54 = vadd.f32 1e-06, %v3887_v25 }
 0xd01   : > { %v5247_v2 = vpop.eup %5246  ;;  %5252 = vrsqrt.f32 %v3900_v54 }
 0xd02   : > { %v3923_v16 = vmul.f32 %v5247_v2, %v7376_v0 }
 0xd03   : > { %v5249_v14 = vpop.eup %5248 }
 0xd04   : > { %v3942_v35 = vmul.f32 %v7433_v50, %v3923_v16  ;;  %v3924_v13 = vmul.f32 %v5249_v14, %v7379_v39 }
 0xd06   : > { %v3961_v27 = vadd.f32 %v7439_v5, %v3942_v35  ;;  %v3943_v63 = vmul.f32 %v7433_v50, %v3924_v13 }
 0xd08   : > { %3974 = vst [vmem:[%s7448_s18 + $0x10] sm:$0xff] %v3961_v27  ;;  %v3962_v18 = vadd.f32 %v7439_v5, %v3943_v63 }
 0xd09   : > { %v5251_v9 = vpop.eup %5250 }
 0xd0a   : > { %3975 = vst [vmem:[%s7448_s18 + $0x18] sm:$0xff] %v3962_v18  ;;  %v3925_v3 = vmul.f32 %v5251_v9, %v7386_v23 }
 0xd0b   : > { %v5253_v46 = vpop.eup %5252 }
 0xd0c   : > { %v3944_v0 = vmul.f32 %v7433_v50, %v3925_v3  ;;  %v3926_v30 = vmul.f32 %v5253_v46, %v7389_v12 }
 0xd0e   : > { %v3963_v24 = vadd.f32 %v7439_v5, %v3944_v0  ;;  %v3945_v39 = vmul.f32 %v7433_v50, %v3926_v30 }
 0xd10   : > { %3976 = vst [vmem:[%s7448_s18 + $0x20] sm:$0xff] %v3963_v24  ;;  %v3964_v53 = vadd.f32 %v7439_v5, %v3945_v39 }
 0xd12   : > { %3977 = vst [vmem:[%s7448_s18 + $0x28] sm:$0xff] %v3964_v53 }
 0xd18   : > { %v3869_v22 = vpop.xlane.xlu0 %3868 }
 0xd19   : > { %v3888_v45 = vmul.f32 0.0078125, %v3869_v22 }
 0xd1a   : > { %v3871_v31 = vpop.xlane.xlu1 %3870 }
 0xd1b   : > { %v3901_v60 = vadd.f32 1e-06, %v3888_v45  ;;  %v3889_v23 = vmul.f32 0.0078125, %v3871_v31 }
 0xd1d   : > { %5254 = vrsqrt.f32 %v3901_v60  ;;  %v3902_v49 = vadd.f32 1e-06, %v3889_v23 }
 0xd1f   : > { %5256 = vrsqrt.f32 %v3902_v49 }
 0xd27   : > { %v5255_v43 = vpop.eup %5254 }
 0xd28   : > { %v3927_v12 = vmul.f32 %v5255_v43, %v7396_v59 }
 0xd29   : > { %v5257_v57 = vpop.eup %5256 }
 0xd2a   : > { %v3946_v42 = vmul.f32 %v7433_v50, %v3927_v12  ;;  %v3928_v17 = vmul.f32 %v5257_v57, %v7399_v33 }
 0xd2c   : > { %v3965_v56 = vadd.f32 %v7439_v5, %v3946_v42  ;;  %v3947_v28 = vmul.f32 %v7433_v50, %v3928_v17 }
 0xd2e   : > { %3978 = vst [vmem:[%s7448_s18 + $0x30] sm:$0xff] %v3965_v56  ;;  %v3966_v48 = vadd.f32 %v7439_v5, %v3947_v28 }
 0xd30   : > { %3979 = vst [vmem:[%s7448_s18 + $0x38] sm:$0xff] %v3966_v48 }
 0xd48   : > { %v3873_v37 = vpop.xlane.xlu0 %3872 }
 0xd49   : > { %v3890_v8 = vmul.f32 0.0078125, %v3873_v37 }
 0xd4a   : > { %v3875_v51 = vpop.xlane.xlu1 %3874 }
 0xd4b   : > { %v3903_v11 = vadd.f32 1e-06, %v3890_v8  ;;  %v3891_v4 = vmul.f32 0.0078125, %v3875_v51 }
 0xd4d   : > { %5258 = vrsqrt.f32 %v3903_v11  ;;  %v3904_v59 = vadd.f32 1e-06, %v3891_v4 }
 0xd4f   : > { %5260 = vrsqrt.f32 %v3904_v59 }
 0xd50   : > { %v3877_v47 = vpop.xlane.xlu0 %3876 }
 0xd51   : > { %v3892_v55 = vmul.f32 0.0078125, %v3877_v47 }
 0xd52   : > { %v3879_v20 = vpop.xlane.xlu1 %3878 }
 0xd53   : > { %v3905_v33 = vadd.f32 1e-06, %v3892_v55  ;;  %v3893_v40 = vmul.f32 0.0078125, %v3879_v20 }
 0xd55   : > { %5262 = vrsqrt.f32 %v3905_v33  ;;  %v3906_v52 = vadd.f32 1e-06, %v3893_v40 }
 0xd57   : > { %v5259_v62 = vpop.eup %5258  ;;  %5264 = vrsqrt.f32 %v3906_v52 }
 0xd58   : > { %v3929_v34 = vmul.f32 %v5259_v62, %v7406_v6  ;;  %v3881_v44 = vpop.xlane.xlu0 %3880 }
 0xd59   : > { %v5261_v61 = vpop.eup %5260  ;;  %v3894_v26 = vmul.f32 0.0078125, %v3881_v44 }
 0xd5a   : > { %v3948_v15 = vmul.f32 %v7433_v50, %v3929_v34  ;;  %v3930_v36 = vmul.f32 %v5261_v61, %v7409_v7 }
 0xd5b   : > { %v3907_v32 = vadd.f32 1e-06, %v3894_v26 }
 0xd5c   : > { %v3967_v41 = vadd.f32 %v7439_v5, %v3948_v15  ;;  %v3949_v21 = vmul.f32 %v7433_v50, %v3930_v36 }
 0xd5d   : > { %5266 = vrsqrt.f32 %v3907_v32 }
 0xd5e   : > { %3980 = vst [vmem:[%s7448_s18 + $0x40] sm:$0xff] %v3967_v41  ;;  %v3968_v58 = vadd.f32 %v7439_v5, %v3949_v21 }
 0xd5f   : > { %v5263_v6 = vpop.eup %5262 }
 0xd60   : > { %3981 = vst [vmem:[%s7448_s18 + $0x48] sm:$0xff] %v3968_v58  ;;  %v3931_v10 = vmul.f32 %v5263_v6, %v7416_v29 }
 0xd61   : > { %v5265_v19 = vpop.eup %5264 }
 0xd62   : > { %v3950_v25 = vmul.f32 %v7433_v50, %v3931_v10  ;;  %v3932_v7 = vmul.f32 %v5265_v19, %v7419_v1 }
 0xd64   : > { %v3969_v54 = vadd.f32 %v7439_v5, %v3950_v25  ;;  %v3951_v2 = vmul.f32 %v7433_v50, %v3932_v7 }
 0xd66   : > { %3982 = vst [vmem:[%s7448_s18 + $0x50] sm:$0xff] %v3969_v54  ;;  %v3970_v16 = vadd.f32 %v7439_v5, %v3951_v2 }
 0xd67   : > { %v5267_v14 = vpop.eup %5266 }
 0xd68   : > { %3983 = vst [vmem:[%s7448_s18 + $0x58] sm:$0xff] %v3970_v16  ;;  %v3933_v35 = vmul.f32 %v5267_v14, %v7426_v38 }
 0xd6a   : > { %v3952_v13 = vmul.f32 %v7433_v50, %v3933_v35 }
 0xd6c   : > { %v3971_v29 = vadd.f32 %v7439_v5, %v3952_v13 }
 0xd6e   : > { %3984 = vst [vmem:[%s7448_s18 + $0x60] sm:$0xff] %v3971_v29 }
 0xd6f PF: > { %s24_s29 = sadd.s32 1, %s5288_s29  }
 0xd70   : > { %p21_p4 = scmp.ge.s32.totalorder %s24_s29, 4  }
 0xd72   :  { %23 = sbr.rel (!%p21_p4) target bundleno = 1 (0x1), region = 109 }

// kernel: attn_cnn_forward.7
= control target key start
LH: loop header
LB: loop body
LE: loop exit
PB: predicated region body
PF: predicated region fallthrough
CT: control target
= control target key end

     0   :  { %12 = vsyncpa [#allocation3], 0  ;;  %s12509_s0 = inlined_call_operand.vmem [shape: f32[2,104,128], index: 0, kind: input, shape index: {}]   ;;  %s12510_s1 = inlined_call_operand.vmem [shape: bf16[30,128,128], index: 1, kind: input, shape index: {}]   ;;  %s12511_s2 = inlined_call_operand.vmem [shape: f32[5,128], index: 2, kind: input, shape index: {}]   ;;  %s12512_s3 = inlined_call_operand.vmem [shape: bf16[640,128], index: 3, kind: input, shape index: {}]   ;;  %s12513_s4 = inlined_call_operand.vmem [shape: f32[1,128], index: 4, kind: input, shape index: {}]   ;;  %s12514_s5 = inlined_call_operand.vmem [shape: bf16[128,17], index: 5, kind: input, shape index: {}]   ;;  %s12515_s6 = inlined_call_operand.vmem [shape: f32[1,17], index: 6, kind: input, shape index: {}]   ;;  %s12516_s7 = inlined_call_operand.hbm [shape: f32[2,1,17], index: 7, kind: output, shape index: {}]  }
   0x1   :  { %14 = vsyncpa [#allocation3 + $0x1], 0  ;;  %s9520_s24 = smov 0   ;;  %s9522_s25 = smov 0  }
   0x2   :  { %s9524_s26 = smov 0   ;;  %s9526_s27 = smov 0  }
   0x3 LB: > { %s9541_s28 = sadd.s32 4294967295, %s9475_s27   ;;  %s6405_s29 = sadd.s32 4294967294, %s9475_s27   ;;  %s9475_s27 = sphi %s9526_s27, %s12674_s27   ;;  %s9471_s26 = sphi %s9524_s26, %s12673_s26   ;;  %s9467_s25 = sphi %s9522_s25, %s12672_s25   ;;  %s9463_s24 = sphi %s9520_s24, %s12671_s24  }
   0x4   : > { %s9545_s30 = sadd.s32 1, %s9475_s27   ;;  %s179_s8 = sadd.s32 1, %s9471_s26 }
   0x5   : > { %s176_s9 = ssub.s32 %s9475_s27, %s9545_s30  ;;  %p189_p0 = scmp.ne.s32.totalorder %s9471_s26, %s9467_s25 }
   0x6   : > { %p177_p1 = scmp.eq.s32.totalorder %s176_s9, 0  ;;  %p190_p2 = scmp.eq.s32.totalorder %s9541_s28, 1 }
   0x7   : > { %p195_p3 = scmp.ne.s32.totalorder %s9467_s25, %s9463_s24  ;;  %p196_p4 = scmp.eq.s32.totalorder %s6405_s29, 1 }
   0x8   : > { %s9556_s10 = scalar_select %p177_p1, %s9471_s26, %s179_s8  }
   0x9   : > { %p9558_p5 = por %p190_p2, %p189_p0  ;;  %p9562_p6 = por %p196_p4, %p195_p3 }
   0xa   : > { %p6408_p7 = scmp.ge.s32.totalorder %s9475_s27, 1  ;;  %p240_p8 = scmp.lt.s32.totalorder %s9475_s27, 3 }
   0xc   : > { %p241_p9 = pnand %p6408_p7, %p240_p8 }
   0xe   : > { %244 = sbr.rel (%p241_p9) target bundleno = 1565 (0x61d), region = 48 }
  0x15   : > { %v9079_v0 = vld [vmem:[%s12510_s1 + $0x40] sm:$0xff]   ;;  %v12518_v1 = vmov 0.0   ;;  %v9081_v3 = vld [vmem:[%s12510_s1 + $0x48] sm:$0xff]   ;;  %vm9478_vm0 = vmmov 0   ;;  %p271_p10 = scmp.lt.s32.totalorder %s9541_s28, 1  ;;  %v9083_v5 = vld [vmem:[%s12510_s1 + $0x50] sm:$0xff]   ;;  %v291_v9 = vlaneseq }
  0x16   : > { %7677 = vmatprep.subr.bf16.mxu0 %v12518_v1  ;;  %7721 = vmatprep.subr.bf16.mxu1 %v12518_v1  ;;  %v9080_v2 = vld [vmem:[%s12510_s1] sm:$0xff]   ;;  %v9082_v4 = vld [vmem:[%s12510_s1 + $0x8] sm:$0xff]   ;;  %v9084_v6 = vld [vmem:[%s12510_s1 + $0x10] sm:$0xff]   ;;  %s269_s14 = sand.u32 1, %s9467_s25   ;;  %s7162_s17 = sshll.u32 %s9541_s28, 4  ;;  %vm6335_vm13 = vcmask 131072  }
  0x17   : > { %7678 = vmatpush3.bf16.msra.mxu0 %v9079_v0  ;;  %7693 = vmatprep.mubr.msk.bf16.mxu0 %vm9478_vm0, %v12518_v1  ;;  %s272_s21 = scalar_select %p271_p10, %s9541_s28, 1  ;;  %v9085_v7 = vld [vmem:[%s12510_s1 + $0x58] sm:$0xff]   ;;  %v9087_v10 = vld [vmem:[%s12510_s1 + $0x60] sm:$0xff]   ;;  %v9618_v12 = vshrl.u32 %v291_v9, 7  ;;  %v9089_v15 = vld [vmem:[%s12510_s1 + $0x68] sm:$0xff]  }
  0x18   : > { %7722 = vmatpush3.bf16.msra.mxu1 %v9080_v2  ;;  %7679 = vmatprep.subr.bf16.mxu0 %v12518_v1  ;;  %v9086_v8 = vld [vmem:[%s12510_s1 + $0x18] sm:$0xff]   ;;  %v9088_v11 = vld [vmem:[%s12510_s1 + $0x20] sm:$0xff]   ;;  %v9090_v16 = vld [vmem:[%s12510_s1 + $0x28] sm:$0xff]   ;;  %s270_s18 = scalar_lea.vmem [#allocation2], %s269_s14  ;;  %s12467_s22 = scalar_lea.hbm %s12516_s7, %s7162_s17 }
  0x19   : > { %7723 = vmatprep.subr.bf16.mxu1 %v12518_v1  ;;  %7737 = vmatprep.mubr.msk.bf16.mxu1 %vm9478_vm0, %v12518_v1  ;;  %s9037_s9 = smul.u32 104, %s272_s21  ;;  %vm341_vm1 = vcmp.lt.s32.totalorder %v9618_v12, 7  ;;  %v9091_v23 = vld [vmem:[%s12510_s1 + $0x70] sm:$0xff]   ;;  %v9093_v34 = vld [vmem:[%s12510_s1 + $0x78] sm:$0xff]   ;;  %v9095_v44 = vld [vmem:[%s12510_s1 + $0xc0] sm:$0xff]   ;;  %vm1044_vm2 = vcmp.lt.s32.totalorder %v9618_v12, 6 }
  0x1a   : > { %v9092_v28 = vld [vmem:[%s12510_s1 + $0x30] sm:$0xff]   ;;  %v9094_v40 = vld [vmem:[%s12510_s1 + $0x38] sm:$0xff]   ;;  %v9096_v49 = vld [vmem:[%s12510_s1 + $0x80] sm:$0xff]   ;;  %vm1244_vm3 = vcmp.lt.s32.totalorder %v9618_v12, 5  ;;  %vm2156_vm5 = vcmp.lt.s32.totalorder %v9618_v12, 4  ;;  %vm2356_vm6 = vcmp.lt.s32.totalorder %v9618_v12, 3 }
  0x1b   : > { %7680 = vmatpush3.bf16.msra.mxu0 %v9081_v3  ;;  %s9609_s19 = scalar_lea.vmem %s12509_s0, %s9037_s9  ;;  %v9097_v55 = vld [vmem:[%s12510_s1 + $0xc8] sm:$0xff]   ;;  %v9099_v9 = vld [vmem:[%s12510_s1 + $0xd0] sm:$0xff]   ;;  %vm3600_vm8 = vcmp.lt.s32.totalorder %v9618_v12, 2  ;;  %vm3800_vm9 = vcmp.lt.s32.totalorder %v9618_v12, 1  ;;  %s6350_s20 = sshll.u32 %s270_s18, 4  ;;  %s12469_s20 = int_to_ptr.vmem [resolvable:$true] %s6350_s20 }
  0x1c   : > { %7724 = vmatpush3.bf16.msra.mxu1 %v9082_v4  ;;  %7681 = vmatprep.subr.bf16.mxu0 %v12518_v1  ;;  %v9622_v13 = vld [vmem:[%s9609_s19 + $0x8] sm:$0xff]  ;;  %v9625_v14 = vld [vmem:[%s9609_s19 + $0x10] sm:$0xff]  ;;  %v9637_v19 = vld [vmem:[%s9609_s19] sm:$0xff]  ;;  %s6338_s28 = scalar_lea.sflag [#allocation3], %s269_s14  ;;  %s9413_s23 = scalar_lea.vmem %s12469_s20, 16 }
  0x1d   : > { %7725 = vmatprep.subr.bf16.mxu1 %v12518_v1  ;;  %v329_v17 = vrot.slane %v9622_v13, 1  ;;  %v330_v18 = vrot.slane %v9625_v14, 1  ;;  %v9641_v20 = vld [vmem:[%s9609_s19 + $0x18] sm:$0xff]  ;;  %v9644_v21 = vld [vmem:[%s9609_s19 + $0x20] sm:$0xff]  ;;  %v328_v24 = vrot.slane %v9637_v19, 1  ;;  %v9668_v30 = vld [vmem:[%s9609_s19 + $0x28] sm:$0xff]  ;;  %v9723_v48 = vpack.c.bf16 %v9622_v13, %v9637_v19  ;;  %p9414_p11 = scmp.ne.s32.totalorder %s12469_s20, %s9413_s23 }
  0x1e   : > { %v331_v22 = vrot.slane %v9641_v20, 1  ;;  %v332_v26 = vrot.slane %v9644_v21, 1  ;;  %v9671_v31 = vld [vmem:[%s9609_s19 + $0x30] sm:$0xff]  ;;  %v333_v32 = vrot.slane %v9668_v30, 1  ;;  %v9692_v38 = vld [vmem:[%s9609_s19 + $0x38] sm:$0xff]  ;;  %v9695_v39 = vld [vmem:[%s9609_s19 + $0x40] sm:$0xff] }
  0x1f   : > { %7682 = vmatpush3.bf16.msra.mxu0 %v9083_v5  ;;  %v9654_v25 = vsel %vm341_vm1, %v329_v17, %v330_v18  ;;  %v334_v33 = vrot.slane %v9671_v31, 1  ;;  %v9681_v35 = vsel %vm341_vm1, %v328_v24, %v329_v17  ;;  %v335_v42 = vrot.slane %v9692_v38, 1  ;;  %v9731_v51 = vld [vmem:[%s9609_s19 + $0x48] sm:$0xff]  ;;  %v9734_v52 = vld [vmem:[%s9609_s19 + $0x50] sm:$0xff]  ;;  %v9753_v58 = vld [vmem:[%s9609_s19 + $0x58] sm:$0xff]  ;;  %p9415_p12 = pnand %p9414_p11, %p9558_p5  ;;  %s9479_s29 = smov [#allocation2]  }
  0x20   : > { %7726 = vmatpush3.bf16.msra.mxu1 %v9084_v6  ;;  %7683 = vmatprep.subr.bf16.mxu0 %v12518_v1  ;;  %12573 = vst [vmem:[#allocation5_spill] sm:$0xff] %v9654_v25  ;;  %v9659_v27 = vsel %vm341_vm1, %v330_v18, %v331_v22  ;;  %12575 = vst [vmem:[#allocation7_spill] sm:$0xff] %v9681_v35  ;;  %v9685_v36 = vsel %vm341_vm1, %v331_v22, %v332_v26  ;;  %v336_v46 = vrot.slane %v9695_v39, 1  ;;  %v9756_v59 = vld [vmem:[%s9609_s19 + $0x60] sm:$0xff]  ;;  %v9098_v63 = vld [vmem:[%s12510_s1 + $0x88] sm:$0xff]   ;;  %s9417_s8 = sshll.u32 %s9479_s29, 4  ;;  %s9418_s8 = int_to_ptr.vmem [resolvable:$false] %s9417_s8 }
  0x21   : > { %7727 = vmatprep.subr.bf16.mxu1 %v12518_v1  ;;  %12574 = vst [vmem:[#allocation6_spill] sm:$0xff] %v9659_v27  ;;  %12576 = vst [vmem:[#allocation8_spill] sm:$0xff] %v9685_v36  ;;  %v9689_v37 = vsel %vm341_vm1, %v332_v26, %v333_v32  ;;  %v9707_v43 = vpack.c.bf16 %v9654_v25, %v9681_v35  ;;  %v9714_v45 = vsel %vm341_vm1, %v333_v32, %v334_v33  ;;  %v9103_v18 = vld [vmem:[%s12510_s1 + $0xe0] sm:$0xff]   ;;  %v9107_v32 = vld [vmem:[%s12510_s1 + $0xf0] sm:$0xff]   ;;  %p9416_p13 = pneg %p9415_p12  ;;  %s9419_s9 = scalar_lea.vmem %s9418_s8, 32 }
  0x22   : > { %12577 = vst [vmem:[#allocation9_spill] sm:$0xff] %v9689_v37  ;;  %12578 = vst [vmem:[#allocation10_spill] sm:$0xff] %v9714_v45  ;;  %v9719_v47 = vsel %vm341_vm1, %v334_v33, %v335_v42  ;;  %v337_v53 = vrot.slane %v9731_v51, 1  ;;  %v338_v54 = vrot.slane %v9734_v52, 1  ;;  %v9746_v56 = vsel %vm341_vm1, %v335_v42, %v336_v46  ;;  %v9104_v22 = vld [vmem:[%s12510_s1 + $0xa0] sm:$0xff]   ;;  %v9108_v33 = vld [vmem:[%s12510_s1 + $0xb0] sm:$0xff]   ;;  %p9420_p0 = scmp.lt.s32.totalorder %s12469_s20, %s9418_s8  ;;  %p9421_p1 = scmp.lt.s32.totalorder %s9419_s9, %s9413_s23 }
  0x23   : > { %7684 = vmatpush3.bf16.msra.mxu0 %v9085_v7  ;;  %12579 = vst [vmem:[#allocation11_spill] sm:$0xff] %v9719_v47  ;;  %12580 = vst [vmem:[#allocation12_spill] sm:$0xff] %v9746_v56  ;;  %v339_v61 = vrot.slane %v9753_v58, 1  ;;  %v340_v62 = vrot.slane %v9756_v59, 1  ;;  %v9789_v5 = vpack.c.bf16 %v9685_v36, %v9659_v27  ;;  %v9828_v17 = vpack.c.bf16 %v9668_v30, %v9644_v21  ;;  %v9129_v7 = vld [vmem:[%s12510_s1 + $0x1c8] sm:$0xff]   ;;  %v10115_v60 = vld [vmem:[%s9609_s19 + $0x50] sm:$0xff] }
  0x24   : > { %7728 = vmatpush3.bf16.msra.mxu1 %v9086_v8  ;;  %7685 = vmatprep.subr.bf16.mxu0 %v12518_v1  ;;  %v9750_v57 = vsel %vm341_vm1, %v336_v46, %v337_v53  ;;  %v9770_v0 = vsel %vm341_vm1, %v337_v53, %v338_v54  ;;  %v9798_v8 = vpack.c.bf16 %v9641_v20, %v9625_v14  ;;  %p9422_p2 = por %p9421_p1, %p9420_p0 }
  0x25   : > { %7729 = vmatprep.subr.bf16.mxu1 %v12518_v1  ;;  %12581 = vst [vmem:[#allocation13_spill] sm:$0xff] %v9750_v57  ;;  %12582 = vst [vmem:[#allocation14_spill] sm:$0xff] %v9770_v0  ;;  %v9777_v2 = vsel %vm341_vm1, %v339_v61, %v340_v62  ;;  %v9781_v3 = vsel %vm341_vm1, %v338_v54, %v339_v61  ;;  %v9785_v4 = vsel %vm341_vm1, %v340_v62, %v328_v24  ;;  %v9106_v24 = vld [vmem:[%s12510_s1 + $0xa8] sm:$0xff]   ;;  %v9112_v54 = vld [vmem:[%s12510_s1 + $0x140] sm:$0xff]  }
  0x26   : > { %12583 = vst [vmem:[#allocation15_spill] sm:$0xff] %v9777_v2  ;;  %12584 = vst [vmem:[#allocation16_spill] sm:$0xff] %v9781_v3  ;;  %v9853_v26 = vpack.c.bf16 %v9746_v56, %v9719_v47  ;;  %v9883_v42 = vpack.c.bf16 %v9770_v0, %v9750_v57  ;;  %v9900_v46 = vpack.c.bf16 %v9777_v2, %v9781_v3  ;;  %v9116_v61 = vld [vmem:[%s12510_s1 + $0x150] sm:$0xff]   ;;  %v9117_v62 = vld [vmem:[%s12510_s1 + $0x118] sm:$0xff]   ;;  %p9423_p3 = pnand %p9422_p2, %p9416_p13 }
  0x27   : > { %7686 = vmatpush3.bf16.msra.mxu0 %v9087_v10  ;;  %12585 = vst [vmem:[#allocation17_spill] sm:$0xff] %v9785_v4  ;;  %v9100_v10 = vld [vmem:[%s12510_s1 + $0x90] sm:$0xff]   ;;  %v9918_v53 = vpack.c.bf16 %v9756_v59, %v9756_v59  ;;  %v9375_v3 = vld [vmem:[%s9609_s19 + $0x20] sm:$0xff] }
  0x28   : > { %7730 = vmatpush3.bf16.msra.mxu1 %v9088_v11  ;;  %7687 = vmatprep.subr.bf16.mxu0 %v12518_v1  ;;  %v9101_v11 = vld [vmem:[%s12510_s1 + $0xd8] sm:$0xff]   ;;  %v9115_v59 = vld [vmem:[%s12510_s1 + $0x110] sm:$0xff]  }
  0x29   : > { %7731 = vmatprep.subr.bf16.mxu1 %v12518_v1  ;;  %v9377_v57 = vld [vmem:[%s9609_s19 + $0x30] sm:$0xff] }
  0x2b   : > { %7688 = vmatpush3.bf16.msra.mxu0 %v9089_v15  ;;  %v9102_v15 = vld [vmem:[%s12510_s1 + $0x98] sm:$0xff]  }
  0x2c   : > { %7732 = vmatpush3.bf16.msra.mxu1 %v9090_v16  ;;  %7689 = vmatprep.subr.bf16.mxu0 %v12518_v1  ;;  %v9823_v16 = vpack.c.bf16 %v9714_v45, %v9689_v37  ;;  %v2149_v45 = vrot.slane %v9377_v57, 4  ;;  %v9379_v37 = vld [vmem:[%s9609_s19 + $0x40] sm:$0xff] }
  0x2d   : > { %7733 = vmatprep.subr.bf16.mxu1 %v12518_v1  ;;  %v2151_v25 = vrot.slane %v9379_v37, 4 }
  0x2f   : > { %7690 = vmatpush3.bf16.msra.mxu0 %v9091_v23  ;;  %v9105_v23 = vld [vmem:[%s12510_s1 + $0xe8] sm:$0xff]  }
  0x30   : > { %7734 = vmatpush3.bf16.msra.mxu1 %v9092_v28  ;;  %7691 = vmatprep.subr.bf16.mxu0 %v12518_v1  ;;  %v9858_v28 = vpack.c.bf16 %v9692_v38, %v9671_v31 }
  0x31   : > { %7735 = vmatprep.subr.bf16.mxu1 %v12518_v1 }
  0x33   : > { %7692 = vmatpush3.bf16.msra.mxu0 %v9093_v34  ;;  %v9109_v34 = vld [vmem:[%s12510_s1 + $0xf8] sm:$0xff]  }
  0x34   : > { %7736 = vmatpush3.bf16.msra.mxu1 %v9094_v40  ;;  %7765 = vmatprep.subr.bf16.mxu0 %v12518_v1  ;;  %v9110_v40 = vld [vmem:[%s12510_s1 + $0xb8] sm:$0xff]  }
  0x35   : > { %7809 = vmatprep.subr.bf16.mxu1 %v12518_v1 }
  0x36   : > { %7694 = vmatmul.mubr.bf16.vlgmr.msra.gmra.mrb[0].mxu0 %v9707_v43 }
  0x37   : > { %7738 = vmatmul.mubr.bf16.vlgmr.msra.gmra.mrb[0].mxu1 %v9723_v48  ;;  %7766 = vmatpush3.bf16.msra.mxu0 %v9095_v44  ;;  %v9888_v44 = vpack.c.bf16 %v9731_v51, %v9695_v39  ;;  %v9914_v51 = vpack.c.bf16 %v9785_v4, %v9785_v4  ;;  %v9374_v4 = vld [vmem:[%s9609_s19 + $0x18] sm:$0xff] }
  0x38   : > { %7810 = vmatpush3.bf16.msra.mxu1 %v9096_v49  ;;  %7697 = vmatprep.mubr.msk.bf16.mxu0 %vm9478_vm0, %v12518_v1  ;;  %v9904_v49 = vpack.c.bf16 %v9753_v58, %v9734_v52  ;;  %v9111_v52 = vld [vmem:[%s12510_s1 + $0x100] sm:$0xff]   ;;  %v9114_v58 = vld [vmem:[%s12510_s1 + $0x148] sm:$0xff]   ;;  %v2146_v0 = vrot.slane %v9374_v4, 4 }
  0x39   : > { %7741 = vmatprep.mubr.msk.bf16.mxu1 %vm9478_vm0, %v12518_v1  ;;  %7767 = vmatprep.subr.bf16.mxu0 %v12518_v1 }
  0x3a   : > { %7811 = vmatprep.subr.bf16.mxu1 %v12518_v1 }
  0x3b   : > { %7768 = vmatpush3.bf16.msra.mxu0 %v9097_v55  ;;  %v9113_v55 = vld [vmem:[%s12510_s1 + $0x108] sm:$0xff]  }
  0x3c   : > { %7812 = vmatpush3.bf16.msra.mxu1 %v9098_v63  ;;  %7769 = vmatprep.subr.bf16.mxu0 %v12518_v1  ;;  %v9118_v63 = vld [vmem:[%s12510_s1 + $0x158] sm:$0xff]  }
  0x3d   : > { %7813 = vmatprep.subr.bf16.mxu1 %v12518_v1 }
  0x3e   : > { %7698 = vmatmul.mubr.bf16.gmra.mrb[4].mxu0 %v9789_v5 }
  0x3f   : > { %7742 = vmatmul.mubr.bf16.gmra.mrb[4].mxu1 %v9798_v8  ;;  %7701 = vmatprep.mubr.msk.bf16.mxu0 %vm9478_vm0, %v12518_v1 }
  0x40   : > { %7745 = vmatprep.mubr.msk.bf16.mxu1 %vm9478_vm0, %v12518_v1  ;;  %7770 = vmatpush3.bf16.msra.mxu0 %v9099_v9  ;;  %v9119_v9 = vld [vmem:[%s12510_s1 + $0x120] sm:$0xff]  }
  0x41   : > { %7814 = vmatpush3.bf16.msra.mxu1 %v9100_v10  ;;  %7771 = vmatprep.subr.bf16.mxu0 %v12518_v1  ;;  %v9120_v10 = vld [vmem:[%s12510_s1 + $0x160] sm:$0xff]  }
  0x42   : > { %7815 = vmatprep.subr.bf16.mxu1 %v12518_v1 }
  0x44   : > { %7772 = vmatpush3.bf16.msra.mxu0 %v9101_v11  ;;  %v9121_v11 = vld [vmem:[%s12510_s1 + $0x128] sm:$0xff]  }
  0x45   : > { %7816 = vmatpush3.bf16.msra.mxu1 %v9102_v15  ;;  %7773 = vmatprep.subr.bf16.mxu0 %v12518_v1  ;;  %v9122_v15 = vld [vmem:[%s12510_s1 + $0x168] sm:$0xff]  }
  0x46   : > { %7702 = vmatmul.mubr.bf16.gmra.mrb[8].mxu0 %v9823_v16  ;;  %7817 = vmatprep.subr.bf16.mxu1 %v12518_v1 }
  0x47   : > { %7746 = vmatmul.mubr.bf16.gmra.mrb[8].mxu1 %v9828_v17  ;;  %7705 = vmatprep.mubr.msk.bf16.mxu0 %vm9478_vm0, %v12518_v1 }
  0x48   : > { %7749 = vmatprep.mubr.msk.bf16.mxu1 %vm9478_vm0, %v12518_v1  ;;  %7774 = vmatpush3.bf16.msra.mxu0 %v9103_v18  ;;  %v1031_v18 = vrot.slane %v9637_v19, 2 }
  0x49   : > { %7818 = vmatpush3.bf16.msra.mxu1 %v9104_v22  ;;  %7775 = vmatprep.subr.bf16.mxu0 %v12518_v1  ;;  %v9123_v22 = vld [vmem:[%s12510_s1 + $0x130] sm:$0xff]  }
  0x4a   : > { %7819 = vmatprep.subr.bf16.mxu1 %v12518_v1 }
  0x4c   : > { %7776 = vmatpush3.bf16.msra.mxu0 %v9105_v23  ;;  %v9124_v23 = vld [vmem:[%s12510_s1 + $0x170] sm:$0xff]  }
  0x4d   : > { %7820 = vmatpush3.bf16.msra.mxu1 %v9106_v24  ;;  %7777 = vmatprep.subr.bf16.mxu0 %v12518_v1  ;;  %v9125_v24 = vld [vmem:[%s12510_s1 + $0x138] sm:$0xff]  }
  0x4e   : > { %7706 = vmatmul.mubr.bf16.gmra.mrb[12].mxu0 %v9853_v26  ;;  %7821 = vmatprep.subr.bf16.mxu1 %v12518_v1 }
  0x4f   : > { %7750 = vmatmul.mubr.bf16.gmra.mrb[12].mxu1 %v9858_v28  ;;  %7709 = vmatprep.mubr.msk.bf16.mxu0 %vm9478_vm0, %v12518_v1 }
  0x50   : > { %7753 = vmatprep.mubr.msk.bf16.mxu1 %vm9478_vm0, %v12518_v1  ;;  %7778 = vmatpush3.bf16.msra.mxu0 %v9107_v32  ;;  %v9126_v32 = vld [vmem:[%s12510_s1 + $0x178] sm:$0xff]  }
  0x51   : > { %7822 = vmatpush3.bf16.msra.mxu1 %v9108_v33  ;;  %7779 = vmatprep.subr.bf16.mxu0 %v12518_v1  ;;  %v1032_v33 = vrot.slane %v9622_v13, 2 }
  0x52   : > { %7823 = vmatprep.subr.bf16.mxu1 %v12518_v1 }
  0x54   : > { %7780 = vmatpush3.bf16.msra.mxu0 %v9109_v34  ;;  %v1033_v34 = vrot.slane %v9625_v14, 2 }
  0x55   : > { %7824 = vmatpush3.bf16.msra.mxu1 %v9110_v40  ;;  %7853 = vmatprep.subr.bf16.mxu0 %v12518_v1  ;;  %v1231_v40 = vrot.slane %v9637_v19, 3  ;;  %v9143_v19 = vld [vmem:[%s12510_s1 + $0x200] sm:$0xff]  }
  0x56   : > { %7710 = vmatmul.mubr.bf16.gmra.mrb[16].mxu0 %v9883_v42  ;;  %7897 = vmatprep.subr.bf16.mxu1 %v12518_v1 }
  0x57   : > { %7754 = vmatmul.mubr.bf16.gmra.mrb[16].mxu1 %v9888_v44  ;;  %7713 = vmatprep.mubr.msk.bf16.mxu0 %vm9478_vm0, %v12518_v1 }
  0x58   : > { %7757 = vmatprep.mubr.msk.bf16.mxu1 %vm9478_vm0, %v12518_v1 }
  0x5e   : > { %7714 = vmatmul.mubr.bf16.gmra.mrb[20].mxu0 %v9900_v46 }
  0x5f   : > { %7758 = vmatmul.mubr.bf16.gmra.mrb[20].mxu1 %v9904_v49  ;;  %7717 = vmatprep.mubr.msk.bf16.mxu0 %vm9478_vm0, %v12518_v1 }
  0x60   : > { %7761 = vmatprep.mubr.msk.bf16.mxu1 %vm9478_vm0, %v12518_v1 }
  0x66   : > { %7718 = vmatmul.mubr.bf16.gmra.mrb[24].mxu0 %v9914_v51 }
  0x67   : > { %7762 = vmatmul.mubr.bf16.gmra.mrb[24].mxu1 %v9918_v53  ;;  %7781 = vmatprep.mubr.msk.bf16.mxu0 %vm9478_vm0, %v12518_v1 }
  0x68   : > { %7825 = vmatprep.mubr.msk.bf16.mxu1 %vm9478_vm0, %v12518_v1 }
  0x6e   : > { %7782 = vmatmul.mubr.bf16.vlgmr.msra.gmra.mrb[28].mxu0 %v9707_v43 }
  0x6f   : > { %7826 = vmatmul.mubr.bf16.vlgmr.msra.gmra.mrb[28].mxu1 %v9723_v48  ;;  %7854 = vmatpush3.bf16.msra.mxu0 %v9111_v52  ;;  %v1232_v52 = vrot.slane %v9622_v13, 3  ;;  %v1235_v13 = vrot.slane %v9644_v21, 3 }
  0x70   : > { %7898 = vmatpush3.bf16.msra.mxu1 %v9112_v54  ;;  %7785 = vmatprep.mubr.msk.bf16.mxu0 %vm9478_vm0, %v12518_v1  ;;  %v1233_v54 = vrot.slane %v9625_v14, 3  ;;  %v1036_v14 = vrot.slane %v9668_v30, 2 }
  0x71   : > { %7829 = vmatprep.mubr.msk.bf16.mxu1 %vm9478_vm0, %v12518_v1  ;;  %7855 = vmatprep.subr.bf16.mxu0 %v12518_v1 }
  0x72   : > { %7899 = vmatprep.subr.bf16.mxu1 %v12518_v1 }
  0x73   : > { %7856 = vmatpush3.bf16.msra.mxu0 %v9113_v55  ;;  %v1034_v55 = vrot.slane %v9641_v20, 2 }
  0x74   : > { %7900 = vmatpush3.bf16.msra.mxu1 %v9114_v58  ;;  %7857 = vmatprep.subr.bf16.mxu0 %v12518_v1  ;;  %v1035_v58 = vrot.slane %v9644_v21, 2  ;;  %v9136_v21 = vld [vmem:[%s12510_s1 + $0x1a0] sm:$0xff]  }
  0x75   : > { %7901 = vmatprep.subr.bf16.mxu1 %v12518_v1 }
  0x76   : > { %7786 = vmatmul.mubr.bf16.gmra.mrb[32].mxu0 %v9789_v5 }
  0x77   : > { %7830 = vmatmul.mubr.bf16.gmra.mrb[32].mxu1 %v9798_v8  ;;  %7789 = vmatprep.mubr.msk.bf16.mxu0 %vm9478_vm0, %v12518_v1 }
  0x78   : > { %7833 = vmatprep.mubr.msk.bf16.mxu1 %vm9478_vm0, %v12518_v1  ;;  %7858 = vmatpush3.bf16.msra.mxu0 %v9115_v59  ;;  %v1234_v59 = vrot.slane %v9641_v20, 3  ;;  %v1236_v20 = vrot.slane %v9668_v30, 3  ;;  %v1255_v30 = vsel %vm1244_vm3, %v1232_v52, %v1233_v54 }
  0x79   : > { %7902 = vmatpush3.bf16.msra.mxu1 %v9116_v61  ;;  %7859 = vmatprep.subr.bf16.mxu0 %v12518_v1  ;;  %v1037_v61 = vrot.slane %v9671_v31, 2 }
  0x7a   : > { %7903 = vmatprep.subr.bf16.mxu1 %v12518_v1  ;;  %v1252_v50 = vsel %vm1244_vm3, %v1235_v13, %v1236_v20 }
  0x7c   : > { %7860 = vmatpush3.bf16.msra.mxu0 %v9117_v62  ;;  %v1237_v62 = vrot.slane %v9671_v31, 3  ;;  %v9140_v31 = vld [vmem:[%s12510_s1 + $0x1b0] sm:$0xff]  }
  0x7d   : > { %7904 = vmatpush3.bf16.msra.mxu1 %v9118_v63  ;;  %7861 = vmatprep.subr.bf16.mxu0 %v12518_v1  ;;  %v1055_v63 = vsel %vm1044_vm2, %v1032_v33, %v1033_v34 }
  0x7e   : > { %7790 = vmatmul.mubr.bf16.gmra.mrb[36].mxu0 %v9823_v16  ;;  %7905 = vmatprep.subr.bf16.mxu1 %v12518_v1 }
  0x7f   : > { %7834 = vmatmul.mubr.bf16.gmra.mrb[36].mxu1 %v9828_v17  ;;  %7793 = vmatprep.mubr.msk.bf16.mxu0 %vm9478_vm0, %v12518_v1 }
  0x80   : > { %7837 = vmatprep.mubr.msk.bf16.mxu1 %vm9478_vm0, %v12518_v1  ;;  %7862 = vmatpush3.bf16.msra.mxu0 %v9119_v9  ;;  %v1056_v9 = vsel %vm1044_vm2, %v1031_v18, %v1032_v33  ;;  %v1238_v33 = vrot.slane %v9692_v38, 3 }
  0x81   : > { %7906 = vmatpush3.bf16.msra.mxu1 %v9120_v10  ;;  %7863 = vmatprep.subr.bf16.mxu0 %v12518_v1  ;;  %v1256_v10 = vsel %vm1244_vm3, %v1231_v40, %v1232_v52  ;;  %v1239_v52 = vrot.slane %v9695_v39, 3 }
  0x82   : > { %7907 = vmatprep.subr.bf16.mxu1 %v12518_v1 }
  0x84   : > { %7864 = vmatpush3.bf16.msra.mxu0 %v9121_v11  ;;  %v1038_v11 = vrot.slane %v9692_v38, 2  ;;  %v1250_v38 = vsel %vm1244_vm3, %v1237_v62, %v1238_v33 }
  0x85   : > { %7908 = vmatpush3.bf16.msra.mxu1 %v9122_v15  ;;  %7865 = vmatprep.subr.bf16.mxu0 %v12518_v1  ;;  %v1039_v15 = vrot.slane %v9695_v39, 2 }
  0x86   : > { %7794 = vmatmul.mubr.bf16.gmra.mrb[40].mxu0 %v9853_v26  ;;  %7909 = vmatprep.subr.bf16.mxu1 %v12518_v1 }
  0x87   : > { %7838 = vmatmul.mubr.bf16.gmra.mrb[40].mxu1 %v9858_v28  ;;  %7797 = vmatprep.mubr.msk.bf16.mxu0 %vm9478_vm0, %v12518_v1 }
  0x88   : > { %7841 = vmatprep.mubr.msk.bf16.mxu1 %vm9478_vm0, %v12518_v1  ;;  %7866 = vmatpush3.bf16.msra.mxu0 %v9123_v22  ;;  %v10062_v22 = vpack.c.bf16 %v1055_v63, %v1056_v9  ;;  %v9130_v63 = vld [vmem:[%s12510_s1 + $0x188] sm:$0xff]   ;;  %v1053_v9 = vsel %vm1044_vm2, %v1034_v55, %v1035_v58 }
  0x89   : > { %7910 = vmatpush3.bf16.msra.mxu1 %v9124_v23  ;;  %7867 = vmatprep.subr.bf16.mxu0 %v12518_v1  ;;  %v10064_v23 = vpack.c.bf16 %v1255_v30, %v1256_v10  ;;  %v1054_v30 = vsel %vm1044_vm2, %v1033_v34, %v1034_v55  ;;  %v1253_v10 = vsel %vm1244_vm3, %v1234_v59, %v1235_v13  ;;  %v9131_v55 = vld [vmem:[%s12510_s1 + $0x1d0] sm:$0xff]   ;;  %v1241_v13 = vrot.slane %v10115_v60, 3 }
  0x8a   : > { %7911 = vmatprep.subr.bf16.mxu1 %v12518_v1  ;;  %v10099_v6 = vpack.c.bf16 %v1053_v9, %v1054_v30  ;;  %v1041_v9 = vrot.slane %v10115_v60, 2  ;;  %v1052_v30 = vsel %vm1044_vm2, %v1035_v58, %v1036_v14 }
  0x8c   : > { %7868 = vmatpush3.bf16.msra.mxu0 %v9125_v24  ;;  %v9127_v24 = vld [vmem:[%s12510_s1 + $0x1c0] sm:$0xff]  }
  0x8d   : > { %7912 = vmatpush3.bf16.msra.mxu1 %v9126_v32  ;;  %7941 = vmatprep.subr.bf16.mxu0 %v12518_v1  ;;  %v9128_v32 = vld [vmem:[%s12510_s1 + $0x180] sm:$0xff]  }
  0x8e   : > { %7798 = vmatmul.mubr.bf16.gmra.mrb[44].mxu0 %v9883_v42  ;;  %7985 = vmatprep.subr.bf16.mxu1 %v12518_v1 }
  0x8f   : > { %7842 = vmatmul.mubr.bf16.gmra.mrb[44].mxu1 %v9888_v44  ;;  %7801 = vmatprep.mubr.msk.bf16.mxu0 %vm9478_vm0, %v12518_v1 }
  0x90   : > { %7845 = vmatprep.mubr.msk.bf16.mxu1 %vm9478_vm0, %v12518_v1 }
  0x96   : > { %7802 = vmatmul.mubr.bf16.gmra.mrb[48].mxu0 %v9900_v46 }
  0x97   : > { %7846 = vmatmul.mubr.bf16.gmra.mrb[48].mxu1 %v9904_v49  ;;  %7805 = vmatprep.mubr.msk.bf16.mxu0 %vm9478_vm0, %v12518_v1 }
  0x98   : > { %7849 = vmatprep.mubr.msk.bf16.mxu1 %vm9478_vm0, %v12518_v1 }
  0x9e   : > { %7806 = vmatmul.mubr.bf16.gmra.mrb[52].mxu0 %v9914_v51 }
  0x9f   : > { %7850 = vmatmul.mubr.bf16.gmra.mrb[52].mxu1 %v9918_v53  ;;  %7869 = vmatprep.mubr.msk.bf16.mxu0 %vm9478_vm0, %v12518_v1 }
  0xa0   : > { %7913 = vmatprep.mubr.msk.bf16.mxu1 %vm9478_vm0, %v12518_v1 }
  0xa6   : > { %7870 = vmatmul.mubr.bf16.vlgmr.msra.gmra.mrb[56].mxu0 %v10062_v22 }
  0xa7   : > { %7914 = vmatmul.mubr.bf16.vlgmr.msra.gmra.mrb[56].mxu1 %v10064_v23  ;;  %7942 = vmatpush3.bf16.msra.mxu0 %v9127_v24  ;;  %v1254_v24 = vsel %vm1244_vm3, %v1233_v54, %v1234_v59  ;;  %v9132_v54 = vld [vmem:[%s12510_s1 + $0x190] sm:$0xff]   ;;  %v10111_v59 = vld [vmem:[%s9609_s19 + $0x48] sm:$0xff] }
  0xa8   : > { %7986 = vmatpush3.bf16.msra.mxu1 %v9128_v32  ;;  %7873 = vmatprep.mubr.msk.bf16.mxu0 %vm9478_vm0, %v12518_v1  ;;  %v10102_v34 = vpack.c.bf16 %v1253_v10, %v1254_v24  ;;  %v1040_v32 = vrot.slane %v10111_v59, 2  ;;  %v9134_v10 = vld [vmem:[%s12510_s1 + $0x198] sm:$0xff]   ;;  %v1251_v24 = vsel %vm1244_vm3, %v1236_v20, %v1237_v62  ;;  %v1240_v41 = vrot.slane %v10111_v59, 3  ;;  %v9138_v59 = vld [vmem:[%s12510_s1 + $0x1a8] sm:$0xff]  }
  0xa9   : > { %7917 = vmatprep.mubr.msk.bf16.mxu1 %vm9478_vm0, %v12518_v1  ;;  %7943 = vmatprep.subr.bf16.mxu0 %v12518_v1  ;;  %v1049_v20 = vsel %vm1044_vm2, %v1038_v11, %v1039_v15 }
  0xaa   : > { %7987 = vmatprep.subr.bf16.mxu1 %v12518_v1  ;;  %v1047_v62 = vsel %vm1044_vm2, %v1040_v32, %v1041_v9 }
  0xab   : > { %7944 = vmatpush3.bf16.msra.mxu0 %v9129_v7  ;;  %v9133_v7 = vld [vmem:[%s12510_s1 + $0x1d8] sm:$0xff]  }
  0xac   : > { %7988 = vmatpush3.bf16.msra.mxu1 %v9130_v63  ;;  %7945 = vmatprep.subr.bf16.mxu0 %v12518_v1  ;;  %v1051_v63 = vsel %vm1044_vm2, %v1036_v14, %v1037_v61  ;;  %v10152_v14 = vpack.c.bf16 %v1251_v24, %v1252_v50  ;;  %v9137_v50 = vld [vmem:[%s12510_s1 + $0x1e8] sm:$0xff]  }
  0xad   : > { %7989 = vmatprep.subr.bf16.mxu1 %v12518_v1  ;;  %v10149_v58 = vpack.c.bf16 %v1051_v63, %v1052_v30  ;;  %v9141_v30 = vld [vmem:[%s12510_s1 + $0x1f8] sm:$0xff]  }
  0xae   : > { %7874 = vmatmul.mubr.bf16.gmra.mrb[60].mxu0 %v10099_v6 }
  0xaf   : > { %7918 = vmatmul.mubr.bf16.gmra.mrb[60].mxu1 %v10102_v34  ;;  %7877 = vmatprep.mubr.msk.bf16.mxu0 %vm9478_vm0, %v12518_v1 }
  0xb0   : > { %7921 = vmatprep.mubr.msk.bf16.mxu1 %vm9478_vm0, %v12518_v1  ;;  %7946 = vmatpush3.bf16.msra.mxu0 %v9131_v55  ;;  %v9135_v55 = vld [vmem:[%s12510_s1 + $0x1e0] sm:$0xff]  }
  0xb1   : > { %7990 = vmatpush3.bf16.msra.mxu1 %v9132_v54  ;;  %7947 = vmatprep.subr.bf16.mxu0 %v12518_v1  ;;  %v1050_v54 = vsel %vm1044_vm2, %v1037_v61, %v1038_v11  ;;  %v9139_v11 = vld [vmem:[%s12510_s1 + $0x1f0] sm:$0xff]  }
  0xb2   : > { %7991 = vmatprep.subr.bf16.mxu1 %v12518_v1  ;;  %v10197_v61 = vpack.c.bf16 %v1049_v20, %v1050_v54 }
  0xb4   : > { %7948 = vmatpush3.bf16.msra.mxu0 %v9133_v7  ;;  %v1249_v7 = vsel %vm1244_vm3, %v1238_v33, %v1239_v52  ;;  %v1048_v33 = vsel %vm1044_vm2, %v1039_v15, %v1040_v32  ;;  %v1247_v15 = vsel %vm1244_vm3, %v1240_v41, %v1241_v13  ;;  %v1248_v32 = vsel %vm1244_vm3, %v1239_v52, %v1240_v41 }
  0xb5   : > { %7992 = vmatpush3.bf16.msra.mxu1 %v9134_v10  ;;  %7949 = vmatprep.subr.bf16.mxu0 %v12518_v1  ;;  %v10203_v63 = vpack.c.bf16 %v1249_v7, %v1250_v38  ;;  %v9142_v10 = vld [vmem:[%s12510_s1 + $0x1b8] sm:$0xff]   ;;  %v10236_v24 = vpack.c.bf16 %v1047_v62, %v1048_v33  ;;  %v10242_v7 = vpack.c.bf16 %v1247_v15, %v1248_v32  ;;  %v9146_v33 = vld [vmem:[%s12510_s1 + $0x248] sm:$0xff]  }
  0xb6   : > { %7878 = vmatmul.mubr.bf16.gmra.mrb[64].mxu0 %v10149_v58  ;;  %7993 = vmatprep.subr.bf16.mxu1 %v12518_v1  ;;  %v9149_v15 = vld [vmem:[%s12510_s1 + $0x218] sm:$0xff]  }
  0xb7   : > { %7922 = vmatmul.mubr.bf16.gmra.mrb[64].mxu1 %v10152_v14  ;;  %7881 = vmatprep.mubr.msk.bf16.mxu0 %vm9478_vm0, %v12518_v1  ;;  %12586 = vst [vmem:[#allocation18_spill] sm:$0xff] %v10242_v7  ;;  %v9150_v32 = vld [vmem:[%s12510_s1 + $0x258] sm:$0xff]  }
  0xb8   : > { %7925 = vmatprep.mubr.msk.bf16.mxu1 %vm9478_vm0, %v12518_v1  ;;  %7950 = vmatpush3.bf16.msra.mxu0 %v9135_v55  ;;  %v9369_v55 = vld [vmem:[%s9609_s19 + $0x58] sm:$0xff] }
  0xb9   : > { %7994 = vmatpush3.bf16.msra.mxu1 %v9136_v21  ;;  %7951 = vmatprep.subr.bf16.mxu0 %v12518_v1  ;;  %v1042_v21 = vrot.slane %v9369_v55, 2  ;;  %v1242_v54 = vrot.slane %v9369_v55, 3  ;;  %v9151_v55 = vld [vmem:[%s12510_s1 + $0x220] sm:$0xff]  }
  0xba   : > { %7995 = vmatprep.subr.bf16.mxu1 %v12518_v1 }
  0xbb   : > { %v1046_v41 = vsel %vm1044_vm2, %v1041_v9, %v1042_v21  ;;  %v1246_v38 = vsel %vm1244_vm3, %v1241_v13, %v1242_v54 }
  0xbc   : > { %7952 = vmatpush3.bf16.msra.mxu0 %v9137_v50  ;;  %v9370_v50 = vld [vmem:[%s9609_s19 + $0x60] sm:$0xff] }
  0xbd   : > { %7996 = vmatpush3.bf16.msra.mxu1 %v9138_v59  ;;  %7953 = vmatprep.subr.bf16.mxu0 %v12518_v1  ;;  %v1043_v20 = vrot.slane %v9370_v50, 2  ;;  %v1243_v59 = vrot.slane %v9370_v50, 3  ;;  %v9153_v50 = vld [vmem:[%s12510_s1 + $0x228] sm:$0xff]  }
  0xbe   : > { %7882 = vmatmul.mubr.bf16.gmra.mrb[68].mxu0 %v10197_v61  ;;  %7997 = vmatprep.subr.bf16.mxu1 %v12518_v1 }
  0xbf   : > { %7926 = vmatmul.mubr.bf16.gmra.mrb[68].mxu1 %v10203_v63  ;;  %7885 = vmatprep.mubr.msk.bf16.mxu0 %vm9478_vm0, %v12518_v1  ;;  %v1045_v39 = vsel %vm1044_vm2, %v1042_v21, %v1043_v20  ;;  %v1245_v52 = vsel %vm1244_vm3, %v1242_v54, %v1243_v59  ;;  %v1057_v60 = vsel %vm1044_vm2, %v1043_v20, %v1031_v18  ;;  %v9144_v18 = vld [vmem:[%s12510_s1 + $0x240] sm:$0xff]   ;;  %v9154_v20 = vld [vmem:[%s12510_s1 + $0x268] sm:$0xff]   ;;  %v9155_v54 = vld [vmem:[%s12510_s1 + $0x230] sm:$0xff]  }
  0xc0   : > { %7929 = vmatprep.mubr.msk.bf16.mxu1 %vm9478_vm0, %v12518_v1  ;;  %7954 = vmatpush3.bf16.msra.mxu0 %v9139_v11  ;;  %v10262_v11 = vpack.c.bf16 %v1045_v39, %v1046_v41  ;;  %v1257_v9 = vsel %vm1244_vm3, %v1243_v59, %v1231_v40  ;;  %v10280_v13 = vpack.c.bf16 %v1057_v60, %v1057_v60  ;;  %v9145_v40 = vld [vmem:[%s12510_s1 + $0x208] sm:$0xff]   ;;  %v9152_v21 = vld [vmem:[%s12510_s1 + $0x260] sm:$0xff]   ;;  %v9156_v59 = vld [vmem:[%s12510_s1 + $0x270] sm:$0xff]  }
  0xc1   : > { %7998 = vmatpush3.bf16.msra.mxu1 %v9140_v31  ;;  %7955 = vmatprep.subr.bf16.mxu0 %v12518_v1  ;;  %v10264_v31 = vpack.c.bf16 %v1245_v52, %v1246_v38  ;;  %v10282_v62 = vpack.c.bf16 %v1257_v9, %v1257_v9  ;;  %v9157_v39 = vld [vmem:[%s12510_s1 + $0x238] sm:$0xff]  }
  0xc2   : > { %7999 = vmatprep.subr.bf16.mxu1 %v12518_v1  ;;  %12587 = vst [vmem:[#allocation19_spill] sm:$0xff] %v10262_v11  ;;  %12589 = vst [vmem:[#allocation21_spill] sm:$0xff] %v10280_v13  ;;  %v9158_v41 = vld [vmem:[%s12510_s1 + $0x278] sm:$0xff]  }
  0xc3   : > { %12588 = vst [vmem:[#allocation20_spill] sm:$0xff] %v10264_v31  ;;  %12590 = vst [vmem:[#allocation22_spill] sm:$0xff] %v10282_v62 }
  0xc4   : > { %7956 = vmatpush3.bf16.msra.mxu0 %v9141_v30  ;;  %v9147_v30 = vld [vmem:[%s12510_s1 + $0x210] sm:$0xff]  }
  0xc5   : > { %8000 = vmatpush3.bf16.msra.mxu1 %v9142_v10  ;;  %8029 = vmatprep.subr.bf16.mxu0 %v12518_v1  ;;  %v9148_v10 = vld [vmem:[%s12510_s1 + $0x250] sm:$0xff]  }
  0xc6   : > { %7886 = vmatmul.mubr.bf16.gmra.mrb[72].mxu0 %v10236_v24  ;;  %8073 = vmatprep.subr.bf16.mxu1 %v12518_v1 }
  0xc7   : > { %7930 = vmatmul.mubr.bf16.gmra.mrb[72].mxu1 %v10242_v7  ;;  %7889 = vmatprep.mubr.msk.bf16.mxu0 %vm9478_vm0, %v12518_v1 }
  0xc8   : > { %7933 = vmatprep.mubr.msk.bf16.mxu1 %vm9478_vm0, %v12518_v1 }
  0xce   : > { %7890 = vmatmul.mubr.bf16.gmra.mrb[76].mxu0 %v10262_v11 }
  0xcf   : > { %7934 = vmatmul.mubr.bf16.gmra.mrb[76].mxu1 %v10264_v31  ;;  %7893 = vmatprep.mubr.msk.bf16.mxu0 %vm9478_vm0, %v12518_v1 }
  0xd0   : > { %7937 = vmatprep.mubr.msk.bf16.mxu1 %vm9478_vm0, %v12518_v1 }
  0xd6   : > { %7894 = vmatmul.mubr.bf16.gmra.mrb[80].mxu0 %v10280_v13 }
  0xd7   : > { %7938 = vmatmul.mubr.bf16.gmra.mrb[80].mxu1 %v10282_v62  ;;  %7957 = vmatprep.mubr.msk.bf16.mxu0 %vm9478_vm0, %v12518_v1 }
  0xd8   : > { %8001 = vmatprep.mubr.msk.bf16.mxu1 %vm9478_vm0, %v12518_v1 }
  0xde   : > { %7958 = vmatmul.mubr.bf16.vlgmr.msra.gmra.mrb[84].mxu0 %v9707_v43 }
  0xdf   : > { %8002 = vmatmul.mubr.bf16.vlgmr.msra.gmra.mrb[84].mxu1 %v9723_v48  ;;  %8030 = vmatpush3.bf16.msra.mxu0 %v9143_v19 }
  0xe0   : > { %8074 = vmatpush3.bf16.msra.mxu1 %v9144_v18  ;;  %7961 = vmatprep.mubr.msk.bf16.mxu0 %vm9478_vm0, %v12518_v1 }
  0xe1   : > { %8005 = vmatprep.mubr.msk.bf16.mxu1 %vm9478_vm0, %v12518_v1  ;;  %8031 = vmatprep.subr.bf16.mxu0 %v12518_v1 }
  0xe2   : > { %8075 = vmatprep.subr.bf16.mxu1 %v12518_v1 }
  0xe3   : > { %8032 = vmatpush3.bf16.msra.mxu0 %v9145_v40 }
  0xe4   : > { %8076 = vmatpush3.bf16.msra.mxu1 %v9146_v33  ;;  %8033 = vmatprep.subr.bf16.mxu0 %v12518_v1 }
  0xe5   : > { %8077 = vmatprep.subr.bf16.mxu1 %v12518_v1 }
  0xe6   : > { %7962 = vmatmul.mubr.bf16.gmra.mrb[88].mxu0 %v9789_v5 }
  0xe7   : > { %8006 = vmatmul.mubr.bf16.gmra.mrb[88].mxu1 %v9798_v8  ;;  %7965 = vmatprep.mubr.msk.bf16.mxu0 %vm9478_vm0, %v12518_v1 }
  0xe8   : > { %8009 = vmatprep.mubr.msk.bf16.mxu1 %vm9478_vm0, %v12518_v1  ;;  %8034 = vmatpush3.bf16.msra.mxu0 %v9147_v30 }
  0xe9   : > { %8078 = vmatpush3.bf16.msra.mxu1 %v9148_v10  ;;  %8035 = vmatprep.subr.bf16.mxu0 %v12518_v1 }
  0xea   : > { %8079 = vmatprep.subr.bf16.mxu1 %v12518_v1 }
  0xec   : > { %8036 = vmatpush3.bf16.msra.mxu0 %v9149_v15 }
  0xed   : > { %8080 = vmatpush3.bf16.msra.mxu1 %v9150_v32  ;;  %8037 = vmatprep.subr.bf16.mxu0 %v12518_v1 }
  0xee   : > { %7966 = vmatmul.mubr.bf16.gmra.mrb[92].mxu0 %v9823_v16  ;;  %8081 = vmatprep.subr.bf16.mxu1 %v12518_v1 }
  0xef   : > { %8010 = vmatmul.mubr.bf16.gmra.mrb[92].mxu1 %v9828_v17  ;;  %7969 = vmatprep.mubr.msk.bf16.mxu0 %vm9478_vm0, %v12518_v1 }
  0xf0   : > { %8013 = vmatprep.mubr.msk.bf16.mxu1 %vm9478_vm0, %v12518_v1  ;;  %8038 = vmatpush3.bf16.msra.mxu0 %v9151_v55 }
  0xf1   : > { %8082 = vmatpush3.bf16.msra.mxu1 %v9152_v21  ;;  %8039 = vmatprep.subr.bf16.mxu0 %v12518_v1  ;;  %v653_v21 = vsub.s32 0, %v9618_v12 }
  0xf2   : > { %8083 = vmatprep.subr.bf16.mxu1 %v12518_v1 }
  0xf4   : > { %8040 = vmatpush3.bf16.msra.mxu0 %v9153_v50 }
  0xf5   : > { %8084 = vmatpush3.bf16.msra.mxu1 %v9154_v20  ;;  %8041 = vmatprep.subr.bf16.mxu0 %v12518_v1 }
  0xf6   : > { %7970 = vmatmul.mubr.bf16.gmra.mrb[96].mxu0 %v9853_v26  ;;  %8085 = vmatprep.subr.bf16.mxu1 %v12518_v1 }
  0xf7   : > { %8014 = vmatmul.mubr.bf16.gmra.mrb[96].mxu1 %v9858_v28  ;;  %7973 = vmatprep.mubr.msk.bf16.mxu0 %vm9478_vm0, %v12518_v1 }
  0xf8   : > { %8017 = vmatprep.mubr.msk.bf16.mxu1 %vm9478_vm0, %v12518_v1  ;;  %8042 = vmatpush3.bf16.msra.mxu0 %v9155_v54 }
  0xf9   : > { %8086 = vmatpush3.bf16.msra.mxu1 %v9156_v59  ;;  %8043 = vmatprep.subr.bf16.mxu0 %v12518_v1  ;;  %v9159_v59 = vld [vmem:[%s12510_s1 + $0x280] sm:$0xff]  }
  0xfa   : > { %8087 = vmatprep.subr.bf16.mxu1 %v12518_v1 }
  0xfc   : > { %8044 = vmatpush3.bf16.msra.mxu0 %v9157_v39  ;;  %v10403_v39 = vld [vmem:[%s12511_s2] sm:$0x1f] }
  0xfd   : > { %8088 = vmatpush3.bf16.msra.mxu1 %v9158_v41  ;;  %8117 = vmatprep.subr.bf16.mxu0 %v12518_v1 }
  0xfe   : > { %7974 = vmatmul.mubr.bf16.gmra.mrb[100].mxu0 %v9883_v42  ;;  %8161 = vmatprep.subr.bf16.mxu1 %v12518_v1 }
  0xff   : > { %8018 = vmatmul.mubr.bf16.gmra.mrb[100].mxu1 %v9888_v44  ;;  %7977 = vmatprep.mubr.msk.bf16.mxu0 %vm9478_vm0, %v12518_v1 }
 0x100   : > { %8021 = vmatprep.mubr.msk.bf16.mxu1 %vm9478_vm0, %v12518_v1 }
 0x106   : > { %7978 = vmatmul.mubr.bf16.gmra.mrb[104].mxu0 %v9900_v46 }
 0x107   : > { %8022 = vmatmul.mubr.bf16.gmra.mrb[104].mxu1 %v9904_v49  ;;  %7981 = vmatprep.mubr.msk.bf16.mxu0 %vm9478_vm0, %v12518_v1 }
 0x108   : > { %8025 = vmatprep.mubr.msk.bf16.mxu1 %vm9478_vm0, %v12518_v1 }
 0x109   : > { %v461_v52 = vpop.f32.mrb[0].mxu0 }
 0x10a   : > { %v597_v38 = vpop.f32.mrb[0].mxu1  ;;  %v7695_v60 = vpop.f32.mrb[1].mxu0 }
 0x10b   : > { %v598_v9 = vadd.f32 %v597_v38, %v461_v52  ;;  %v7739_v19 = vpop.f32.mrb[1].mxu1  ;;  %v464_v18 = vpop.f32.mrb[2].mxu0  ;;  %v9160_v38 = vld [vmem:[%s12510_s1 + $0x2c0] sm:$0xff]  }
 0x10c   : > { %v600_v40 = vpop.f32.mrb[2].mxu1  ;;  %v7696_v33 = vpop.f32.mrb[3].mxu0 }
 0x10d   : > { %v601_v30 = vadd.f32 %v600_v40, %v464_v18  ;;  %v7740_v10 = vpop.f32.mrb[3].mxu1  ;;  %v10410_v18 = vrot.slane %v10403_v39, %v653_v21  ;;  %v9161_v40 = vld [vmem:[%s12510_s1 + $0x288] sm:$0xff]  }
 0x10e   : > { %7982 = vmatmul.mubr.bf16.gmra.mrb[108].mxu0 %v9914_v51  ;;  %v9162_v33 = vld [vmem:[%s12510_s1 + $0x2c8] sm:$0xff]  }
 0x10f   : > { %8026 = vmatmul.mubr.bf16.gmra.mrb[108].mxu1 %v9918_v53  ;;  %8045 = vmatprep.mubr.msk.bf16.mxu0 %vm9478_vm0, %v12518_v1 }
 0x110   : > { %8089 = vmatprep.mubr.msk.bf16.mxu1 %vm9478_vm0, %v12518_v1 }
 0x111   : > { %v469_v15 = vpop.f32.mrb[4].mxu0 }
 0x112   : > { %v605_v32 = vpop.f32.mrb[4].mxu1  ;;  %v7699_v55 = vpop.f32.mrb[5].mxu0 }
 0x113   : > { %v606_v50 = vadd.f32 %v605_v32, %v469_v15  ;;  %v7743_v20 = vpop.f32.mrb[5].mxu1  ;;  %v472_v54 = vpop.f32.mrb[6].mxu0  ;;  %v655_v55 = vadd.f32 %v10410_v18, %v598_v9  ;;  %v9164_v9 = vld [vmem:[%s12510_s1 + $0x2d0] sm:$0xff]  }
 0x114   : > { %v608_v41 = vpop.f32.mrb[6].mxu1  ;;  %v7700_v52 = vpop.f32.mrb[7].mxu0 }
 0x115   : > { %v609_v60 = vadd.f32 %v608_v41, %v472_v54  ;;  %v7744_v19 = vpop.f32.mrb[7].mxu1  ;;  %v9163_v52 = vld [vmem:[%s12510_s1 + $0x290] sm:$0xff]  }
 0x116   : > { %8046 = vmatmul.mubr.bf16.vlgmr.msra.gmra.mrb[112].mxu0 %v10062_v22 }
 0x117   : > { %8090 = vmatmul.mubr.bf16.vlgmr.msra.gmra.mrb[112].mxu1 %v10064_v23  ;;  %8118 = vmatpush3.bf16.msra.mxu0 %v9159_v59 }
 0x118   : > { %8162 = vmatpush3.bf16.msra.mxu1 %v9160_v38  ;;  %8049 = vmatprep.mubr.msk.bf16.mxu0 %vm9478_vm0, %v12518_v1  ;;  %v656_v38 = vadd.f32 %v10410_v18, %v601_v30 }
 0x119   : > { %v477_v10 = vpop.f32.mrb[8].mxu0  ;;  %8093 = vmatprep.mubr.msk.bf16.mxu1 %vm9478_vm0, %v12518_v1  ;;  %8119 = vmatprep.subr.bf16.mxu0 %v12518_v1 }
 0x11a   : > { %v613_v15 = vpop.f32.mrb[8].mxu1  ;;  %v7703_v32 = vpop.f32.mrb[9].mxu0  ;;  %8163 = vmatprep.subr.bf16.mxu1 %v12518_v1  ;;  %v669_v30 = vmax.f32 %v656_v38, 0.0 }
 0x11b   : > { %v614_v21 = vadd.f32 %v613_v15, %v477_v10  ;;  %v7747_v20 = vpop.f32.mrb[9].mxu1  ;;  %v480_v54 = vpop.f32.mrb[10].mxu0  ;;  %8120 = vmatpush3.bf16.msra.mxu0 %v9161_v40  ;;  %v668_v40 = vmax.f32 %v655_v55, 0.0 }
 0x11c   : > { %v616_v59 = vpop.f32.mrb[10].mxu1  ;;  %v7704_v41 = vpop.f32.mrb[11].mxu0  ;;  %8164 = vmatpush3.bf16.msra.mxu1 %v9162_v33  ;;  %8121 = vmatprep.subr.bf16.mxu0 %v12518_v1  ;;  %v9166_v20 = vld [vmem:[%s12510_s1 + $0x2d8] sm:$0xff]  }
 0x11d   : > { %v659_v19 = vadd.f32 %v10410_v18, %v614_v21  ;;  %v617_v32 = vadd.f32 %v616_v59, %v480_v54  ;;  %v7748_v29 = vpop.f32.mrb[11].mxu1  ;;  %8165 = vmatprep.subr.bf16.mxu1 %v12518_v1  ;;  %v657_v41 = vadd.f32 %v10410_v18, %v606_v50  ;;  %v12591_v50 = vmov 0.0  }
 0x11e   : > { %8050 = vmatmul.mubr.bf16.gmra.mrb[116].mxu0 %v10099_v6  ;;  %v9165_v29 = vld [vmem:[%s12510_s1 + $0x298] sm:$0xff]  }
 0x11f   : > { %v672_v33 = vmax.f32 %v659_v19, 0.0  ;;  %v660_v10 = vadd.f32 %v10410_v18, %v617_v32  ;;  %8094 = vmatmul.mubr.bf16.gmra.mrb[116].mxu1 %v10102_v34  ;;  %8053 = vmatprep.mubr.msk.bf16.mxu0 %vm9478_vm0, %v12518_v1 }
 0x120   : > { %8097 = vmatprep.mubr.msk.bf16.mxu1 %vm9478_vm0, %v12518_v1  ;;  %8122 = vmatpush3.bf16.msra.mxu0 %v9163_v52 }
 0x121   : > { %v10446_v15 = vmax.f32 %v668_v40, %v672_v33  ;;  %v673_v55 = vmax.f32 %v660_v10, 0.0  ;;  %v485_v21 = vpop.f32.mrb[12].mxu0  ;;  %8166 = vmatpush3.bf16.msra.mxu1 %v9164_v9  ;;  %8123 = vmatprep.subr.bf16.mxu0 %v12518_v1  ;;  %v9167_v9 = vld [vmem:[%s12510_s1 + $0x2a0] sm:$0xff]   ;;  %v658_v10 = vadd.f32 %v10410_v18, %v609_v60 }
 0x122   : > { %v621_v54 = vpop.f32.mrb[12].mxu1  ;;  %v7707_v59 = vpop.f32.mrb[13].mxu0  ;;  %8167 = vmatprep.subr.bf16.mxu1 %v12518_v1 }
 0x123   : > { %v10454_v52 = vmax.f32 %v669_v30, %v673_v55  ;;  %v622_v38 = vadd.f32 %v621_v54, %v485_v21  ;;  %v7751_v19 = vpop.f32.mrb[13].mxu1  ;;  %v488_v32 = vpop.f32.mrb[14].mxu0  ;;  %v9168_v30 = vld [vmem:[%s12510_s1 + $0x2e0] sm:$0xff]   ;;  %v671_v60 = vmax.f32 %v658_v10, 0.0 }
 0x124   : > { %v624_v40 = vpop.f32.mrb[14].mxu1  ;;  %v7708_v33 = vpop.f32.mrb[15].mxu0  ;;  %8124 = vmatpush3.bf16.msra.mxu0 %v9165_v29  ;;  %v670_v29 = vmax.f32 %v657_v41, 0.0 }
 0x125   : > { %v661_v59 = vadd.f32 %v10410_v18, %v622_v38  ;;  %v625_v35 = vadd.f32 %v624_v40, %v488_v32  ;;  %v7752_v1 = vpop.f32.mrb[15].mxu1  ;;  %8168 = vmatpush3.bf16.msra.mxu1 %v9166_v20  ;;  %8125 = vmatprep.subr.bf16.mxu0 %v12591_v50 }
 0x126   : > { %8054 = vmatmul.mubr.bf16.gmra.mrb[120].mxu0 %v10149_v58  ;;  %8169 = vmatprep.subr.bf16.mxu1 %v12591_v50  ;;  %v9169_v1 = vld [vmem:[%s12510_s1 + $0x2a8] sm:$0xff]  }
 0x127   : > { %v674_v55 = vmax.f32 %v661_v59, 0.0  ;;  %v662_v21 = vadd.f32 %v10410_v18, %v625_v35  ;;  %8098 = vmatmul.mubr.bf16.gmra.mrb[120].mxu1 %v10152_v14  ;;  %8057 = vmatprep.mubr.msk.bf16.mxu0 %vm9478_vm0, %v12591_v50  ;;  %v9170_v35 = vld [vmem:[%s12510_s1 + $0x2e8] sm:$0xff]  }
 0x128   : > { %8101 = vmatprep.mubr.msk.bf16.mxu1 %vm9478_vm0, %v12591_v50  ;;  %8126 = vmatpush3.bf16.msra.mxu0 %v9167_v9 }
 0x129   : > { %v709_v20 = vmax.f32 %v670_v29, %v674_v55  ;;  %v675_v54 = vmax.f32 %v662_v21, 0.0  ;;  %v493_v41 = vpop.f32.mrb[16].mxu0  ;;  %8170 = vmatpush3.bf16.msra.mxu1 %v9168_v30  ;;  %8127 = vmatprep.subr.bf16.mxu0 %v12591_v50  ;;  %v9171_v30 = vld [vmem:[%s12510_s1 + $0x2b0] sm:$0xff]  }
 0x12a   : > { %v629_v38 = vpop.f32.mrb[16].mxu1  ;;  %v7711_v19 = vpop.f32.mrb[17].mxu0  ;;  %8171 = vmatprep.subr.bf16.mxu1 %v12591_v50 }
 0x12b   : > { %v710_v32 = vmax.f32 %v671_v60, %v675_v54  ;;  %v630_v40 = vadd.f32 %v629_v38, %v493_v41  ;;  %v7755_v33 = vpop.f32.mrb[17].mxu1  ;;  %v496_v9 = vpop.f32.mrb[18].mxu0  ;;  %v9172_v60 = vld [vmem:[%s12510_s1 + $0x2f0] sm:$0xff]   ;;  %v9173_v41 = vld [vmem:[%s12510_s1 + $0x2b8] sm:$0xff]  }
 0x12c   : > { %v632_v59 = vpop.f32.mrb[18].mxu1  ;;  %v7712_v10 = vpop.f32.mrb[19].mxu0  ;;  %8128 = vmatpush3.bf16.msra.mxu0 %v9169_v1 }
 0x12d   : > { %v663_v29 = vadd.f32 %v10410_v18, %v630_v40  ;;  %v633_v55 = vadd.f32 %v632_v59, %v496_v9  ;;  %v7756_v21 = vpop.f32.mrb[19].mxu1  ;;  %8172 = vmatpush3.bf16.msra.mxu1 %v9170_v35  ;;  %8129 = vmatprep.subr.bf16.mxu0 %v12591_v50  ;;  %v9174_v40 = vld [vmem:[%s12510_s1 + $0x2f8] sm:$0xff]  }
 0x12e   : > { %8058 = vmatmul.mubr.bf16.gmra.mrb[124].mxu0 %v10197_v61  ;;  %8173 = vmatprep.subr.bf16.mxu1 %v12591_v50 }
 0x12f   : > { %v676_v1 = vmax.f32 %v663_v29, 0.0  ;;  %v664_v54 = vadd.f32 %v10410_v18, %v633_v55  ;;  %8102 = vmatmul.mubr.bf16.gmra.mrb[124].mxu1 %v10203_v63  ;;  %8061 = vmatprep.mubr.msk.bf16.mxu0 %vm9478_vm0, %v12591_v50 }
 0x130   : > { %8105 = vmatprep.mubr.msk.bf16.mxu1 %vm9478_vm0, %v12591_v50  ;;  %8130 = vmatpush3.bf16.msra.mxu0 %v9171_v30 }
 0x131   : > { %v10501_v35 = vmax.f32 %v10446_v15, %v676_v1  ;;  %v677_v38 = vmax.f32 %v664_v54, 0.0  ;;  %v501_v19 = vpop.f32.mrb[20].mxu0  ;;  %8174 = vmatpush3.bf16.msra.mxu1 %v9172_v60  ;;  %8131 = vmatprep.subr.bf16.mxu0 %v12591_v50 }
 0x132   : > { %v637_v33 = vpop.f32.mrb[20].mxu1  ;;  %v7715_v9 = vpop.f32.mrb[21].mxu0  ;;  %8175 = vmatprep.subr.bf16.mxu1 %v12591_v50 }
 0x133   : > { %v712_v59 = vmax.f32 %v10454_v52, %v677_v38  ;;  %v638_v10 = vadd.f32 %v637_v33, %v501_v19  ;;  %v7759_v30 = vpop.f32.mrb[21].mxu1  ;;  %v504_v29 = vpop.f32.mrb[22].mxu0 }
 0x134   : > { %v640_v15 = vpop.f32.mrb[22].mxu1  ;;  %v7716_v55 = vpop.f32.mrb[23].mxu0  ;;  %8132 = vmatpush3.bf16.msra.mxu0 %v9173_v41 }
 0x135   : > { %v665_v21 = vadd.f32 %v10410_v18, %v638_v10  ;;  %v641_v60 = vadd.f32 %v640_v15, %v504_v29  ;;  %v7760_v1 = vpop.f32.mrb[23].mxu1  ;;  %8176 = vmatpush3.bf16.msra.mxu1 %v9174_v40  ;;  %8205 = vmatprep.subr.bf16.mxu0 %v12591_v50  ;;  %v10520_v40 = vadd.s32 96, %v9618_v12 }
 0x136   : > { %8062 = vmatmul.mubr.bf16.gmra.mrb[128].mxu0 %v10236_v24  ;;  %8249 = vmatprep.subr.bf16.mxu1 %v12591_v50 }
 0x137   : > { %v678_v54 = vmax.f32 %v665_v21, 0.0  ;;  %v666_v52 = vadd.f32 %v10410_v18, %v641_v60  ;;  %8106 = vmatmul.mubr.bf16.gmra.mrb[128].mxu1 %v10242_v7  ;;  %8065 = vmatprep.mubr.msk.bf16.mxu0 %vm9478_vm0, %v12591_v50  ;;  %vm693_vm4 = vcmp.lt.s32.totalorder %v10520_v40, 103  ;;  %vm1473_vm7 = vcmp.lt.s32.totalorder %v10520_v40, 101 }
 0x138   : > { %8109 = vmatprep.mubr.msk.bf16.mxu1 %vm9478_vm0, %v12591_v50  ;;  %vm2585_vm10 = vcmp.lt.s32.totalorder %v10520_v40, 99  ;;  %vm4029_vm11 = vcmp.lt.s32.totalorder %v10520_v40, 97 }
 0x139   : > { %v713_v41 = vmax.f32 %v709_v20, %v678_v54  ;;  %v679_v38 = vmax.f32 %v666_v52, 0.0  ;;  %v509_v19 = vpop.f32.mrb[24].mxu0 }
 0x13a   : > { %v645_v33 = vpop.f32.mrb[24].mxu1  ;;  %v7719_v9 = vpop.f32.mrb[25].mxu0 }
 0x13b   : > { %v714_v10 = vmax.f32 %v710_v32, %v679_v38  ;;  %v646_v30 = vadd.f32 %v645_v33, %v509_v19  ;;  %v7763_v29 = vpop.f32.mrb[25].mxu1  ;;  %v512_v15 = vpop.f32.mrb[26].mxu0 }
 0x13c   : > { %v648_v55 = vpop.f32.mrb[26].mxu1  ;;  %v7720_v21 = vpop.f32.mrb[27].mxu0  ;;  %v9373_v29 = vld [vmem:[%s9609_s19 + $0x10] sm:$0xff] }
 0x13d   : > { %v717_v60 = vmax.f32 %v713_v41, %v714_v10  ;;  %v667_v1 = vadd.f32 %v10410_v18, %v646_v30  ;;  %v7764_v2 = vpop.f32.mrb[27].mxu1  ;;  %v10532_v41 = vld [vmem:[%s9609_s19] sm:$0xff]  ;;  %v9372_v10 = vld [vmem:[%s9609_s19 + $0x8] sm:$0xff]  ;;  %v2145_v15 = vrot.slane %v9373_v29, 4 }
 0x13e   : > { %8066 = vmatmul.mubr.bf16.gmra.mrb[132].mxu0 %v10262_v11  ;;  %v2144_v30 = vrot.slane %v9372_v10, 4  ;;  %v12525_v55 = vrot.slane %v10532_v41, 5 }
 0x13f   : > { %v680_v20 = vmax.f32 %v667_v1, 0.0  ;;  %8110 = vmatmul.mubr.bf16.gmra.mrb[132].mxu1 %v10264_v31  ;;  %8069 = vmatprep.mubr.msk.bf16.mxu0 %vm9478_vm0, %v12591_v50 }
 0x140   : > { %8113 = vmatprep.mubr.msk.bf16.mxu1 %vm9478_vm0, %v12591_v50 }
 0x141   : > { %v706_v32 = vsel %vm693_vm4, %v680_v20, -1e+30  ;;  %v841_v54 = vpop.f32.mrb[28].mxu0 }
 0x142   : > { %v715_v18 = vmax.f32 %v10501_v35, %v706_v32  ;;  %v977_v2 = vpop.f32.mrb[28].mxu1  ;;  %v7783_v52 = vpop.f32.mrb[29].mxu0  ;;  %v2344_v35 = vrot.slane %v9372_v10, 5  ;;  %v2345_v32 = vrot.slane %v9373_v29, 5 }
 0x143   : > { %v10535_v19 = vadd.f32 %v977_v2, %v841_v54  ;;  %v7827_v33 = vpop.f32.mrb[29].mxu1  ;;  %v844_v9 = vpop.f32.mrb[30].mxu0 }
 0x144   : > { %v716_v21 = vmax.f32 %v715_v18, %v712_v59  ;;  %v980_v1 = vpop.f32.mrb[30].mxu1  ;;  %v7784_v20 = vpop.f32.mrb[31].mxu0  ;;  %v2167_v59 = vsel %vm2156_vm5, %v2144_v30, %v2145_v15  ;;  %v12593_v18 = vrot.slane %v10532_v41, 4 }
 0x145   : > { %v10541_v52 = vadd.f32 %v980_v1, %v844_v9  ;;  %v7828_v38 = vpop.f32.mrb[31].mxu1 }
 0x146   : > { %v10544_v54 = vmax.f32 %v716_v21, %v717_v60  ;;  %8070 = vmatmul.mubr.bf16.gmra.mrb[136].mxu0 %v10280_v13  ;;  %v2168_v2 = vsel %vm2156_vm5, %v12593_v18, %v2144_v30  ;;  %v2367_v60 = vsel %vm2356_vm6, %v2344_v35, %v2345_v32  ;;  %v2368_v38 = vsel %vm2356_vm6, %v12525_v55, %v2344_v35  ;;  %v9175_v18 = vld [vmem:[%s12510_s1 + $0x340] sm:$0xff]  }
 0x147   : > { %8114 = vmatmul.mubr.bf16.gmra.mrb[136].mxu1 %v10282_v62  ;;  %8133 = vmatprep.mubr.msk.bf16.mxu0 %vm9478_vm0, %v12591_v50  ;;  %v10564_v29 = vpack.c.bf16 %v2167_v59, %v2168_v2  ;;  %v10568_v20 = vpack.c.bf16 %v2367_v60, %v2368_v38  ;;  %v9176_v59 = vld [vmem:[%s12510_s1 + $0x300] sm:$0xff]   ;;  %v2346_v2 = vrot.slane %v9374_v4, 5 }
 0x148   : > { %12592 = vst [vmem:[#allocation23_spill] sm:$0xff] %v10544_v54  ;;  %8177 = vmatprep.mubr.msk.bf16.mxu1 %vm9478_vm0, %v12591_v50  ;;  %v2147_v54 = vrot.slane %v9375_v3, 4 }
 0x149   : > { %v849_v33 = vpop.f32.mrb[32].mxu0  ;;  %12594 = vst [vmem:[#allocation24_spill] sm:$0xff] %v10564_v29  ;;  %12595 = vst [vmem:[#allocation25_spill] sm:$0xff] %v10568_v20  ;;  %v2366_v4 = vsel %vm2356_vm6, %v2345_v32, %v2346_v2 }
 0x14a   : > { %v985_v9 = vpop.f32.mrb[32].mxu1  ;;  %v7787_v10 = vpop.f32.mrb[33].mxu0  ;;  %v2165_v38 = vsel %vm2156_vm5, %v2146_v0, %v2147_v54 }
 0x14b   : > { %v10566_v21 = vadd.f32 %v985_v9, %v849_v33  ;;  %v7831_v1 = vpop.f32.mrb[33].mxu1  ;;  %v852_v30 = vpop.f32.mrb[34].mxu0  ;;  %v2347_v33 = vrot.slane %v9375_v3, 5  ;;  %v9177_v10 = vld [vmem:[%s12510_s1 + $0x348] sm:$0xff]  }
 0x14c   : > { %v988_v35 = vpop.f32.mrb[34].mxu1  ;;  %v7788_v55 = vpop.f32.mrb[35].mxu0 }
 0x14d   : > { %v10578_v9 = vadd.f32 %v988_v35, %v852_v30  ;;  %v7832_v60 = vpop.f32.mrb[35].mxu1  ;;  %v2166_v55 = vsel %vm2156_vm5, %v2145_v15, %v2146_v0  ;;  %v2365_v3 = vsel %vm2356_vm6, %v2346_v2, %v2347_v33  ;;  %v9178_v0 = vld [vmem:[%s12510_s1 + $0x308] sm:$0xff]  }
 0x14e   : > { %8134 = vmatmul.mubr.bf16.vlgmr.msra.gmra.mrb[140].mxu0 %v10564_v29  ;;  %v10606_v2 = vpack.c.bf16 %v2365_v3, %v2366_v4  ;;  %v9376_v60 = vld [vmem:[%s9609_s19 + $0x28] sm:$0xff] }
 0x14f   : > { %8178 = vmatmul.mubr.bf16.vlgmr.msra.gmra.mrb[140].mxu1 %v10568_v20  ;;  %8206 = vmatpush3.bf16.msra.mxu0 %v9175_v18  ;;  %v10601_v18 = vpack.c.bf16 %v2165_v38, %v2166_v55  ;;  %v2148_v56 = vrot.slane %v9376_v60, 4  ;;  %v9179_v38 = vld [vmem:[%s12510_s1 + $0x350] sm:$0xff]   ;;  %v2348_v55 = vrot.slane %v9376_v60, 5  ;;  %v2351_v20 = vrot.slane %v9379_v37, 5 }
 0x150   : > { %8250 = vmatpush3.bf16.msra.mxu1 %v9176_v59  ;;  %8137 = vmatprep.mubr.msk.bf16.mxu0 %vm9478_vm0, %v12591_v50  ;;  %12597 = vst [vmem:[#allocation27_spill] sm:$0xff] %v10606_v2 }
 0x151   : > { %v857_v15 = vpop.f32.mrb[36].mxu0  ;;  %8181 = vmatprep.mubr.msk.bf16.mxu1 %vm9478_vm0, %v12591_v50  ;;  %8207 = vmatprep.subr.bf16.mxu0 %v12591_v50  ;;  %12596 = vst [vmem:[#allocation26_spill] sm:$0xff] %v10601_v18  ;;  %v2364_v4 = vsel %vm2356_vm6, %v2347_v33, %v2348_v55 }
 0x152   : > { %v993_v1 = vpop.f32.mrb[36].mxu1  ;;  %v7791_v30 = vpop.f32.mrb[37].mxu0  ;;  %8251 = vmatprep.subr.bf16.mxu1 %v12591_v50 }
 0x153   : > { %v10604_v35 = vadd.f32 %v993_v1, %v857_v15  ;;  %v7835_v32 = vpop.f32.mrb[37].mxu1  ;;  %v860_v59 = vpop.f32.mrb[38].mxu0  ;;  %8208 = vmatpush3.bf16.msra.mxu0 %v9177_v10  ;;  %v2349_v15 = vrot.slane %v9377_v57, 5  ;;  %v9180_v10 = vld [vmem:[%s12510_s1 + $0x310] sm:$0xff]  }
 0x154   : > { %v996_v47 = vpop.f32.mrb[38].mxu1  ;;  %v7792_v36 = vpop.f32.mrb[39].mxu0  ;;  %8252 = vmatpush3.bf16.msra.mxu1 %v9178_v0  ;;  %8209 = vmatprep.subr.bf16.mxu0 %v12591_v50  ;;  %v9181_v0 = vld [vmem:[%s12510_s1 + $0x358] sm:$0xff]  }
 0x155   : > { %v10614_v1 = vadd.f32 %v996_v47, %v860_v59  ;;  %v7836_v3 = vpop.f32.mrb[39].mxu1  ;;  %8253 = vmatprep.subr.bf16.mxu1 %v12591_v50  ;;  %v2163_v36 = vsel %vm2156_vm5, %v2148_v56, %v2149_v45  ;;  %v2164_v47 = vsel %vm2156_vm5, %v2147_v54, %v2148_v56  ;;  %v2363_v57 = vsel %vm2356_vm6, %v2348_v55, %v2349_v15  ;;  %v9182_v56 = vld [vmem:[%s12510_s1 + $0x318] sm:$0xff]  }
 0x156   : > { %8138 = vmatmul.mubr.bf16.gmra.mrb[144].mxu0 %v10601_v18  ;;  %v10641_v59 = vpack.c.bf16 %v2163_v36, %v2164_v47  ;;  %v10646_v55 = vpack.c.bf16 %v2363_v57, %v2364_v4  ;;  %v9378_v3 = vld [vmem:[%s9609_s19 + $0x38] sm:$0xff]  ;;  %v9183_v36 = vld [vmem:[%s12510_s1 + $0x360] sm:$0xff]  }
 0x157   : > { %8182 = vmatmul.mubr.bf16.gmra.mrb[144].mxu1 %v10606_v2  ;;  %8141 = vmatprep.mubr.msk.bf16.mxu0 %vm9478_vm0, %v12591_v50  ;;  %v2350_v18 = vrot.slane %v9378_v3, 5  ;;  %v9184_v57 = vld [vmem:[%s12510_s1 + $0x320] sm:$0xff]  }
 0x158   : > { %8185 = vmatprep.mubr.msk.bf16.mxu1 %vm9478_vm0, %v12591_v50  ;;  %8210 = vmatpush3.bf16.msra.mxu0 %v9179_v38  ;;  %12598 = vst [vmem:[#allocation28_spill] sm:$0xff] %v10641_v59  ;;  %12599 = vst [vmem:[#allocation29_spill] sm:$0xff] %v10646_v55 }
 0x159   : > { %v865_v30 = vpop.f32.mrb[40].mxu0  ;;  %8254 = vmatpush3.bf16.msra.mxu1 %v9180_v10  ;;  %8211 = vmatprep.subr.bf16.mxu0 %v12591_v50  ;;  %v2150_v10 = vrot.slane %v9378_v3, 4  ;;  %v2362_v4 = vsel %vm2356_vm6, %v2349_v15, %v2350_v18 }
 0x15a   : > { %v1001_v54 = vpop.f32.mrb[40].mxu1  ;;  %v7795_v32 = vpop.f32.mrb[41].mxu0  ;;  %8255 = vmatprep.subr.bf16.mxu1 %v12591_v50 }
 0x15b   : > { %v10644_v33 = vadd.f32 %v1001_v54, %v865_v30  ;;  %v7839_v60 = vpop.f32.mrb[41].mxu1  ;;  %v868_v38 = vpop.f32.mrb[42].mxu0  ;;  %v2162_v37 = vsel %vm2156_vm5, %v2149_v45, %v2150_v10  ;;  %v9186_v45 = vld [vmem:[%s12510_s1 + $0x328] sm:$0xff]  }
 0x15c   : > { %v1004_v27 = vpop.f32.mrb[42].mxu1  ;;  %v7796_v2 = vpop.f32.mrb[43].mxu0  ;;  %8212 = vmatpush3.bf16.msra.mxu0 %v9181_v0  ;;  %v9185_v0 = vld [vmem:[%s12510_s1 + $0x368] sm:$0xff]  }
 0x15d   : > { %v10653_v47 = vadd.f32 %v1004_v27, %v868_v38  ;;  %v7840_v30 = vpop.f32.mrb[43].mxu1  ;;  %8256 = vmatpush3.bf16.msra.mxu1 %v9182_v56  ;;  %8213 = vmatprep.subr.bf16.mxu0 %v12591_v50  ;;  %v2161_v27 = vsel %vm2156_vm5, %v2150_v10, %v2151_v25  ;;  %v2361_v2 = vsel %vm2356_vm6, %v2350_v18, %v2351_v20  ;;  %v9380_v10 = vld [vmem:[%s9609_s19 + $0x48] sm:$0xff] }
 0x15e   : > { %8142 = vmatmul.mubr.bf16.gmra.mrb[148].mxu0 %v10641_v59  ;;  %8257 = vmatprep.subr.bf16.mxu1 %v12591_v50  ;;  %v10681_v60 = vpack.c.bf16 %v2161_v27, %v2162_v37  ;;  %v10686_v3 = vpack.c.bf16 %v2361_v2, %v2362_v4  ;;  %v9381_v30 = vld [vmem:[%s9609_s19 + $0x50] sm:$0xff]  ;;  %v2352_v29 = vrot.slane %v9380_v10, 5 }
 0x15f   : > { %8186 = vmatmul.mubr.bf16.gmra.mrb[148].mxu1 %v10646_v55  ;;  %8145 = vmatprep.mubr.msk.bf16.mxu0 %vm9478_vm0, %v12591_v50  ;;  %v2353_v62 = vrot.slane %v9381_v30, 5  ;;  %v9187_v27 = vld [vmem:[%s12510_s1 + $0x370] sm:$0xff]  }
 0x160   : > { %8189 = vmatprep.mubr.msk.bf16.mxu1 %vm9478_vm0, %v12591_v50  ;;  %8214 = vmatpush3.bf16.msra.mxu0 %v9183_v36  ;;  %12600 = vst [vmem:[#allocation30_spill] sm:$0xff] %v10681_v60  ;;  %12601 = vst [vmem:[#allocation31_spill] sm:$0xff] %v10686_v3  ;;  %v2152_v36 = vrot.slane %v9380_v10, 4  ;;  %v9188_v2 = vld [vmem:[%s12510_s1 + $0x330] sm:$0xff]  }
 0x161   : > { %v873_v56 = vpop.f32.mrb[44].mxu0  ;;  %8258 = vmatpush3.bf16.msra.mxu1 %v9184_v57  ;;  %8215 = vmatprep.subr.bf16.mxu0 %v12591_v50  ;;  %v2153_v57 = vrot.slane %v9381_v30, 4  ;;  %v2359_v4 = vsel %vm2356_vm6, %v2352_v29, %v2353_v62  ;;  %v9382_v30 = vld [vmem:[%s9609_s19 + $0x58] sm:$0xff] }
 0x162   : > { %v1009_v54 = vpop.f32.mrb[44].mxu1  ;;  %v7799_v32 = vpop.f32.mrb[45].mxu0  ;;  %8259 = vmatprep.subr.bf16.mxu1 %v12591_v50  ;;  %v2354_v13 = vrot.slane %v9382_v30, 5 }
 0x163   : > { %v10684_v18 = vadd.f32 %v1009_v54, %v873_v56  ;;  %v7843_v15 = vpop.f32.mrb[45].mxu1  ;;  %v876_v38 = vpop.f32.mrb[46].mxu0 }
 0x164   : > { %v1012_v55 = vpop.f32.mrb[46].mxu1  ;;  %v7800_v59 = vpop.f32.mrb[47].mxu0  ;;  %8216 = vmatpush3.bf16.msra.mxu0 %v9185_v0  ;;  %v2360_v0 = vsel %vm2356_vm6, %v2351_v20, %v2352_v29 }
 0x165   : > { %v10693_v37 = vadd.f32 %v1012_v55, %v876_v38  ;;  %v7844_v56 = vpop.f32.mrb[47].mxu1  ;;  %8260 = vmatpush3.bf16.msra.mxu1 %v9186_v45  ;;  %8217 = vmatprep.subr.bf16.mxu0 %v12591_v50  ;;  %v2159_v59 = vsel %vm2156_vm5, %v2152_v36, %v2153_v57  ;;  %v2160_v55 = vsel %vm2156_vm5, %v2151_v25, %v2152_v36  ;;  %v9189_v45 = vld [vmem:[%s12510_s1 + $0x378] sm:$0xff]  }
 0x166   : > { %8146 = vmatmul.mubr.bf16.gmra.mrb[152].mxu0 %v10681_v60  ;;  %8261 = vmatprep.subr.bf16.mxu1 %v12591_v50  ;;  %v9190_v25 = vld [vmem:[%s12510_s1 + $0x338] sm:$0xff]   ;;  %v10721_v38 = vpack.c.bf16 %v2159_v59, %v2160_v55  ;;  %v10726_v36 = vpack.c.bf16 %v2359_v4, %v2360_v0  ;;  %v9383_v56 = vld [vmem:[%s9609_s19 + $0x60] sm:$0xff]  ;;  %v2358_v4 = vsel %vm2356_vm6, %v2353_v62, %v2354_v13 }
 0x167   : > { %8190 = vmatmul.mubr.bf16.gmra.mrb[152].mxu1 %v10686_v3  ;;  %8149 = vmatprep.mubr.msk.bf16.mxu0 %vm9478_vm0, %v12591_v50  ;;  %v2355_v31 = vrot.slane %v9383_v56, 5 }
 0x168   : > { %8193 = vmatprep.mubr.msk.bf16.mxu1 %vm9478_vm0, %v12591_v50  ;;  %8218 = vmatpush3.bf16.msra.mxu0 %v9187_v27  ;;  %12602 = vst [vmem:[#allocation32_spill] sm:$0xff] %v10721_v38  ;;  %12603 = vst [vmem:[#allocation33_spill] sm:$0xff] %v10726_v36  ;;  %v2154_v27 = vrot.slane %v9382_v30, 4 }
 0x169   : > { %v881_v54 = vpop.f32.mrb[48].mxu0  ;;  %8262 = vmatpush3.bf16.msra.mxu1 %v9188_v2  ;;  %8219 = vmatprep.subr.bf16.mxu0 %v12591_v50  ;;  %v2155_v2 = vrot.slane %v9383_v56, 4  ;;  %v2357_v55 = vsel %vm2356_vm6, %v2354_v13, %v2355_v31  ;;  %v12606_v13 = vrot.slane %v10532_v41, 4 }
 0x16a   : > { %v1017_v32 = vpop.f32.mrb[48].mxu1  ;;  %v7803_v15 = vpop.f32.mrb[49].mxu0  ;;  %8263 = vmatprep.subr.bf16.mxu1 %v12591_v50  ;;  %v10752_v30 = vpack.c.bf16 %v2357_v55, %v2358_v4 }
 0x16b   : > { %v10724_v29 = vadd.f32 %v1017_v32, %v881_v54  ;;  %v7847_v20 = vpop.f32.mrb[49].mxu1  ;;  %v884_v10 = vpop.f32.mrb[50].mxu0  ;;  %v2169_v62 = vsel %vm2156_vm5, %v2155_v2, %v12606_v13 }
 0x16c   : > { %v1020_v3 = vpop.f32.mrb[50].mxu1  ;;  %v7804_v60 = vpop.f32.mrb[51].mxu0  ;;  %8220 = vmatpush3.bf16.msra.mxu0 %v9189_v45  ;;  %12605 = vst [vmem:[#allocation35_spill] sm:$0xff] %v10752_v30 }
 0x16d   : > { %v10730_v15 = vadd.f32 %v1020_v3, %v884_v10  ;;  %v7848_v59 = vpop.f32.mrb[51].mxu1  ;;  %8264 = vmatpush3.bf16.msra.mxu1 %v9190_v25  ;;  %8293 = vmatprep.subr.bf16.mxu0 %v12591_v50  ;;  %v2157_v60 = vsel %vm2156_vm5, %v2154_v27, %v2155_v2  ;;  %v2158_v3 = vsel %vm2156_vm5, %v2153_v57, %v2154_v27 }
 0x16e   : > { %8150 = vmatmul.mubr.bf16.gmra.mrb[156].mxu0 %v10721_v38  ;;  %8337 = vmatprep.subr.bf16.mxu1 %v12591_v50  ;;  %v10748_v25 = vpack.c.bf16 %v2157_v60, %v2158_v3  ;;  %v12607_v59 = vrot.slane %v10532_v41, 5 }
 0x16f   : > { %8194 = vmatmul.mubr.bf16.gmra.mrb[156].mxu1 %v10726_v36  ;;  %8153 = vmatprep.mubr.msk.bf16.mxu0 %vm9478_vm0, %v12591_v50 }
 0x170   : > { %8197 = vmatprep.mubr.msk.bf16.mxu1 %vm9478_vm0, %v12591_v50  ;;  %12604 = vst [vmem:[#allocation34_spill] sm:$0xff] %v10748_v25  ;;  %v2369_v60 = vsel %vm2356_vm6, %v2355_v31, %v12607_v59 }
 0x171   : > { %v889_v0 = vpop.f32.mrb[52].mxu0 }
 0x172   : > { %v1025_v45 = vpop.f32.mrb[52].mxu1  ;;  %v7807_v54 = vpop.f32.mrb[53].mxu0 }
 0x173   : > { %v10750_v32 = vadd.f32 %v1025_v45, %v889_v0  ;;  %v7851_v20 = vpop.f32.mrb[53].mxu1  ;;  %v892_v10 = vpop.f32.mrb[54].mxu0  ;;  %v10769_v45 = vpack.c.bf16 %v2169_v62, %v2169_v62 }
 0x174   : > { %v1028_v57 = vpop.f32.mrb[54].mxu1  ;;  %v7808_v27 = vpop.f32.mrb[55].mxu0  ;;  %v10771_v10 = vpack.c.bf16 %v2369_v60, %v2369_v60 }
 0x175   : > { %v7852_v56 = vpop.f32.mrb[55].mxu1  ;;  %12608 = vst [vmem:[#allocation36_spill] sm:$0xff] %v10769_v45 }
 0x176   : > { %8154 = vmatmul.mubr.bf16.gmra.mrb[160].mxu0 %v10748_v25  ;;  %12609 = vst [vmem:[#allocation37_spill] sm:$0xff] %v10771_v10 }
 0x177   : > { %8198 = vmatmul.mubr.bf16.gmra.mrb[160].mxu1 %v10752_v30  ;;  %8157 = vmatprep.mubr.msk.bf16.mxu0 %vm9478_vm0, %v12591_v50 }
 0x178   : > { %8201 = vmatprep.mubr.msk.bf16.mxu1 %vm9478_vm0, %v12591_v50 }
 0x179   : > { %v1164_v3 = vpop.f32.mrb[56].mxu0 }
 0x17a   : > { %v1218_v55 = vadd.f32 %v1164_v3, %v10535_v19  ;;  %v1364_v4 = vpop.f32.mrb[56].mxu1  ;;  %v7871_v0 = vpop.f32.mrb[57].mxu0  ;;  %v9191_v3 = vld [vmem:[%s12510_s1 + $0x380] sm:$0xff]  }
 0x17b   : > { %v7915_v54 = vpop.f32.mrb[57].mxu1  ;;  %v1167_v20 = vpop.f32.mrb[58].mxu0 }
 0x17c   : > { %v1418_v2 = vadd.f32 %v1364_v4, %v1218_v55  ;;  %v1219_v57 = vadd.f32 %v1167_v20, %v10541_v52  ;;  %v1367_v27 = vpop.f32.mrb[58].mxu1  ;;  %v7872_v56 = vpop.f32.mrb[59].mxu0  ;;  %v1433_v55 = vsub.s32 1, %v9618_v12 }
 0x17d   : > { %v7916_v41 = vpop.f32.mrb[59].mxu1  ;;  %v9193_v56 = vld [vmem:[%s12510_s1 + $0x388] sm:$0xff]  }
 0x17e   : > { %v1419_v13 = vadd.f32 %v1367_v27, %v1219_v57  ;;  %8158 = vmatmul.mubr.bf16.gmra.mrb[164].mxu0 %v10769_v45  ;;  %v9192_v57 = vld [vmem:[%s12510_s1 + $0x3c0] sm:$0xff]   ;;  %v9194_v41 = vld [vmem:[%s12510_s1 + $0x3c8] sm:$0xff]  }
 0x17f   : > { %8202 = vmatmul.mubr.bf16.gmra.mrb[164].mxu1 %v10771_v10  ;;  %8221 = vmatprep.mubr.msk.bf16.mxu0 %vm9478_vm0, %v12591_v50 }
 0x180   : > { %8265 = vmatprep.mubr.msk.bf16.mxu1 %vm9478_vm0, %v12591_v50 }
 0x181   : > { %v1172_v31 = vpop.f32.mrb[60].mxu0 }
 0x182   : > { %v1220_v19 = vadd.f32 %v1172_v31, %v10566_v21  ;;  %v1372_v62 = vpop.f32.mrb[60].mxu1  ;;  %v7875_v59 = vpop.f32.mrb[61].mxu0 }
 0x183   : > { %v7919_v52 = vpop.f32.mrb[61].mxu1  ;;  %v1175_v60 = vpop.f32.mrb[62].mxu0 }
 0x184   : > { %v1420_v4 = vadd.f32 %v1372_v62, %v1220_v19  ;;  %v1221_v0 = vadd.f32 %v1175_v60, %v10578_v9  ;;  %v1375_v54 = vpop.f32.mrb[62].mxu1  ;;  %v7876_v20 = vpop.f32.mrb[63].mxu0  ;;  %v10797_v9 = vrot.slane %v10403_v39, %v1433_v55 }
 0x185   : > { %v7920_v21 = vpop.f32.mrb[63].mxu1 }
 0x186   : > { %v10789_v27 = vadd.f32 %v1375_v54, %v1221_v0  ;;  %8222 = vmatmul.mubr.bf16.vlgmr.msra.gmra.mrb[168].mxu0 %v9707_v43  ;;  %v1435_v60 = vadd.f32 %v10797_v9, %v1418_v2  ;;  %v1436_v2 = vadd.f32 %v10797_v9, %v1419_v13  ;;  %v9197_v13 = vld [vmem:[%s12510_s1 + $0x398] sm:$0xff]  }
 0x187   : > { %8266 = vmatmul.mubr.bf16.vlgmr.msra.gmra.mrb[168].mxu1 %v9723_v48  ;;  %8294 = vmatpush3.bf16.msra.mxu0 %v9191_v3 }
 0x188   : > { %8338 = vmatpush3.bf16.msra.mxu1 %v9192_v57  ;;  %8225 = vmatprep.mubr.msk.bf16.mxu0 %vm9478_vm0, %v12591_v50  ;;  %v9196_v57 = vld [vmem:[%s12510_s1 + $0x3d0] sm:$0xff]  }
 0x189   : > { %v1180_v31 = vpop.f32.mrb[64].mxu0  ;;  %8269 = vmatprep.mubr.msk.bf16.mxu1 %vm9478_vm0, %v12591_v50  ;;  %8295 = vmatprep.subr.bf16.mxu0 %v12591_v50 }
 0x18a   : > { %v1222_v19 = vadd.f32 %v1180_v31, %v10604_v35  ;;  %v1380_v62 = vpop.f32.mrb[64].mxu1  ;;  %v7879_v59 = vpop.f32.mrb[65].mxu0  ;;  %8339 = vmatprep.subr.bf16.mxu1 %v12591_v50  ;;  %v9195_v35 = vld [vmem:[%s12510_s1 + $0x390] sm:$0xff]  }
 0x18b   : > { %v7923_v39 = vpop.f32.mrb[65].mxu1  ;;  %v1183_v52 = vpop.f32.mrb[66].mxu0  ;;  %8296 = vmatpush3.bf16.msra.mxu0 %v9193_v56  ;;  %v1448_v56 = vmax.f32 %v1435_v60, 0.0  ;;  %v1449_v59 = vmax.f32 %v1436_v2, 0.0 }
 0x18c   : > { %v1422_v3 = vadd.f32 %v1380_v62, %v1222_v19  ;;  %v1223_v55 = vadd.f32 %v1183_v52, %v10614_v1  ;;  %v1383_v0 = vpop.f32.mrb[66].mxu1  ;;  %v7880_v54 = vpop.f32.mrb[67].mxu0  ;;  %8340 = vmatpush3.bf16.msra.mxu1 %v9194_v41  ;;  %8297 = vmatprep.subr.bf16.mxu0 %v12591_v50  ;;  %v9198_v62 = vld [vmem:[%s12510_s1 + $0x3d8] sm:$0xff]  }
 0x18d   : > { %v7924_v20 = vpop.f32.mrb[67].mxu1  ;;  %8341 = vmatprep.subr.bf16.mxu1 %v12591_v50 }
 0x18e   : > { %v1439_v1 = vadd.f32 %v10797_v9, %v1422_v3  ;;  %v1423_v21 = vadd.f32 %v1383_v0, %v1223_v55  ;;  %8226 = vmatmul.mubr.bf16.gmra.mrb[172].mxu0 %v9789_v5 }
 0x18f   : > { %8270 = vmatmul.mubr.bf16.gmra.mrb[172].mxu1 %v9798_v8  ;;  %8229 = vmatprep.mubr.msk.bf16.mxu0 %vm9478_vm0, %v12591_v50 }
 0x190   : > { %v1452_v41 = vmax.f32 %v1439_v1, 0.0  ;;  %v1440_v31 = vadd.f32 %v10797_v9, %v1423_v21  ;;  %8273 = vmatprep.mubr.msk.bf16.mxu1 %vm9478_vm0, %v12591_v50  ;;  %8298 = vmatpush3.bf16.msra.mxu0 %v9195_v35  ;;  %v1437_v35 = vadd.f32 %v10797_v9, %v1420_v4  ;;  %v9200_v4 = vld [vmem:[%s12510_s1 + $0x3e0] sm:$0xff]  }
 0x191   : > { %v1188_v19 = vpop.f32.mrb[68].mxu0  ;;  %8342 = vmatpush3.bf16.msra.mxu1 %v9196_v57  ;;  %8299 = vmatprep.subr.bf16.mxu0 %v12591_v50 }
 0x192   : > { %v10835_v39 = vmax.f32 %v1448_v56, %v1452_v41  ;;  %v1453_v52 = vmax.f32 %v1440_v31, 0.0  ;;  %v1224_v60 = vadd.f32 %v1188_v19, %v10644_v33  ;;  %v1388_v3 = vpop.f32.mrb[68].mxu1  ;;  %v7883_v55 = vpop.f32.mrb[69].mxu0  ;;  %8343 = vmatprep.subr.bf16.mxu1 %v12591_v50  ;;  %v9199_v33 = vld [vmem:[%s12510_s1 + $0x3a0] sm:$0xff]   ;;  %v1438_v41 = vadd.f32 %v10797_v9, %v10789_v27  ;;  %v9201_v27 = vld [vmem:[%s12510_s1 + $0x3a8] sm:$0xff]  }
 0x193   : > { %v7927_v0 = vpop.f32.mrb[69].mxu1  ;;  %v1191_v54 = vpop.f32.mrb[70].mxu0 }
 0x194   : > { %v10840_v20 = vmax.f32 %v1449_v59, %v1453_v52  ;;  %v1424_v57 = vadd.f32 %v1388_v3, %v1224_v60  ;;  %v1225_v1 = vadd.f32 %v1191_v54, %v10653_v47  ;;  %v1391_v21 = vpop.f32.mrb[70].mxu1  ;;  %v7884_v2 = vpop.f32.mrb[71].mxu0  ;;  %8300 = vmatpush3.bf16.msra.mxu0 %v9197_v13  ;;  %v1450_v13 = vmax.f32 %v1437_v35, 0.0  ;;  %v9202_v52 = vld [vmem:[%s12510_s1 + $0x3e8] sm:$0xff]  }
 0x195   : > { %v7928_v56 = vpop.f32.mrb[71].mxu1  ;;  %8344 = vmatpush3.bf16.msra.mxu1 %v9198_v62  ;;  %8301 = vmatprep.subr.bf16.mxu0 %v12591_v50  ;;  %v1451_v60 = vmax.f32 %v1438_v41, 0.0  ;;  %v9203_v41 = vld [vmem:[%s12510_s1 + $0x3b0] sm:$0xff]  }
 0x196   : > { %v1441_v47 = vadd.f32 %v10797_v9, %v1424_v57  ;;  %v1425_v31 = vadd.f32 %v1391_v21, %v1225_v1  ;;  %8230 = vmatmul.mubr.bf16.gmra.mrb[176].mxu0 %v9823_v16  ;;  %8345 = vmatprep.subr.bf16.mxu1 %v12591_v50 }
 0x197   : > { %8274 = vmatmul.mubr.bf16.gmra.mrb[176].mxu1 %v9828_v17  ;;  %8233 = vmatprep.mubr.msk.bf16.mxu0 %vm9478_vm0, %v12591_v50 }
 0x198   : > { %v1454_v19 = vmax.f32 %v1441_v47, 0.0  ;;  %v1442_v62 = vadd.f32 %v10797_v9, %v1425_v31  ;;  %8277 = vmatprep.mubr.msk.bf16.mxu1 %vm9478_vm0, %v12591_v50  ;;  %8302 = vmatpush3.bf16.msra.mxu0 %v9199_v33 }
 0x199   : > { %v1196_v59 = vpop.f32.mrb[72].mxu0  ;;  %8346 = vmatpush3.bf16.msra.mxu1 %v9200_v4  ;;  %8303 = vmatprep.subr.bf16.mxu0 %v12591_v50 }
 0x19a   : > { %v1489_v3 = vmax.f32 %v1450_v13, %v1454_v19  ;;  %v1455_v55 = vmax.f32 %v1442_v62, 0.0  ;;  %v1226_v0 = vadd.f32 %v1196_v59, %v10684_v18  ;;  %v1396_v54 = vpop.f32.mrb[72].mxu1  ;;  %v7887_v35 = vpop.f32.mrb[73].mxu0  ;;  %8347 = vmatprep.subr.bf16.mxu1 %v12591_v50  ;;  %v9204_v18 = vld [vmem:[%s12510_s1 + $0x3f0] sm:$0xff]   ;;  %v9205_v62 = vld [vmem:[%s12510_s1 + $0x3b8] sm:$0xff]  }
 0x19b   : > { %v7931_v57 = vpop.f32.mrb[73].mxu1  ;;  %v1199_v1 = vpop.f32.mrb[74].mxu0  ;;  %v9206_v59 = vld [vmem:[%s12510_s1 + $0x3f8] sm:$0xff]  }
 0x19c   : > { %v1490_v21 = vmax.f32 %v1451_v60, %v1455_v55  ;;  %v1426_v2 = vadd.f32 %v1396_v54, %v1226_v0  ;;  %v1227_v33 = vadd.f32 %v1199_v1, %v10693_v37  ;;  %v1399_v56 = vpop.f32.mrb[74].mxu1  ;;  %v7888_v4 = vpop.f32.mrb[75].mxu0  ;;  %8304 = vmatpush3.bf16.msra.mxu0 %v9201_v27 }
 0x19d   : > { %v7932_v47 = vpop.f32.mrb[75].mxu1  ;;  %8348 = vmatpush3.bf16.msra.mxu1 %v9202_v52  ;;  %8305 = vmatprep.subr.bf16.mxu0 %v12591_v50 }
 0x19e   : > { %v1443_v31 = vadd.f32 %v10797_v9, %v1426_v2  ;;  %v1427_v13 = vadd.f32 %v1399_v56, %v1227_v33  ;;  %8234 = vmatmul.mubr.bf16.gmra.mrb[180].mxu0 %v9853_v26  ;;  %8349 = vmatprep.subr.bf16.mxu1 %v12591_v50 }
 0x19f   : > { %8278 = vmatmul.mubr.bf16.gmra.mrb[180].mxu1 %v9858_v28  ;;  %8237 = vmatprep.mubr.msk.bf16.mxu0 %vm9478_vm0, %v12591_v50 }
 0x1a0   : > { %v1456_v37 = vmax.f32 %v1443_v31, 0.0  ;;  %v1444_v19 = vadd.f32 %v10797_v9, %v1427_v13  ;;  %8281 = vmatprep.mubr.msk.bf16.mxu1 %vm9478_vm0, %v12591_v50  ;;  %8306 = vmatpush3.bf16.msra.mxu0 %v9203_v41 }
 0x1a1   : > { %v1204_v27 = vpop.f32.mrb[76].mxu0  ;;  %8350 = vmatpush3.bf16.msra.mxu1 %v9204_v18  ;;  %8307 = vmatprep.subr.bf16.mxu0 %v12591_v50 }
 0x1a2   : > { %v1491_v52 = vmax.f32 %v10835_v39, %v1456_v37  ;;  %v1457_v60 = vmax.f32 %v1444_v19, 0.0  ;;  %v1228_v55 = vadd.f32 %v1204_v27, %v10724_v29  ;;  %v1404_v0 = vpop.f32.mrb[76].mxu1  ;;  %v7891_v54 = vpop.f32.mrb[77].mxu0  ;;  %8351 = vmatprep.subr.bf16.mxu1 %v12591_v50 }
 0x1a3   : > { %v7935_v35 = vpop.f32.mrb[77].mxu1  ;;  %v1207_v57 = vpop.f32.mrb[78].mxu0 }
 0x1a4   : > { %v1492_v1 = vmax.f32 %v10840_v20, %v1457_v60  ;;  %v1428_v2 = vadd.f32 %v1404_v0, %v1228_v55  ;;  %v1229_v33 = vadd.f32 %v1207_v57, %v10730_v15  ;;  %v1407_v56 = vpop.f32.mrb[78].mxu1  ;;  %v7892_v4 = vpop.f32.mrb[79].mxu0  ;;  %8308 = vmatpush3.bf16.msra.mxu0 %v9205_v62 }
 0x1a5   : > { %v7936_v41 = vpop.f32.mrb[79].mxu1  ;;  %8352 = vmatpush3.bf16.msra.mxu1 %v9206_v59  ;;  %8381 = vmatprep.subr.bf16.mxu0 %v12591_v50 }
 0x1a6   : > { %v1445_v29 = vadd.f32 %v10797_v9, %v1428_v2  ;;  %v1429_v39 = vadd.f32 %v1407_v56, %v1229_v33  ;;  %8238 = vmatmul.mubr.bf16.gmra.mrb[184].mxu0 %v9883_v42  ;;  %8425 = vmatprep.subr.bf16.mxu1 %v12591_v50 }
 0x1a7   : > { %8282 = vmatmul.mubr.bf16.gmra.mrb[184].mxu1 %v9888_v44  ;;  %8241 = vmatprep.mubr.msk.bf16.mxu0 %vm9478_vm0, %v12591_v50 }
 0x1a8   : > { %v1458_v15 = vmax.f32 %v1445_v29, 0.0  ;;  %v1446_v20 = vadd.f32 %v10797_v9, %v1429_v39  ;;  %8285 = vmatprep.mubr.msk.bf16.mxu1 %vm9478_vm0, %v12591_v50 }
 0x1a9   : > { %v1212_v47 = vpop.f32.mrb[80].mxu0 }
 0x1aa   : > { %v1493_v18 = vmax.f32 %v1489_v3, %v1458_v15  ;;  %v1459_v31 = vmax.f32 %v1446_v20, 0.0  ;;  %v1230_v13 = vadd.f32 %v1212_v47, %v10750_v32  ;;  %v1412_v37 = vpop.f32.mrb[80].mxu1  ;;  %v7895_v19 = vpop.f32.mrb[81].mxu0 }
 0x1ab   : > { %v7939_v62 = vpop.f32.mrb[81].mxu1  ;;  %v1215_v27 = vpop.f32.mrb[82].mxu0 }
 0x1ac   : > { %v1494_v59 = vmax.f32 %v1490_v21, %v1459_v31  ;;  %v1430_v60 = vadd.f32 %v1412_v37, %v1230_v13  ;;  %v1415_v55 = vpop.f32.mrb[82].mxu1  ;;  %v7896_v0 = vpop.f32.mrb[83].mxu0  ;;  %v9207_v62 = vld [vmem:[%s12510_s1 + $0x400] sm:$0xff]  }
 0x1ad   : > { %v7940_v54 = vpop.f32.mrb[83].mxu1 }
 0x1ae   : > { %v1497_v35 = vmax.f32 %v1493_v18, %v1494_v59  ;;  %v1447_v57 = vadd.f32 %v10797_v9, %v1430_v60  ;;  %8242 = vmatmul.mubr.bf16.gmra.mrb[188].mxu0 %v9900_v46  ;;  %v9208_v60 = vld [vmem:[%s12510_s1 + $0x440] sm:$0xff]   ;;  %v9209_v54 = vld [vmem:[%s12510_s1 + $0x408] sm:$0xff]  }
 0x1af   : > { %8286 = vmatmul.mubr.bf16.gmra.mrb[188].mxu1 %v9904_v49  ;;  %8245 = vmatprep.mubr.msk.bf16.mxu0 %vm9478_vm0, %v12591_v50 }
 0x1b0   : > { %v1460_v32 = vmax.f32 %v1447_v57, 0.0  ;;  %8289 = vmatprep.mubr.msk.bf16.mxu1 %vm9478_vm0, %v12591_v50 }
 0x1b1   : > { %v1621_v3 = vpop.f32.mrb[84].mxu0 }
 0x1b2   : > { %v1486_v21 = vsel %vm1473_vm7, %v1460_v32, -1e+30  ;;  %v1757_v2 = vpop.f32.mrb[84].mxu1  ;;  %v7959_v33 = vpop.f32.mrb[85].mxu0 }
 0x1b3   : > { %v1495_v56 = vmax.f32 %v1491_v52, %v1486_v21  ;;  %v10918_v4 = vadd.f32 %v1757_v2, %v1621_v3  ;;  %v8003_v9 = vpop.f32.mrb[85].mxu1  ;;  %v1624_v41 = vpop.f32.mrb[86].mxu0 }
 0x1b4   : > { %v1760_v29 = vpop.f32.mrb[86].mxu1  ;;  %v7960_v39 = vpop.f32.mrb[87].mxu0 }
 0x1b5   : > { %v1496_v15 = vmax.f32 %v1495_v56, %v1492_v1  ;;  %v10920_v20 = vadd.f32 %v1760_v29, %v1624_v41  ;;  %v8004_v47 = vpop.f32.mrb[87].mxu1  ;;  %v9211_v41 = vld [vmem:[%s12510_s1 + $0x410] sm:$0xff]  }
 0x1b6   : > { %8246 = vmatmul.mubr.bf16.gmra.mrb[192].mxu0 %v9914_v51  ;;  %v9213_v47 = vld [vmem:[%s12510_s1 + $0x418] sm:$0xff]  }
 0x1b7   : > { %8290 = vmatmul.mubr.bf16.gmra.mrb[192].mxu1 %v9918_v53  ;;  %8309 = vmatprep.mubr.msk.bf16.mxu0 %vm9478_vm0, %v12591_v50  ;;  %v10928_v52 = vmax.f32 %v1496_v15, %v1497_v35  ;;  %v9210_v35 = vld [vmem:[%s12510_s1 + $0x448] sm:$0xff]   ;;  %v9212_v15 = vld [vmem:[%s12510_s1 + $0x450] sm:$0xff]  }
 0x1b8   : > { %8353 = vmatprep.mubr.msk.bf16.mxu1 %vm9478_vm0, %v12591_v50 }
 0x1b9   : > { %12610 = vst [vmem:[#allocation38_spill] sm:$0xff] %v10928_v52  ;;  %v1629_v18 = vpop.f32.mrb[88].mxu0 }
 0x1ba   : > { %v1765_v31 = vpop.f32.mrb[88].mxu1  ;;  %v7963_v13 = vpop.f32.mrb[89].mxu0 }
 0x1bb   : > { %v10930_v37 = vadd.f32 %v1765_v31, %v1629_v18  ;;  %v8007_v1 = vpop.f32.mrb[89].mxu1  ;;  %v1632_v19 = vpop.f32.mrb[90].mxu0  ;;  %v9214_v31 = vld [vmem:[%s12510_s1 + $0x458] sm:$0xff]  }
 0x1bc   : > { %v1768_v27 = vpop.f32.mrb[90].mxu1  ;;  %v7964_v59 = vpop.f32.mrb[91].mxu0 }
 0x1bd   : > { %v10938_v55 = vadd.f32 %v1768_v27, %v1632_v19  ;;  %v8008_v0 = vpop.f32.mrb[91].mxu1 }
 0x1be   : > { %8310 = vmatmul.mubr.bf16.vlgmr.msra.gmra.mrb[196].mxu0 %v10062_v22  ;;  %v9215_v0 = vld [vmem:[%s12510_s1 + $0x420] sm:$0xff]  }
 0x1bf   : > { %8354 = vmatmul.mubr.bf16.vlgmr.msra.gmra.mrb[196].mxu1 %v10064_v23  ;;  %8382 = vmatpush3.bf16.msra.mxu0 %v9207_v62 }
 0x1c0   : > { %8426 = vmatpush3.bf16.msra.mxu1 %v9208_v60  ;;  %8313 = vmatprep.mubr.msk.bf16.mxu0 %vm9478_vm0, %v12591_v50 }
 0x1c1   : > { %v1637_v57 = vpop.f32.mrb[92].mxu0  ;;  %8357 = vmatprep.mubr.msk.bf16.mxu1 %vm9478_vm0, %v12591_v50  ;;  %8383 = vmatprep.subr.bf16.mxu0 %v12591_v50 }
 0x1c2   : > { %v1773_v32 = vpop.f32.mrb[92].mxu1  ;;  %v7967_v3 = vpop.f32.mrb[93].mxu0  ;;  %8427 = vmatprep.subr.bf16.mxu1 %v12591_v50 }
 0x1c3   : > { %v10954_v21 = vadd.f32 %v1773_v32, %v1637_v57  ;;  %v8011_v2 = vpop.f32.mrb[93].mxu1  ;;  %v1640_v33 = vpop.f32.mrb[94].mxu0  ;;  %8384 = vmatpush3.bf16.msra.mxu0 %v9209_v54  ;;  %v9216_v57 = vld [vmem:[%s12510_s1 + $0x460] sm:$0xff]   ;;  %v9217_v32 = vld [vmem:[%s12510_s1 + $0x428] sm:$0xff]  }
 0x1c4   : > { %v1776_v56 = vpop.f32.mrb[94].mxu1  ;;  %v7968_v9 = vpop.f32.mrb[95].mxu0  ;;  %8428 = vmatpush3.bf16.msra.mxu1 %v9210_v35  ;;  %8385 = vmatprep.subr.bf16.mxu0 %v12591_v50  ;;  %v9218_v2 = vld [vmem:[%s12510_s1 + $0x468] sm:$0xff]  }
 0x1c5   : > { %v10960_v29 = vadd.f32 %v1776_v56, %v1640_v33  ;;  %v8012_v39 = vpop.f32.mrb[95].mxu1  ;;  %8429 = vmatprep.subr.bf16.mxu1 %v12591_v50 }
 0x1c6   : > { %8314 = vmatmul.mubr.bf16.gmra.mrb[200].mxu0 %v10099_v6 }
 0x1c7   : > { %8358 = vmatmul.mubr.bf16.gmra.mrb[200].mxu1 %v10102_v34  ;;  %8317 = vmatprep.mubr.msk.bf16.mxu0 %vm9478_vm0, %v12591_v50 }
 0x1c8   : > { %8361 = vmatprep.mubr.msk.bf16.mxu1 %vm9478_vm0, %v12591_v50  ;;  %8386 = vmatpush3.bf16.msra.mxu0 %v9211_v41 }
 0x1c9   : > { %v1645_v18 = vpop.f32.mrb[96].mxu0  ;;  %8430 = vmatpush3.bf16.msra.mxu1 %v9212_v15  ;;  %8387 = vmatprep.subr.bf16.mxu0 %v12591_v50 }
 0x1ca   : > { %v1781_v13 = vpop.f32.mrb[96].mxu1  ;;  %v7971_v1 = vpop.f32.mrb[97].mxu0  ;;  %8431 = vmatprep.subr.bf16.mxu1 %v12591_v50 }
 0x1cb   : > { %v10980_v19 = vadd.f32 %v1781_v13, %v1645_v18  ;;  %v8015_v62 = vpop.f32.mrb[97].mxu1  ;;  %v1648_v27 = vpop.f32.mrb[98].mxu0  ;;  %v9219_v18 = vld [vmem:[%s12510_s1 + $0x430] sm:$0xff]  }
 0x1cc   : > { %v1784_v59 = vpop.f32.mrb[98].mxu1  ;;  %v7972_v60 = vpop.f32.mrb[99].mxu0  ;;  %8388 = vmatpush3.bf16.msra.mxu0 %v9213_v47  ;;  %v9220_v1 = vld [vmem:[%s12510_s1 + $0x470] sm:$0xff]   ;;  %v9221_v62 = vld [vmem:[%s12510_s1 + $0x438] sm:$0xff]  }
 0x1cd   : > { %v10985_v54 = vadd.f32 %v1784_v59, %v1648_v27  ;;  %v8016_v35 = vpop.f32.mrb[99].mxu1  ;;  %8432 = vmatpush3.bf16.msra.mxu1 %v9214_v31  ;;  %8389 = vmatprep.subr.bf16.mxu0 %v12591_v50  ;;  %v9222_v59 = vld [vmem:[%s12510_s1 + $0x478] sm:$0xff]  }
 0x1ce   : > { %8318 = vmatmul.mubr.bf16.gmra.mrb[204].mxu0 %v10149_v58  ;;  %8433 = vmatprep.subr.bf16.mxu1 %v12591_v50 }
 0x1cf   : > { %8362 = vmatmul.mubr.bf16.gmra.mrb[204].mxu1 %v10152_v14  ;;  %8321 = vmatprep.mubr.msk.bf16.mxu0 %vm9478_vm0, %v12591_v50 }
 0x1d0   : > { %8365 = vmatprep.mubr.msk.bf16.mxu1 %vm9478_vm0, %v12591_v50  ;;  %8390 = vmatpush3.bf16.msra.mxu0 %v9215_v0 }
 0x1d1   : > { %v1653_v3 = vpop.f32.mrb[100].mxu0  ;;  %8434 = vmatpush3.bf16.msra.mxu1 %v9216_v57  ;;  %8391 = vmatprep.subr.bf16.mxu0 %v12591_v50 }
 0x1d2   : > { %v1789_v33 = vpop.f32.mrb[100].mxu1  ;;  %v7975_v56 = vpop.f32.mrb[101].mxu0  ;;  %8435 = vmatprep.subr.bf16.mxu1 %v12591_v50 }
 0x1d3   : > { %v11006_v9 = vadd.f32 %v1789_v33, %v1653_v3  ;;  %v8019_v41 = vpop.f32.mrb[101].mxu1  ;;  %v1656_v39 = vpop.f32.mrb[102].mxu0 }
 0x1d4   : > { %v1792_v15 = vpop.f32.mrb[102].mxu1  ;;  %v7976_v47 = vpop.f32.mrb[103].mxu0  ;;  %8392 = vmatpush3.bf16.msra.mxu0 %v9217_v32 }
 0x1d5   : > { %v11011_v31 = vadd.f32 %v1792_v15, %v1656_v39  ;;  %v8020_v13 = vpop.f32.mrb[103].mxu1  ;;  %8436 = vmatpush3.bf16.msra.mxu1 %v9218_v2  ;;  %8393 = vmatprep.subr.bf16.mxu0 %v12591_v50 }
 0x1d6   : > { %8322 = vmatmul.mubr.bf16.gmra.mrb[208].mxu0 %v10197_v61  ;;  %8437 = vmatprep.subr.bf16.mxu1 %v12591_v50 }
 0x1d7   : > { %8366 = vmatmul.mubr.bf16.gmra.mrb[208].mxu1 %v10203_v63  ;;  %8325 = vmatprep.mubr.msk.bf16.mxu0 %vm9478_vm0, %v12591_v50 }
 0x1d8   : > { %8369 = vmatprep.mubr.msk.bf16.mxu1 %vm9478_vm0, %v12591_v50  ;;  %8394 = vmatpush3.bf16.msra.mxu0 %v9219_v18 }
 0x1d9   : > { %v1661_v27 = vpop.f32.mrb[104].mxu0  ;;  %8438 = vmatpush3.bf16.msra.mxu1 %v9220_v1  ;;  %8395 = vmatprep.subr.bf16.mxu0 %v12591_v50 }
 0x1da   : > { %v1797_v60 = vpop.f32.mrb[104].mxu1  ;;  %v7979_v0 = vpop.f32.mrb[105].mxu0  ;;  %8439 = vmatprep.subr.bf16.mxu1 %v12591_v50 }
 0x1db   : > { %v11032_v35 = vadd.f32 %v1797_v60, %v1661_v27  ;;  %v8023_v57 = vpop.f32.mrb[105].mxu1  ;;  %v1664_v32 = vpop.f32.mrb[106].mxu0 }
 0x1dc   : > { %v1800_v3 = vpop.f32.mrb[106].mxu1  ;;  %v7980_v2 = vpop.f32.mrb[107].mxu0  ;;  %8396 = vmatpush3.bf16.msra.mxu0 %v9221_v62 }
 0x1dd   : > { %v11034_v33 = vadd.f32 %v1800_v3, %v1664_v32  ;;  %v8024_v56 = vpop.f32.mrb[107].mxu1  ;;  %8440 = vmatpush3.bf16.msra.mxu1 %v9222_v59  ;;  %8469 = vmatprep.subr.bf16.mxu0 %v12591_v50  ;;  %v12611_v59 = vld [vmem:[#allocation20_spill] sm:$0xff] }
 0x1de   : > { %8326 = vmatmul.mubr.bf16.gmra.mrb[212].mxu0 %v10236_v24  ;;  %8513 = vmatprep.subr.bf16.mxu1 %v12591_v50 }
 0x1df   : > { %8370 = vmatmul.mubr.bf16.gmra.mrb[212].mxu1 %v10242_v7  ;;  %8329 = vmatprep.mubr.msk.bf16.mxu0 %vm9478_vm0, %v12591_v50 }
 0x1e0   : > { %8373 = vmatprep.mubr.msk.bf16.mxu1 %vm9478_vm0, %v12591_v50 }
 0x1e1   : > { %v1669_v41 = vpop.f32.mrb[108].mxu0 }
 0x1e2   : > { %v1805_v39 = vpop.f32.mrb[108].mxu1  ;;  %v7983_v15 = vpop.f32.mrb[109].mxu0 }
 0x1e3   : > { %v11044_v47 = vadd.f32 %v1805_v39, %v1669_v41  ;;  %v8027_v18 = vpop.f32.mrb[109].mxu1  ;;  %v1672_v13 = vpop.f32.mrb[110].mxu0 }
 0x1e4   : > { %v1808_v1 = vpop.f32.mrb[110].mxu1  ;;  %v7984_v62 = vpop.f32.mrb[111].mxu0 }
 0x1e5   : > { %v8028_v27 = vpop.f32.mrb[111].mxu1  ;;  %v12612_v1 = vld [vmem:[#allocation21_spill] sm:$0xff]  ;;  %v12613_v62 = vld [vmem:[#allocation22_spill] sm:$0xff] }
 0x1e6   : > { %8330 = vmatmul.mubr.bf16.gmra.mrb[216].mxu0 %v10262_v11 }
 0x1e7   : > { %8374 = vmatmul.mubr.bf16.gmra.mrb[216].mxu1 %v12611_v59  ;;  %8333 = vmatprep.mubr.msk.bf16.mxu0 %vm9478_vm0, %v12591_v50 }
 0x1e8   : > { %8377 = vmatprep.mubr.msk.bf16.mxu1 %vm9478_vm0, %v12591_v50 }
 0x1e9   : > { %v1910_v60 = vpop.f32.mrb[112].mxu0 }
 0x1ea   : > { %v1964_v0 = vadd.f32 %v1910_v60, %v10918_v4  ;;  %v2076_v57 = vpop.f32.mrb[112].mxu1  ;;  %v8047_v32 = vpop.f32.mrb[113].mxu0 }
 0x1eb   : > { %v8091_v3 = vpop.f32.mrb[113].mxu1  ;;  %v1913_v2 = vpop.f32.mrb[114].mxu0  ;;  %v9223_v32 = vld [vmem:[%s12510_s1 + $0x480] sm:$0xff]  }
 0x1ec   : > { %v11053_v56 = vadd.f32 %v2076_v57, %v1964_v0  ;;  %v1965_v41 = vadd.f32 %v1913_v2, %v10920_v20  ;;  %v2079_v39 = vpop.f32.mrb[114].mxu1  ;;  %v8048_v15 = vpop.f32.mrb[115].mxu0 }
 0x1ed   : > { %v8092_v18 = vpop.f32.mrb[115].mxu1  ;;  %v9224_v15 = vld [vmem:[%s12510_s1 + $0x4c0] sm:$0xff]  }
 0x1ee   : > { %v11056_v13 = vadd.f32 %v2079_v39, %v1965_v41  ;;  %8334 = vmatmul.mubr.bf16.gmra.mrb[220].mxu0 %v12612_v1  ;;  %v11239_v1 = vld [vmem:[%s9609_s19 + $0x20] sm:$0xff] }
 0x1ef   : > { %8378 = vmatmul.mubr.bf16.gmra.mrb[220].mxu1 %v12613_v62  ;;  %8397 = vmatprep.mubr.msk.bf16.mxu0 %vm9478_vm0, %v12591_v50  ;;  %v3591_v59 = vrot.slane %v11239_v1, 6 }
 0x1f0   : > { %8441 = vmatprep.mubr.msk.bf16.mxu1 %vm9478_vm0, %v12591_v50 }
 0x1f1   : > { %v1918_v4 = vpop.f32.mrb[116].mxu0 }
 0x1f2   : > { %v1966_v27 = vadd.f32 %v1918_v4, %v10930_v37  ;;  %v2084_v60 = vpop.f32.mrb[116].mxu1  ;;  %v8051_v20 = vpop.f32.mrb[117].mxu0  ;;  %v12614_v4 = vld [vmem:[#allocation24_spill] sm:$0xff] }
 0x1f3   : > { %v8095_v0 = vpop.f32.mrb[117].mxu1  ;;  %v1921_v57 = vpop.f32.mrb[118].mxu0  ;;  %v12615_v20 = vld [vmem:[#allocation25_spill] sm:$0xff] }
 0x1f4   : > { %v11068_v3 = vadd.f32 %v2084_v60, %v1966_v27  ;;  %v1967_v2 = vadd.f32 %v1921_v57, %v10938_v55  ;;  %v2087_v41 = vpop.f32.mrb[118].mxu1  ;;  %v8052_v39 = vpop.f32.mrb[119].mxu0  ;;  %v9225_v27 = vld [vmem:[%s12510_s1 + $0x488] sm:$0xff]  }
 0x1f5   : > { %v8096_v18 = vpop.f32.mrb[119].mxu1  ;;  %v9226_v55 = vld [vmem:[%s12510_s1 + $0x4c8] sm:$0xff]  }
 0x1f6   : > { %v11074_v37 = vadd.f32 %v2087_v41, %v1967_v2  ;;  %8398 = vmatmul.mubr.bf16.vlgmr.msra.gmra.mrb[224].mxu0 %v12614_v4 }
 0x1f7   : > { %8442 = vmatmul.mubr.bf16.vlgmr.msra.gmra.mrb[224].mxu1 %v12615_v20  ;;  %8470 = vmatpush3.bf16.msra.mxu0 %v9223_v32  ;;  %v9231_v20 = vld [vmem:[%s12510_s1 + $0x4a0] sm:$0xff]  }
 0x1f8   : > { %8514 = vmatpush3.bf16.msra.mxu1 %v9224_v15  ;;  %8401 = vmatprep.mubr.msk.bf16.mxu0 %vm9478_vm0, %v12591_v50 }
 0x1f9   : > { %v1926_v60 = vpop.f32.mrb[120].mxu0  ;;  %8445 = vmatprep.mubr.msk.bf16.mxu1 %vm9478_vm0, %v12591_v50  ;;  %8471 = vmatprep.subr.bf16.mxu0 %v12591_v50 }
 0x1fa   : > { %v1968_v0 = vadd.f32 %v1926_v60, %v10954_v21  ;;  %v2092_v57 = vpop.f32.mrb[120].mxu1  ;;  %v8055_v32 = vpop.f32.mrb[121].mxu0  ;;  %8515 = vmatprep.subr.bf16.mxu1 %v12591_v50  ;;  %v9227_v21 = vld [vmem:[%s12510_s1 + $0x490] sm:$0xff]  }
 0x1fb   : > { %v8099_v2 = vpop.f32.mrb[121].mxu1  ;;  %v1929_v41 = vpop.f32.mrb[122].mxu0  ;;  %8472 = vmatpush3.bf16.msra.mxu0 %v9225_v27  ;;  %v9228_v27 = vld [vmem:[%s12510_s1 + $0x4d0] sm:$0xff]   ;;  %v9230_v32 = vld [vmem:[%s12510_s1 + $0x4d8] sm:$0xff]  }
 0x1fc   : > { %v11091_v39 = vadd.f32 %v2092_v57, %v1968_v0  ;;  %v1969_v15 = vadd.f32 %v1929_v41, %v10960_v29  ;;  %v2095_v18 = vpop.f32.mrb[122].mxu1  ;;  %v8056_v52 = vpop.f32.mrb[123].mxu0  ;;  %8516 = vmatpush3.bf16.msra.mxu1 %v9226_v55  ;;  %8473 = vmatprep.subr.bf16.mxu0 %v12591_v50  ;;  %v12616_v57 = vld [vmem:[#allocation26_spill] sm:$0xff]  ;;  %v12617_v29 = vld [vmem:[#allocation27_spill] sm:$0xff] }
 0x1fd   : > { %v8100_v60 = vpop.f32.mrb[123].mxu1  ;;  %8517 = vmatprep.subr.bf16.mxu1 %v12591_v50  ;;  %v9229_v52 = vld [vmem:[%s12510_s1 + $0x498] sm:$0xff]  }
 0x1fe   : > { %v11102_v0 = vadd.f32 %v2095_v18, %v1969_v15  ;;  %8402 = vmatmul.mubr.bf16.gmra.mrb[228].mxu0 %v12616_v57 }
 0x1ff   : > { %8446 = vmatmul.mubr.bf16.gmra.mrb[228].mxu1 %v12617_v29  ;;  %8405 = vmatprep.mubr.msk.bf16.mxu0 %vm9478_vm0, %v12591_v50 }
 0x200   : > { %8449 = vmatprep.mubr.msk.bf16.mxu1 %vm9478_vm0, %v12591_v50  ;;  %8474 = vmatpush3.bf16.msra.mxu0 %v9227_v21 }
 0x201   : > { %v1934_v55 = vpop.f32.mrb[124].mxu0  ;;  %8518 = vmatpush3.bf16.msra.mxu1 %v9228_v27  ;;  %8475 = vmatprep.subr.bf16.mxu0 %v12591_v50 }
 0x202   : > { %v1970_v2 = vadd.f32 %v1934_v55, %v10980_v19  ;;  %v2100_v41 = vpop.f32.mrb[124].mxu1  ;;  %v8059_v15 = vpop.f32.mrb[125].mxu0  ;;  %8519 = vmatprep.subr.bf16.mxu1 %v12591_v50  ;;  %v9232_v19 = vld [vmem:[%s12510_s1 + $0x4e0] sm:$0xff]  }
 0x203   : > { %v8103_v18 = vpop.f32.mrb[125].mxu1  ;;  %v1937_v21 = vpop.f32.mrb[126].mxu0 }
 0x204   : > { %v11119_v60 = vadd.f32 %v2100_v41, %v1970_v2  ;;  %v1971_v29 = vadd.f32 %v1937_v21, %v10985_v54  ;;  %v2103_v57 = vpop.f32.mrb[126].mxu1  ;;  %v8060_v27 = vpop.f32.mrb[127].mxu0  ;;  %8476 = vmatpush3.bf16.msra.mxu0 %v9229_v52  ;;  %v12618_v2 = vld [vmem:[#allocation28_spill] sm:$0xff]  ;;  %v12619_v54 = vld [vmem:[#allocation29_spill] sm:$0xff] }
 0x205   : > { %v8104_v4 = vpop.f32.mrb[127].mxu1  ;;  %8520 = vmatpush3.bf16.msra.mxu1 %v9230_v32  ;;  %8477 = vmatprep.subr.bf16.mxu0 %v12591_v50 }
 0x206   : > { %v11129_v55 = vadd.f32 %v2103_v57, %v1971_v29  ;;  %8406 = vmatmul.mubr.bf16.gmra.mrb[232].mxu0 %v12618_v2  ;;  %8521 = vmatprep.subr.bf16.mxu1 %v12591_v50  ;;  %v9233_v4 = vld [vmem:[%s12510_s1 + $0x4a8] sm:$0xff]  }
 0x207   : > { %8450 = vmatmul.mubr.bf16.gmra.mrb[232].mxu1 %v12619_v54  ;;  %8409 = vmatprep.mubr.msk.bf16.mxu0 %vm9478_vm0, %v12591_v50  ;;  %v9234_v57 = vld [vmem:[%s12510_s1 + $0x4e8] sm:$0xff]   ;;  %v9235_v54 = vld [vmem:[%s12510_s1 + $0x4b0] sm:$0xff]  }
 0x208   : > { %8453 = vmatprep.mubr.msk.bf16.mxu1 %vm9478_vm0, %v12591_v50  ;;  %8478 = vmatpush3.bf16.msra.mxu0 %v9231_v20 }
 0x209   : > { %v1942_v52 = vpop.f32.mrb[128].mxu0  ;;  %8522 = vmatpush3.bf16.msra.mxu1 %v9232_v19  ;;  %8479 = vmatprep.subr.bf16.mxu0 %v12591_v50 }
 0x20a   : > { %v1972_v29 = vadd.f32 %v1942_v52, %v11006_v9  ;;  %v2108_v32 = vpop.f32.mrb[128].mxu1  ;;  %v8063_v41 = vpop.f32.mrb[129].mxu0  ;;  %8523 = vmatprep.subr.bf16.mxu1 %v12591_v50  ;;  %v9236_v9 = vld [vmem:[%s12510_s1 + $0x4f0] sm:$0xff]  }
 0x20b   : > { %v8107_v15 = vpop.f32.mrb[129].mxu1  ;;  %v1945_v20 = vpop.f32.mrb[130].mxu0 }
 0x20c   : > { %v11147_v18 = vadd.f32 %v2108_v32, %v1972_v29  ;;  %v1973_v21 = vadd.f32 %v1945_v20, %v11011_v31  ;;  %v2111_v27 = vpop.f32.mrb[130].mxu1  ;;  %v8064_v19 = vpop.f32.mrb[131].mxu0  ;;  %8480 = vmatpush3.bf16.msra.mxu0 %v9233_v4  ;;  %v12620_v29 = vld [vmem:[#allocation30_spill] sm:$0xff]  ;;  %v12621_v31 = vld [vmem:[#allocation31_spill] sm:$0xff] }
 0x20d   : > { %v8108_v2 = vpop.f32.mrb[131].mxu1  ;;  %8524 = vmatpush3.bf16.msra.mxu1 %v9234_v57  ;;  %8481 = vmatprep.subr.bf16.mxu0 %v12591_v50  ;;  %v9238_v57 = vld [vmem:[%s12510_s1 + $0x4f8] sm:$0xff]  }
 0x20e   : > { %v11157_v52 = vadd.f32 %v2111_v27, %v1973_v21  ;;  %8410 = vmatmul.mubr.bf16.gmra.mrb[236].mxu0 %v12620_v29  ;;  %8525 = vmatprep.subr.bf16.mxu1 %v12591_v50  ;;  %v9237_v2 = vld [vmem:[%s12510_s1 + $0x4b8] sm:$0xff]  }
 0x20f   : > { %8454 = vmatmul.mubr.bf16.gmra.mrb[236].mxu1 %v12621_v31  ;;  %8413 = vmatprep.mubr.msk.bf16.mxu0 %vm9478_vm0, %v12591_v50 }
 0x210   : > { %8457 = vmatprep.mubr.msk.bf16.mxu1 %vm9478_vm0, %v12591_v50  ;;  %8482 = vmatpush3.bf16.msra.mxu0 %v9235_v54 }
 0x211   : > { %v1950_v4 = vpop.f32.mrb[132].mxu0  ;;  %8526 = vmatpush3.bf16.msra.mxu1 %v9236_v9  ;;  %8483 = vmatprep.subr.bf16.mxu0 %v12591_v50 }
 0x212   : > { %v1974_v32 = vadd.f32 %v1950_v4, %v11032_v35  ;;  %v2116_v41 = vpop.f32.mrb[132].mxu1  ;;  %v8067_v15 = vpop.f32.mrb[133].mxu0  ;;  %8527 = vmatprep.subr.bf16.mxu1 %v12591_v50 }
 0x213   : > { %v8111_v20 = vpop.f32.mrb[133].mxu1  ;;  %v1953_v54 = vpop.f32.mrb[134].mxu0 }
 0x214   : > { %v11175_v21 = vadd.f32 %v2116_v41, %v1974_v32  ;;  %v1975_v27 = vadd.f32 %v1953_v54, %v11034_v33  ;;  %v2119_v19 = vpop.f32.mrb[134].mxu1  ;;  %v8068_v9 = vpop.f32.mrb[135].mxu0  ;;  %8484 = vmatpush3.bf16.msra.mxu0 %v9237_v2  ;;  %v2545_v54 = vsub.s32 2, %v9618_v12 }
 0x215   : > { %v8112_v31 = vpop.f32.mrb[135].mxu1  ;;  %8528 = vmatpush3.bf16.msra.mxu1 %v9238_v57  ;;  %8557 = vmatprep.subr.bf16.mxu0 %v12591_v50  ;;  %v9384_v9 = vld [vmem:[%s12511_s2] sm:$0x1f] }
 0x216   : > { %v11179_v29 = vadd.f32 %v2119_v19, %v1975_v27  ;;  %8414 = vmatmul.mubr.bf16.gmra.mrb[240].mxu0 %v10721_v38  ;;  %8601 = vmatprep.subr.bf16.mxu1 %v12591_v50 }
 0x217   : > { %8458 = vmatmul.mubr.bf16.gmra.mrb[240].mxu1 %v10726_v36  ;;  %8417 = vmatprep.mubr.msk.bf16.mxu0 %vm9478_vm0, %v12591_v50 }
 0x218   : > { %8461 = vmatprep.mubr.msk.bf16.mxu1 %vm9478_vm0, %v12591_v50 }
 0x219   : > { %v1958_v35 = vpop.f32.mrb[136].mxu0 }
 0x21a   : > { %v1976_v33 = vadd.f32 %v1958_v35, %v11044_v47  ;;  %v2124_v31 = vpop.f32.mrb[136].mxu1  ;;  %v8071_v2 = vpop.f32.mrb[137].mxu0  ;;  %v11202_v35 = vrot.slane %v9384_v9, %v2545_v54 }
 0x21b   : > { %v8115_v4 = vpop.f32.mrb[137].mxu1  ;;  %v1961_v57 = vpop.f32.mrb[138].mxu0 }
 0x21c   : > { %v11189_v32 = vadd.f32 %v2124_v31, %v1976_v33  ;;  %v2127_v41 = vpop.f32.mrb[138].mxu1  ;;  %v8072_v15 = vpop.f32.mrb[139].mxu0  ;;  %v11205_v31 = vld [vmem:[%s9609_s19] sm:$0xff] }
 0x21d   : > { %v8116_v20 = vpop.f32.mrb[139].mxu1  ;;  %v9386_v41 = vld [vmem:[%s9609_s19 + $0x8] sm:$0xff] }
 0x21e   : > { %8418 = vmatmul.mubr.bf16.gmra.mrb[244].mxu0 %v10748_v25  ;;  %v3588_v15 = vrot.slane %v9386_v41, 6  ;;  %v9387_v20 = vld [vmem:[%s9609_s19 + $0x10] sm:$0xff] }
 0x21f   : > { %8462 = vmatmul.mubr.bf16.gmra.mrb[244].mxu1 %v10752_v30  ;;  %8421 = vmatprep.mubr.msk.bf16.mxu0 %vm9478_vm0, %v12591_v50  ;;  %v3589_v30 = vrot.slane %v9387_v20, 6  ;;  %v3789_v36 = vrot.slane %v9387_v20, 7 }
 0x220   : > { %8465 = vmatprep.mubr.msk.bf16.mxu1 %vm9478_vm0, %v12591_v50 }
 0x221   : > { %v2276_v47 = vpop.f32.mrb[140].mxu0 }
 0x222   : > { %v2330_v27 = vadd.f32 %v2276_v47, %v11053_v56  ;;  %v2476_v19 = vpop.f32.mrb[140].mxu1  ;;  %v8135_v33 = vpop.f32.mrb[141].mxu0  ;;  %v12565_v56 = vrot.slane %v11205_v31, 7 }
 0x223   : > { %v8179_v4 = vpop.f32.mrb[141].mxu1  ;;  %v2279_v57 = vpop.f32.mrb[142].mxu0  ;;  %v3788_v33 = vrot.slane %v9386_v41, 7 }
 0x224   : > { %v2530_v47 = vadd.f32 %v2476_v19, %v2330_v27  ;;  %v2331_v25 = vadd.f32 %v2279_v57, %v11056_v13  ;;  %v2479_v54 = vpop.f32.mrb[142].mxu1  ;;  %v8136_v9 = vpop.f32.mrb[143].mxu0  ;;  %v3611_v13 = vsel %vm3600_vm8, %v3588_v15, %v3589_v30  ;;  %v12622_v27 = vrot.slane %v11205_v31, 6 }
 0x225   : > { %v8180_v38 = vpop.f32.mrb[143].mxu1  ;;  %v3812_v57 = vsel %vm3800_vm9, %v12565_v56, %v3788_v33  ;;  %v11285_v56 = vld [vmem:[%s9609_s19 + $0x30] sm:$0xff] }
 0x226   : > { %v2547_v4 = vadd.f32 %v11202_v35, %v2530_v47  ;;  %v2531_v2 = vadd.f32 %v2479_v54, %v2331_v25  ;;  %8422 = vmatmul.mubr.bf16.gmra.mrb[248].mxu0 %v10769_v45  ;;  %v3612_v38 = vsel %vm3600_vm8, %v12622_v27, %v3588_v15  ;;  %v3811_v25 = vsel %vm3800_vm9, %v3788_v33, %v3789_v36  ;;  %v9388_v45 = vld [vmem:[%s9609_s19 + $0x18] sm:$0xff]  ;;  %v9239_v33 = vld [vmem:[%s12510_s1 + $0x540] sm:$0xff]  }
 0x227   : > { %8466 = vmatmul.mubr.bf16.gmra.mrb[248].mxu1 %v10771_v10  ;;  %8485 = vmatprep.mubr.msk.bf16.mxu0 %vm9478_vm0, %v12591_v50  ;;  %v11235_v27 = vpack.c.bf16 %v3611_v13, %v3612_v38  ;;  %v3590_v62 = vrot.slane %v9388_v45, 6  ;;  %v3790_v11 = vrot.slane %v9388_v45, 7  ;;  %v11242_v7 = vpack.c.bf16 %v3811_v25, %v3812_v57 }
 0x228   : > { %v2548_v19 = vadd.f32 %v11202_v35, %v2531_v2  ;;  %8529 = vmatprep.mubr.msk.bf16.mxu1 %vm9478_vm0, %v12591_v50  ;;  %v2560_v20 = vmax.f32 %v2547_v4, 0.0 }
 0x229   : > { %v2284_v41 = vpop.f32.mrb[144].mxu0  ;;  %v3609_v57 = vsel %vm3600_vm8, %v3590_v62, %v3591_v59 }
 0x22a   : > { %v2561_v47 = vmax.f32 %v2548_v19, 0.0  ;;  %v2332_v54 = vadd.f32 %v2284_v41, %v11068_v3  ;;  %v2484_v15 = vpop.f32.mrb[144].mxu1  ;;  %v8139_v9 = vpop.f32.mrb[145].mxu0  ;;  %v3791_v41 = vrot.slane %v11239_v1, 7  ;;  %v9245_v1 = vld [vmem:[%s12510_s1 + $0x558] sm:$0xff]  }
 0x22b   : > { %v8183_v2 = vpop.f32.mrb[145].mxu1  ;;  %v2287_v10 = vpop.f32.mrb[146].mxu0  ;;  %v9240_v9 = vld [vmem:[%s12510_s1 + $0x500] sm:$0xff]  }
 0x22c   : > { %v2599_v3 = vmax.f32 %v2560_v20, %v2561_v47  ;;  %v2532_v4 = vadd.f32 %v2484_v15, %v2332_v54  ;;  %v2333_v13 = vadd.f32 %v2287_v10, %v11074_v37  ;;  %v2487_v38 = vpop.f32.mrb[146].mxu1  ;;  %v8140_v19 = vpop.f32.mrb[147].mxu0  ;;  %v3610_v10 = vsel %vm3600_vm8, %v3589_v30, %v3590_v62  ;;  %v9241_v37 = vld [vmem:[%s12510_s1 + $0x548] sm:$0xff]  }
 0x22d   : > { %v8184_v2 = vpop.f32.mrb[147].mxu1  ;;  %v3809_v54 = vsel %vm3800_vm9, %v3790_v11, %v3791_v41  ;;  %v3810_v15 = vsel %vm3800_vm9, %v3789_v36, %v3790_v11  ;;  %v9242_v30 = vld [vmem:[%s12510_s1 + $0x508] sm:$0xff]  }
 0x22e   : > { %v2549_v45 = vadd.f32 %v11202_v35, %v2532_v4  ;;  %v2533_v25 = vadd.f32 %v2487_v38, %v2333_v13  ;;  %8486 = vmatmul.mubr.bf16.vlgmr.msra.gmra.mrb[252].mxu0 %v11235_v27  ;;  %v11277_v13 = vpack.c.bf16 %v3609_v57, %v3610_v10  ;;  %v11281_v19 = vpack.c.bf16 %v3809_v54, %v3810_v15 }
 0x22f   : > { %8530 = vmatmul.mubr.bf16.vlgmr.msra.gmra.mrb[252].mxu1 %v11242_v7  ;;  %8558 = vmatpush3.bf16.msra.mxu0 %v9239_v33  ;;  %v3793_v54 = vrot.slane %v11285_v56, 7 }
 0x230   : > { %v2562_v20 = vmax.f32 %v2549_v45, 0.0  ;;  %v2550_v47 = vadd.f32 %v11202_v35, %v2533_v25  ;;  %8602 = vmatpush3.bf16.msra.mxu1 %v9240_v9  ;;  %8489 = vmatprep.mubr.msk.bf16.mxu0 %vm9478_vm0, %v12591_v50  ;;  %v9390_v45 = vld [vmem:[%s9609_s19 + $0x28] sm:$0xff] }
 0x231   : > { %v2292_v62 = vpop.f32.mrb[148].mxu0  ;;  %8533 = vmatprep.mubr.msk.bf16.mxu1 %vm9478_vm0, %v12591_v50  ;;  %8559 = vmatprep.subr.bf16.mxu0 %v12591_v50  ;;  %v3592_v25 = vrot.slane %v9390_v45, 6 }
 0x232   : > { %v2600_v33 = vmax.f32 %v2562_v20, %v2599_v3  ;;  %v2563_v4 = vmax.f32 %v2550_v47, 0.0  ;;  %v2334_v11 = vadd.f32 %v2292_v62, %v11091_v39  ;;  %v2492_v36 = vpop.f32.mrb[148].mxu1  ;;  %v8143_v38 = vpop.f32.mrb[149].mxu0  ;;  %8603 = vmatprep.subr.bf16.mxu1 %v12591_v50  ;;  %v12566_v3 = vrot.slane %v11285_v56, 6 }
 0x233   : > { %v8187_v9 = vpop.f32.mrb[149].mxu1  ;;  %v2295_v2 = vpop.f32.mrb[150].mxu0  ;;  %8560 = vmatpush3.bf16.msra.mxu0 %v9241_v37  ;;  %v3792_v20 = vrot.slane %v9390_v45, 7  ;;  %v9243_v37 = vld [vmem:[%s12510_s1 + $0x550] sm:$0xff]  }
 0x234   : > { %v2601_v57 = vmax.f32 %v2563_v4, %v2600_v33  ;;  %v2534_v10 = vadd.f32 %v2492_v36, %v2334_v11  ;;  %v2335_v39 = vadd.f32 %v2295_v2, %v11102_v0  ;;  %v2495_v47 = vpop.f32.mrb[150].mxu1  ;;  %v8144_v62 = vpop.f32.mrb[151].mxu0  ;;  %8604 = vmatpush3.bf16.msra.mxu1 %v9242_v30  ;;  %8561 = vmatprep.subr.bf16.mxu0 %v12591_v50  ;;  %v9244_v33 = vld [vmem:[%s12510_s1 + $0x510] sm:$0xff]  }
 0x235   : > { %v8188_v15 = vpop.f32.mrb[151].mxu1  ;;  %8605 = vmatprep.subr.bf16.mxu1 %v12591_v50  ;;  %v3607_v30 = vsel %vm3600_vm8, %v3592_v25, %v12566_v3  ;;  %v3608_v11 = vsel %vm3600_vm8, %v3591_v59, %v3592_v25  ;;  %v3807_v9 = vsel %vm3800_vm9, %v3792_v20, %v3793_v54  ;;  %v3808_v2 = vsel %vm3800_vm9, %v3791_v41, %v3792_v20  ;;  %v9246_v59 = vld [vmem:[%s12510_s1 + $0x518] sm:$0xff]  }
 0x236   : > { %v2551_v0 = vadd.f32 %v11202_v35, %v2534_v10  ;;  %v2535_v4 = vadd.f32 %v2495_v47, %v2335_v39  ;;  %8490 = vmatmul.mubr.bf16.gmra.mrb[0].mxu0 %v11277_v13  ;;  %v11326_v20 = vpack.c.bf16 %v3607_v30, %v3608_v11  ;;  %v11329_v15 = vpack.c.bf16 %v3807_v9, %v3808_v2  ;;  %v9247_v9 = vld [vmem:[%s12510_s1 + $0x560] sm:$0xff]  }
 0x237   : > { %8534 = vmatmul.mubr.bf16.gmra.mrb[0].mxu1 %v11281_v19  ;;  %8493 = vmatprep.mubr.msk.bf16.mxu0 %vm9478_vm0, %v12591_v50 }
 0x238   : > { %v2564_v36 = vmax.f32 %v2551_v0, 0.0  ;;  %v2552_v38 = vadd.f32 %v11202_v35, %v2535_v4  ;;  %8537 = vmatprep.mubr.msk.bf16.mxu1 %vm9478_vm0, %v12591_v50  ;;  %8562 = vmatpush3.bf16.msra.mxu0 %v9243_v37  ;;  %v11333_v4 = vld [vmem:[%s9609_s19 + $0x40] sm:$0xff] }
 0x239   : > { %v2300_v45 = vpop.f32.mrb[152].mxu0  ;;  %8606 = vmatpush3.bf16.msra.mxu1 %v9244_v33  ;;  %8563 = vmatprep.subr.bf16.mxu0 %v12591_v50  ;;  %v9392_v33 = vld [vmem:[%s9609_s19 + $0x38] sm:$0xff]  ;;  %v3595_v3 = vrot.slane %v11333_v4, 6  ;;  %v12567_v11 = vrot.slane %v11333_v4, 7 }
 0x23a   : > { %v2602_v25 = vmax.f32 %v2564_v36, %v2601_v57  ;;  %v2565_v10 = vmax.f32 %v2552_v38, 0.0  ;;  %v2336_v39 = vadd.f32 %v2300_v45, %v11119_v60  ;;  %v2500_v47 = vpop.f32.mrb[152].mxu1  ;;  %v8147_v41 = vpop.f32.mrb[153].mxu0  ;;  %8607 = vmatprep.subr.bf16.mxu1 %v12591_v50  ;;  %v3594_v0 = vrot.slane %v9392_v33, 6 }
 0x23b   : > { %v8191_v62 = vpop.f32.mrb[153].mxu1  ;;  %v2303_v37 = vpop.f32.mrb[154].mxu0  ;;  %v3794_v57 = vrot.slane %v9392_v33, 7 }
 0x23c   : > { %v2603_v36 = vmax.f32 %v2565_v10, %v2602_v25  ;;  %v2536_v38 = vadd.f32 %v2500_v47, %v2336_v39  ;;  %v2337_v60 = vadd.f32 %v2303_v37, %v11129_v55  ;;  %v2503_v45 = vpop.f32.mrb[154].mxu1  ;;  %v8148_v30 = vpop.f32.mrb[155].mxu0  ;;  %8564 = vmatpush3.bf16.msra.mxu0 %v9245_v1  ;;  %v9248_v25 = vld [vmem:[%s12510_s1 + $0x520] sm:$0xff]   ;;  %v3605_v1 = vsel %vm3600_vm8, %v3594_v0, %v3595_v3 }
 0x23d   : > { %v8192_v2 = vpop.f32.mrb[155].mxu1  ;;  %8608 = vmatpush3.bf16.msra.mxu1 %v9246_v59  ;;  %8565 = vmatprep.subr.bf16.mxu0 %v12591_v50  ;;  %v12623_v59 = vrot.slane %v11285_v56, 6  ;;  %v3805_v62 = vsel %vm3800_vm9, %v3794_v57, %v12567_v11  ;;  %v3806_v37 = vsel %vm3800_vm9, %v3793_v54, %v3794_v57  ;;  %v9249_v56 = vld [vmem:[%s12510_s1 + $0x568] sm:$0xff]  }
 0x23e   : > { %v2553_v10 = vadd.f32 %v11202_v35, %v2536_v38  ;;  %v2537_v55 = vadd.f32 %v2503_v45, %v2337_v60  ;;  %8494 = vmatmul.mubr.bf16.gmra.mrb[4].mxu0 %v11326_v20  ;;  %8609 = vmatprep.subr.bf16.mxu1 %v12591_v50 }
 0x23f   : > { %8538 = vmatmul.mubr.bf16.gmra.mrb[4].mxu1 %v11329_v15  ;;  %8497 = vmatprep.mubr.msk.bf16.mxu0 %vm9478_vm0, %v12591_v50  ;;  %v3606_v39 = vsel %vm3600_vm8, %v12623_v59, %v3594_v0  ;;  %v9250_v0 = vld [vmem:[%s12510_s1 + $0x528] sm:$0xff]   ;;  %v11383_v59 = vld [vmem:[%s9609_s19 + $0x50] sm:$0xff] }
 0x240   : > { %v2566_v47 = vmax.f32 %v2553_v10, 0.0  ;;  %v2554_v41 = vadd.f32 %v11202_v35, %v2537_v55  ;;  %8541 = vmatprep.mubr.msk.bf16.mxu1 %vm9478_vm0, %v12591_v50  ;;  %8566 = vmatpush3.bf16.msra.mxu0 %v9247_v9  ;;  %v11376_v30 = vpack.c.bf16 %v3605_v1, %v3606_v39  ;;  %v11379_v10 = vpack.c.bf16 %v3805_v62, %v3806_v37  ;;  %v9251_v62 = vld [vmem:[%s12510_s1 + $0x570] sm:$0xff]  }
 0x241   : > { %v2308_v33 = vpop.f32.mrb[156].mxu0  ;;  %8610 = vmatpush3.bf16.msra.mxu1 %v9248_v25  ;;  %8567 = vmatprep.subr.bf16.mxu0 %v12591_v50  ;;  %v9394_v25 = vld [vmem:[%s9609_s19 + $0x48] sm:$0xff]  ;;  %v12569_v11 = vrot.slane %v11383_v59, 6  ;;  %v12568_v39 = vrot.slane %v11383_v59, 7 }
 0x242   : > { %v2604_v38 = vmax.f32 %v2566_v47, %v2603_v36  ;;  %v2567_v60 = vmax.f32 %v2554_v41, 0.0  ;;  %v2338_v45 = vadd.f32 %v2308_v33, %v11147_v18  ;;  %v2508_v54 = vpop.f32.mrb[156].mxu1  ;;  %v8151_v57 = vpop.f32.mrb[157].mxu0  ;;  %8611 = vmatprep.subr.bf16.mxu1 %v12591_v50  ;;  %12624 = vst [vmem:[#allocation39_spill] sm:$0xff] %v11379_v10  ;;  %v3596_v55 = vrot.slane %v9394_v25, 6 }
 0x243   : > { %v8195_v9 = vpop.f32.mrb[157].mxu1  ;;  %v2311_v2 = vpop.f32.mrb[158].mxu0  ;;  %v3796_v36 = vrot.slane %v9394_v25, 7 }
 0x244   : > { %v2605_v47 = vmax.f32 %v2567_v60, %v2604_v38  ;;  %v2538_v41 = vadd.f32 %v2508_v54, %v2338_v45  ;;  %v2339_v18 = vadd.f32 %v2311_v2, %v11157_v52  ;;  %v2511_v33 = vpop.f32.mrb[158].mxu1  ;;  %v8152_v1 = vpop.f32.mrb[159].mxu0  ;;  %8568 = vmatpush3.bf16.msra.mxu0 %v9249_v56  ;;  %v9252_v38 = vld [vmem:[%s12510_s1 + $0x530] sm:$0xff]   ;;  %v3603_v56 = vsel %vm3600_vm8, %v3596_v55, %v12569_v11 }
 0x245   : > { %v8196_v37 = vpop.f32.mrb[159].mxu1  ;;  %8612 = vmatpush3.bf16.msra.mxu1 %v9250_v0  ;;  %8569 = vmatprep.subr.bf16.mxu0 %v12591_v50  ;;  %v3604_v0 = vsel %vm3600_vm8, %v3595_v3, %v3596_v55  ;;  %v3803_v57 = vsel %vm3800_vm9, %v3796_v36, %v12568_v39  ;;  %v12625_v9 = vrot.slane %v11333_v4, 7  ;;  %v9253_v3 = vld [vmem:[%s12510_s1 + $0x578] sm:$0xff]  }
 0x246   : > { %v2555_v60 = vadd.f32 %v11202_v35, %v2538_v41  ;;  %v2539_v52 = vadd.f32 %v2511_v33, %v2339_v18  ;;  %8498 = vmatmul.mubr.bf16.gmra.mrb[8].mxu0 %v11376_v30  ;;  %8613 = vmatprep.subr.bf16.mxu1 %v12591_v50  ;;  %v9254_v55 = vld [vmem:[%s12510_s1 + $0x538] sm:$0xff]   ;;  %v11428_v1 = vpack.c.bf16 %v3603_v56, %v3604_v0 }
 0x247   : > { %8542 = vmatmul.mubr.bf16.gmra.mrb[8].mxu1 %v11379_v10  ;;  %8501 = vmatprep.mubr.msk.bf16.mxu0 %vm9478_vm0, %v12591_v50  ;;  %v3804_v2 = vsel %vm3800_vm9, %v12625_v9, %v3796_v36  ;;  %v9397_v39 = vld [vmem:[%s9609_s19 + $0x58] sm:$0xff] }
 0x248   : > { %v2568_v45 = vmax.f32 %v2555_v60, 0.0  ;;  %v2556_v54 = vadd.f32 %v11202_v35, %v2539_v52  ;;  %8545 = vmatprep.mubr.msk.bf16.mxu1 %vm9478_vm0, %v12591_v50  ;;  %8570 = vmatpush3.bf16.msra.mxu0 %v9251_v62  ;;  %v9396_v62 = vld [vmem:[%s9609_s19 + $0x60] sm:$0xff]  ;;  %v11432_v9 = vpack.c.bf16 %v3803_v57, %v3804_v2  ;;  %v3598_v11 = vrot.slane %v9397_v39, 6 }
 0x249   : > { %v2316_v25 = vpop.f32.mrb[160].mxu0  ;;  %8614 = vmatpush3.bf16.msra.mxu1 %v9252_v38  ;;  %8571 = vmatprep.subr.bf16.mxu0 %v12591_v50  ;;  %v3599_v37 = vrot.slane %v9396_v62, 6  ;;  %v3799_v38 = vrot.slane %v9396_v62, 7 }
 0x24a   : > { %v2606_v41 = vmax.f32 %v2568_v45, %v2605_v47  ;;  %v2569_v18 = vmax.f32 %v2556_v54, 0.0  ;;  %v2340_v4 = vadd.f32 %v2316_v25, %v11175_v21  ;;  %v2516_v33 = vpop.f32.mrb[160].mxu1  ;;  %v8155_v36 = vpop.f32.mrb[161].mxu0  ;;  %8615 = vmatprep.subr.bf16.mxu1 %v12591_v50  ;;  %v3798_v25 = vrot.slane %v9397_v39, 7 }
 0x24b   : > { %v8199_v60 = vpop.f32.mrb[161].mxu1  ;;  %v2319_v52 = vpop.f32.mrb[162].mxu0  ;;  %v12626_v39 = vrot.slane %v11383_v59, 6 }
 0x24c   : > { %v2609_v10 = vmax.f32 %v2569_v18, %v2606_v41  ;;  %v2540_v47 = vadd.f32 %v2516_v33, %v2340_v4  ;;  %v2341_v45 = vadd.f32 %v2319_v52, %v11179_v29  ;;  %v2519_v21 = vpop.f32.mrb[162].mxu1  ;;  %v8156_v54 = vpop.f32.mrb[163].mxu0  ;;  %8572 = vmatpush3.bf16.msra.mxu0 %v9253_v3  ;;  %v3601_v29 = vsel %vm3600_vm8, %v3598_v11, %v3599_v37 }
 0x24d   : > { %v8200_v56 = vpop.f32.mrb[163].mxu1  ;;  %8616 = vmatpush3.bf16.msra.mxu1 %v9254_v55  ;;  %8645 = vmatprep.subr.bf16.mxu0 %v12591_v50  ;;  %v3602_v57 = vsel %vm3600_vm8, %v12626_v39, %v3598_v11  ;;  %v3801_v55 = vsel %vm3800_vm9, %v3798_v25, %v3799_v38  ;;  %v12627_v41 = vrot.slane %v11383_v59, 7 }
 0x24e   : > { %v2557_v0 = vadd.f32 %v11202_v35, %v2540_v47  ;;  %v2541_v36 = vadd.f32 %v2519_v21, %v2341_v45  ;;  %8502 = vmatmul.mubr.bf16.gmra.mrb[12].mxu0 %v11428_v1  ;;  %8689 = vmatprep.subr.bf16.mxu1 %v12591_v50  ;;  %v11459_v47 = vpack.c.bf16 %v3601_v29, %v3602_v57  ;;  %v12629_v29 = vrot.slane %v11205_v31, 7 }
 0x24f   : > { %8546 = vmatmul.mubr.bf16.gmra.mrb[12].mxu1 %v11432_v9  ;;  %8505 = vmatprep.mubr.msk.bf16.mxu0 %vm9478_vm0, %v12591_v50  ;;  %v3802_v18 = vsel %vm3800_vm9, %v12627_v41, %v3798_v25 }
 0x250   : > { %v2570_v2 = vmax.f32 %v2557_v0, 0.0  ;;  %v2558_v3 = vadd.f32 %v11202_v35, %v2541_v36  ;;  %8549 = vmatprep.mubr.msk.bf16.mxu1 %vm9478_vm0, %v12591_v50  ;;  %v11461_v54 = vpack.c.bf16 %v3801_v55, %v3802_v18  ;;  %v3813_v57 = vsel %vm3800_vm9, %v3799_v38, %v12629_v29 }
 0x251   : > { %v2324_v4 = vpop.f32.mrb[164].mxu0  ;;  %v11481_v18 = vpack.c.bf16 %v3813_v57, %v3813_v57 }
 0x252   : > { %v2607_v33 = vmax.f32 %v2570_v2, %v2609_v10  ;;  %v2571_v62 = vmax.f32 %v2558_v3, 0.0  ;;  %v2342_v60 = vadd.f32 %v2324_v4, %v11189_v32  ;;  %v2524_v11 = vpop.f32.mrb[164].mxu1  ;;  %v8159_v52 = vpop.f32.mrb[165].mxu0  ;;  %v12628_v10 = vrot.slane %v11205_v31, 6 }
 0x253   : > { %v8203_v45 = vpop.f32.mrb[165].mxu1  ;;  %v2327_v21 = vpop.f32.mrb[166].mxu0 }
 0x254   : > { %v2608_v56 = vmax.f32 %v2607_v33, %v2571_v62  ;;  %v2542_v0 = vadd.f32 %v2524_v11, %v2342_v60  ;;  %v2527_v36 = vpop.f32.mrb[166].mxu1  ;;  %v8160_v59 = vpop.f32.mrb[167].mxu0  ;;  %v3613_v32 = vsel %vm3600_vm8, %v3599_v37, %v12628_v10 }
 0x255   : > { %v8204_v39 = vpop.f32.mrb[167].mxu1  ;;  %v11479_v3 = vpack.c.bf16 %v3613_v32, %v3613_v32  ;;  %v9256_v32 = vld [vmem:[%s12510_s1 + $0x5c0] sm:$0xff]  }
 0x256   : > { %v2559_v25 = vadd.f32 %v11202_v35, %v2542_v0  ;;  %8506 = vmatmul.mubr.bf16.gmra.mrb[16].mxu0 %v11459_v47  ;;  %v9255_v39 = vld [vmem:[%s12510_s1 + $0x580] sm:$0xff]  }
 0x257   : > { %8550 = vmatmul.mubr.bf16.gmra.mrb[16].mxu1 %v11461_v54  ;;  %8509 = vmatprep.mubr.msk.bf16.mxu0 %vm9478_vm0, %v12591_v50 }
 0x258   : > { %v2572_v35 = vmax.f32 %v2559_v25, 0.0  ;;  %8553 = vmatprep.mubr.msk.bf16.mxu1 %vm9478_vm0, %v12591_v50 }
 0x259   : > { %v2733_v2 = vpop.f32.mrb[168].mxu0 }
 0x25a   : > { %v2598_v37 = vsel %vm2585_vm10, %v2572_v35, -1e+30  ;;  %v2869_v55 = vpop.f32.mrb[168].mxu1  ;;  %v8223_v41 = vpop.f32.mrb[169].mxu0  ;;  %v9257_v35 = vld [vmem:[%s12510_s1 + $0x588] sm:$0xff]  }
 0x25b   : > { %v11483_v4 = vmax.f32 %v2608_v56, %v2598_v37  ;;  %v8267_v33 = vpop.f32.mrb[169].mxu1  ;;  %v2736_v62 = vpop.f32.mrb[170].mxu0  ;;  %v11485_v31 = vadd.f32 %v2869_v55, %v2733_v2  ;;  %v9258_v2 = vld [vmem:[%s12510_s1 + $0x5c8] sm:$0xff]  }
 0x25c   : > { %v2872_v60 = vpop.f32.mrb[170].mxu1  ;;  %v8224_v38 = vpop.f32.mrb[171].mxu0 }
 0x25d   : > { %v8268_v11 = vpop.f32.mrb[171].mxu1  ;;  %v11487_v52 = vadd.f32 %v2872_v60, %v2736_v62  ;;  %v9259_v38 = vld [vmem:[%s12510_s1 + $0x590] sm:$0xff]  }
 0x25e   : > { %8510 = vmatmul.mubr.bf16.gmra.mrb[20].mxu0 %v11479_v3 }
 0x25f   : > { %8554 = vmatmul.mubr.bf16.gmra.mrb[20].mxu1 %v11481_v18  ;;  %8573 = vmatprep.mubr.msk.bf16.mxu0 %vm9478_vm0, %v12591_v50 }
 0x260   : > { %8617 = vmatprep.mubr.msk.bf16.mxu1 %vm9478_vm0, %v12591_v50 }
 0x261   : > { %v2741_v45 = vpop.f32.mrb[172].mxu0 }
 0x262   : > { %v2877_v21 = vpop.f32.mrb[172].mxu1  ;;  %v8227_v56 = vpop.f32.mrb[173].mxu0 }
 0x263   : > { %v11495_v0 = vadd.f32 %v2877_v21, %v2741_v45  ;;  %v8271_v36 = vpop.f32.mrb[173].mxu1  ;;  %v2744_v59 = vpop.f32.mrb[174].mxu0  ;;  %v9260_v21 = vld [vmem:[%s12510_s1 + $0x5d0] sm:$0xff]   ;;  %v9261_v56 = vld [vmem:[%s12510_s1 + $0x598] sm:$0xff]  }
 0x264   : > { %v2880_v25 = vpop.f32.mrb[174].mxu1  ;;  %v8228_v10 = vpop.f32.mrb[175].mxu0 }
 0x265   : > { %v11503_v29 = vadd.f32 %v2880_v25, %v2744_v59  ;;  %v8272_v57 = vpop.f32.mrb[175].mxu1 }
 0x266   : > { %8574 = vmatmul.mubr.bf16.vlgmr.msra.gmra.mrb[24].mxu0 %v9707_v43 }
 0x267   : > { %8618 = vmatmul.mubr.bf16.vlgmr.msra.gmra.mrb[24].mxu1 %v9723_v48  ;;  %8646 = vmatpush3.bf16.msra.mxu0 %v9255_v39 }
 0x268   : > { %8690 = vmatpush3.bf16.msra.mxu1 %v9256_v32  ;;  %8577 = vmatprep.mubr.msk.bf16.mxu0 %vm9478_vm0, %v12591_v50 }
 0x269   : > { %v2749_v37 = vpop.f32.mrb[176].mxu0  ;;  %8621 = vmatprep.mubr.msk.bf16.mxu1 %vm9478_vm0, %v12591_v50  ;;  %8647 = vmatprep.subr.bf16.mxu0 %v12591_v50 }
 0x26a   : > { %v2885_v43 = vpop.f32.mrb[176].mxu1  ;;  %v8231_v48 = vpop.f32.mrb[177].mxu0  ;;  %8691 = vmatprep.subr.bf16.mxu1 %v12591_v50 }
 0x26b   : > { %v11519_v55 = vadd.f32 %v2885_v43, %v2749_v37  ;;  %v8275_v41 = vpop.f32.mrb[177].mxu1  ;;  %v2752_v33 = vpop.f32.mrb[178].mxu0  ;;  %8648 = vmatpush3.bf16.msra.mxu0 %v9257_v35  ;;  %v9263_v35 = vld [vmem:[%s12510_s1 + $0x5a0] sm:$0xff]   ;;  %v9265_v48 = vld [vmem:[%s12510_s1 + $0x5a8] sm:$0xff]  }
 0x26c   : > { %v2888_v62 = vpop.f32.mrb[178].mxu1  ;;  %v8232_v60 = vpop.f32.mrb[179].mxu0  ;;  %8692 = vmatpush3.bf16.msra.mxu1 %v9258_v2  ;;  %8649 = vmatprep.subr.bf16.mxu0 %v12591_v50  ;;  %v9264_v43 = vld [vmem:[%s12510_s1 + $0x5e0] sm:$0xff]  }
 0x26d   : > { %v11525_v11 = vadd.f32 %v2888_v62, %v2752_v33  ;;  %v8276_v45 = vpop.f32.mrb[179].mxu1  ;;  %8693 = vmatprep.subr.bf16.mxu1 %v12591_v50 }
 0x26e   : > { %8578 = vmatmul.mubr.bf16.gmra.mrb[28].mxu0 %v9789_v5  ;;  %v9262_v5 = vld [vmem:[%s12510_s1 + $0x5d8] sm:$0xff]  }
 0x26f   : > { %8622 = vmatmul.mubr.bf16.gmra.mrb[28].mxu1 %v9798_v8  ;;  %8581 = vmatprep.mubr.msk.bf16.mxu0 %vm9478_vm0, %v12591_v50 }
 0x270   : > { %8625 = vmatprep.mubr.msk.bf16.mxu1 %vm9478_vm0, %v12591_v50  ;;  %8650 = vmatpush3.bf16.msra.mxu0 %v9259_v38 }
 0x271   : > { %v2757_v36 = vpop.f32.mrb[180].mxu0  ;;  %8694 = vmatpush3.bf16.msra.mxu1 %v9260_v21  ;;  %8651 = vmatprep.subr.bf16.mxu0 %v12591_v50 }
 0x272   : > { %v2893_v8 = vpop.f32.mrb[180].mxu1  ;;  %v8235_v59 = vpop.f32.mrb[181].mxu0  ;;  %8695 = vmatprep.subr.bf16.mxu1 %v12591_v50 }
 0x273   : > { %v11545_v39 = vadd.f32 %v2893_v8, %v2757_v36  ;;  %v8279_v25 = vpop.f32.mrb[181].mxu1  ;;  %v2760_v10 = vpop.f32.mrb[182].mxu0  ;;  %v9268_v8 = vld [vmem:[%s12510_s1 + $0x5f0] sm:$0xff]   ;;  %v9269_v59 = vld [vmem:[%s12510_s1 + $0x5b8] sm:$0xff]  }
 0x274   : > { %v2896_v32 = vpop.f32.mrb[182].mxu1  ;;  %v8236_v57 = vpop.f32.mrb[183].mxu0  ;;  %8652 = vmatpush3.bf16.msra.mxu0 %v9261_v56  ;;  %v9267_v56 = vld [vmem:[%s12510_s1 + $0x5b0] sm:$0xff]  }
 0x275   : > { %v11550_v2 = vadd.f32 %v2896_v32, %v2760_v10  ;;  %v8280_v37 = vpop.f32.mrb[183].mxu1  ;;  %8696 = vmatpush3.bf16.msra.mxu1 %v9262_v5  ;;  %8653 = vmatprep.subr.bf16.mxu0 %v12591_v50 }
 0x276   : > { %8582 = vmatmul.mubr.bf16.gmra.mrb[32].mxu0 %v9823_v16  ;;  %8697 = vmatprep.subr.bf16.mxu1 %v12591_v50  ;;  %v9266_v16 = vld [vmem:[%s12510_s1 + $0x5e8] sm:$0xff]  }
 0x277   : > { %8626 = vmatmul.mubr.bf16.gmra.mrb[32].mxu1 %v9828_v17  ;;  %8585 = vmatprep.mubr.msk.bf16.mxu0 %vm9478_vm0, %v12591_v50 }
 0x278   : > { %8629 = vmatprep.mubr.msk.bf16.mxu1 %vm9478_vm0, %v12591_v50  ;;  %8654 = vmatpush3.bf16.msra.mxu0 %v9263_v35 }
 0x279   : > { %v2765_v41 = vpop.f32.mrb[184].mxu0  ;;  %8698 = vmatpush3.bf16.msra.mxu1 %v9264_v43  ;;  %8655 = vmatprep.subr.bf16.mxu0 %v12591_v50 }
 0x27a   : > { %v2901_v17 = vpop.f32.mrb[184].mxu1  ;;  %v8239_v33 = vpop.f32.mrb[185].mxu0  ;;  %8699 = vmatprep.subr.bf16.mxu1 %v12591_v50 }
 0x27b   : > { %v11571_v62 = vadd.f32 %v2901_v17, %v2765_v41  ;;  %v8283_v60 = vpop.f32.mrb[185].mxu1  ;;  %v2768_v38 = vpop.f32.mrb[186].mxu0 }
 0x27c   : > { %v2904_v45 = vpop.f32.mrb[186].mxu1  ;;  %v8240_v21 = vpop.f32.mrb[187].mxu0  ;;  %8656 = vmatpush3.bf16.msra.mxu0 %v9265_v48 }
 0x27d   : > { %v11576_v36 = vadd.f32 %v2904_v45, %v2768_v38  ;;  %v8284_v5 = vpop.f32.mrb[187].mxu1  ;;  %8700 = vmatpush3.bf16.msra.mxu1 %v9266_v16  ;;  %8657 = vmatprep.subr.bf16.mxu0 %v12591_v50 }
 0x27e   : > { %8586 = vmatmul.mubr.bf16.gmra.mrb[36].mxu0 %v9853_v26  ;;  %8701 = vmatprep.subr.bf16.mxu1 %v12591_v50  ;;  %v9270_v26 = vld [vmem:[%s12510_s1 + $0x5f8] sm:$0xff]  }
 0x27f   : > { %8630 = vmatmul.mubr.bf16.gmra.mrb[36].mxu1 %v9858_v28  ;;  %8589 = vmatprep.mubr.msk.bf16.mxu0 %vm9478_vm0, %v12591_v50 }
 0x280   : > { %8633 = vmatprep.mubr.msk.bf16.mxu1 %vm9478_vm0, %v12591_v50  ;;  %8658 = vmatpush3.bf16.msra.mxu0 %v9267_v56 }
 0x281   : > { %v2773_v25 = vpop.f32.mrb[188].mxu0  ;;  %8702 = vmatpush3.bf16.msra.mxu1 %v9268_v8  ;;  %8659 = vmatprep.subr.bf16.mxu0 %v12591_v50 }
 0x282   : > { %v2909_v28 = vpop.f32.mrb[188].mxu1  ;;  %v8243_v10 = vpop.f32.mrb[189].mxu0  ;;  %8703 = vmatprep.subr.bf16.mxu1 %v12591_v50 }
 0x283   : > { %v11597_v32 = vadd.f32 %v2909_v28, %v2773_v25  ;;  %v8287_v57 = vpop.f32.mrb[189].mxu1  ;;  %v2776_v35 = vpop.f32.mrb[190].mxu0 }
 0x284   : > { %v2912_v37 = vpop.f32.mrb[190].mxu1  ;;  %v8244_v43 = vpop.f32.mrb[191].mxu0  ;;  %8660 = vmatpush3.bf16.msra.mxu0 %v9269_v59 }
 0x285   : > { %v11599_v48 = vadd.f32 %v2912_v37, %v2776_v35  ;;  %v8288_v41 = vpop.f32.mrb[191].mxu1  ;;  %8704 = vmatpush3.bf16.msra.mxu1 %v9270_v26  ;;  %8733 = vmatprep.subr.bf16.mxu0 %v12591_v50 }
 0x286   : > { %8590 = vmatmul.mubr.bf16.gmra.mrb[40].mxu0 %v9883_v42  ;;  %8777 = vmatprep.subr.bf16.mxu1 %v12591_v50 }
 0x287   : > { %8634 = vmatmul.mubr.bf16.gmra.mrb[40].mxu1 %v9888_v44  ;;  %8593 = vmatprep.mubr.msk.bf16.mxu0 %vm9478_vm0, %v12591_v50 }
 0x288   : > { %8637 = vmatprep.mubr.msk.bf16.mxu1 %vm9478_vm0, %v12591_v50 }
 0x289   : > { %v2781_v16 = vpop.f32.mrb[192].mxu0 }
 0x28a   : > { %v2917_v17 = vpop.f32.mrb[192].mxu1  ;;  %v8247_v33 = vpop.f32.mrb[193].mxu0 }
 0x28b   : > { %v11609_v60 = vadd.f32 %v2917_v17, %v2781_v16  ;;  %v8291_v38 = vpop.f32.mrb[193].mxu1  ;;  %v2784_v45 = vpop.f32.mrb[194].mxu0  ;;  %v9271_v17 = vld [vmem:[%s12510_s1 + $0x600] sm:$0xff]  }
 0x28c   : > { %v2920_v21 = vpop.f32.mrb[194].mxu1  ;;  %v8248_v56 = vpop.f32.mrb[195].mxu0  ;;  %v9272_v45 = vld [vmem:[%s12510_s1 + $0x640] sm:$0xff]  }
 0x28d   : > { %v8292_v42 = vpop.f32.mrb[195].mxu1  ;;  %v9273_v56 = vld [vmem:[%s12510_s1 + $0x608] sm:$0xff]  }
 0x28e   : > { %8594 = vmatmul.mubr.bf16.gmra.mrb[44].mxu0 %v9900_v46 }
 0x28f   : > { %8638 = vmatmul.mubr.bf16.gmra.mrb[44].mxu1 %v9904_v49  ;;  %8597 = vmatprep.mubr.msk.bf16.mxu0 %vm9478_vm0, %v12591_v50 }
 0x290   : > { %8641 = vmatprep.mubr.msk.bf16.mxu1 %vm9478_vm0, %v12591_v50 }
 0x291   : > { %v3022_v44 = vpop.f32.mrb[196].mxu0 }
 0x292   : > { %v3076_v5 = vadd.f32 %v3022_v44, %v11485_v31  ;;  %v3188_v8 = vpop.f32.mrb[196].mxu1  ;;  %v8311_v59 = vpop.f32.mrb[197].mxu0 }
 0x293   : > { %v8355_v25 = vpop.f32.mrb[197].mxu1  ;;  %v3025_v26 = vpop.f32.mrb[198].mxu0 }
 0x294   : > { %v11618_v28 = vadd.f32 %v3188_v8, %v3076_v5  ;;  %v3077_v10 = vadd.f32 %v3025_v26, %v11487_v52  ;;  %v3191_v46 = vpop.f32.mrb[198].mxu1  ;;  %v8312_v57 = vpop.f32.mrb[199].mxu0 }
 0x295   : > { %v8356_v49 = vpop.f32.mrb[199].mxu1  ;;  %v9276_v57 = vld [vmem:[%s12510_s1 + $0x650] sm:$0xff]  }
 0x296   : > { %v11621_v35 = vadd.f32 %v3191_v46, %v3077_v10  ;;  %8598 = vmatmul.mubr.bf16.gmra.mrb[48].mxu0 %v9914_v51 }
 0x297   : > { %8642 = vmatmul.mubr.bf16.gmra.mrb[48].mxu1 %v9918_v53  ;;  %8661 = vmatprep.mubr.msk.bf16.mxu0 %vm9478_vm0, %v12591_v50 }
 0x298   : > { %8705 = vmatprep.mubr.msk.bf16.mxu1 %vm9478_vm0, %v12591_v50 }
 0x299   : > { %v3030_v31 = vpop.f32.mrb[200].mxu0 }
 0x29a   : > { %v3078_v37 = vadd.f32 %v3030_v31, %v11495_v0  ;;  %v3196_v43 = vpop.f32.mrb[200].mxu1  ;;  %v8315_v52 = vpop.f32.mrb[201].mxu0 }
 0x29b   : > { %v8359_v41 = vpop.f32.mrb[201].mxu1  ;;  %v3033_v16 = vpop.f32.mrb[202].mxu0 }
 0x29c   : > { %v11633_v51 = vadd.f32 %v3196_v43, %v3078_v37  ;;  %v3079_v53 = vadd.f32 %v3033_v16, %v11503_v29  ;;  %v3199_v33 = vpop.f32.mrb[202].mxu1  ;;  %v8316_v38 = vpop.f32.mrb[203].mxu0  ;;  %v9274_v29 = vld [vmem:[%s12510_s1 + $0x648] sm:$0xff]  }
 0x29d   : > { %v8360_v21 = vpop.f32.mrb[203].mxu1  ;;  %v9279_v38 = vld [vmem:[%s12510_s1 + $0x620] sm:$0xff]  }
 0x29e   : > { %v11639_v0 = vadd.f32 %v3199_v33, %v3079_v53  ;;  %8662 = vmatmul.mubr.bf16.vlgmr.msra.gmra.mrb[52].mxu0 %v10062_v22 }
 0x29f   : > { %8706 = vmatmul.mubr.bf16.vlgmr.msra.gmra.mrb[52].mxu1 %v10064_v23  ;;  %8734 = vmatpush3.bf16.msra.mxu0 %v9271_v17 }
 0x2a0   : > { %8778 = vmatpush3.bf16.msra.mxu1 %v9272_v45  ;;  %8665 = vmatprep.mubr.msk.bf16.mxu0 %vm9478_vm0, %v12591_v50 }
 0x2a1   : > { %v3038_v42 = vpop.f32.mrb[204].mxu0  ;;  %8709 = vmatprep.mubr.msk.bf16.mxu1 %vm9478_vm0, %v12591_v50  ;;  %8735 = vmatprep.subr.bf16.mxu0 %v12591_v50 }
 0x2a2   : > { %v3080_v22 = vadd.f32 %v3038_v42, %v11519_v55  ;;  %v3204_v23 = vpop.f32.mrb[204].mxu1  ;;  %v8319_v44 = vpop.f32.mrb[205].mxu0  ;;  %8779 = vmatprep.subr.bf16.mxu1 %v12591_v50  ;;  %v9275_v55 = vld [vmem:[%s12510_s1 + $0x610] sm:$0xff]  }
 0x2a3   : > { %v8363_v5 = vpop.f32.mrb[205].mxu1  ;;  %v3041_v8 = vpop.f32.mrb[206].mxu0  ;;  %8736 = vmatpush3.bf16.msra.mxu0 %v9273_v56 }
 0x2a4   : > { %v11656_v59 = vadd.f32 %v3204_v23, %v3080_v22  ;;  %v3081_v25 = vadd.f32 %v3041_v8, %v11525_v11  ;;  %v3207_v26 = vpop.f32.mrb[206].mxu1  ;;  %v8320_v10 = vpop.f32.mrb[207].mxu0  ;;  %8780 = vmatpush3.bf16.msra.mxu1 %v9274_v29  ;;  %8737 = vmatprep.subr.bf16.mxu0 %v12591_v50  ;;  %v9277_v11 = vld [vmem:[%s12510_s1 + $0x618] sm:$0xff]  }
 0x2a5   : > { %v8364_v46 = vpop.f32.mrb[207].mxu1  ;;  %8781 = vmatprep.subr.bf16.mxu1 %v12591_v50 }
 0x2a6   : > { %v11667_v49 = vadd.f32 %v3207_v26, %v3081_v25  ;;  %8666 = vmatmul.mubr.bf16.gmra.mrb[56].mxu0 %v10099_v6  ;;  %v9278_v6 = vld [vmem:[%s12510_s1 + $0x658] sm:$0xff]   ;;  %v9283_v26 = vld [vmem:[%s12510_s1 + $0x630] sm:$0xff]  }
 0x2a7   : > { %8710 = vmatmul.mubr.bf16.gmra.mrb[56].mxu1 %v10102_v34  ;;  %8669 = vmatprep.mubr.msk.bf16.mxu0 %vm9478_vm0, %v12591_v50 }
 0x2a8   : > { %8713 = vmatprep.mubr.msk.bf16.mxu1 %vm9478_vm0, %v12591_v50  ;;  %8738 = vmatpush3.bf16.msra.mxu0 %v9275_v55 }
 0x2a9   : > { %v3046_v31 = vpop.f32.mrb[208].mxu0  ;;  %8782 = vmatpush3.bf16.msra.mxu1 %v9276_v57  ;;  %8739 = vmatprep.subr.bf16.mxu0 %v12591_v50 }
 0x2aa   : > { %v3082_v34 = vadd.f32 %v3046_v31, %v11545_v39  ;;  %v3212_v37 = vpop.f32.mrb[208].mxu1  ;;  %v8323_v43 = vpop.f32.mrb[209].mxu0  ;;  %8783 = vmatprep.subr.bf16.mxu1 %v12591_v50  ;;  %v9280_v39 = vld [vmem:[%s12510_s1 + $0x660] sm:$0xff]  }
 0x2ab   : > { %v8367_v52 = vpop.f32.mrb[209].mxu1  ;;  %v3049_v41 = vpop.f32.mrb[210].mxu0 }
 0x2ac   : > { %v11684_v16 = vadd.f32 %v3212_v37, %v3082_v34  ;;  %v3083_v17 = vadd.f32 %v3049_v41, %v11550_v2  ;;  %v3215_v53 = vpop.f32.mrb[210].mxu1  ;;  %v8324_v33 = vpop.f32.mrb[211].mxu0  ;;  %8740 = vmatpush3.bf16.msra.mxu0 %v9277_v11  ;;  %v9281_v2 = vld [vmem:[%s12510_s1 + $0x628] sm:$0xff]  }
 0x2ad   : > { %v8368_v45 = vpop.f32.mrb[211].mxu1  ;;  %8784 = vmatpush3.bf16.msra.mxu1 %v9278_v6  ;;  %8741 = vmatprep.subr.bf16.mxu0 %v12591_v50 }
 0x2ae   : > { %v11694_v21 = vadd.f32 %v3215_v53, %v3083_v17  ;;  %8670 = vmatmul.mubr.bf16.gmra.mrb[60].mxu0 %v10149_v58  ;;  %8785 = vmatprep.subr.bf16.mxu1 %v12591_v50  ;;  %v9282_v58 = vld [vmem:[%s12510_s1 + $0x668] sm:$0xff]  }
 0x2af   : > { %8714 = vmatmul.mubr.bf16.gmra.mrb[60].mxu1 %v10152_v14  ;;  %8673 = vmatprep.mubr.msk.bf16.mxu0 %vm9478_vm0, %v12591_v50 }
 0x2b0   : > { %8717 = vmatprep.mubr.msk.bf16.mxu1 %vm9478_vm0, %v12591_v50  ;;  %8742 = vmatpush3.bf16.msra.mxu0 %v9279_v38 }
 0x2b1   : > { %v3054_v56 = vpop.f32.mrb[212].mxu0  ;;  %8786 = vmatpush3.bf16.msra.mxu1 %v9280_v39  ;;  %8743 = vmatprep.subr.bf16.mxu0 %v12591_v50 }
 0x2b2   : > { %v3084_v14 = vadd.f32 %v3054_v56, %v11571_v62  ;;  %v3220_v29 = vpop.f32.mrb[212].mxu1  ;;  %v8327_v42 = vpop.f32.mrb[213].mxu0  ;;  %8787 = vmatprep.subr.bf16.mxu1 %v12591_v50  ;;  %v9284_v62 = vld [vmem:[%s12510_s1 + $0x670] sm:$0xff]  }
 0x2b3   : > { %v8371_v22 = vpop.f32.mrb[213].mxu1  ;;  %v3057_v23 = vpop.f32.mrb[214].mxu0 }
 0x2b4   : > { %v11712_v44 = vadd.f32 %v3220_v29, %v3084_v14  ;;  %v3085_v5 = vadd.f32 %v3057_v23, %v11576_v36  ;;  %v3223_v8 = vpop.f32.mrb[214].mxu1  ;;  %v8328_v25 = vpop.f32.mrb[215].mxu0  ;;  %8744 = vmatpush3.bf16.msra.mxu0 %v9281_v2  ;;  %v9285_v36 = vld [vmem:[%s12510_s1 + $0x638] sm:$0xff]  }
 0x2b5   : > { %v8372_v10 = vpop.f32.mrb[215].mxu1  ;;  %8788 = vmatpush3.bf16.msra.mxu1 %v9282_v58  ;;  %8745 = vmatprep.subr.bf16.mxu0 %v12591_v50  ;;  %v12631_v14 = vld [vmem:[#allocation19_spill] sm:$0xff]  ;;  %v12632_v29 = vld [vmem:[#allocation20_spill] sm:$0xff] }
 0x2b6   : > { %v11722_v55 = vadd.f32 %v3223_v8, %v3085_v5  ;;  %8674 = vmatmul.mubr.bf16.gmra.mrb[64].mxu0 %v10197_v61  ;;  %8789 = vmatprep.subr.bf16.mxu1 %v12591_v50  ;;  %v9286_v61 = vld [vmem:[%s12510_s1 + $0x678] sm:$0xff]  }
 0x2b7   : > { %8718 = vmatmul.mubr.bf16.gmra.mrb[64].mxu1 %v10203_v63  ;;  %8677 = vmatprep.mubr.msk.bf16.mxu0 %vm9478_vm0, %v12591_v50 }
 0x2b8   : > { %8721 = vmatprep.mubr.msk.bf16.mxu1 %vm9478_vm0, %v12591_v50  ;;  %8746 = vmatpush3.bf16.msra.mxu0 %v9283_v26 }
 0x2b9   : > { %v3062_v46 = vpop.f32.mrb[216].mxu0  ;;  %8790 = vmatpush3.bf16.msra.mxu1 %v9284_v62  ;;  %8747 = vmatprep.subr.bf16.mxu0 %v12591_v50 }
 0x2ba   : > { %v3086_v63 = vadd.f32 %v3062_v46, %v11597_v32  ;;  %v3228_v57 = vpop.f32.mrb[216].mxu1  ;;  %v8331_v11 = vpop.f32.mrb[217].mxu0  ;;  %8791 = vmatprep.subr.bf16.mxu1 %v12591_v50  ;;  %v12630_v32 = vld [vmem:[#allocation18_spill] sm:$0xff] }
 0x2bb   : > { %v8375_v31 = vpop.f32.mrb[217].mxu1  ;;  %v3065_v6 = vpop.f32.mrb[218].mxu0 }
 0x2bc   : > { %v11740_v34 = vadd.f32 %v3228_v57, %v3086_v63  ;;  %v3087_v37 = vadd.f32 %v3065_v6, %v11599_v48  ;;  %v3231_v43 = vpop.f32.mrb[218].mxu1  ;;  %v8332_v52 = vpop.f32.mrb[219].mxu0  ;;  %8748 = vmatpush3.bf16.msra.mxu0 %v9285_v36  ;;  %v12634_v63 = vld [vmem:[#allocation22_spill] sm:$0xff] }
 0x2bd   : > { %v8376_v41 = vpop.f32.mrb[219].mxu1  ;;  %8792 = vmatpush3.bf16.msra.mxu1 %v9286_v61  ;;  %8821 = vmatprep.subr.bf16.mxu0 %v12591_v50  ;;  %v12633_v61 = vld [vmem:[#allocation21_spill] sm:$0xff] }
 0x2be   : > { %v11744_v17 = vadd.f32 %v3231_v43, %v3087_v37  ;;  %8678 = vmatmul.mubr.bf16.gmra.mrb[68].mxu0 %v10236_v24  ;;  %8865 = vmatprep.subr.bf16.mxu1 %v12591_v50  ;;  %v9287_v37 = vld [vmem:[%s12510_s1 + $0x680] sm:$0xff]  }
 0x2bf   : > { %8722 = vmatmul.mubr.bf16.gmra.mrb[68].mxu1 %v12630_v32  ;;  %8681 = vmatprep.mubr.msk.bf16.mxu0 %vm9478_vm0, %v12591_v50 }
 0x2c0   : > { %8725 = vmatprep.mubr.msk.bf16.mxu1 %vm9478_vm0, %v12591_v50 }
 0x2c1   : > { %v3070_v48 = vpop.f32.mrb[220].mxu0 }
 0x2c2   : > { %v3088_v53 = vadd.f32 %v3070_v48, %v11609_v60  ;;  %v3236_v33 = vpop.f32.mrb[220].mxu1  ;;  %v8335_v38 = vpop.f32.mrb[221].mxu0  ;;  %v9288_v48 = vld [vmem:[%s12510_s1 + $0x6c0] sm:$0xff]  }
 0x2c3   : > { %v8379_v45 = vpop.f32.mrb[221].mxu1  ;;  %v3073_v39 = vpop.f32.mrb[222].mxu0  ;;  %v12636_v38 = vld [vmem:[#allocation25_spill] sm:$0xff] }
 0x2c4   : > { %v11754_v2 = vadd.f32 %v3236_v33, %v3088_v53  ;;  %v3239_v24 = vpop.f32.mrb[222].mxu1  ;;  %v8336_v56 = vpop.f32.mrb[223].mxu0  ;;  %v12635_v33 = vld [vmem:[#allocation24_spill] sm:$0xff]  ;;  %v9289_v45 = vld [vmem:[%s12510_s1 + $0x688] sm:$0xff]  }
 0x2c5   : > { %v8380_v58 = vpop.f32.mrb[223].mxu1 }
 0x2c6   : > { %8682 = vmatmul.mubr.bf16.gmra.mrb[72].mxu0 %v12631_v14 }
 0x2c7   : > { %8726 = vmatmul.mubr.bf16.gmra.mrb[72].mxu1 %v12632_v29  ;;  %8685 = vmatprep.mubr.msk.bf16.mxu0 %vm9478_vm0, %v12591_v50 }
 0x2c8   : > { %8729 = vmatprep.mubr.msk.bf16.mxu1 %vm9478_vm0, %v12591_v50 }
 0x2c9   : > { %v3354_v60 = vpop.f32.mrb[224].mxu0 }
 0x2ca   : > { %v3408_v42 = vadd.f32 %v3354_v60, %v11618_v28  ;;  %v3520_v22 = vpop.f32.mrb[224].mxu1  ;;  %v8399_v23 = vpop.f32.mrb[225].mxu0 }
 0x2cb   : > { %v8443_v5 = vpop.f32.mrb[225].mxu1  ;;  %v3357_v8 = vpop.f32.mrb[226].mxu0 }
 0x2cc   : > { %v11763_v25 = vadd.f32 %v3520_v22, %v3408_v42  ;;  %v3409_v26 = vadd.f32 %v3357_v8, %v11621_v35  ;;  %v3523_v10 = vpop.f32.mrb[226].mxu1  ;;  %v8400_v62 = vpop.f32.mrb[227].mxu0  ;;  %v9292_v8 = vld [vmem:[%s12510_s1 + $0x6d0] sm:$0xff]  }
 0x2cd   : > { %v8444_v36 = vpop.f32.mrb[227].mxu1  ;;  %v9293_v62 = vld [vmem:[%s12510_s1 + $0x698] sm:$0xff]  }
 0x2ce   : > { %v11766_v46 = vadd.f32 %v3523_v10, %v3409_v26  ;;  %8686 = vmatmul.mubr.bf16.gmra.mrb[76].mxu0 %v12633_v61  ;;  %v12637_v10 = vld [vmem:[#allocation26_spill] sm:$0xff]  ;;  %v9294_v61 = vld [vmem:[%s12510_s1 + $0x6d8] sm:$0xff]  }
 0x2cf   : > { %8730 = vmatmul.mubr.bf16.gmra.mrb[76].mxu1 %v12634_v63  ;;  %8749 = vmatprep.mubr.msk.bf16.mxu0 %vm9478_vm0, %v12591_v50 }
 0x2d0   : > { %8793 = vmatprep.mubr.msk.bf16.mxu1 %vm9478_vm0, %v12591_v50 }
 0x2d1   : > { %v3362_v28 = vpop.f32.mrb[228].mxu0 }
 0x2d2   : > { %v3410_v57 = vadd.f32 %v3362_v28, %v11633_v51  ;;  %v3528_v11 = vpop.f32.mrb[228].mxu1  ;;  %v8403_v35 = vpop.f32.mrb[229].mxu0 }
 0x2d3   : > { %v8447_v31 = vpop.f32.mrb[229].mxu1  ;;  %v3365_v6 = vpop.f32.mrb[230].mxu0 }
 0x2d4   : > { %v11778_v43 = vadd.f32 %v3528_v11, %v3410_v57  ;;  %v3411_v52 = vadd.f32 %v3365_v6, %v11639_v0  ;;  %v3531_v41 = vpop.f32.mrb[230].mxu1  ;;  %v8404_v32 = vpop.f32.mrb[231].mxu0  ;;  %v9290_v0 = vld [vmem:[%s12510_s1 + $0x6c8] sm:$0xff]  }
 0x2d5   : > { %v8448_v53 = vpop.f32.mrb[231].mxu1 }
 0x2d6   : > { %v11784_v51 = vadd.f32 %v3531_v41, %v3411_v52  ;;  %8750 = vmatmul.mubr.bf16.vlgmr.msra.gmra.mrb[80].mxu0 %v12635_v33  ;;  %v9295_v41 = vld [vmem:[%s12510_s1 + $0x6a0] sm:$0xff]   ;;  %v9297_v33 = vld [vmem:[%s12510_s1 + $0x6a8] sm:$0xff]  }
 0x2d7   : > { %8794 = vmatmul.mubr.bf16.vlgmr.msra.gmra.mrb[80].mxu1 %v12636_v38  ;;  %8822 = vmatpush3.bf16.msra.mxu0 %v9287_v37  ;;  %v12639_v53 = vld [vmem:[#allocation28_spill] sm:$0xff] }
 0x2d8   : > { %8866 = vmatpush3.bf16.msra.mxu1 %v9288_v48  ;;  %8753 = vmatprep.mubr.msk.bf16.mxu0 %vm9478_vm0, %v12591_v50 }
 0x2d9   : > { %v3370_v39 = vpop.f32.mrb[232].mxu0  ;;  %8797 = vmatprep.mubr.msk.bf16.mxu1 %vm9478_vm0, %v12591_v50  ;;  %8823 = vmatprep.subr.bf16.mxu0 %v12591_v50 }
 0x2da   : > { %v3412_v24 = vadd.f32 %v3370_v39, %v11656_v59  ;;  %v3536_v56 = vpop.f32.mrb[232].mxu1  ;;  %v8407_v58 = vpop.f32.mrb[233].mxu0  ;;  %8867 = vmatprep.subr.bf16.mxu1 %v12591_v50  ;;  %v9291_v59 = vld [vmem:[%s12510_s1 + $0x690] sm:$0xff]  }
 0x2db   : > { %v8451_v14 = vpop.f32.mrb[233].mxu1  ;;  %v3373_v29 = vpop.f32.mrb[234].mxu0  ;;  %8824 = vmatpush3.bf16.msra.mxu0 %v9289_v45  ;;  %v9298_v45 = vld [vmem:[%s12510_s1 + $0x6e8] sm:$0xff]  }
 0x2dc   : > { %v11801_v60 = vadd.f32 %v3536_v56, %v3412_v24  ;;  %v3413_v42 = vadd.f32 %v3373_v29, %v11667_v49  ;;  %v3539_v22 = vpop.f32.mrb[234].mxu1  ;;  %v8408_v23 = vpop.f32.mrb[235].mxu0  ;;  %8868 = vmatpush3.bf16.msra.mxu1 %v9290_v0  ;;  %8825 = vmatprep.subr.bf16.mxu0 %v12591_v50  ;;  %v12638_v49 = vld [vmem:[#allocation27_spill] sm:$0xff] }
 0x2dd   : > { %v8452_v5 = vpop.f32.mrb[235].mxu1  ;;  %8869 = vmatprep.subr.bf16.mxu1 %v12591_v50  ;;  %v9299_v23 = vld [vmem:[%s12510_s1 + $0x6b0] sm:$0xff]  }
 0x2de   : > { %v11812_v26 = vadd.f32 %v3539_v22, %v3413_v42  ;;  %8754 = vmatmul.mubr.bf16.gmra.mrb[84].mxu0 %v12637_v10  ;;  %v9301_v10 = vld [vmem:[%s12510_s1 + $0x6b8] sm:$0xff]  }
 0x2df   : > { %8798 = vmatmul.mubr.bf16.gmra.mrb[84].mxu1 %v12638_v49  ;;  %8757 = vmatprep.mubr.msk.bf16.mxu0 %vm9478_vm0, %v12591_v50 }
 0x2e0   : > { %8801 = vmatprep.mubr.msk.bf16.mxu1 %vm9478_vm0, %v12591_v50  ;;  %8826 = vmatpush3.bf16.msra.mxu0 %v9291_v59 }
 0x2e1   : > { %v3378_v36 = vpop.f32.mrb[236].mxu0  ;;  %8870 = vmatpush3.bf16.msra.mxu1 %v9292_v8  ;;  %8827 = vmatprep.subr.bf16.mxu0 %v12591_v50  ;;  %v12641_v8 = vld [vmem:[#allocation30_spill] sm:$0xff] }
 0x2e2   : > { %v3414_v63 = vadd.f32 %v3378_v36, %v11684_v16  ;;  %v3544_v28 = vpop.f32.mrb[236].mxu1  ;;  %v8411_v57 = vpop.f32.mrb[237].mxu0  ;;  %8871 = vmatprep.subr.bf16.mxu1 %v12591_v50  ;;  %v9296_v16 = vld [vmem:[%s12510_s1 + $0x6e0] sm:$0xff]  }
 0x2e3   : > { %v8455_v11 = vpop.f32.mrb[237].mxu1  ;;  %v3381_v35 = vpop.f32.mrb[238].mxu0 }
 0x2e4   : > { %v11829_v31 = vadd.f32 %v3544_v28, %v3414_v63  ;;  %v3415_v6 = vadd.f32 %v3381_v35, %v11694_v21  ;;  %v3547_v37 = vpop.f32.mrb[238].mxu1  ;;  %v8412_v52 = vpop.f32.mrb[239].mxu0  ;;  %8828 = vmatpush3.bf16.msra.mxu0 %v9293_v62  ;;  %v12640_v21 = vld [vmem:[#allocation29_spill] sm:$0xff]  ;;  %v9302_v62 = vld [vmem:[%s12510_s1 + $0x6f8] sm:$0xff]  }
 0x2e5   : > { %v8456_v32 = vpop.f32.mrb[239].mxu1  ;;  %8872 = vmatpush3.bf16.msra.mxu1 %v9294_v61  ;;  %8829 = vmatprep.subr.bf16.mxu0 %v12591_v50 }
 0x2e6   : > { %v11839_v48 = vadd.f32 %v3547_v37, %v3415_v6  ;;  %8758 = vmatmul.mubr.bf16.gmra.mrb[88].mxu0 %v12639_v53  ;;  %8873 = vmatprep.subr.bf16.mxu1 %v12591_v50  ;;  %v12644_v32 = vld [vmem:[#allocation33_spill] sm:$0xff] }
 0x2e7   : > { %8802 = vmatmul.mubr.bf16.gmra.mrb[88].mxu1 %v12640_v21  ;;  %8761 = vmatprep.mubr.msk.bf16.mxu0 %vm9478_vm0, %v12591_v50 }
 0x2e8   : > { %8805 = vmatprep.mubr.msk.bf16.mxu1 %vm9478_vm0, %v12591_v50  ;;  %8830 = vmatpush3.bf16.msra.mxu0 %v9295_v41 }
 0x2e9   : > { %v3386_v38 = vpop.f32.mrb[240].mxu0  ;;  %8874 = vmatpush3.bf16.msra.mxu1 %v9296_v16  ;;  %8831 = vmatprep.subr.bf16.mxu0 %v12591_v50 }
 0x2ea   : > { %v3416_v0 = vadd.f32 %v3386_v38, %v11712_v44  ;;  %v3552_v39 = vpop.f32.mrb[240].mxu1  ;;  %v8415_v24 = vpop.f32.mrb[241].mxu0  ;;  %8875 = vmatprep.subr.bf16.mxu1 %v12591_v50  ;;  %v9300_v44 = vld [vmem:[%s12510_s1 + $0x6f0] sm:$0xff]  }
 0x2eb   : > { %v8459_v56 = vpop.f32.mrb[241].mxu1  ;;  %v3389_v58 = vpop.f32.mrb[242].mxu0 }
 0x2ec   : > { %v11857_v14 = vadd.f32 %v3552_v39, %v3416_v0  ;;  %v3417_v29 = vadd.f32 %v3389_v58, %v11722_v55  ;;  %v3555_v42 = vpop.f32.mrb[242].mxu1  ;;  %v8416_v22 = vpop.f32.mrb[243].mxu0  ;;  %8832 = vmatpush3.bf16.msra.mxu0 %v9297_v33  ;;  %v12642_v55 = vld [vmem:[#allocation31_spill] sm:$0xff]  ;;  %v12645_v56 = vld [vmem:[#allocation34_spill] sm:$0xff] }
 0x2ed   : > { %v8460_v59 = vpop.f32.mrb[243].mxu1  ;;  %8876 = vmatpush3.bf16.msra.mxu1 %v9298_v45  ;;  %8833 = vmatprep.subr.bf16.mxu0 %v12591_v50  ;;  %v12646_v58 = vld [vmem:[#allocation35_spill] sm:$0xff] }
 0x2ee   : > { %v11867_v5 = vadd.f32 %v3555_v42, %v3417_v29  ;;  %8762 = vmatmul.mubr.bf16.gmra.mrb[92].mxu0 %v12641_v8  ;;  %8877 = vmatprep.subr.bf16.mxu1 %v12591_v50 }
 0x2ef   : > { %8806 = vmatmul.mubr.bf16.gmra.mrb[92].mxu1 %v12642_v55  ;;  %8765 = vmatprep.mubr.msk.bf16.mxu0 %vm9478_vm0, %v12591_v50 }
 0x2f0   : > { %8809 = vmatprep.mubr.msk.bf16.mxu1 %vm9478_vm0, %v12591_v50  ;;  %8834 = vmatpush3.bf16.msra.mxu0 %v9299_v23 }
 0x2f1   : > { %v3394_v49 = vpop.f32.mrb[244].mxu0  ;;  %8878 = vmatpush3.bf16.msra.mxu1 %v9300_v44  ;;  %8835 = vmatprep.subr.bf16.mxu0 %v12591_v50 }
 0x2f2   : > { %v3418_v36 = vadd.f32 %v3394_v49, %v11740_v34  ;;  %v3560_v61 = vpop.f32.mrb[244].mxu1  ;;  %v8419_v63 = vpop.f32.mrb[245].mxu0  ;;  %8879 = vmatprep.subr.bf16.mxu1 %v12591_v50  ;;  %v12643_v34 = vld [vmem:[#allocation32_spill] sm:$0xff] }
 0x2f3   : > { %v8463_v28 = vpop.f32.mrb[245].mxu1  ;;  %v3397_v57 = vpop.f32.mrb[246].mxu0 }
 0x2f4   : > { %v11885_v11 = vadd.f32 %v3560_v61, %v3418_v36  ;;  %v3419_v35 = vadd.f32 %v3397_v57, %v11744_v17  ;;  %v3563_v6 = vpop.f32.mrb[246].mxu1  ;;  %v8420_v37 = vpop.f32.mrb[247].mxu0  ;;  %8836 = vmatpush3.bf16.msra.mxu0 %v9301_v10  ;;  %v12647_v36 = vld [vmem:[#allocation36_spill] sm:$0xff]  ;;  %v12648_v61 = vld [vmem:[#allocation37_spill] sm:$0xff] }
 0x2f5   : > { %v8464_v52 = vpop.f32.mrb[247].mxu1  ;;  %8880 = vmatpush3.bf16.msra.mxu1 %v9302_v62  ;;  %8909 = vmatprep.subr.bf16.mxu0 %v12591_v50  ;;  %v3989_v37 = vsub.s32 3, %v9618_v12 }
 0x2f6   : > { %v11889_v41 = vadd.f32 %v3563_v6, %v3419_v35  ;;  %8766 = vmatmul.mubr.bf16.gmra.mrb[96].mxu0 %v12643_v34  ;;  %8953 = vmatprep.subr.bf16.mxu1 %v12591_v50  ;;  %v9303_v6 = vld [vmem:[%s12510_s1 + $0x700] sm:$0xff]  }
 0x2f7   : > { %8810 = vmatmul.mubr.bf16.gmra.mrb[96].mxu1 %v12644_v32  ;;  %8769 = vmatprep.mubr.msk.bf16.mxu0 %vm9478_vm0, %v12591_v50 }
 0x2f8   : > { %8813 = vmatprep.mubr.msk.bf16.mxu1 %vm9478_vm0, %v12591_v50 }
 0x2f9   : > { %v3402_v17 = vpop.f32.mrb[248].mxu0 }
 0x2fa   : > { %v3420_v16 = vadd.f32 %v3402_v17, %v11754_v2  ;;  %v3568_v53 = vpop.f32.mrb[248].mxu1  ;;  %v8423_v21 = vpop.f32.mrb[249].mxu0 }
 0x2fb   : > { %v8467_v33 = vpop.f32.mrb[249].mxu1  ;;  %v3405_v38 = vpop.f32.mrb[250].mxu0  ;;  %v9305_v21 = vld [vmem:[%s12510_s1 + $0x708] sm:$0xff]  }
 0x2fc   : > { %v11899_v45 = vadd.f32 %v3568_v53, %v3420_v16  ;;  %v3571_v0 = vpop.f32.mrb[250].mxu1  ;;  %v8424_v39 = vpop.f32.mrb[251].mxu0  ;;  %v9304_v16 = vld [vmem:[%s12510_s1 + $0x740] sm:$0xff]  }
 0x2fd   : > { %v8468_v24 = vpop.f32.mrb[251].mxu1 }
 0x2fe   : > { %8770 = vmatmul.mubr.bf16.gmra.mrb[100].mxu0 %v12645_v56 }
 0x2ff   : > { %8814 = vmatmul.mubr.bf16.gmra.mrb[100].mxu1 %v12646_v58  ;;  %8773 = vmatprep.mubr.msk.bf16.mxu0 %vm9478_vm0, %v12591_v50 }
 0x300   : > { %8817 = vmatprep.mubr.msk.bf16.mxu1 %vm9478_vm0, %v12591_v50 }
 0x301   : > { %v3720_v2 = vpop.f32.mrb[252].mxu0 }
 0x302   : > { %v3774_v29 = vadd.f32 %v3720_v2, %v11763_v25  ;;  %v3920_v42 = vpop.f32.mrb[252].mxu1  ;;  %v8487_v22 = vpop.f32.mrb[253].mxu0 }
 0x303   : > { %v8531_v23 = vpop.f32.mrb[253].mxu1  ;;  %v3723_v59 = vpop.f32.mrb[254].mxu0 }
 0x304   : > { %v3974_v44 = vadd.f32 %v3920_v42, %v3774_v29  ;;  %v3775_v8 = vadd.f32 %v3723_v59, %v11766_v46  ;;  %v3923_v55 = vpop.f32.mrb[254].mxu1  ;;  %v8488_v10 = vpop.f32.mrb[255].mxu0  ;;  %v9308_v59 = vld [vmem:[%s12510_s1 + $0x750] sm:$0xff]  }
 0x305   : > { %v8532_v49 = vpop.f32.mrb[255].mxu1 }
 0x306   : > { %v3975_v62 = vadd.f32 %v3923_v55, %v3775_v8  ;;  %8774 = vmatmul.mubr.bf16.gmra.mrb[104].mxu0 %v12647_v36 }
 0x307   : > { %8818 = vmatmul.mubr.bf16.gmra.mrb[104].mxu1 %v12648_v61  ;;  %8837 = vmatprep.mubr.msk.bf16.mxu0 %vm9478_vm0, %v12591_v50 }
 0x308   : > { %8881 = vmatprep.mubr.msk.bf16.mxu1 %vm9478_vm0, %v12591_v50 }
 0x309   : > { %v3728_v25 = vpop.f32.mrb[0].mxu0 }
 0x30a   : > { %v3776_v63 = vadd.f32 %v3728_v25, %v11778_v43  ;;  %v3928_v28 = vpop.f32.mrb[0].mxu1  ;;  %v8491_v57 = vpop.f32.mrb[1].mxu0 }
 0x30b   : > { %v8535_v46 = vpop.f32.mrb[1].mxu1  ;;  %v3731_v35 = vpop.f32.mrb[2].mxu0 }
 0x30c   : > { %v3976_v52 = vadd.f32 %v3928_v28, %v3776_v63  ;;  %v3777_v34 = vadd.f32 %v3731_v35, %v11784_v51  ;;  %v3931_v32 = vpop.f32.mrb[2].mxu1  ;;  %v8492_v17 = vpop.f32.mrb[3].mxu0  ;;  %v9398_v51 = vld [vmem:[%s12511_s2] sm:$0x1f] }
 0x30d   : > { %v8536_v43 = vpop.f32.mrb[3].mxu1  ;;  %v11934_v33 = vrot.slane %v9398_v51, %v3989_v37 }
 0x30e   : > { %v11924_v53 = vadd.f32 %v3931_v32, %v3777_v34  ;;  %8838 = vmatmul.mubr.bf16.vlgmr.msra.gmra.mrb[108].mxu0 %v11235_v27  ;;  %v9306_v27 = vld [vmem:[%s12510_s1 + $0x748] sm:$0xff]  }
 0x30f   : > { %8882 = vmatmul.mubr.bf16.vlgmr.msra.gmra.mrb[108].mxu1 %v11242_v7  ;;  %8910 = vmatpush3.bf16.msra.mxu0 %v9303_v6  ;;  %v3991_v58 = vadd.f32 %v11934_v33, %v3974_v44  ;;  %v3992_v44 = vadd.f32 %v11934_v33, %v3975_v62  ;;  %v9309_v62 = vld [vmem:[%s12510_s1 + $0x718] sm:$0xff]   ;;  %v3993_v6 = vadd.f32 %v11934_v33, %v3976_v52  ;;  %v9312_v52 = vld [vmem:[%s12510_s1 + $0x760] sm:$0xff]  }
 0x310   : > { %8954 = vmatpush3.bf16.msra.mxu1 %v9304_v16  ;;  %8841 = vmatprep.mubr.msk.bf16.mxu0 %vm9478_vm0, %v12591_v50 }
 0x311   : > { %v3736_v7 = vpop.f32.mrb[4].mxu0  ;;  %8885 = vmatprep.mubr.msk.bf16.mxu1 %vm9478_vm0, %v12591_v50  ;;  %8911 = vmatprep.subr.bf16.mxu0 %v12591_v50  ;;  %v4004_v55 = vmax.f32 %v3991_v58, 0.0 }
 0x312   : > { %v3778_v38 = vadd.f32 %v3736_v7, %v11801_v60  ;;  %v3936_v0 = vpop.f32.mrb[4].mxu1  ;;  %v8495_v39 = vpop.f32.mrb[5].mxu0  ;;  %8955 = vmatprep.subr.bf16.mxu1 %v12591_v50  ;;  %v9307_v60 = vld [vmem:[%s12510_s1 + $0x710] sm:$0xff]  }
 0x313   : > { %v8539_v24 = vpop.f32.mrb[5].mxu1  ;;  %v3739_v56 = vpop.f32.mrb[6].mxu0  ;;  %8912 = vmatpush3.bf16.msra.mxu0 %v9305_v21  ;;  %v3994_v21 = vadd.f32 %v11934_v33, %v11924_v53  ;;  %v9313_v53 = vld [vmem:[%s12510_s1 + $0x728] sm:$0xff]  }
 0x314   : > { %v3978_v2 = vadd.f32 %v3936_v0, %v3778_v38  ;;  %v3779_v29 = vadd.f32 %v3739_v56, %v11812_v26  ;;  %v3939_v42 = vpop.f32.mrb[6].mxu1  ;;  %v8496_v22 = vpop.f32.mrb[7].mxu0  ;;  %8956 = vmatpush3.bf16.msra.mxu1 %v9306_v27  ;;  %8913 = vmatprep.subr.bf16.mxu0 %v12591_v50  ;;  %v4006_v27 = vmax.f32 %v3993_v6, 0.0 }
 0x315   : > { %v8540_v23 = vpop.f32.mrb[7].mxu1  ;;  %8957 = vmatprep.subr.bf16.mxu1 %v12591_v50  ;;  %v4007_v0 = vmax.f32 %v3994_v21, 0.0 }
 0x316   : > { %v3995_v26 = vadd.f32 %v11934_v33, %v3978_v2  ;;  %v3979_v8 = vadd.f32 %v3939_v42, %v3779_v29  ;;  %8842 = vmatmul.mubr.bf16.gmra.mrb[112].mxu0 %v11277_v13  ;;  %v9310_v13 = vld [vmem:[%s12510_s1 + $0x758] sm:$0xff]  }
 0x317   : > { %8886 = vmatmul.mubr.bf16.gmra.mrb[112].mxu1 %v11281_v19  ;;  %8845 = vmatprep.mubr.msk.bf16.mxu0 %vm9478_vm0, %v12591_v50  ;;  %v4005_v19 = vmax.f32 %v3992_v44, 0.0 }
 0x318   : > { %v4008_v10 = vmax.f32 %v3995_v26, 0.0  ;;  %v3996_v49 = vadd.f32 %v11934_v33, %v3979_v8  ;;  %8889 = vmatprep.mubr.msk.bf16.mxu1 %vm9478_vm0, %v12591_v50  ;;  %8914 = vmatpush3.bf16.msra.mxu0 %v9307_v60  ;;  %v9315_v26 = vld [vmem:[%s12510_s1 + $0x730] sm:$0xff]  }
 0x319   : > { %v3744_v36 = vpop.f32.mrb[8].mxu0  ;;  %8958 = vmatpush3.bf16.msra.mxu1 %v9308_v59  ;;  %8915 = vmatprep.subr.bf16.mxu0 %v12591_v50 }
 0x31a   : > { %v11972_v61 = vmax.f32 %v4004_v55, %v4008_v10  ;;  %v4009_v25 = vmax.f32 %v3996_v49, 0.0  ;;  %v3780_v63 = vadd.f32 %v3744_v36, %v11829_v31  ;;  %v3944_v28 = vpop.f32.mrb[8].mxu1  ;;  %v8499_v57 = vpop.f32.mrb[9].mxu0  ;;  %8959 = vmatprep.subr.bf16.mxu1 %v12591_v50  ;;  %v9311_v31 = vld [vmem:[%s12510_s1 + $0x720] sm:$0xff]   ;;  %v9317_v36 = vld [vmem:[%s12510_s1 + $0x738] sm:$0xff]  }
 0x31b   : > { %v8543_v46 = vpop.f32.mrb[9].mxu1  ;;  %v3747_v35 = vpop.f32.mrb[10].mxu0 }
 0x31c   : > { %v11977_v37 = vmax.f32 %v4005_v19, %v4009_v25  ;;  %v3980_v34 = vadd.f32 %v3944_v28, %v3780_v63  ;;  %v3781_v32 = vadd.f32 %v3747_v35, %v11839_v48  ;;  %v3947_v17 = vpop.f32.mrb[10].mxu1  ;;  %v8500_v16 = vpop.f32.mrb[11].mxu0  ;;  %8916 = vmatpush3.bf16.msra.mxu0 %v9309_v62  ;;  %v9319_v19 = vld [vmem:[%s12512_s3 + $0x40] sm:$0xff]  }
 0x31d   : > { %v8544_v43 = vpop.f32.mrb[11].mxu1  ;;  %8960 = vmatpush3.bf16.msra.mxu1 %v9310_v13  ;;  %8917 = vmatprep.subr.bf16.mxu0 %v12591_v50  ;;  %v9320_v35 = vld [vmem:[%s12512_s3 + $0xc0] sm:$0xff]  }
 0x31e   : > { %v3997_v48 = vadd.f32 %v11934_v33, %v3980_v34  ;;  %v3981_v51 = vadd.f32 %v3947_v17, %v3781_v32  ;;  %8846 = vmatmul.mubr.bf16.gmra.mrb[116].mxu0 %v11326_v20  ;;  %8961 = vmatprep.subr.bf16.mxu1 %v12591_v50 }
 0x31f   : > { %8890 = vmatmul.mubr.bf16.gmra.mrb[116].mxu1 %v11329_v15  ;;  %8849 = vmatprep.mubr.msk.bf16.mxu0 %vm9478_vm0, %v12591_v50  ;;  %v9314_v15 = vld [vmem:[%s12510_s1 + $0x768] sm:$0xff]  }
 0x320   : > { %v4010_v7 = vmax.f32 %v3997_v48, 0.0  ;;  %v3998_v38 = vadd.f32 %v11934_v33, %v3981_v51  ;;  %8893 = vmatprep.mubr.msk.bf16.mxu1 %vm9478_vm0, %v12591_v50  ;;  %8918 = vmatpush3.bf16.msra.mxu0 %v9311_v31 }
 0x321   : > { %v3752_v20 = vpop.f32.mrb[12].mxu0  ;;  %8962 = vmatpush3.bf16.msra.mxu1 %v9312_v52  ;;  %8919 = vmatprep.subr.bf16.mxu0 %v12591_v50 }
 0x322   : > { %v12005_v39 = vmax.f32 %v4006_v27, %v4010_v7  ;;  %v4011_v24 = vmax.f32 %v3998_v38, 0.0  ;;  %v3782_v56 = vadd.f32 %v3752_v20, %v11857_v14  ;;  %v3952_v58 = vpop.f32.mrb[12].mxu1  ;;  %v8503_v2 = vpop.f32.mrb[13].mxu0  ;;  %8963 = vmatprep.subr.bf16.mxu1 %v12591_v50  ;;  %v9316_v14 = vld [vmem:[%s12510_s1 + $0x770] sm:$0xff]  }
 0x323   : > { %v8547_v29 = vpop.f32.mrb[13].mxu1  ;;  %v3755_v42 = vpop.f32.mrb[14].mxu0 }
 0x324   : > { %v4046_v22 = vmax.f32 %v4007_v0, %v4011_v24  ;;  %v3982_v60 = vadd.f32 %v3952_v58, %v3782_v56  ;;  %v3783_v23 = vadd.f32 %v3755_v42, %v11867_v5  ;;  %v3955_v59 = vpop.f32.mrb[14].mxu1  ;;  %v8504_v44 = vpop.f32.mrb[15].mxu0  ;;  %8920 = vmatpush3.bf16.msra.mxu0 %v9313_v53  ;;  %v12649_v5 = vld [vmem:[#allocation39_spill] sm:$0xff] }
 0x325   : > { %v8548_v8 = vpop.f32.mrb[15].mxu1  ;;  %8964 = vmatpush3.bf16.msra.mxu1 %v9314_v15  ;;  %8921 = vmatprep.subr.bf16.mxu0 %v12591_v50 }
 0x326   : > { %v3999_v55 = vadd.f32 %v11934_v33, %v3982_v60  ;;  %v3983_v10 = vadd.f32 %v3955_v59, %v3783_v23  ;;  %8850 = vmatmul.mubr.bf16.gmra.mrb[120].mxu0 %v11376_v30  ;;  %8965 = vmatprep.subr.bf16.mxu1 %v12591_v50  ;;  %v9318_v30 = vld [vmem:[%s12510_s1 + $0x778] sm:$0xff]  }
 0x327   : > { %8894 = vmatmul.mubr.bf16.gmra.mrb[120].mxu1 %v12649_v5  ;;  %8853 = vmatprep.mubr.msk.bf16.mxu0 %vm9478_vm0, %v12591_v50  ;;  %v9400_v5 = vld [vmem:[%s9609_s19 + $0x10] sm:$0xff] }
 0x328   : > { %v4012_v49 = vmax.f32 %v3999_v55, 0.0  ;;  %v4000_v62 = vadd.f32 %v11934_v33, %v3983_v10  ;;  %8897 = vmatprep.mubr.msk.bf16.mxu1 %vm9478_vm0, %v12591_v50  ;;  %8922 = vmatpush3.bf16.msra.mxu0 %v9315_v26  ;;  %v9399_v10 = vld [vmem:[%s9609_s19 + $0x8] sm:$0xff] }
 0x329   : > { %v3760_v13 = vpop.f32.mrb[16].mxu0  ;;  %8966 = vmatpush3.bf16.msra.mxu1 %v9316_v14  ;;  %8923 = vmatprep.subr.bf16.mxu0 %v12591_v50 }
 0x32a   : > { %v4047_v25 = vmax.f32 %v11972_v61, %v4012_v49  ;;  %v4013_v63 = vmax.f32 %v4000_v62, 0.0  ;;  %v3784_v28 = vadd.f32 %v3760_v13, %v11885_v11  ;;  %v3960_v57 = vpop.f32.mrb[16].mxu1  ;;  %v8507_v46 = vpop.f32.mrb[17].mxu0  ;;  %8967 = vmatprep.subr.bf16.mxu1 %v12591_v50  ;;  %v5363_v49 = vpack.c.bf16 %v9400_v5, %v9399_v10  ;;  %v9338_v5 = vld [vmem:[%s12512_s3 + $0xa0] sm:$0xff]  }
 0x32b   : > { %v8551_v6 = vpop.f32.mrb[17].mxu1  ;;  %v3763_v34 = vpop.f32.mrb[18].mxu0  ;;  %v12650_v46 = vld [vmem:[#allocation6_spill] sm:$0xff] }
 0x32c   : > { %v4048_v32 = vmax.f32 %v11977_v37, %v4013_v63  ;;  %v3984_v17 = vadd.f32 %v3960_v57, %v3784_v28  ;;  %v3785_v16 = vadd.f32 %v3763_v34, %v11889_v41  ;;  %v3963_v31 = vpop.f32.mrb[18].mxu1  ;;  %v8508_v61 = vpop.f32.mrb[19].mxu0  ;;  %8924 = vmatpush3.bf16.msra.mxu0 %v9317_v36  ;;  %v9322_v63 = vld [vmem:[%s12512_s3 + $0x80] sm:$0xff]   ;;  %v9323_v28 = vld [vmem:[%s12512_s3 + $0x48] sm:$0xff]  }
 0x32d   : > { %v8552_v43 = vpop.f32.mrb[19].mxu1  ;;  %8968 = vmatpush3.bf16.msra.mxu1 %v9318_v30  ;;  %7615 = vmatprep.subr.bf16.mxu0 %v9319_v19  ;;  %v9324_v57 = vld [vmem:[%s12512_s3 + $0xc8] sm:$0xff]  }
 0x32e   : > { %v4001_v11 = vadd.f32 %v11934_v33, %v3984_v17  ;;  %v3985_v52 = vadd.f32 %v3963_v31, %v3785_v16  ;;  %8854 = vmatmul.mubr.bf16.gmra.mrb[124].mxu0 %v11428_v1  ;;  %7637 = vmatprep.subr.bf16.mxu1 %v9320_v35  ;;  %v12651_v35 = vld [vmem:[#allocation5_spill] sm:$0xff]  ;;  %v9327_v16 = vld [vmem:[%s12512_s3 + $0x50] sm:$0xff]   ;;  %v9401_v43 = vld [vmem:[%s9609_s19 + $0x18] sm:$0xff] }
 0x32f   : > { %8898 = vmatmul.mubr.bf16.gmra.mrb[124].mxu1 %v11432_v9  ;;  %8857 = vmatprep.mubr.msk.bf16.mxu0 %vm9478_vm0, %v12591_v50  ;;  %v12652_v6 = vpack.c.bf16 %v12650_v46, %v12651_v35  ;;  %v9325_v34 = vld [vmem:[%s12512_s3 + $0x8] sm:$0xff]   ;;  %v9405_v35 = vld [vmem:[%s9609_s19 + $0x38] sm:$0xff] }
 0x330   : > { %v4014_v37 = vmax.f32 %v4001_v11, 0.0  ;;  %v4002_v41 = vadd.f32 %v11934_v33, %v3985_v52  ;;  %8901 = vmatprep.mubr.msk.bf16.mxu1 %vm9478_vm0, %v12591_v50  ;;  %v9326_v17 = vld [vmem:[%s12512_s3 + $0x88] sm:$0xff]   ;;  %v9402_v11 = vld [vmem:[%s9609_s19 + $0x20] sm:$0xff] }
 0x331   : > { %v3768_v21 = vpop.f32.mrb[20].mxu0  ;;  %v5364_v52 = vpack.c.bf16 %v9402_v11, %v9401_v43  ;;  %v9345_v11 = vld [vmem:[%s12512_s3 + $0x30] sm:$0xff]  }
 0x332   : > { %v4049_v48 = vmax.f32 %v12005_v39, %v4014_v37  ;;  %v4015_v51 = vmax.f32 %v4002_v41, 0.0  ;;  %v3786_v27 = vadd.f32 %v3768_v21, %v11899_v45  ;;  %v3968_v7 = vpop.f32.mrb[20].mxu1  ;;  %v8511_v1 = vpop.f32.mrb[21].mxu0  ;;  %v9328_v37 = vld [vmem:[%s12512_s3 + $0xd0] sm:$0xff]  }
 0x333   : > { %v8555_v38 = vpop.f32.mrb[21].mxu1  ;;  %v3771_v53 = vpop.f32.mrb[22].mxu0 }
 0x334   : > { %v4050_v9 = vmax.f32 %v4046_v22, %v4015_v51  ;;  %v3986_v20 = vadd.f32 %v3968_v7, %v3786_v27  ;;  %v3971_v15 = vpop.f32.mrb[22].mxu1  ;;  %v8512_v0 = vpop.f32.mrb[23].mxu0  ;;  %v9329_v7 = vld [vmem:[%s12512_s3 + $0x10] sm:$0xff]  }
 0x335   : > { %v8556_v24 = vpop.f32.mrb[23].mxu1  ;;  %v9330_v53 = vld [vmem:[%s12512_s3 + $0x90] sm:$0xff]   ;;  %v12653_v15 = vld [vmem:[#allocation9_spill] sm:$0xff]  ;;  %v12654_v0 = vld [vmem:[#allocation8_spill] sm:$0xff] }
 0x336   : > { %v4053_v56 = vmax.f32 %v4049_v48, %v4050_v9  ;;  %v4003_v58 = vadd.f32 %v11934_v33, %v3986_v20  ;;  %8858 = vmatmul.mubr.bf16.gmra.mrb[128].mxu0 %v11459_v47  ;;  %v9331_v9 = vld [vmem:[%s12512_s3 + $0x58] sm:$0xff]   ;;  %v12655_v24 = vpack.c.bf16 %v12653_v15, %v12654_v0 }
 0x337   : > { %8902 = vmatmul.mubr.bf16.gmra.mrb[128].mxu1 %v11461_v54  ;;  %8861 = vmatprep.mubr.msk.bf16.mxu0 %vm9478_vm0, %v12591_v50  ;;  %v9332_v20 = vld [vmem:[%s12512_s3 + $0xd8] sm:$0xff]  }
 0x338   : > { %v4016_v45 = vmax.f32 %v4003_v58, 0.0  ;;  %8905 = vmatprep.mubr.msk.bf16.mxu1 %vm9478_vm0, %v12591_v50  ;;  %v9349_v15 = vld [vmem:[%s12512_s3 + $0x38] sm:$0xff]  }
 0x339   : > { %v4177_v39 = vpop.f32.mrb[24].mxu0 }
 0x33a   : > { %v4042_v2 = vsel %vm4029_vm11, %v4016_v45, -1e+30  ;;  %v4313_v29 = vpop.f32.mrb[24].mxu1  ;;  %v8575_v42 = vpop.f32.mrb[25].mxu0  ;;  %v9334_v45 = vld [vmem:[%s12512_s3 + $0x98] sm:$0xff]  }
 0x33b   : > { %v4051_v22 = vmax.f32 %v4047_v25, %v4042_v2  ;;  %v12062_v60 = vadd.f32 %v4313_v29, %v4177_v39  ;;  %v8619_v47 = vpop.f32.mrb[25].mxu1  ;;  %v4180_v40 = vpop.f32.mrb[26].mxu0  ;;  %v9335_v39 = vld [vmem:[%s12512_s3 + $0x60] sm:$0xff]   ;;  %v9403_v42 = vld [vmem:[%s9609_s19 + $0x28] sm:$0xff] }
 0x33c   : > { %v4316_v33 = vpop.f32.mrb[26].mxu1  ;;  %v8576_v54 = vpop.f32.mrb[27].mxu0 }
 0x33d   : > { %v4052_v23 = vmax.f32 %v4051_v22, %v4048_v32  ;;  %v12064_v59 = vadd.f32 %v4316_v33, %v4180_v40  ;;  %v8620_v44 = vpop.f32.mrb[27].mxu1  ;;  %v9404_v22 = vld [vmem:[%s9609_s19 + $0x30] sm:$0xff]  ;;  %v9336_v40 = vld [vmem:[%s12512_s3 + $0xe0] sm:$0xff]  }
 0x33e   : > { %8862 = vmatmul.mubr.bf16.gmra.mrb[132].mxu0 %v11479_v3  ;;  %v5365_v47 = vpack.c.bf16 %v9404_v22, %v9403_v42 }
 0x33f   : > { %v12067_v26 = vmax.f32 %v4052_v23, %v4053_v56  ;;  %8906 = vmatmul.mubr.bf16.gmra.mrb[132].mxu1 %v11481_v18  ;;  %8925 = vmatprep.mubr.msk.bf16.mxu0 %vm9478_vm0, %v12591_v50  ;;  %v9321_v18 = vld [vmem:[%s12512_s3] sm:$0xff]   ;;  %v9333_v56 = vld [vmem:[%s12512_s3 + $0x18] sm:$0xff]  }
 0x340   : > { %8969 = vmatprep.mubr.msk.bf16.mxu1 %vm9478_vm0, %v12591_v50 }
 0x341   : > { %v4185_v8 = vpop.f32.mrb[28].mxu0 }
 0x342   : > { %v4321_v14 = vpop.f32.mrb[28].mxu1  ;;  %v8579_v55 = vpop.f32.mrb[29].mxu0 }
 0x343   : > { %v12076_v62 = vadd.f32 %v4321_v14, %v4185_v8  ;;  %v8623_v36 = vpop.f32.mrb[29].mxu1  ;;  %v4188_v3 = vpop.f32.mrb[30].mxu0  ;;  %v9337_v14 = vld [vmem:[%s12512_s3 + $0x20] sm:$0xff]  }
 0x344   : > { %v4324_v13 = vpop.f32.mrb[30].mxu1  ;;  %v8580_v30 = vpop.f32.mrb[31].mxu0  ;;  %v9340_v36 = vld [vmem:[%s12512_s3 + $0xe8] sm:$0xff]  }
 0x345   : > { %v12081_v19 = vadd.f32 %v4324_v13, %v4188_v3  ;;  %v8624_v25 = vpop.f32.mrb[31].mxu1  ;;  %v12656_v3 = vld [vmem:[#allocation11_spill] sm:$0xff]  ;;  %v12657_v13 = vld [vmem:[#allocation10_spill] sm:$0xff] }
 0x346   : > { %8926 = vmatmul.mubr.bf16.vlgmr.msra.gmra.mrb[136].mxu0 %v5363_v49  ;;  %v9339_v49 = vld [vmem:[%s12512_s3 + $0x68] sm:$0xff]   ;;  %v12658_v30 = vpack.c.bf16 %v12656_v3, %v12657_v13 }
 0x347   : > { %8970 = vmatmul.mubr.bf16.vlgmr.msra.gmra.mrb[136].mxu1 %v12652_v6  ;;  %8929 = vmatprep.mubr.msk.bf16.mxu0 %vm9478_vm0, %v12591_v50  ;;  %v9406_v6 = vld [vmem:[%s9609_s19 + $0x40] sm:$0xff]  ;;  %v12665_v3 = vld [vmem:[#allocation14_spill] sm:$0xff] }
 0x348   : > { %8973 = vmatprep.mubr.msk.bf16.mxu1 %vm9478_vm0, %v12591_v50  ;;  %7616 = vmatpush3.bf16.msra.mxu0 %v9321_v18  ;;  %v9341_v18 = vld [vmem:[%s12512_s3 + $0x28] sm:$0xff]  }
 0x349   : > { %v4193_v32 = vpop.f32.mrb[32].mxu0  ;;  %7638 = vmatpush3.bf16.msra.mxu1 %v9322_v63  ;;  %7617 = vmatprep.subr.bf16.mxu0 %v9323_v28  ;;  %v9342_v63 = vld [vmem:[%s12512_s3 + $0xa8] sm:$0xff]   ;;  %v9343_v28 = vld [vmem:[%s12512_s3 + $0x70] sm:$0xff]  }
 0x34a   : > { %v4329_v31 = vpop.f32.mrb[32].mxu1  ;;  %v8583_v61 = vpop.f32.mrb[33].mxu0  ;;  %7639 = vmatprep.subr.bf16.mxu1 %v9324_v57 }
 0x34b   : > { %v12113_v41 = vadd.f32 %v4329_v31, %v4193_v32  ;;  %v8627_v21 = vpop.f32.mrb[33].mxu1  ;;  %v4196_v48 = vpop.f32.mrb[34].mxu0  ;;  %v9344_v32 = vld [vmem:[%s12512_s3 + $0xf0] sm:$0xff]  }
 0x34c   : > { %v4332_v51 = vpop.f32.mrb[34].mxu1  ;;  %v8584_v27 = vpop.f32.mrb[35].mxu0  ;;  %7618 = vmatpush3.bf16.msra.mxu0 %v9325_v34  ;;  %v5366_v34 = vpack.c.bf16 %v9406_v6, %v9405_v35  ;;  %v12659_v21 = vld [vmem:[#allocation38_spill] sm:$0xff]  ;;  %v9410_v35 = vld [vmem:[%s9609_s19 + $0x60] sm:$0xff] }
 0x34d   : > { %v12118_v1 = vadd.f32 %v4332_v51, %v4196_v48  ;;  %v8628_v38 = vpop.f32.mrb[35].mxu1  ;;  %7640 = vmatpush3.bf16.msra.mxu1 %v9326_v17  ;;  %7619 = vmatprep.subr.bf16.mxu0 %v9327_v16  ;;  %v1499_v48 = vrot.slane %v12659_v21, 4  ;;  %v9346_v51 = vld [vmem:[%s12512_s3 + $0xb0] sm:$0xff]   ;;  %v9347_v27 = vld [vmem:[%s12512_s3 + $0x78] sm:$0xff]  }
 0x34e   : > { %8930 = vmatmul.mubr.bf16.gmra.mrb[140].mxu0 %v5364_v52  ;;  %7641 = vmatprep.subr.bf16.mxu1 %v9328_v37  ;;  %v9348_v38 = vld [vmem:[%s12512_s3 + $0xf8] sm:$0xff]  }
 0x34f   : > { %8974 = vmatmul.mubr.bf16.gmra.mrb[140].mxu1 %v12655_v24  ;;  %8933 = vmatprep.mubr.msk.bf16.mxu0 %vm9478_vm0, %v12591_v50  ;;  %v1500_v24 = vmax.f32 %v12659_v21, %v1499_v48 }
 0x350   : > { %8977 = vmatprep.mubr.msk.bf16.mxu1 %vm9478_vm0, %v12591_v50  ;;  %7620 = vmatpush3.bf16.msra.mxu0 %v9329_v7  ;;  %v4055_v7 = vrot.slane %v12067_v26, 4 }
 0x351   : > { %v4201_v58 = vpop.f32.mrb[36].mxu0  ;;  %7642 = vmatpush3.bf16.msra.mxu1 %v9330_v53  ;;  %7621 = vmatprep.subr.bf16.mxu0 %v9331_v9  ;;  %v12660_v53 = vld [vmem:[#allocation13_spill] sm:$0xff]  ;;  %v12661_v9 = vld [vmem:[#allocation12_spill] sm:$0xff] }
 0x352   : > { %v4337_v2 = vpop.f32.mrb[36].mxu1  ;;  %v8587_v29 = vpop.f32.mrb[37].mxu0  ;;  %7643 = vmatprep.subr.bf16.mxu1 %v9332_v20  ;;  %v12662_v20 = vpack.c.bf16 %v12660_v53, %v12661_v9  ;;  %v4056_v42 = vmax.f32 %v12067_v26, %v4055_v7 }
 0x353   : > { %v12150_v33 = vadd.f32 %v4337_v2, %v4201_v58  ;;  %v8631_v54 = vpop.f32.mrb[37].mxu1  ;;  %v4204_v23 = vpop.f32.mrb[38].mxu0  ;;  %v9408_v2 = vld [vmem:[%s9609_s19 + $0x50] sm:$0xff] }
 0x354   : > { %v4340_v44 = vpop.f32.mrb[38].mxu1  ;;  %v8588_v8 = vpop.f32.mrb[39].mxu0  ;;  %7622 = vmatpush3.bf16.msra.mxu0 %v9333_v56  ;;  %v9350_v56 = vld [vmem:[%s12512_s3 + $0xb8] sm:$0xff]   ;;  %v4057_v26 = vrot.slane %v4056_v42, 2 }
 0x355   : > { %v12155_v55 = vadd.f32 %v4340_v44, %v4204_v23  ;;  %v8632_v10 = vpop.f32.mrb[39].mxu1  ;;  %7644 = vmatpush3.bf16.msra.mxu1 %v9334_v45  ;;  %7623 = vmatprep.subr.bf16.mxu0 %v9335_v39  ;;  %v9407_v39 = vld [vmem:[%s9609_s19 + $0x48] sm:$0xff]  ;;  %v12663_v54 = vld [vmem:[#allocation23_spill] sm:$0xff] }
 0x356   : > { %8934 = vmatmul.mubr.bf16.gmra.mrb[144].mxu0 %v5365_v47  ;;  %7645 = vmatprep.subr.bf16.mxu1 %v9336_v40  ;;  %v5367_v29 = vpack.c.bf16 %v9408_v2, %v9407_v39  ;;  %v719_v23 = vrot.slane %v12663_v54, 4 }
 0x357   : > { %8978 = vmatmul.mubr.bf16.gmra.mrb[144].mxu1 %v12658_v30  ;;  %8937 = vmatprep.mubr.msk.bf16.mxu0 %vm9478_vm0, %v12591_v50 }
 0x358   : > { %8981 = vmatprep.mubr.msk.bf16.mxu1 %vm9478_vm0, %v12591_v50  ;;  %7624 = vmatpush3.bf16.msra.mxu0 %v9337_v14  ;;  %v2611_v14 = vrot.slane %v11483_v4, 4  ;;  %v720_v30 = vmax.f32 %v12663_v54, %v719_v23 }
 0x359   : > { %v4209_v25 = vpop.f32.mrb[40].mxu0  ;;  %7646 = vmatpush3.bf16.msra.mxu1 %v9338_v5  ;;  %7625 = vmatprep.subr.bf16.mxu0 %v9339_v49  ;;  %v1501_v49 = vrot.slane %v1500_v24, 2 }
 0x35a   : > { %v4345_v57 = vpop.f32.mrb[40].mxu1  ;;  %v8591_v46 = vpop.f32.mrb[41].mxu0  ;;  %7647 = vmatprep.subr.bf16.mxu1 %v9340_v36  ;;  %v12664_v36 = vld [vmem:[#allocation16_spill] sm:$0xff] }
 0x35b   : > { %v12187_v17 = vadd.f32 %v4345_v57, %v4209_v25  ;;  %v8635_v16 = vpop.f32.mrb[41].mxu1  ;;  %v4212_v31 = vpop.f32.mrb[42].mxu0  ;;  %v12666_v13 = vpack.c.bf16 %v12664_v36, %v12665_v3  ;;  %v9409_v46 = vld [vmem:[%s9609_s19 + $0x58] sm:$0xff] }
 0x35c   : > { %v4348_v61 = vpop.f32.mrb[42].mxu1  ;;  %v8592_v43 = vpop.f32.mrb[43].mxu0  ;;  %7626 = vmatpush3.bf16.msra.mxu0 %v9341_v18  ;;  %v2612_v18 = vmax.f32 %v11483_v4, %v2611_v14  ;;  %v5368_v6 = vpack.c.bf16 %v9410_v35, %v9409_v46  ;;  %v12667_v4 = vld [vmem:[#allocation17_spill] sm:$0xff] }
 0x35d   : > { %v12192_v52 = vadd.f32 %v4348_v61, %v4212_v31  ;;  %v8636_v37 = vpop.f32.mrb[43].mxu1  ;;  %7648 = vmatpush3.bf16.msra.mxu1 %v9342_v63  ;;  %7627 = vmatprep.subr.bf16.mxu0 %v9343_v28  ;;  %v1502_v63 = vmax.f32 %v1500_v24, %v1501_v49  ;;  %v721_v31 = vrot.slane %v720_v30, 2  ;;  %v9411_v24 = vld [vmem:[%s9609_s19] sm:$0xff] }
 0x35e   : > { %8938 = vmatmul.mubr.bf16.gmra.mrb[148].mxu0 %v5366_v34  ;;  %7649 = vmatprep.subr.bf16.mxu1 %v9344_v32  ;;  %v4058_v34 = vmax.f32 %v4056_v42, %v4057_v26 }
 0x35f   : > { %8982 = vmatmul.mubr.bf16.gmra.mrb[148].mxu1 %v12662_v20  ;;  %8941 = vmatprep.mubr.msk.bf16.mxu0 %vm9478_vm0, %v12591_v50  ;;  %v1503_v21 = vrot.slane %v1502_v63, 1  ;;  %v722_v7 = vmax.f32 %v720_v30, %v721_v31 }
 0x360   : > { %8985 = vmatprep.mubr.msk.bf16.mxu1 %vm9478_vm0, %v12591_v50  ;;  %7628 = vmatpush3.bf16.msra.mxu0 %v9345_v11  ;;  %v2613_v11 = vrot.slane %v2612_v18, 2  ;;  %v4059_v48 = vrot.slane %v4058_v34, 1 }
 0x361   : > { %v4217_v0 = vpop.f32.mrb[44].mxu0  ;;  %7650 = vmatpush3.bf16.msra.mxu1 %v9346_v51  ;;  %7629 = vmatprep.subr.bf16.mxu0 %v9347_v27  ;;  %v12668_v51 = vld [vmem:[#allocation15_spill] sm:$0xff]  ;;  %v1504_v9 = vmax.f32 %v1502_v63, %v1503_v21  ;;  %v723_v42 = vrot.slane %v722_v7, 1 }
 0x362   : > { %v4353_v58 = vpop.f32.mrb[44].mxu1  ;;  %v8595_v45 = vpop.f32.mrb[45].mxu0  ;;  %7651 = vmatprep.subr.bf16.mxu1 %v9348_v38  ;;  %v12669_v27 = vpack.c.bf16 %v12667_v4, %v12668_v51  ;;  %v2614_v38 = vmax.f32 %v2612_v18, %v2613_v11 }
 0x363   : > { %v12222_v22 = vadd.f32 %v4353_v58, %v4217_v0  ;;  %v8639_v47 = vpop.f32.mrb[45].mxu1  ;;  %v4220_v40 = vpop.f32.mrb[46].mxu0  ;;  %v4060_v58 = vmax.f32 %v4058_v34, %v4059_v48  ;;  %v12670_v45 = vld [vmem:[#allocation7_spill] sm:$0xff]  ;;  %v724_v49 = vmax.f32 %v722_v7, %v723_v42 }
 0x364   : > { %v4356_v44 = vpop.f32.mrb[46].mxu1  ;;  %v8596_v8 = vpop.f32.mrb[47].mxu0  ;;  %7630 = vmatpush3.bf16.msra.mxu0 %v9349_v15  ;;  %v5542_v39 = vpack.c.bf16 %v12670_v45, %v12670_v45 }
 0x365   : > { %v12226_v10 = vadd.f32 %v4356_v44, %v4220_v40  ;;  %v8640_v5 = vpop.f32.mrb[47].mxu1  ;;  %7652 = vmatpush3.bf16.msra.mxu1 %v9350_v56  ;;  %8997 = vmatprep.subr.bf16.mxu0 %v12591_v50  ;;  %v5369_v56 = vpack.c.bf16 %v9411_v24, %v9411_v24  ;;  %v2615_v44 = vrot.slane %v2614_v38, 1 }
 0x366   : > { %8942 = vmatmul.mubr.bf16.gmra.mrb[152].mxu0 %v5367_v29  ;;  %9017 = vmatprep.subr.bf16.mxu1 %v12591_v50  ;;  %v5786_v5 = vpack.c.bf16 %v4060_v58, %v4060_v58 }
 0x367   : > { %8986 = vmatmul.mubr.bf16.gmra.mrb[152].mxu1 %v12666_v13  ;;  %8945 = vmatprep.mubr.msk.bf16.mxu0 %vm9478_vm0, %v12591_v50  ;;  %v2616_v26 = vmax.f32 %v2614_v38, %v2615_v44 }
 0x368   : > { %8989 = vmatprep.mubr.msk.bf16.mxu1 %vm9478_vm0, %v12591_v50 }
 0x369   : > { %v4225_v25 = vpop.f32.mrb[48].mxu0  ;;  %v5785_v35 = vpack.c.bf16 %v2616_v26, %v2616_v26 }
 0x36a   : > { %v4361_v28 = vpop.f32.mrb[48].mxu1  ;;  %v8599_v57 = vpop.f32.mrb[49].mxu0  ;;  %v5783_v25 = vpack.c.bf16 %v724_v49, %v724_v49 }
 0x36b   : > { %v8643_v32 = vpop.f32.mrb[49].mxu1  ;;  %v4228_v16 = vpop.f32.mrb[50].mxu0 }
 0x36c   : > { %v4364_v61 = vpop.f32.mrb[50].mxu1  ;;  %v8600_v43 = vpop.f32.mrb[51].mxu0 }
 0x36d   : > { %v8644_v37 = vpop.f32.mrb[51].mxu1 }
 0x36e   : > { %8946 = vmatmul.mubr.bf16.gmra.mrb[156].mxu0 %v5368_v6 }
 0x36f   : > { %8990 = vmatmul.mubr.bf16.gmra.mrb[156].mxu1 %v12669_v27  ;;  %8949 = vmatprep.mubr.msk.bf16.mxu0 %vm9478_vm0, %v12591_v50 }
 0x370   : > { %8993 = vmatprep.mubr.msk.bf16.mxu1 %vm9478_vm0, %v12591_v50 }
 0x371   : > { %v4466_v53 = vpop.f32.mrb[52].mxu0 }
 0x372   : > { %v4520_v20 = vadd.f32 %v4466_v53, %v12062_v60  ;;  %v4632_v15 = vpop.f32.mrb[52].mxu1  ;;  %v8663_v0 = vpop.f32.mrb[53].mxu0  ;;  %v5784_v60 = vpack.c.bf16 %v1504_v9, %v1504_v9 }
 0x373   : > { %v8707_v2 = vpop.f32.mrb[53].mxu1  ;;  %v4469_v29 = vpop.f32.mrb[54].mxu0 }
 0x374   : > { %v12252_v47 = vadd.f32 %v4632_v15, %v4520_v20  ;;  %v4521_v40 = vadd.f32 %v4469_v29, %v12064_v59  ;;  %v4635_v54 = vpop.f32.mrb[54].mxu1  ;;  %v8664_v23 = vpop.f32.mrb[55].mxu0 }
 0x375   : > { %v8708_v8 = vpop.f32.mrb[55].mxu1 }
 0x376   : > { %v12255_v14 = vadd.f32 %v4635_v54, %v4521_v40  ;;  %8950 = vmatmul.mubr.bf16.gmra.mrb[160].mxu0 %v5369_v56 }
 0x377   : > { %8994 = vmatmul.mubr.bf16.gmra.mrb[160].mxu1 %v5542_v39  ;;  %6141 = vmatprep.mubr.bf16.mxu0 %v5784_v60 }
 0x378   : > { %6181 = vmatprep.mubr.bf16.mxu1 %v5786_v5 }
 0x379   : > { %v4474_v36 = vpop.f32.mrb[56].mxu0 }
 0x37a   : > { %v4522_v3 = vadd.f32 %v4474_v36, %v12076_v62  ;;  %v4640_v13 = vpop.f32.mrb[56].mxu1  ;;  %v8667_v30 = vpop.f32.mrb[57].mxu0 }
 0x37b   : > { %v8711_v59 = vpop.f32.mrb[57].mxu1  ;;  %v4477_v18 = vpop.f32.mrb[58].mxu0 }
 0x37c   : > { %v12258_v63 = vadd.f32 %v4640_v13, %v4522_v3  ;;  %v4523_v28 = vadd.f32 %v4477_v18, %v12081_v19  ;;  %v4643_v57 = vpop.f32.mrb[58].mxu1  ;;  %v8668_v46 = vpop.f32.mrb[59].mxu0 }
 0x37d   : > { %v8712_v6 = vpop.f32.mrb[59].mxu1 }
 0x37e   : > { %v12261_v34 = vadd.f32 %v4643_v57, %v4523_v28  ;;  %6142 = vmatmul.mubr.bf16.vlgmr.msra.gmra.mrb[164].mxu0 %v5783_v25 }
 0x37f   : > { %6182 = vmatmul.mubr.bf16.vlgmr.msra.gmra.mrb[164].mxu1 %v5785_v35  ;;  %9013 = vmatprep.mubr.msk.bf16.mxu0 %vm9478_vm0, %v12591_v50 }
 0x380   : > { %9033 = vmatprep.mubr.msk.bf16.mxu1 %vm9478_vm0, %v12591_v50 }
 0x381   : > { %v4482_v62 = vpop.f32.mrb[60].mxu0 }
 0x382   : > { %v4524_v32 = vadd.f32 %v4482_v62, %v12113_v41  ;;  %v4648_v16 = vpop.f32.mrb[60].mxu1  ;;  %v8671_v31 = vpop.f32.mrb[61].mxu0 }
 0x383   : > { %v8715_v19 = vpop.f32.mrb[61].mxu1  ;;  %v4485_v61 = vpop.f32.mrb[62].mxu0 }
 0x384   : > { %v12268_v43 = vadd.f32 %v4648_v16, %v4524_v32  ;;  %v4525_v11 = vadd.f32 %v4485_v61, %v12118_v1  ;;  %v4651_v37 = vpop.f32.mrb[62].mxu1  ;;  %v8672_v21 = vpop.f32.mrb[63].mxu0 }
 0x385   : > { %v8716_v48 = vpop.f32.mrb[63].mxu1 }
 0x386   : > { %v12271_v4 = vadd.f32 %v4651_v37, %v4525_v11 }
 0x389   : > { %v4490_v51 = vpop.f32.mrb[64].mxu0 }
 0x38a   : > { %v4526_v27 = vadd.f32 %v4490_v51, %v12150_v33  ;;  %v4656_v7 = vpop.f32.mrb[64].mxu1  ;;  %v8675_v38 = vpop.f32.mrb[65].mxu0 }
 0x38b   : > { %v8719_v53 = vpop.f32.mrb[65].mxu1  ;;  %v4493_v41 = vpop.f32.mrb[66].mxu0 }
 0x38c   : > { %v12274_v9 = vadd.f32 %v4656_v7, %v4526_v27  ;;  %v4527_v20 = vadd.f32 %v4493_v41, %v12155_v55  ;;  %v4659_v15 = vpop.f32.mrb[66].mxu1  ;;  %v8676_v0 = vpop.f32.mrb[67].mxu0 }
 0x38d   : > { %v8720_v24 = vpop.f32.mrb[67].mxu1 }
 0x38e   : > { %v12277_v1 = vadd.f32 %v4659_v15, %v4527_v20 }
 0x391   : > { %v4498_v56 = vpop.f32.mrb[68].mxu0 }
 0x392   : > { %v4528_v58 = vadd.f32 %v4498_v56, %v12187_v17  ;;  %v4664_v45 = vpop.f32.mrb[68].mxu1  ;;  %v8679_v39 = vpop.f32.mrb[69].mxu0 }
 0x393   : > { %v8723_v2 = vpop.f32.mrb[69].mxu1  ;;  %v4501_v33 = vpop.f32.mrb[70].mxu0 }
 0x394   : > { %v12280_v29 = vadd.f32 %v4664_v45, %v4528_v58  ;;  %v4529_v42 = vadd.f32 %v4501_v33, %v12192_v52  ;;  %v4667_v40 = vpop.f32.mrb[70].mxu1  ;;  %v8680_v54 = vpop.f32.mrb[71].mxu0 }
 0x395   : > { %v8724_v23 = vpop.f32.mrb[71].mxu1 }
 0x396   : > { %v12283_v55 = vadd.f32 %v4667_v40, %v4529_v42 }
 0x399   : > { %v4506_v44 = vpop.f32.mrb[72].mxu0 }
 0x39a   : > { %v4530_v8 = vadd.f32 %v4506_v44, %v12222_v22  ;;  %v4672_v60 = vpop.f32.mrb[72].mxu1  ;;  %v8683_v5 = vpop.f32.mrb[73].mxu0 }
 0x39b   : > { %v8727_v49 = vpop.f32.mrb[73].mxu1  ;;  %v4509_v17 = vpop.f32.mrb[74].mxu0 }
 0x39c   : > { %v12286_v26 = vadd.f32 %v4672_v60, %v4530_v8  ;;  %v4531_v36 = vadd.f32 %v4509_v17, %v12226_v10  ;;  %v4675_v3 = vpop.f32.mrb[74].mxu1  ;;  %v8684_v13 = vpop.f32.mrb[75].mxu0 }
 0x39d   : > { %v8728_v30 = vpop.f32.mrb[75].mxu1 }
 0x39e   : > { %v12289_v52 = vadd.f32 %v4675_v3, %v4531_v36 }
 0x3a1   : > { %v4514_v59 = vpop.f32.mrb[76].mxu0 }
 0x3a2   : > { %v4680_v18 = vpop.f32.mrb[76].mxu1  ;;  %v8687_v25 = vpop.f32.mrb[77].mxu0 }
 0x3a3   : > { %v8731_v28 = vpop.f32.mrb[77].mxu1  ;;  %v4517_v57 = vpop.f32.mrb[78].mxu0 }
 0x3a4   : > { %v4683_v46 = vpop.f32.mrb[78].mxu1  ;;  %v8688_v22 = vpop.f32.mrb[79].mxu0  ;;  %v9353_v57 = vld [vmem:[%s12512_s3 + $0x110] sm:$0xff]  }
 0x3a5   : > { %v8732_v35 = vpop.f32.mrb[79].mxu1 }
 0x3a9   : > { %v4798_v6 = vpop.f32.mrb[80].mxu0 }
 0x3aa   : > { %v4852_v62 = vadd.f32 %v4798_v6, %v12252_v47  ;;  %v4964_v32 = vpop.f32.mrb[80].mxu1  ;;  %v8751_v16 = vpop.f32.mrb[81].mxu0 }
 0x3ab   : > { %v8795_v31 = vpop.f32.mrb[81].mxu1  ;;  %v4801_v10 = vpop.f32.mrb[82].mxu0 }
 0x3ac   : > { %v12292_v19 = vadd.f32 %v4964_v32, %v4852_v62  ;;  %v4853_v61 = vadd.f32 %v4801_v10, %v12255_v14  ;;  %v4967_v11 = vpop.f32.mrb[82].mxu1  ;;  %v8752_v37 = vpop.f32.mrb[83].mxu0 }
 0x3ad   : > { %v8796_v21 = vpop.f32.mrb[83].mxu1  ;;  %v9355_v37 = vld [vmem:[%s12512_s3 + $0x120] sm:$0xff]  }
 0x3ae   : > { %v12295_v48 = vadd.f32 %v4967_v11, %v4853_v61 }
 0x3b1   : > { %v4806_v51 = vpop.f32.mrb[84].mxu0 }
 0x3b2   : > { %v4854_v27 = vadd.f32 %v4806_v51, %v12258_v63  ;;  %v4972_v7 = vpop.f32.mrb[84].mxu1  ;;  %v8755_v38 = vpop.f32.mrb[85].mxu0 }
 0x3b3   : > { %v8799_v53 = vpop.f32.mrb[85].mxu1  ;;  %v4809_v47 = vpop.f32.mrb[86].mxu0 }
 0x3b4   : > { %v12298_v41 = vadd.f32 %v4972_v7, %v4854_v27  ;;  %v4855_v20 = vadd.f32 %v4809_v47, %v12261_v34  ;;  %v4975_v15 = vpop.f32.mrb[86].mxu1  ;;  %v8756_v0 = vpop.f32.mrb[87].mxu0 }
 0x3b5   : > { %v8800_v24 = vpop.f32.mrb[87].mxu1 }
 0x3b6   : > { %v12301_v14 = vadd.f32 %v4975_v15, %v4855_v20 }
 0x3b9   : > { %v4814_v56 = vpop.f32.mrb[88].mxu0 }
 0x3ba   : > { %v4856_v58 = vadd.f32 %v4814_v56, %v12268_v43  ;;  %v4980_v45 = vpop.f32.mrb[88].mxu1  ;;  %v8759_v39 = vpop.f32.mrb[89].mxu0  ;;  %v9351_v43 = vld [vmem:[%s12512_s3 + $0x100] sm:$0xff]  }
 0x3bb   : > { %v8803_v2 = vpop.f32.mrb[89].mxu1  ;;  %v4817_v63 = vpop.f32.mrb[90].mxu0  ;;  %8998 = vmatpush3.bf16.msra.mxu0 %v9351_v43 }
 0x3bc   : > { %v12304_v33 = vadd.f32 %v4980_v45, %v4856_v58  ;;  %v4857_v42 = vadd.f32 %v4817_v63, %v12271_v4  ;;  %v4983_v40 = vpop.f32.mrb[90].mxu1  ;;  %v8760_v54 = vpop.f32.mrb[91].mxu0  ;;  %8999 = vmatprep.subr.bf16.mxu0 %v12591_v50  ;;  %v9358_v63 = vld [vmem:[%s12512_s3 + $0x138] sm:$0xff]  }
 0x3bd   : > { %v8804_v23 = vpop.f32.mrb[91].mxu1 }
 0x3be   : > { %v12307_v34 = vadd.f32 %v4983_v40, %v4857_v42  ;;  %v9359_v40 = vld [vmem:[%s12514_s5] sm:$0xff]  }
 0x3bf   : > { %9018 = vmatpush3.bf16.msra.mxu1 %v9359_v40 }
 0x3c0   : > { %9019 = vmatprep.subr.bf16.mxu1 %v12591_v50 }
 0x3c1   : > { %v4822_v44 = vpop.f32.mrb[92].mxu0 }
 0x3c2   : > { %v4858_v8 = vadd.f32 %v4822_v44, %v12274_v9  ;;  %v4988_v60 = vpop.f32.mrb[92].mxu1  ;;  %v8763_v5 = vpop.f32.mrb[93].mxu0  ;;  %v9352_v9 = vld [vmem:[%s12512_s3 + $0x108] sm:$0xff]  }
 0x3c3   : > { %v8807_v49 = vpop.f32.mrb[93].mxu1  ;;  %v4825_v17 = vpop.f32.mrb[94].mxu0  ;;  %9000 = vmatpush3.bf16.msra.mxu0 %v9352_v9  ;;  %v9360_v5 = vld [vmem:[%s12514_s5 + $0x8] sm:$0xff]  }
 0x3c4   : > { %v12313_v36 = vadd.f32 %v4988_v60, %v4858_v8  ;;  %v4859_v4 = vadd.f32 %v4825_v17, %v12277_v1  ;;  %v4991_v3 = vpop.f32.mrb[94].mxu1  ;;  %v8764_v13 = vpop.f32.mrb[95].mxu0  ;;  %9001 = vmatprep.subr.bf16.mxu0 %v12591_v50  ;;  %9020 = vmatpush3.bf16.msra.mxu1 %v9360_v5 }
 0x3c5   : > { %v8808_v30 = vpop.f32.mrb[95].mxu1  ;;  %9021 = vmatprep.subr.bf16.mxu1 %v12591_v50 }
 0x3c6   : > { %v12317_v59 = vadd.f32 %v4991_v3, %v4859_v4 }
 0x3c7   : > { %9002 = vmatpush3.bf16.msra.mxu0 %v9353_v57 }
 0x3c8   : > { %9003 = vmatprep.subr.bf16.mxu0 %v12591_v50 }
 0x3c9   : > { %v4830_v18 = vpop.f32.mrb[96].mxu0 }
 0x3ca   : > { %v4860_v25 = vadd.f32 %v4830_v18, %v12280_v29  ;;  %v4996_v28 = vpop.f32.mrb[96].mxu1  ;;  %v8767_v1 = vpop.f32.mrb[97].mxu0  ;;  %v9354_v29 = vld [vmem:[%s12512_s3 + $0x118] sm:$0xff]  }
 0x3cb   : > { %v8811_v46 = vpop.f32.mrb[97].mxu1  ;;  %v4833_v22 = vpop.f32.mrb[98].mxu0  ;;  %9004 = vmatpush3.bf16.msra.mxu0 %v9354_v29  ;;  %v9362_v1 = vld [vmem:[%s12514_s5 + $0x18] sm:$0xff]  }
 0x3cc   : > { %v12327_v35 = vadd.f32 %v4996_v28, %v4860_v25  ;;  %v4861_v6 = vadd.f32 %v4833_v22, %v12283_v55  ;;  %v4999_v62 = vpop.f32.mrb[98].mxu1  ;;  %v8768_v32 = vpop.f32.mrb[99].mxu0  ;;  %9005 = vmatprep.subr.bf16.mxu0 %v12591_v50 }
 0x3cd   : > { %v8812_v16 = vpop.f32.mrb[99].mxu1 }
 0x3ce   : > { %v12331_v31 = vadd.f32 %v4999_v62, %v4861_v6 }
 0x3cf   : > { %9006 = vmatpush3.bf16.msra.mxu0 %v9355_v37 }
 0x3d0   : > { %9007 = vmatprep.subr.bf16.mxu0 %v12591_v50 }
 0x3d1   : > { %v4838_v10 = vpop.f32.mrb[100].mxu0 }
 0x3d2   : > { %v4862_v61 = vadd.f32 %v4838_v10, %v12286_v26  ;;  %v5004_v11 = vpop.f32.mrb[100].mxu1  ;;  %v8771_v55 = vpop.f32.mrb[101].mxu0  ;;  %v9356_v26 = vld [vmem:[%s12512_s3 + $0x128] sm:$0xff]  }
 0x3d3   : > { %v8815_v21 = vpop.f32.mrb[101].mxu1  ;;  %v4841_v51 = vpop.f32.mrb[102].mxu0  ;;  %9008 = vmatpush3.bf16.msra.mxu0 %v9356_v26  ;;  %v9364_v55 = vld [vmem:[%s12514_s5 + $0x28] sm:$0xff]  }
 0x3d4   : > { %v12341_v27 = vadd.f32 %v5004_v11, %v4862_v61  ;;  %v4863_v7 = vadd.f32 %v4841_v51, %v12289_v52  ;;  %v5007_v38 = vpop.f32.mrb[102].mxu1  ;;  %v8772_v53 = vpop.f32.mrb[103].mxu0  ;;  %9009 = vmatprep.subr.bf16.mxu0 %v12591_v50  ;;  %v9357_v52 = vld [vmem:[%s12512_s3 + $0x130] sm:$0xff]  }
 0x3d5   : > { %v8816_v47 = vpop.f32.mrb[103].mxu1 }
 0x3d6   : > { %v12345_v20 = vadd.f32 %v5007_v38, %v4863_v7 }
 0x3d7   : > { %9010 = vmatpush3.bf16.msra.mxu0 %v9357_v52 }
 0x3d8   : > { %9011 = vmatprep.subr.bf16.mxu0 %v12591_v50 }
 0x3d9   : > { %v4846_v15 = vpop.f32.mrb[104].mxu0 }
 0x3da   : > { %v5012_v0 = vpop.f32.mrb[104].mxu1  ;;  %v8775_v24 = vpop.f32.mrb[105].mxu0 }
 0x3db   : > { %v8819_v56 = vpop.f32.mrb[105].mxu1  ;;  %v4849_v58 = vpop.f32.mrb[106].mxu0  ;;  %9012 = vmatpush3.bf16.msra.mxu0 %v9358_v63 }
 0x3dc   : > { %v5015_v45 = vpop.f32.mrb[106].mxu1  ;;  %v8776_v39 = vpop.f32.mrb[107].mxu0 }
 0x3dd   : > { %v8820_v2 = vpop.f32.mrb[107].mxu1 }
 0x3e1   : > { %v5130_v42 = vpop.f32.mrb[108].mxu0 }
 0x3e2   : > { %v5184_v54 = vadd.f32 %v5130_v42, %v12292_v19  ;;  %v5296_v23 = vpop.f32.mrb[108].mxu1  ;;  %v8839_v44 = vpop.f32.mrb[109].mxu0  ;;  %v9361_v19 = vld [vmem:[%s12514_s5 + $0x10] sm:$0xff]  }
 0x3e3   : > { %v8883_v8 = vpop.f32.mrb[109].mxu1  ;;  %v5133_v60 = vpop.f32.mrb[110].mxu0  ;;  %9022 = vmatpush3.bf16.msra.mxu1 %v9361_v19 }
 0x3e4   : > { %v12365_v43 = vadd.f32 %v5296_v23, %v5184_v54  ;;  %v5185_v49 = vadd.f32 %v5133_v60, %v12295_v48  ;;  %v5299_v17 = vpop.f32.mrb[110].mxu1  ;;  %v8840_v4 = vpop.f32.mrb[111].mxu0  ;;  %9023 = vmatprep.subr.bf16.mxu1 %v12591_v50 }
 0x3e5   : > { %v8884_v3 = vpop.f32.mrb[111].mxu1 }
 0x3e6   : > { %v12369_v13 = vadd.f32 %v5299_v17, %v5185_v49 }
 0x3e7   : > { %9024 = vmatpush3.bf16.msra.mxu1 %v9362_v1 }
 0x3e8   : > { %9025 = vmatprep.subr.bf16.mxu1 %v12591_v50 }
 0x3e9   : > { %v5138_v30 = vpop.f32.mrb[112].mxu0 }
 0x3ea   : > { %v5186_v9 = vadd.f32 %v5138_v30, %v12298_v41  ;;  %v5304_v18 = vpop.f32.mrb[112].mxu1  ;;  %v8843_v25 = vpop.f32.mrb[113].mxu0  ;;  %v9363_v41 = vld [vmem:[%s12514_s5 + $0x20] sm:$0xff]  }
 0x3eb   : > { %v8887_v48 = vpop.f32.mrb[113].mxu1  ;;  %v5141_v28 = vpop.f32.mrb[114].mxu0  ;;  %9026 = vmatpush3.bf16.msra.mxu1 %v9363_v41 }
 0x3ec   : > { %v12379_v57 = vadd.f32 %v5304_v18, %v5186_v9  ;;  %v5187_v46 = vadd.f32 %v5141_v28, %v12301_v14  ;;  %v5307_v22 = vpop.f32.mrb[114].mxu1  ;;  %v8844_v6 = vpop.f32.mrb[115].mxu0  ;;  %9027 = vmatprep.subr.bf16.mxu1 %v12591_v50 }
 0x3ed   : > { %v8888_v62 = vpop.f32.mrb[115].mxu1 }
 0x3ee   : > { %v12383_v32 = vadd.f32 %v5307_v22, %v5187_v46 }
 0x3ef   : > { %9028 = vmatpush3.bf16.msra.mxu1 %v9364_v55 }
 0x3f0   : > { %9029 = vmatprep.subr.bf16.mxu1 %v12591_v50 }
 0x3f1   : > { %v5146_v16 = vpop.f32.mrb[116].mxu0 }
 0x3f2   : > { %v5188_v29 = vadd.f32 %v5146_v16, %v12304_v33  ;;  %v5312_v10 = vpop.f32.mrb[116].mxu1  ;;  %v8847_v61 = vpop.f32.mrb[117].mxu0  ;;  %v9365_v33 = vld [vmem:[%s12514_s5 + $0x30] sm:$0xff]  }
 0x3f3   : > { %v8891_v14 = vpop.f32.mrb[117].mxu1  ;;  %v5149_v11 = vpop.f32.mrb[118].mxu0  ;;  %9030 = vmatpush3.bf16.msra.mxu1 %v9365_v33 }
 0x3f4   : > { %v12393_v37 = vadd.f32 %v5312_v10, %v5188_v29  ;;  %v5189_v21 = vadd.f32 %v5149_v11, %v12307_v34  ;;  %v5315_v51 = vpop.f32.mrb[118].mxu1  ;;  %v8848_v7 = vpop.f32.mrb[119].mxu0  ;;  %9031 = vmatprep.subr.bf16.mxu1 %v12591_v50 }
 0x3f5   : > { %v8892_v38 = vpop.f32.mrb[119].mxu1 }
 0x3f6   : > { %v12397_v53 = vadd.f32 %v5315_v51, %v5189_v21 }
 0x3f9   : > { %v5154_v47 = vpop.f32.mrb[120].mxu0 }
 0x3fa   : > { %v5190_v26 = vadd.f32 %v5154_v47, %v12313_v36  ;;  %v5320_v15 = vpop.f32.mrb[120].mxu1  ;;  %v8851_v0 = vpop.f32.mrb[121].mxu0 }
 0x3fb   : > { %v8895_v34 = vpop.f32.mrb[121].mxu1  ;;  %v5157_v24 = vpop.f32.mrb[122].mxu0 }
 0x3fc   : > { %v12404_v52 = vadd.f32 %v5320_v15, %v5190_v26  ;;  %v5191_v56 = vadd.f32 %v5157_v24, %v12317_v59  ;;  %v5323_v58 = vpop.f32.mrb[122].mxu1  ;;  %v8852_v45 = vpop.f32.mrb[123].mxu0 }
 0x3fd   : > { %v8896_v39 = vpop.f32.mrb[123].mxu1 }
 0x3fe   : > { %v12408_v2 = vadd.f32 %v5323_v58, %v5191_v56 }
 0x401   : > { %v5162_v63 = vpop.f32.mrb[124].mxu0 }
 0x402   : > { %v5192_v42 = vadd.f32 %v5162_v63, %v12327_v35  ;;  %v5328_v36 = vpop.f32.mrb[124].mxu1  ;;  %v8855_v40 = vpop.f32.mrb[125].mxu0  ;;  %v9412_v63 = vld [vmem:[%s12511_s2] sm:$0x1f] }
 0x403   : > { %v8899_v54 = vpop.f32.mrb[125].mxu1  ;;  %v5165_v23 = vpop.f32.mrb[126].mxu0 }
 0x404   : > { %v12411_v44 = vadd.f32 %v5328_v36, %v5192_v42  ;;  %v5193_v8 = vadd.f32 %v5165_v23, %v12331_v31  ;;  %v5331_v60 = vpop.f32.mrb[126].mxu1  ;;  %v8856_v59 = vpop.f32.mrb[127].mxu0 }
 0x405   : > { %v8900_v5 = vpop.f32.mrb[127].mxu1 }
 0x406   : > { %v12414_v49 = vadd.f32 %v5331_v60, %v5193_v8 }
 0x409   : > { %v5170_v50 = vpop.f32.mrb[128].mxu0 }
 0x40a   : > { %v5194_v17 = vadd.f32 %v5170_v50, %v12341_v27  ;;  %v5336_v4 = vpop.f32.mrb[128].mxu1  ;;  %v8859_v3 = vpop.f32.mrb[129].mxu0 }
 0x40b   : > { %v8903_v19 = vpop.f32.mrb[129].mxu1  ;;  %v5173_v35 = vpop.f32.mrb[130].mxu0 }
 0x40c   : > { %v12417_v30 = vadd.f32 %v5336_v4, %v5194_v17  ;;  %v5195_v9 = vadd.f32 %v5173_v35, %v12345_v20  ;;  %v5339_v18 = vpop.f32.mrb[130].mxu1  ;;  %v8860_v25 = vpop.f32.mrb[131].mxu0 }
 0x40d   : > { %v8904_v48 = vpop.f32.mrb[131].mxu1 }
 0x40e   : > { %v12420_v31 = vadd.f32 %v5339_v18, %v5195_v9 }
 0x411   : > { %v5178_v28 = vpop.f32.mrb[132].mxu0 }
 0x412   : > { %v5344_v1 = vpop.f32.mrb[132].mxu1  ;;  %v8863_v46 = vpop.f32.mrb[133].mxu0 }
 0x413   : > { %v8907_v22 = vpop.f32.mrb[133].mxu1  ;;  %v5181_v6 = vpop.f32.mrb[134].mxu0 }
 0x414   : > { %v5347_v62 = vpop.f32.mrb[134].mxu1  ;;  %v8864_v27 = vpop.f32.mrb[135].mxu0 }
 0x415   : > { %v8908_v41 = vpop.f32.mrb[135].mxu1 }
 0x419   : > { %v5469_v16 = vpop.f32.mrb[136].mxu0 }
 0x41a   : > { %v5523_v29 = vadd.f32 %v5469_v16, %v12365_v43  ;;  %v5642_v10 = vpop.f32.mrb[136].mxu1  ;;  %v8927_v61 = vpop.f32.mrb[137].mxu0  ;;  %v5711_v43 = vsub.s32 4, %v9618_v12 }
 0x41b   : > { %v8971_v14 = vpop.f32.mrb[137].mxu1  ;;  %v5472_v20 = vpop.f32.mrb[138].mxu0 }
 0x41c   : > { %v5696_v11 = vadd.f32 %v5642_v10, %v5523_v29  ;;  %v5524_v55 = vadd.f32 %v5472_v20, %v12369_v13  ;;  %v5645_v21 = vpop.f32.mrb[138].mxu1  ;;  %v8928_v51 = vpop.f32.mrb[139].mxu0  ;;  %v12430_v42 = vrot.slane %v9412_v63, %v5711_v43 }
 0x41d   : > { %v8972_v7 = vpop.f32.mrb[139].mxu1 }
 0x41e   : > { %v5697_v38 = vadd.f32 %v5645_v21, %v5524_v55  ;;  %v5713_v60 = vadd.f32 %v12430_v42, %v5696_v11 }
 0x420   : > { %v5714_v4 = vadd.f32 %v12430_v42, %v5697_v38  ;;  %v5726_v35 = vmax.f32 %v5713_v60, 0.0 }
 0x421   : > { %v5477_v33 = vpop.f32.mrb[140].mxu0 }
 0x422   : > { %v5525_v47 = vadd.f32 %v5477_v33, %v12379_v57  ;;  %v5650_v26 = vpop.f32.mrb[140].mxu1  ;;  %v8931_v15 = vpop.f32.mrb[141].mxu0  ;;  %v5727_v25 = vmax.f32 %v5714_v4, 0.0 }
 0x423   : > { %v8975_v0 = vpop.f32.mrb[141].mxu1  ;;  %v5480_v34 = vpop.f32.mrb[142].mxu0 }
 0x424   : > { %v5698_v24 = vadd.f32 %v5650_v26, %v5525_v47  ;;  %v5526_v56 = vadd.f32 %v5480_v34, %v12383_v32  ;;  %v5653_v58 = vpop.f32.mrb[142].mxu1  ;;  %v8932_v45 = vpop.f32.mrb[143].mxu0 }
 0x425   : > { %v8976_v39 = vpop.f32.mrb[143].mxu1 }
 0x426   : > { %v5699_v13 = vadd.f32 %v5653_v58, %v5526_v56  ;;  %v5715_v62 = vadd.f32 %v12430_v42, %v5698_v24 }
 0x428   : > { %v5716_v14 = vadd.f32 %v12430_v42, %v5699_v13  ;;  %v5728_v55 = vmax.f32 %v5715_v62, 0.0 }
 0x429   : > { %v5485_v57 = vpop.f32.mrb[144].mxu0 }
 0x42a   : > { %v5527_v36 = vadd.f32 %v5485_v57, %v12393_v37  ;;  %v5658_v40 = vpop.f32.mrb[144].mxu1  ;;  %v8935_v54 = vpop.f32.mrb[145].mxu0  ;;  %v5729_v7 = vmax.f32 %v5716_v14, 0.0 }
 0x42b   : > { %v8979_v23 = vpop.f32.mrb[145].mxu1  ;;  %v5488_v8 = vpop.f32.mrb[146].mxu0 }
 0x42c   : > { %v5700_v32 = vadd.f32 %v5658_v40, %v5527_v36  ;;  %v5528_v59 = vadd.f32 %v5488_v8, %v12397_v53  ;;  %v5661_v5 = vpop.f32.mrb[146].mxu1  ;;  %v8936_v50 = vpop.f32.mrb[147].mxu0 }
 0x42d   : > { %v8980_v17 = vpop.f32.mrb[147].mxu1 }
 0x42e   : > { %v5717_v3 = vadd.f32 %v12430_v42, %v5700_v32  ;;  %v5701_v19 = vadd.f32 %v5661_v5, %v5528_v59 }
 0x430   : > { %v5730_v9 = vmax.f32 %v5717_v3, 0.0  ;;  %v5718_v37 = vadd.f32 %v12430_v42, %v5701_v19  ;;  %v303_v3 = vadd.s32 88, %v9618_v12 }
 0x431   : > { %v5493_v18 = vpop.f32.mrb[148].mxu0 }
 0x432   : > { %v5765_v48 = vmax.f32 %v5726_v35, %v5730_v9  ;;  %v5731_v28 = vmax.f32 %v5718_v37, 0.0  ;;  %v5529_v1 = vadd.f32 %v5493_v18, %v12404_v52  ;;  %v5666_v46 = vpop.f32.mrb[148].mxu1  ;;  %v8939_v53 = vpop.f32.mrb[149].mxu0  ;;  %vm5750_vm12 = vcmp.lt.s32.totalorder %v303_v3, 95 }
 0x433   : > { %v8983_v22 = vpop.f32.mrb[149].mxu1  ;;  %v5496_v6 = vpop.f32.mrb[150].mxu0 }
 0x434   : > { %v5766_v27 = vmax.f32 %v5727_v25, %v5731_v28  ;;  %v5702_v41 = vadd.f32 %v5666_v46, %v5529_v1  ;;  %v5530_v16 = vadd.f32 %v5496_v6, %v12408_v2  ;;  %v5669_v29 = vpop.f32.mrb[150].mxu1  ;;  %v8940_v10 = vpop.f32.mrb[151].mxu0 }
 0x435   : > { %v8984_v61 = vpop.f32.mrb[151].mxu1 }
 0x436   : > { %v5719_v20 = vadd.f32 %v12430_v42, %v5702_v41  ;;  %v5703_v11 = vadd.f32 %v5669_v29, %v5530_v16 }
 0x438   : > { %v5732_v52 = vmax.f32 %v5719_v20, 0.0  ;;  %v5720_v21 = vadd.f32 %v12430_v42, %v5703_v11 }
 0x439   : > { %v5501_v51 = vpop.f32.mrb[152].mxu0 }
 0x43a   : > { %v5767_v38 = vmax.f32 %v5728_v55, %v5732_v52  ;;  %v5733_v33 = vmax.f32 %v5720_v21, 0.0  ;;  %v5531_v47 = vadd.f32 %v5501_v51, %v12411_v44  ;;  %v5674_v26 = vpop.f32.mrb[152].mxu1  ;;  %v8943_v2 = vpop.f32.mrb[153].mxu0 }
 0x43b   : > { %v8987_v15 = vpop.f32.mrb[153].mxu1  ;;  %v5504_v0 = vpop.f32.mrb[154].mxu0 }
 0x43c   : > { %v5768_v34 = vmax.f32 %v5729_v7, %v5733_v33  ;;  %v5704_v43 = vadd.f32 %v5674_v26, %v5531_v47  ;;  %v5532_v24 = vadd.f32 %v5504_v0, %v12414_v49  ;;  %v5677_v56 = vpop.f32.mrb[154].mxu1  ;;  %v8944_v58 = vpop.f32.mrb[155].mxu0 }
 0x43d   : > { %v8988_v45 = vpop.f32.mrb[155].mxu1 }
 0x43e   : > { %v5721_v39 = vadd.f32 %v12430_v42, %v5704_v43  ;;  %v5705_v13 = vadd.f32 %v5677_v56, %v5532_v24  ;;  %v9366_v43 = vld [vmem:[%s12514_s5 + $0x38] sm:$0xff]  }
 0x43f   : > { %9032 = vmatpush3.bf16.msra.mxu1 %v9366_v43 }
 0x440   : > { %v5734_v63 = vmax.f32 %v5721_v39, 0.0  ;;  %v5722_v57 = vadd.f32 %v12430_v42, %v5705_v13 }
 0x441   : > { %v5509_v36 = vpop.f32.mrb[156].mxu0 }
 0x442   : > { %v5769_v40 = vmax.f32 %v5765_v48, %v5734_v63  ;;  %v5735_v44 = vmax.f32 %v5722_v57, 0.0  ;;  %v5533_v54 = vadd.f32 %v5509_v36, %v12417_v30  ;;  %v5682_v23 = vpop.f32.mrb[156].mxu1  ;;  %v8947_v8 = vpop.f32.mrb[157].mxu0  ;;  %v6246_v63 = vld [vmem:[%s12515_s6] sm:$0x1] }
 0x443   : > { %v8991_v60 = vpop.f32.mrb[157].mxu1  ;;  %v5512_v32 = vpop.f32.mrb[158].mxu0 }
 0x444   : > { %v5773_v59 = vmax.f32 %v5769_v40, -1e+30  ;;  %v5770_v49 = vmax.f32 %v5766_v27, %v5735_v44  ;;  %v5706_v5 = vadd.f32 %v5682_v23, %v5533_v54  ;;  %v5534_v50 = vadd.f32 %v5512_v32, %v12420_v31  ;;  %v5685_v17 = vpop.f32.mrb[158].mxu1  ;;  %v8948_v4 = vpop.f32.mrb[159].mxu0 }
 0x445   : > { %v8992_v19 = vpop.f32.mrb[159].mxu1 }
 0x446   : > { %v5774_v35 = vmax.f32 %v5773_v59, %v5770_v49  ;;  %v5723_v9 = vadd.f32 %v12430_v42, %v5706_v5  ;;  %v5707_v37 = vadd.f32 %v5685_v17, %v5534_v50 }
 0x448   : > { %v5736_v18 = vmax.f32 %v5723_v9, 0.0  ;;  %v5724_v30 = vadd.f32 %v12430_v42, %v5707_v37  ;;  %v5868_v42 = vld [vmem:[%s12513_s4] sm:$0x1] }
 0x449   : > { %v5517_v25 = vpop.f32.mrb[160].mxu0 }
 0x44a   : > { %v5771_v48 = vmax.f32 %v5767_v38, %v5736_v18  ;;  %v5737_v28 = vmax.f32 %v5724_v30, 0.0  ;;  %v5690_v1 = vpop.f32.mrb[160].mxu1  ;;  %v8951_v46 = vpop.f32.mrb[161].mxu0 }
 0x44b   : > { %v8995_v53 = vpop.f32.mrb[161].mxu1  ;;  %v5520_v31 = vpop.f32.mrb[162].mxu0 }
 0x44c   : > { %v5763_v22 = vsel %vm5750_vm12, %v5737_v28, -1e+30  ;;  %v5693_v6 = vpop.f32.mrb[162].mxu1  ;;  %v8952_v62 = vpop.f32.mrb[163].mxu0 }
 0x44d   : > { %v5772_v12 = vmax.f32 %v5768_v34, %v5763_v22  ;;  %v8996_v27 = vpop.f32.mrb[163].mxu1 }
 0x44f   : > { %v5775_v41 = vmax.f32 %v5771_v48, %v5772_v12 }
 0x451   : > { %v5776_v16 = vmax.f32 %v5774_v35, %v5775_v41  ;;  %v7631_v29 = vpop.f32.mrb[164].mxu0 }
 0x452   : > { %v7653_v10 = vpop.f32.mrb[164].mxu1  ;;  %v7632_v61 = vpop.f32.mrb[165].mxu0 }
 0x453   : > { %v5777_v14 = vrot.slane %v5776_v16, 4  ;;  %v7633_v20 = vadd.f32 %v7632_v61, %v7631_v29  ;;  %v7654_v11 = vpop.f32.mrb[165].mxu1  ;;  %v7634_v55 = vpop.f32.mrb[166].mxu0 }
 0x454   : > { %v7655_v52 = vadd.f32 %v7654_v11, %v7653_v10  ;;  %v7656_v21 = vpop.f32.mrb[166].mxu1  ;;  %v7635_v51 = vpop.f32.mrb[167].mxu0 }
 0x455   : > { %v5778_v7 = vmax.f32 %v5776_v16, %v5777_v14  ;;  %v6144_v38 = vadd.f32 %v7633_v20, %v5868_v42  ;;  %v7657_v33 = vpop.f32.mrb[167].mxu1 }
 0x457   : > { %v5779_v47 = vrot.slane %v5778_v7, 2  ;;  %v6184_v26 = vadd.f32 %v7655_v52, %v6144_v38 }
 0x459   : > { %v5780_v2 = vmax.f32 %v5778_v7, %v5779_v47 }
 0x45b   : > { %v5781_v15 = vrot.slane %v5780_v2, 1 }
 0x45d   : > { %v5782_v0 = vmax.f32 %v5780_v2, %v5781_v15 }
 0x45f   : > { %v5787_v34 = vpack.c.bf16 %v5782_v0, %v5782_v0 }
 0x461   : > { %9014 = vmatmul.mubr.bf16.vlgmr.msra.gmra.mrb[168].mxu0 %v5787_v34 }
 0x534   : > { %v6223_v24 = vpop.f32.mrb[168].mxu0 }
 0x535   : > { %v6224_v56 = vadd.f32 %v6223_v24, %v6184_v26  ;;  %v9015_v58 = vpop.f32.mrb[169].mxu0 }
 0x536   : > { %v6226_v45 = vpop.f32.mrb[170].mxu0 }
 0x537   : > { %v6229_v39 = vpack.c.bf16 %v6224_v56, %v6224_v56  ;;  %v9016_v13 = vpop.f32.mrb[171].mxu0 }
 0x539   : > { %9034 = vmatmul.mubr.bf16.vlgmr.msra.gmra.mrb[168].mxu1 %v6229_v39 }
 0x60c   : > { %v6329_v57 = vpop.f32.mrb[168].mxu1 }
 0x60d   : > { %v6330_v36 = vadd.f32 %v6329_v57, %v6246_v63  ;;  %v9035_v40 = vpop.f32.mrb[169].mxu1 }
 0x60e   : > { %v6332_v44 = vpop.f32.mrb[170].mxu1 }
 0x60f   : > { %v9036_v54 = vpop.f32.mrb[171].mxu1  ;;  %6336 = vst.msk [vmem:[%s270_s18] sm:$0x1] %vm6335_vm13, %v6330_v36 }
 0x610   : > { %9426 = shalt.err (!%p9423_p3)
}
 0x611   : > { %s9427_s13 = scalar_lea.hbm %s12467_s22, 16  ;;  %s9431_s16 = scalar_lea.hbm %s12516_s7, 32 }
 0x612   : > { %p9428_p4 = scmp.ne.s32.totalorder %s12467_s22, %s9427_s13  ;;  %p9432_p9 = scmp.lt.u32.totalorder %s12467_s22, %s12516_s7 }
 0x613   : > { %p9433_p10 = scmp.lt.u32.totalorder %s9431_s16, %s9427_s13  ;;  %p9435_p12 = scmp.lt.u32.totalorder %s9427_s13, %s12467_s22 }
 0x614   : > { %p9429_p7 = pnand %p9428_p4, %p9558_p5 }
 0x615   : > { %p9434_p11 = por %p9433_p10, %p9432_p9 }
 0x616   : > { %p9430_p8 = pneg %p9429_p7 }
 0x617   : > { %p9436_p13 = por %p9435_p12, %p9434_p11 }
 0x619   : > { %p9437_p0 = pnand %p9436_p13, %p9430_p8 }
 0x61b   : > { %9440 = shalt.err (!%p9437_p0)
}
 0x61c   : > { %9038 = dma.vmem_to_hbm [thread:$0]  (%p9558_p5), %s12469_s20, 16, %s12467_s22, %s6338_s28  }
 0x61d PF: > { %p9044_p1 = scmp.ge.s32.totalorder %s9475_s27, 2  ;;  %s6362_s19 = sand.u32 1, %s9463_s24  }
 0x61e   : > { %s6363_s21 = scalar_lea.sflag [#allocation3], %s6362_s19 }
 0x61f   : > { %p9041_p2 = pnand %p9044_p1, %p9562_p6 }
 0x621   : > { %9458 = dma.done.wait (!%p9041_p2), %s6363_s21, 16  }
 0x622   : > { %9460 = vsyncadd (!%p9041_p2), %s6363_s21, 4294967280  ;;  %p17_p3 = scmp.ge.s32.totalorder %s9545_s30, 4   ;;  %s12671_s24 = smov %s9467_s25 }
 0x623   : > { %s12672_s25 = smov %s9471_s26  ;;  %s12673_s26 = smov %s9556_s10 }
 0x624   : > { %s12674_s27 = smov %s9545_s30  ;;  %19 = sbr.rel (!%p17_p3) target bundleno = 3 (0x3), region = 112 }
 0x62b   :  { %6367 = vsyncpa [#allocation3], 1 }
 0x62c   :  { %6369 = vsyncpa [#allocation3 + $0x1], 1 }

</bundles_post_ra>
